<compile_context>
chip_gen: v6e
topology: v6e:2x2x1
jax: 0.10.0
libtpu: 0.0.40
codegen_flags: <defaults>
</compile_context>

<pallas_src>
import functools

import jax
import jax.numpy as jnp
from jax.experimental import pallas as pl
from jax.experimental.pallas import tpu as pltpu

BN_EPS = 1e-5
LANE = 128   # channel padding target (lane width)


def _round_up(x, m):
    return ((x + m - 1) // m) * m


def _pick_rows_h(H, W):
    """Output rows computed per accumulator chunk: keeps the live f32 accumulator
    around (128, Cout_p) (~16 vregs) and divides H evenly."""
    target = max(1, 128 // max(W, 1))
    for r in range(min(target, H), 0, -1):
        if H % r == 0:
            return r
    return 1


def _pick_row_tile(rows):
    """Large lane-dense row tile for the mem-bound BN+ReLU pass."""
    for t in (2048, 1024, 512, 256, 128, 64, 32, 16, 8):
        if rows % t == 0:
            return t
    return rows


def _conv_stats_kernel(a_ref, scale_ref, shift_ref, w_ref,
                       z_ref, s_ref, ss_ref,
                       taps_ref,
                       *, H, W, rows_h, apply_bn_relu):
    """One image per grid step:
       [optionally a = relu(a*scale + shift)   (fused BN+ReLU of previous layer)]
       -> three dx-pre-shifted bf16 slabs, 1-row zero halo in H only
       -> 3x3 conv as 9 full-tile-slice matmuls accumulated in registers per
          M-row chunk
       -> pre-BN conv output + per-channel partial sum / sum-of-squares."""
    cin = a_ref.shape[-1]
    cout = w_ref.shape[-1]

    a = a_ref[0].astype(jnp.float32)                          # (H, W, Cin_p)
    if apply_bn_relu:
        a = jnp.maximum(a * scale_ref[...] + shift_ref[...], 0.0)

    # taps_ref[dx] holds, at padded row y+1 and column x, the input value at
    # (y, x + dx - 1); rows 0 and H+1 are the conv's zero padding.  One aligned
    # full store per slab; the bf16 cast happens here once, not per tap.
    zrow = jnp.zeros((1, W, cin), jnp.float32)
    zcol = jnp.zeros((H, 1, cin), jnp.float32)

    def put(dx, slab):
        taps_ref[dx] = jnp.concatenate([zrow, slab, zrow], axis=0).astype(jnp.bfloat16)

    put(0, jnp.concatenate([zcol, a[:, : W - 1, :]], axis=1))   # value at x-1
    put(1, a)                                                   # value at x
    put(2, jnp.concatenate([a[:, 1:, :], zcol], axis=1))        # value at x+1

    # 3x3 conv (padding=1): nine contiguous-slice bf16 matmuls, accumulated in a
    # local value (no VMEM RMW of the accumulator), stored once per row chunk.
    mtile = rows_h * W
    s = jnp.zeros((1, cout), jnp.float32)
    ss = jnp.zeros((1, cout), jnp.float32)
    for t in range(H // rows_h):
        y0 = t * rows_h
        acc = jnp.zeros((mtile, cout), jnp.float32)
        for dy in range(3):
            for dx in range(3):
                lhs = taps_ref[dx, y0 + dy: y0 + dy + rows_h].reshape(mtile, cin)
                acc = acc + jnp.dot(lhs, w_ref[dy * 3 + dx],
                                    preferred_element_type=jnp.float32)
        z_ref[0, y0: y0 + rows_h] = acc.reshape(rows_h, W, cout).astype(z_ref.dtype)
        # Partial per-channel statistics for training-mode BatchNorm (one sweep).
        s = s + jnp.sum(acc, axis=0, keepdims=True)
        ss = ss + jnp.sum(acc * acc, axis=0, keepdims=True)

    s_ref[...] = s.reshape(1, 1, cout)
    ss_ref[...] = ss.reshape(1, 1, cout)


def conv_bn_stats(x, scale, shift, w9, *, apply_bn_relu, out_dtype=jnp.float32):
    """x: (N, H, W, Cin_p); scale/shift: (1, 1, Cin_p) f32 (applied with ReLU iff
    apply_bn_relu); w9: (9, Cin_p, Cout_p) bf16.
    Returns pre-BN conv output z (N, H, W, Cout_p) and per-image per-channel
    partial sum / sum-of-squares, each (N, 1, Cout_p) f32."""
    N, H, W, cin_p = x.shape
    cout_p = w9.shape[-1]
    rows_h = _pick_rows_h(H, W)

    in_b = jnp.dtype(x.dtype).itemsize
    out_b = jnp.dtype(out_dtype).itemsize
    est = (2 * H * W * cin_p * in_b            # input block (double-buffered)
           + 2 * H * W * cout_p * out_b        # z output block (double-buffered)
           + 2 * 9 * cin_p * cout_p * 2        # bf16 weights (double-buffered)
           + 3 * (H + 2) * W * cin_p * 2       # dx-shifted bf16 tap slabs (scratch)
           + 16 * cout_p * 4 + 8 * cin_p * 4)  # stats / scale / shift blocks
    vmem_limit = int(min(64 * 1024 * 1024, max(2 * est, 16 * 1024 * 1024)))
    # TODO(synk): for large H*W add a second grid axis over H row tiles (1-row
    # halo) so the per-step footprint stays within v7x's 64 MiB VMEM.

    kernel = functools.partial(_conv_stats_kernel, H=H, W=W, rows_h=rows_h,
                               apply_bn_relu=apply_bn_relu)
    return pl.pallas_call(
        kernel,
        out_shape=(
            jax.ShapeDtypeStruct((N, H, W, cout_p), out_dtype),
            jax.ShapeDtypeStruct((N, 1, cout_p), jnp.float32),
            jax.ShapeDtypeStruct((N, 1, cout_p), jnp.float32),
        ),
        grid_spec=pltpu.PrefetchScalarGridSpec(
            num_scalar_prefetch=0,
            grid=(N,),
            in_specs=[
                pl.BlockSpec((1, H, W, cin_p), lambda n: (n, 0, 0, 0)),
                # Grid-invariant blocks below; at real channel counts they could
                # be single-buffered (pipeline_mode) — tiny here, left default.
                pl.BlockSpec((1, 1, cin_p), lambda n: (0, 0, 0)),
                pl.BlockSpec((1, 1, cin_p), lambda n: (0, 0, 0)),
                pl.BlockSpec((9, cin_p, cout_p), lambda n: (0, 0, 0)),
            ],
            out_specs=[
                pl.BlockSpec((1, H, W, cout_p), lambda n: (n, 0, 0, 0)),
                pl.BlockSpec((1, 1, cout_p), lambda n: (n, 0, 0)),
                pl.BlockSpec((1, 1, cout_p), lambda n: (n, 0, 0)),
            ],
            scratch_shapes=[
                pltpu.VMEM((3, H + 2, W, cin_p), jnp.bfloat16),
            ],
        ),
        compiler_params=pltpu.CompilerParams(
            dimension_semantics=("parallel",),
            vmem_limit_bytes=vmem_limit),
    )(x, scale, shift, w9)


def _bn_relu_kernel(z_ref, scale_ref, shift_ref, y_ref):
    # BN folded into a single FMA, then ReLU.
    y_ref[...] = jnp.maximum(
        z_ref[...].astype(jnp.float32) * scale_ref[...] + shift_ref[...], 0.0)


def bn_relu_apply(z, scale, shift):
    """Final BN+ReLU on a flattened (N*H*W, Cp) view with large lane-dense row
    tiles (amortizes per-step pipeline overhead on this mem-bound pass)."""
    N, H, W, cp = z.shape
    rows = N * H * W
    tr = _pick_row_tile(rows)
    zf = z.reshape(rows, cp)
    y = pl.pallas_call(
        _bn_relu_kernel,
        out_shape=jax.ShapeDtypeStruct((rows, cp), jnp.float32),
        grid_spec=pltpu.PrefetchScalarGridSpec(
            num_scalar_prefetch=0,
            grid=(rows // tr,),
            in_specs=[
                pl.BlockSpec((tr, cp), lambda r: (r, 0)),
                pl.BlockSpec((1, cp), lambda r: (0, 0)),
                pl.BlockSpec((1, cp), lambda r: (0, 0)),
            ],
            out_specs=pl.BlockSpec((tr, cp), lambda r: (r, 0)),
        ),
        compiler_params=pltpu.CompilerParams(
            dimension_semantics=("parallel",)),
    )(zf, scale.reshape(1, cp), shift.reshape(1, cp))
    return y.reshape(N, H, W, cp)


def _bn_scale_shift(s, ss, count, gamma, beta):
    """Finalize training-mode BatchNorm (biased variance over N*H*W, eps=1e-5),
    folded into one FMA: y = z * scale + shift."""
    s = jnp.sum(s, axis=(0, 1))                          # (Cp,)
    ss = jnp.sum(ss, axis=(0, 1))
    mean = s / count
    var = jnp.maximum(ss / count - mean * mean, 0.0)     # biased, clamped >= 0
    scale = gamma * jax.lax.rsqrt(var + BN_EPS)
    shift = beta - mean * scale
    cp = scale.shape[0]
    return scale.reshape(1, 1, cp), shift.reshape(1, 1, cp)


def _pack_weight(w, cin_p, cout_p):
    """(3, 3, Cin, Cout) f32 -> (9, Cin_p, Cout_p) bf16 with zero-padded channels."""
    kh, kw, cin, cout = w.shape
    wp = jnp.pad(w, ((0, 0), (0, 0), (0, cin_p - cin), (0, cout_p - cout)))
    return wp.reshape(kh * kw, cin_p, cout_p).astype(jnp.bfloat16)


def _pad_vec(v, cp, fill):
    return jnp.pad(v, (0, cp - v.shape[0]), constant_values=fill)


def conv_block(x_nhwc, params, *, intermediate_dtype=jnp.float32):
    """Forward of convBlock. x_nhwc: (N, H, W, Cin) f32 -> (N, H, W, Cout) f32.
    intermediate_dtype=jnp.bfloat16 halves HBM traffic of the layer-1
    intermediate at ~1e-3 relative precision cost (default keeps f32)."""
    (w1, b1, g1, be1), (w2, b2, g2, be2) = params
    # Per-channel conv bias added before train-mode BatchNorm is cancelled
    # exactly by the mean subtraction -> dead work + dead DMA, so not used.
    del b1, b2
    N, H, W, cin = x_nhwc.shape
    cout = w1.shape[-1]
    cin_p, cout_p = _round_up(cin, LANE), _round_up(cout, LANE)
    count = N * H * W

    x_p = jnp.pad(x_nhwc, ((0, 0), (0, 0), (0, 0), (0, cin_p - cin)))
    w1_p = _pack_weight(w1, cin_p, cout_p)
    w2_p = _pack_weight(w2, cout_p, cout_p)
    g1_p, be1_p = _pad_vec(g1, cout_p, 1.0), _pad_vec(be1, cout_p, 0.0)
    g2_p, be2_p = _pad_vec(g2, cout_p, 1.0), _pad_vec(be2, cout_p, 0.0)

    ident_scale = jnp.ones((1, 1, cin_p), jnp.float32)   # unused (flag is False)
    ident_shift = jnp.zeros((1, 1, cin_p), jnp.float32)

    # Layer 1: conv1 + per-channel partial stats (single pass, no HBM im2col).
    z1, s1, ss1 = conv_bn_stats(x_p, ident_scale, ident_shift, w1_p,
                                apply_bn_relu=False, out_dtype=intermediate_dtype)
    scale1, shift1 = _bn_scale_shift(s1, ss1, count, g1_p, be1_p)

    # Layer 2: BN1-apply + ReLU fused into conv2's tap construction + stats.
    z2, s2, ss2 = conv_bn_stats(z1, scale1, shift1, w2_p,
                                apply_bn_relu=True, out_dtype=jnp.float32)
    scale2, shift2 = _bn_scale_shift(s2, ss2, count, g2_p, be2_p)

    # Final BN2-apply + ReLU.
    y = bn_relu_apply(z2, scale2, shift2)
    # TODO(synk): nn.BatchNorm2d running_mean/running_var buffer updates
    # (training-time side effect) are not emitted; forward output unaffected.
    return y[..., :cout]


def init_params(key, in_channel, out_channel):
    """Deterministic synthetic parameters (shapes mirror the nn.Module __init__)."""
    k1, k2, k3, k4 = jax.random.split(key, 4)
    w1 = 0.1 * jax.random.normal(k1, (3, 3, in_channel, out_channel), jnp.float32)
    b1 = 0.1 * jax.random.normal(k2, (out_channel,), jnp.float32)
    w2 = 0.1 * jax.random.normal(k3, (3, 3, out_channel, out_channel), jnp.float32)
    b2 = 0.1 * jax.random.normal(k4, (out_channel,), jnp.float32)
    g = jnp.ones((out_channel,), jnp.float32)    # BatchNorm2d default init
    be = jnp.zeros((out_channel,), jnp.float32)
    return (w1, b1, g, be), (w2, b2, g, be)


if __name__ == "__main__":
    key = jax.random.PRNGKey(0)
    kx, kp = jax.random.split(key)

    N, H, W = 2, 16, 16
    in_channel, out_channel = 4, 8

    # PyTorch reference input would be NCHW (2, 4, 16, 16); we use NHWC.
    x = jax.random.normal(kx, (N, H, W, in_channel), jnp.float32)
    params = init_params(kp, in_channel, out_channel)

    out = jax.jit(conv_block)(x, params)
    out = jax.block_until_ready(out)

    assert out.shape == (N, H, W, out_channel)
    assert bool(jnp.all(jnp.isfinite(out)))
    assert bool(jnp.all(out >= 0.0))  # final ReLU

    print("KERNEL_OK")
</pallas_src>

<mosaic_0001>
module attributes {stable_mosaic.version = 11 : i64} {
  func.func @_conv_stats_kernel(%arg0: i32, %arg1: memref<1x16x16x128xf32, #tpu.memory_space<vmem>>, %arg2: memref<1x1x128xf32, #tpu.memory_space<vmem>>, %arg3: memref<1x1x128xf32, #tpu.memory_space<vmem>>, %arg4: memref<9x128x128xbf16, #tpu.memory_space<vmem>>, %arg5: memref<1x16x16x128xf32, #tpu.memory_space<vmem>>, %arg6: memref<1x1x128xf32, #tpu.memory_space<vmem>>, %arg7: memref<1x1x128xf32, #tpu.memory_space<vmem>>, %arg8: memref<3x18x16x128xbf16, #tpu.memory_space<vmem>>) attributes {dimension_semantics = [#tpu.dimension_semantics<parallel>], iteration_bounds = array<i64: 2>, scalar_prefetch = 0 : i64, scratch_operands = 1 : i64, tpu.core_type = #tpu.core_type<tc>, window_params = [{transform_indices = @transform_0, window_bounds = array<i64: 1, 16, 16, 128>}, {pipeline_mode = #tpu.pipeline_mode<synchronous>, transform_indices = @transform_1, window_bounds = array<i64: 1, 1, 128>}, {pipeline_mode = #tpu.pipeline_mode<synchronous>, transform_indices = @transform_2, window_bounds = array<i64: 1, 1, 128>}, {pipeline_mode = #tpu.pipeline_mode<synchronous>, transform_indices = @transform_3, window_bounds = array<i64: 9, 128, 128>}, {transform_indices = @transform_4, window_bounds = array<i64: 1, 16, 16, 128>}, {transform_indices = @transform_5, window_bounds = array<i64: 1, 1, 128>}, {transform_indices = @transform_6, window_bounds = array<i64: 1, 1, 128>}]} {
    %c0 = arith.constant 0 : index
    %c0_0 = arith.constant 0 : index
    %c0_1 = arith.constant 0 : index
    %c0_2 = arith.constant 0 : index
    %0 = vector.load %arg1[%c0, %c0_0, %c0_1, %c0_2] : memref<1x16x16x128xf32, #tpu.memory_space<vmem>>, vector<1x16x16x128xf32>
    %1 = vector.shape_cast %0 : vector<1x16x16x128xf32> to vector<16x16x128xf32>
    %cst = arith.constant 0.000000e+00 : f32
    %2 = vector.broadcast %cst : f32 to vector<1x16x128xf32>
    %cst_3 = arith.constant 0.000000e+00 : f32
    %3 = vector.broadcast %cst_3 : f32 to vector<16x1x128xf32>
    %4 = vector.extract_strided_slice %1 {offsets = [0, 0, 0], sizes = [16, 15, 128], strides = [1, 1, 1]} : vector<16x16x128xf32> to vector<16x15x128xf32>
    %5 = tpu.concatenate %3, %4 in 1 : vector<16x1x128xf32>, vector<16x15x128xf32> -> vector<16x16x128xf32>
    %6 = tpu.concatenate %2, %5, %2 in 0 : vector<1x16x128xf32>, vector<16x16x128xf32>, vector<1x16x128xf32> -> vector<18x16x128xf32>
    %7 = arith.truncf %6 : vector<18x16x128xf32> to vector<18x16x128xbf16>
    %c0_4 = arith.constant 0 : index
    %c0_5 = arith.constant 0 : index
    %c0_6 = arith.constant 0 : index
    %c0_7 = arith.constant 0 : index
    %8 = vector.load %arg8[%c0_4, %c0_5, %c0_6, %c0_7] : memref<3x18x16x128xbf16, #tpu.memory_space<vmem>>, vector<1x18x16x128xbf16>
    %9 = vector.shape_cast %8 : vector<1x18x16x128xbf16> to vector<18x16x128xbf16>
    %10 = vector.shape_cast %7 : vector<18x16x128xbf16> to vector<1x18x16x128xbf16>
    tpu.vector_store %arg8[%c0_4, %c0_5, %c0_6, %c0_7], %10 {strides = array<i32>} : memref<3x18x16x128xbf16, #tpu.memory_space<vmem>>, vector<1x18x16x128xbf16>,
    %11 = tpu.concatenate %2, %1, %2 in 0 : vector<1x16x128xf32>, vector<16x16x128xf32>, vector<1x16x128xf32> -> vector<18x16x128xf32>
    %12 = arith.truncf %11 : vector<18x16x128xf32> to vector<18x16x128xbf16>
    %c1 = arith.constant 1 : index
    %c0_8 = arith.constant 0 : index
    %c0_9 = arith.constant 0 : index
    %c0_10 = arith.constant 0 : index
    %13 = vector.load %arg8[%c1, %c0_8, %c0_9, %c0_10] : memref<3x18x16x128xbf16, #tpu.memory_space<vmem>>, vector<1x18x16x128xbf16>
    %14 = vector.shape_cast %13 : vector<1x18x16x128xbf16> to vector<18x16x128xbf16>
    %15 = vector.shape_cast %12 : vector<18x16x128xbf16> to vector<1x18x16x128xbf16>
    tpu.vector_store %arg8[%c1, %c0_8, %c0_9, %c0_10], %15 {strides = array<i32>} : memref<3x18x16x128xbf16, #tpu.memory_space<vmem>>, vector<1x18x16x128xbf16>,
    %16 = vector.extract_strided_slice %1 {offsets = [0, 1, 0], sizes = [16, 15, 128], strides = [1, 1, 1]} : vector<16x16x128xf32> to vector<16x15x128xf32>
    %17 = tpu.concatenate %16, %3 in 1 : vector<16x15x128xf32>, vector<16x1x128xf32> -> vector<16x16x128xf32>
    %18 = tpu.concatenate %2, %17, %2 in 0 : vector<1x16x128xf32>, vector<16x16x128xf32>, vector<1x16x128xf32> -> vector<18x16x128xf32>
    %19 = arith.truncf %18 : vector<18x16x128xf32> to vector<18x16x128xbf16>
    %c2 = arith.constant 2 : index
    %c0_11 = arith.constant 0 : index
    %c0_12 = arith.constant 0 : index
    %c0_13 = arith.constant 0 : index
    %20 = vector.load %arg8[%c2, %c0_11, %c0_12, %c0_13] : memref<3x18x16x128xbf16, #tpu.memory_space<vmem>>, vector<1x18x16x128xbf16>
    %21 = vector.shape_cast %20 : vector<1x18x16x128xbf16> to vector<18x16x128xbf16>
    %22 = vector.shape_cast %19 : vector<18x16x128xbf16> to vector<1x18x16x128xbf16>
    tpu.vector_store %arg8[%c2, %c0_11, %c0_12, %c0_13], %22 {strides = array<i32>} : memref<3x18x16x128xbf16, #tpu.memory_space<vmem>>, vector<1x18x16x128xbf16>,
    %cst_14 = arith.constant 0.000000e+00 : f32
    %23 = vector.broadcast %cst_14 : f32 to vector<1x128xf32>
    %cst_15 = arith.constant 0.000000e+00 : f32
    %24 = vector.broadcast %cst_15 : f32 to vector<1x128xf32>
    %cst_16 = arith.constant 0.000000e+00 : f32
    %25 = vector.broadcast %cst_16 : f32 to vector<128x128xf32>
    %c0_17 = arith.constant 0 : index
    %c0_18 = arith.constant 0 : index
    %c0_19 = arith.constant 0 : index
    %c0_20 = arith.constant 0 : index
    %26 = vector.load %arg8[%c0_17, %c0_18, %c0_19, %c0_20] : memref<3x18x16x128xbf16, #tpu.memory_space<vmem>>, vector<1x8x16x128xbf16>
    %27 = vector.shape_cast %26 : vector<1x8x16x128xbf16> to vector<8x16x128xbf16>
    %28 = vector.shape_cast %27 : vector<8x16x128xbf16> to vector<128x128xbf16>
    %c0_21 = arith.constant 0 : index
    %c0_22 = arith.constant 0 : index
    %c0_23 = arith.constant 0 : index
    %29 = vector.load %arg4[%c0_21, %c0_22, %c0_23] : memref<9x128x128xbf16, #tpu.memory_space<vmem>>, vector<1x128x128xbf16>
    %30 = vector.shape_cast %29 : vector<1x128x128xbf16> to vector<128x128xbf16>
    %cst_24 = arith.constant dense<0.000000e+00> : vector<128x128xf32>
    %31 = tpu.matmul %28, %30, %cst_24 {dimension_numbers = #tpu.dot_dimension_numbers<[1], [0], [0], [1], [0, 0, 1, 1], [], []>} : vector<128x128xbf16>, vector<128x128xbf16>, vector<128x128xf32> -> vector<128x128xf32>
    %32 = arith.addf %25, %31 : vector<128x128xf32>
    %c1_25 = arith.constant 1 : index
    %c0_26 = arith.constant 0 : index
    %c0_27 = arith.constant 0 : index
    %c0_28 = arith.constant 0 : index
    %33 = vector.load %arg8[%c1_25, %c0_26, %c0_27, %c0_28] : memref<3x18x16x128xbf16, #tpu.memory_space<vmem>>, vector<1x8x16x128xbf16>
    %34 = vector.shape_cast %33 : vector<1x8x16x128xbf16> to vector<8x16x128xbf16>
    %35 = vector.shape_cast %34 : vector<8x16x128xbf16> to vector<128x128xbf16>
    %c1_29 = arith.constant 1 : index
    %c0_30 = arith.constant 0 : index
    %c0_31 = arith.constant 0 : index
    %36 = vector.load %arg4[%c1_29, %c0_30, %c0_31] : memref<9x128x128xbf16, #tpu.memory_space<vmem>>, vector<1x128x128xbf16>
    %37 = vector.shape_cast %36 : vector<1x128x128xbf16> to vector<128x128xbf16>
    %cst_32 = arith.constant dense<0.000000e+00> : vector<128x128xf32>
    %38 = tpu.matmul %35, %37, %cst_32 {dimension_numbers = #tpu.dot_dimension_numbers<[1], [0], [0], [1], [0, 0, 1, 1], [], []>} : vector<128x128xbf16>, vector<128x128xbf16>, vector<128x128xf32> -> vector<128x128xf32>
    %39 = arith.addf %32, %38 : vector<128x128xf32>
    %c2_33 = arith.constant 2 : index
    %c0_34 = arith.constant 0 : index
    %c0_35 = arith.constant 0 : index
    %c0_36 = arith.constant 0 : index
    %40 = vector.load %arg8[%c2_33, %c0_34, %c0_35, %c0_36] : memref<3x18x16x128xbf16, #tpu.memory_space<vmem>>, vector<1x8x16x128xbf16>
    %41 = vector.shape_cast %40 : vector<1x8x16x128xbf16> to vector<8x16x128xbf16>
    %42 = vector.shape_cast %41 : vector<8x16x128xbf16> to vector<128x128xbf16>
    %c2_37 = arith.constant 2 : index
    %c0_38 = arith.constant 0 : index
    %c0_39 = arith.constant 0 : index
    %43 = vector.load %arg4[%c2_37, %c0_38, %c0_39] : memref<9x128x128xbf16, #tpu.memory_space<vmem>>, vector<1x128x128xbf16>
    %44 = vector.shape_cast %43 : vector<1x128x128xbf16> to vector<128x128xbf16>
    %cst_40 = arith.constant dense<0.000000e+00> : vector<128x128xf32>
    %45 = tpu.matmul %42, %44, %cst_40 {dimension_numbers = #tpu.dot_dimension_numbers<[1], [0], [0], [1], [0, 0, 1, 1], [], []>} : vector<128x128xbf16>, vector<128x128xbf16>, vector<128x128xf32> -> vector<128x128xf32>
    %46 = arith.addf %39, %45 : vector<128x128xf32>
    %c0_41 = arith.constant 0 : index
    %c1_42 = arith.constant 1 : index
    %c0_43 = arith.constant 0 : index
    %c0_44 = arith.constant 0 : index
    %47 = vector.load %arg8[%c0_41, %c1_42, %c0_43, %c0_44] : memref<3x18x16x128xbf16, #tpu.memory_space<vmem>>, vector<1x8x16x128xbf16>
    %48 = vector.shape_cast %47 : vector<1x8x16x128xbf16> to vector<8x16x128xbf16>
    %49 = vector.shape_cast %48 : vector<8x16x128xbf16> to vector<128x128xbf16>
    %c3 = arith.constant 3 : index
    %c0_45 = arith.constant 0 : index
    %c0_46 = arith.constant 0 : index
    %50 = vector.load %arg4[%c3, %c0_45, %c0_46] : memref<9x128x128xbf16, #tpu.memory_space<vmem>>, vector<1x128x128xbf16>
    %51 = vector.shape_cast %50 : vector<1x128x128xbf16> to vector<128x128xbf16>
    %cst_47 = arith.constant dense<0.000000e+00> : vector<128x128xf32>
    %52 = tpu.matmul %49, %51, %cst_47 {dimension_numbers = #tpu.dot_dimension_numbers<[1], [0], [0], [1], [0, 0, 1, 1], [], []>} : vector<128x128xbf16>, vector<128x128xbf16>, vector<128x128xf32> -> vector<128x128xf32>
    %53 = arith.addf %46, %52 : vector<128x128xf32>
    %c1_48 = arith.constant 1 : index
    %c1_49 = arith.constant 1 : index
    %c0_50 = arith.constant 0 : index
    %c0_51 = arith.constant 0 : index
    %54 = vector.load %arg8[%c1_48, %c1_49, %c0_50, %c0_51] : memref<3x18x16x128xbf16, #tpu.memory_space<vmem>>, vector<1x8x16x128xbf16>
    %55 = vector.shape_cast %54 : vector<1x8x16x128xbf16> to vector<8x16x128xbf16>
    %56 = vector.shape_cast %55 : vector<8x16x128xbf16> to vector<128x128xbf16>
    %c4 = arith.constant 4 : index
    %c0_52 = arith.constant 0 : index
    %c0_53 = arith.constant 0 : index
    %57 = vector.load %arg4[%c4, %c0_52, %c0_53] : memref<9x128x128xbf16, #tpu.memory_space<vmem>>, vector<1x128x128xbf16>
    %58 = vector.shape_cast %57 : vector<1x128x128xbf16> to vector<128x128xbf16>
    %cst_54 = arith.constant dense<0.000000e+00> : vector<128x128xf32>
    %59 = tpu.matmul %56, %58, %cst_54 {dimension_numbers = #tpu.dot_dimension_numbers<[1], [0], [0], [1], [0, 0, 1, 1], [], []>} : vector<128x128xbf16>, vector<128x128xbf16>, vector<128x128xf32> -> vector<128x128xf32>
    %60 = arith.addf %53, %59 : vector<128x128xf32>
    %c2_55 = arith.constant 2 : index
    %c1_56 = arith.constant 1 : index
    %c0_57 = arith.constant 0 : index
    %c0_58 = arith.constant 0 : index
    %61 = vector.load %arg8[%c2_55, %c1_56, %c0_57, %c0_58] : memref<3x18x16x128xbf16, #tpu.memory_space<vmem>>, vector<1x8x16x128xbf16>
    %62 = vector.shape_cast %61 : vector<1x8x16x128xbf16> to vector<8x16x128xbf16>
    %63 = vector.shape_cast %62 : vector<8x16x128xbf16> to vector<128x128xbf16>
    %c5 = arith.constant 5 : index
    %c0_59 = arith.constant 0 : index
    %c0_60 = arith.constant 0 : index
    %64 = vector.load %arg4[%c5, %c0_59, %c0_60] : memref<9x128x128xbf16, #tpu.memory_space<vmem>>, vector<1x128x128xbf16>
    %65 = vector.shape_cast %64 : vector<1x128x128xbf16> to vector<128x128xbf16>
    %cst_61 = arith.constant dense<0.000000e+00> : vector<128x128xf32>
    %66 = tpu.matmul %63, %65, %cst_61 {dimension_numbers = #tpu.dot_dimension_numbers<[1], [0], [0], [1], [0, 0, 1, 1], [], []>} : vector<128x128xbf16>, vector<128x128xbf16>, vector<128x128xf32> -> vector<128x128xf32>
    %67 = arith.addf %60, %66 : vector<128x128xf32>
    %c0_62 = arith.constant 0 : index
    %c2_63 = arith.constant 2 : index
    %c0_64 = arith.constant 0 : index
    %c0_65 = arith.constant 0 : index
    %68 = vector.load %arg8[%c0_62, %c2_63, %c0_64, %c0_65] : memref<3x18x16x128xbf16, #tpu.memory_space<vmem>>, vector<1x8x16x128xbf16>
    %69 = vector.shape_cast %68 : vector<1x8x16x128xbf16> to vector<8x16x128xbf16>
    %70 = vector.shape_cast %69 : vector<8x16x128xbf16> to vector<128x128xbf16>
    %c6 = arith.constant 6 : index
    %c0_66 = arith.constant 0 : index
    %c0_67 = arith.constant 0 : index
    %71 = vector.load %arg4[%c6, %c0_66, %c0_67] : memref<9x128x128xbf16, #tpu.memory_space<vmem>>, vector<1x128x128xbf16>
    %72 = vector.shape_cast %71 : vector<1x128x128xbf16> to vector<128x128xbf16>
    %cst_68 = arith.constant dense<0.000000e+00> : vector<128x128xf32>
    %73 = tpu.matmul %70, %72, %cst_68 {dimension_numbers = #tpu.dot_dimension_numbers<[1], [0], [0], [1], [0, 0, 1, 1], [], []>} : vector<128x128xbf16>, vector<128x128xbf16>, vector<128x128xf32> -> vector<128x128xf32>
    %74 = arith.addf %67, %73 : vector<128x128xf32>
    %c1_69 = arith.constant 1 : index
    %c2_70 = arith.constant 2 : index
    %c0_71 = arith.constant 0 : index
    %c0_72 = arith.constant 0 : index
    %75 = vector.load %arg8[%c1_69, %c2_70, %c0_71, %c0_72] : memref<3x18x16x128xbf16, #tpu.memory_space<vmem>>, vector<1x8x16x128xbf16>
    %76 = vector.shape_cast %75 : vector<1x8x16x128xbf16> to vector<8x16x128xbf16>
    %77 = vector.shape_cast %76 : vector<8x16x128xbf16> to vector<128x128xbf16>
    %c7 = arith.constant 7 : index
    %c0_73 = arith.constant 0 : index
    %c0_74 = arith.constant 0 : index
    %78 = vector.load %arg4[%c7, %c0_73, %c0_74] : memref<9x128x128xbf16, #tpu.memory_space<vmem>>, vector<1x128x128xbf16>
    %79 = vector.shape_cast %78 : vector<1x128x128xbf16> to vector<128x128xbf16>
    %cst_75 = arith.constant dense<0.000000e+00> : vector<128x128xf32>
    %80 = tpu.matmul %77, %79, %cst_75 {dimension_numbers = #tpu.dot_dimension_numbers<[1], [0], [0], [1], [0, 0, 1, 1], [], []>} : vector<128x128xbf16>, vector<128x128xbf16>, vector<128x128xf32> -> vector<128x128xf32>
    %81 = arith.addf %74, %80 : vector<128x128xf32>
    %c2_76 = arith.constant 2 : index
    %c2_77 = arith.constant 2 : index
    %c0_78 = arith.constant 0 : index
    %c0_79 = arith.constant 0 : index
    %82 = vector.load %arg8[%c2_76, %c2_77, %c0_78, %c0_79] : memref<3x18x16x128xbf16, #tpu.memory_space<vmem>>, vector<1x8x16x128xbf16>
    %83 = vector.shape_cast %82 : vector<1x8x16x128xbf16> to vector<8x16x128xbf16>
    %84 = vector.shape_cast %83 : vector<8x16x128xbf16> to vector<128x128xbf16>
    %c8 = arith.constant 8 : index
    %c0_80 = arith.constant 0 : index
    %c0_81 = arith.constant 0 : index
    %85 = vector.load %arg4[%c8, %c0_80, %c0_81] : memref<9x128x128xbf16, #tpu.memory_space<vmem>>, vector<1x128x128xbf16>
    %86 = vector.shape_cast %85 : vector<1x128x128xbf16> to vector<128x128xbf16>
    %cst_82 = arith.constant dense<0.000000e+00> : vector<128x128xf32>
    %87 = tpu.matmul %84, %86, %cst_82 {dimension_numbers = #tpu.dot_dimension_numbers<[1], [0], [0], [1], [0, 0, 1, 1], [], []>} : vector<128x128xbf16>, vector<128x128xbf16>, vector<128x128xf32> -> vector<128x128xf32>
    %88 = arith.addf %81, %87 : vector<128x128xf32>
    %89 = vector.shape_cast %88 : vector<128x128xf32> to vector<8x16x128xf32>
    %c0_83 = arith.constant 0 : index
    %c0_84 = arith.constant 0 : index
    %c0_85 = arith.constant 0 : index
    %c0_86 = arith.constant 0 : index
    %90 = vector.load %arg5[%c0_83, %c0_84, %c0_85, %c0_86] : memref<1x16x16x128xf32, #tpu.memory_space<vmem>>, vector<1x8x16x128xf32>
    %91 = vector.shape_cast %90 : vector<1x8x16x128xf32> to vector<8x16x128xf32>
    %92 = vector.shape_cast %89 : vector<8x16x128xf32> to vector<1x8x16x128xf32>
    tpu.vector_store %arg5[%c0_83, %c0_84, %c0_85, %c0_86], %92 {strides = array<i32>} : memref<1x16x16x128xf32, #tpu.memory_space<vmem>>, vector<1x8x16x128xf32>,
    %cst_87 = arith.constant dense<0.000000e+00> : vector<128xf32>
    %93 = vector.multi_reduction <add>, %88, %cst_87 [0] : vector<128x128xf32> to vector<128xf32>
    %94 = vector.shape_cast %93 : vector<128xf32> to vector<1x128xf32>
    %95 = arith.addf %23, %94 : vector<1x128xf32>
    %96 = arith.mulf %88, %88 : vector<128x128xf32>
    %cst_88 = arith.constant dense<0.000000e+00> : vector<128xf32>
    %97 = vector.multi_reduction <add>, %96, %cst_88 [0] : vector<128x128xf32> to vector<128xf32>
    %98 = vector.shape_cast %97 : vector<128xf32> to vector<1x128xf32>
    %99 = arith.addf %24, %98 : vector<1x128xf32>
    %cst_89 = arith.constant 0.000000e+00 : f32
    %100 = vector.broadcast %cst_89 : f32 to vector<128x128xf32>
    %c0_90 = arith.constant 0 : index
    %c8_91 = arith.constant 8 : index
    %c0_92 = arith.constant 0 : index
    %c0_93 = arith.constant 0 : index
    %101 = vector.load %arg8[%c0_90, %c8_91, %c0_92, %c0_93] : memref<3x18x16x128xbf16, #tpu.memory_space<vmem>>, vector<1x8x16x128xbf16>
    %102 = vector.shape_cast %101 : vector<1x8x16x128xbf16> to vector<8x16x128xbf16>
    %103 = vector.shape_cast %102 : vector<8x16x128xbf16> to vector<128x128xbf16>
    %c0_94 = arith.constant 0 : index
    %c0_95 = arith.constant 0 : index
    %c0_96 = arith.constant 0 : index
    %104 = vector.load %arg4[%c0_94, %c0_95, %c0_96] : memref<9x128x128xbf16, #tpu.memory_space<vmem>>, vector<1x128x128xbf16>
    %105 = vector.shape_cast %104 : vector<1x128x128xbf16> to vector<128x128xbf16>
    %cst_97 = arith.constant dense<0.000000e+00> : vector<128x128xf32>
    %106 = tpu.matmul %103, %105, %cst_97 {dimension_numbers = #tpu.dot_dimension_numbers<[1], [0], [0], [1], [0, 0, 1, 1], [], []>} : vector<128x128xbf16>, vector<128x128xbf16>, vector<128x128xf32> -> vector<128x128xf32>
    %107 = arith.addf %100, %106 : vector<128x128xf32>
    %c1_98 = arith.constant 1 : index
    %c8_99 = arith.constant 8 : index
    %c0_100 = arith.constant 0 : index
    %c0_101 = arith.constant 0 : index
    %108 = vector.load %arg8[%c1_98, %c8_99, %c0_100, %c0_101] : memref<3x18x16x128xbf16, #tpu.memory_space<vmem>>, vector<1x8x16x128xbf16>
    %109 = vector.shape_cast %108 : vector<1x8x16x128xbf16> to vector<8x16x128xbf16>
    %110 = vector.shape_cast %109 : vector<8x16x128xbf16> to vector<128x128xbf16>
    %c1_102 = arith.constant 1 : index
    %c0_103 = arith.constant 0 : index
    %c0_104 = arith.constant 0 : index
    %111 = vector.load %arg4[%c1_102, %c0_103, %c0_104] : memref<9x128x128xbf16, #tpu.memory_space<vmem>>, vector<1x128x128xbf16>
    %112 = vector.shape_cast %111 : vector<1x128x128xbf16> to vector<128x128xbf16>
    %cst_105 = arith.constant dense<0.000000e+00> : vector<128x128xf32>
    %113 = tpu.matmul %110, %112, %cst_105 {dimension_numbers = #tpu.dot_dimension_numbers<[1], [0], [0], [1], [0, 0, 1, 1], [], []>} : vector<128x128xbf16>, vector<128x128xbf16>, vector<128x128xf32> -> vector<128x128xf32>
    %114 = arith.addf %107, %113 : vector<128x128xf32>
    %c2_106 = arith.constant 2 : index
    %c8_107 = arith.constant 8 : index
    %c0_108 = arith.constant 0 : index
    %c0_109 = arith.constant 0 : index
    %115 = vector.load %arg8[%c2_106, %c8_107, %c0_108, %c0_109] : memref<3x18x16x128xbf16, #tpu.memory_space<vmem>>, vector<1x8x16x128xbf16>
    %116 = vector.shape_cast %115 : vector<1x8x16x128xbf16> to vector<8x16x128xbf16>
    %117 = vector.shape_cast %116 : vector<8x16x128xbf16> to vector<128x128xbf16>
    %c2_110 = arith.constant 2 : index
    %c0_111 = arith.constant 0 : index
    %c0_112 = arith.constant 0 : index
    %118 = vector.load %arg4[%c2_110, %c0_111, %c0_112] : memref<9x128x128xbf16, #tpu.memory_space<vmem>>, vector<1x128x128xbf16>
    %119 = vector.shape_cast %118 : vector<1x128x128xbf16> to vector<128x128xbf16>
    %cst_113 = arith.constant dense<0.000000e+00> : vector<128x128xf32>
    %120 = tpu.matmul %117, %119, %cst_113 {dimension_numbers = #tpu.dot_dimension_numbers<[1], [0], [0], [1], [0, 0, 1, 1], [], []>} : vector<128x128xbf16>, vector<128x128xbf16>, vector<128x128xf32> -> vector<128x128xf32>
    %121 = arith.addf %114, %120 : vector<128x128xf32>
    %c0_114 = arith.constant 0 : index
    %c9 = arith.constant 9 : index
    %c0_115 = arith.constant 0 : index
    %c0_116 = arith.constant 0 : index
    %122 = vector.load %arg8[%c0_114, %c9, %c0_115, %c0_116] : memref<3x18x16x128xbf16, #tpu.memory_space<vmem>>, vector<1x8x16x128xbf16>
    %123 = vector.shape_cast %122 : vector<1x8x16x128xbf16> to vector<8x16x128xbf16>
    %124 = vector.shape_cast %123 : vector<8x16x128xbf16> to vector<128x128xbf16>
    %c3_117 = arith.constant 3 : index
    %c0_118 = arith.constant 0 : index
    %c0_119 = arith.constant 0 : index
    %125 = vector.load %arg4[%c3_117, %c0_118, %c0_119] : memref<9x128x128xbf16, #tpu.memory_space<vmem>>, vector<1x128x128xbf16>
    %126 = vector.shape_cast %125 : vector<1x128x128xbf16> to vector<128x128xbf16>
    %cst_120 = arith.constant dense<0.000000e+00> : vector<128x128xf32>
    %127 = tpu.matmul %124, %126, %cst_120 {dimension_numbers = #tpu.dot_dimension_numbers<[1], [0], [0], [1], [0, 0, 1, 1], [], []>} : vector<128x128xbf16>, vector<128x128xbf16>, vector<128x128xf32> -> vector<128x128xf32>
    %128 = arith.addf %121, %127 : vector<128x128xf32>
    %c1_121 = arith.constant 1 : index
    %c9_122 = arith.constant 9 : index
    %c0_123 = arith.constant 0 : index
    %c0_124 = arith.constant 0 : index
    %129 = vector.load %arg8[%c1_121, %c9_122, %c0_123, %c0_124] : memref<3x18x16x128xbf16, #tpu.memory_space<vmem>>, vector<1x8x16x128xbf16>
    %130 = vector.shape_cast %129 : vector<1x8x16x128xbf16> to vector<8x16x128xbf16>
    %131 = vector.shape_cast %130 : vector<8x16x128xbf16> to vector<128x128xbf16>
    %c4_125 = arith.constant 4 : index
    %c0_126 = arith.constant 0 : index
    %c0_127 = arith.constant 0 : index
    %132 = vector.load %arg4[%c4_125, %c0_126, %c0_127] : memref<9x128x128xbf16, #tpu.memory_space<vmem>>, vector<1x128x128xbf16>
    %133 = vector.shape_cast %132 : vector<1x128x128xbf16> to vector<128x128xbf16>
    %cst_128 = arith.constant dense<0.000000e+00> : vector<128x128xf32>
    %134 = tpu.matmul %131, %133, %cst_128 {dimension_numbers = #tpu.dot_dimension_numbers<[1], [0], [0], [1], [0, 0, 1, 1], [], []>} : vector<128x128xbf16>, vector<128x128xbf16>, vector<128x128xf32> -> vector<128x128xf32>
    %135 = arith.addf %128, %134 : vector<128x128xf32>
    %c2_129 = arith.constant 2 : index
    %c9_130 = arith.constant 9 : index
    %c0_131 = arith.constant 0 : index
    %c0_132 = arith.constant 0 : index
    %136 = vector.load %arg8[%c2_129, %c9_130, %c0_131, %c0_132] : memref<3x18x16x128xbf16, #tpu.memory_space<vmem>>, vector<1x8x16x128xbf16>
    %137 = vector.shape_cast %136 : vector<1x8x16x128xbf16> to vector<8x16x128xbf16>
    %138 = vector.shape_cast %137 : vector<8x16x128xbf16> to vector<128x128xbf16>
    %c5_133 = arith.constant 5 : index
    %c0_134 = arith.constant 0 : index
    %c0_135 = arith.constant 0 : index
    %139 = vector.load %arg4[%c5_133, %c0_134, %c0_135] : memref<9x128x128xbf16, #tpu.memory_space<vmem>>, vector<1x128x128xbf16>
    %140 = vector.shape_cast %139 : vector<1x128x128xbf16> to vector<128x128xbf16>
    %cst_136 = arith.constant dense<0.000000e+00> : vector<128x128xf32>
    %141 = tpu.matmul %138, %140, %cst_136 {dimension_numbers = #tpu.dot_dimension_numbers<[1], [0], [0], [1], [0, 0, 1, 1], [], []>} : vector<128x128xbf16>, vector<128x128xbf16>, vector<128x128xf32> -> vector<128x128xf32>
    %142 = arith.addf %135, %141 : vector<128x128xf32>
    %c0_137 = arith.constant 0 : index
    %c10 = arith.constant 10 : index
    %c0_138 = arith.constant 0 : index
    %c0_139 = arith.constant 0 : index
    %143 = vector.load %arg8[%c0_137, %c10, %c0_138, %c0_139] : memref<3x18x16x128xbf16, #tpu.memory_space<vmem>>, vector<1x8x16x128xbf16>
    %144 = vector.shape_cast %143 : vector<1x8x16x128xbf16> to vector<8x16x128xbf16>
    %145 = vector.shape_cast %144 : vector<8x16x128xbf16> to vector<128x128xbf16>
    %c6_140 = arith.constant 6 : index
    %c0_141 = arith.constant 0 : index
    %c0_142 = arith.constant 0 : index
    %146 = vector.load %arg4[%c6_140, %c0_141, %c0_142] : memref<9x128x128xbf16, #tpu.memory_space<vmem>>, vector<1x128x128xbf16>
    %147 = vector.shape_cast %146 : vector<1x128x128xbf16> to vector<128x128xbf16>
    %cst_143 = arith.constant dense<0.000000e+00> : vector<128x128xf32>
    %148 = tpu.matmul %145, %147, %cst_143 {dimension_numbers = #tpu.dot_dimension_numbers<[1], [0], [0], [1], [0, 0, 1, 1], [], []>} : vector<128x128xbf16>, vector<128x128xbf16>, vector<128x128xf32> -> vector<128x128xf32>
    %149 = arith.addf %142, %148 : vector<128x128xf32>
    %c1_144 = arith.constant 1 : index
    %c10_145 = arith.constant 10 : index
    %c0_146 = arith.constant 0 : index
    %c0_147 = arith.constant 0 : index
    %150 = vector.load %arg8[%c1_144, %c10_145, %c0_146, %c0_147] : memref<3x18x16x128xbf16, #tpu.memory_space<vmem>>, vector<1x8x16x128xbf16>
    %151 = vector.shape_cast %150 : vector<1x8x16x128xbf16> to vector<8x16x128xbf16>
    %152 = vector.shape_cast %151 : vector<8x16x128xbf16> to vector<128x128xbf16>
    %c7_148 = arith.constant 7 : index
    %c0_149 = arith.constant 0 : index
    %c0_150 = arith.constant 0 : index
    %153 = vector.load %arg4[%c7_148, %c0_149, %c0_150] : memref<9x128x128xbf16, #tpu.memory_space<vmem>>, vector<1x128x128xbf16>
    %154 = vector.shape_cast %153 : vector<1x128x128xbf16> to vector<128x128xbf16>
    %cst_151 = arith.constant dense<0.000000e+00> : vector<128x128xf32>
    %155 = tpu.matmul %152, %154, %cst_151 {dimension_numbers = #tpu.dot_dimension_numbers<[1], [0], [0], [1], [0, 0, 1, 1], [], []>} : vector<128x128xbf16>, vector<128x128xbf16>, vector<128x128xf32> -> vector<128x128xf32>
    %156 = arith.addf %149, %155 : vector<128x128xf32>
    %c2_152 = arith.constant 2 : index
    %c10_153 = arith.constant 10 : index
    %c0_154 = arith.constant 0 : index
    %c0_155 = arith.constant 0 : index
    %157 = vector.load %arg8[%c2_152, %c10_153, %c0_154, %c0_155] : memref<3x18x16x128xbf16, #tpu.memory_space<vmem>>, vector<1x8x16x128xbf16>
    %158 = vector.shape_cast %157 : vector<1x8x16x128xbf16> to vector<8x16x128xbf16>
    %159 = vector.shape_cast %158 : vector<8x16x128xbf16> to vector<128x128xbf16>
    %c8_156 = arith.constant 8 : index
    %c0_157 = arith.constant 0 : index
    %c0_158 = arith.constant 0 : index
    %160 = vector.load %arg4[%c8_156, %c0_157, %c0_158] : memref<9x128x128xbf16, #tpu.memory_space<vmem>>, vector<1x128x128xbf16>
    %161 = vector.shape_cast %160 : vector<1x128x128xbf16> to vector<128x128xbf16>
    %cst_159 = arith.constant dense<0.000000e+00> : vector<128x128xf32>
    %162 = tpu.matmul %159, %161, %cst_159 {dimension_numbers = #tpu.dot_dimension_numbers<[1], [0], [0], [1], [0, 0, 1, 1], [], []>} : vector<128x128xbf16>, vector<128x128xbf16>, vector<128x128xf32> -> vector<128x128xf32>
    %163 = arith.addf %156, %162 : vector<128x128xf32>
    %164 = vector.shape_cast %163 : vector<128x128xf32> to vector<8x16x128xf32>
    %c0_160 = arith.constant 0 : index
    %c8_161 = arith.constant 8 : index
    %c0_162 = arith.constant 0 : index
    %c0_163 = arith.constant 0 : index
    %165 = vector.load %arg5[%c0_160, %c8_161, %c0_162, %c0_163] : memref<1x16x16x128xf32, #tpu.memory_space<vmem>>, vector<1x8x16x128xf32>
    %166 = vector.shape_cast %165 : vector<1x8x16x128xf32> to vector<8x16x128xf32>
    %167 = vector.shape_cast %164 : vector<8x16x128xf32> to vector<1x8x16x128xf32>
    tpu.vector_store %arg5[%c0_160, %c8_161, %c0_162, %c0_163], %167 {strides = array<i32>} : memref<1x16x16x128xf32, #tpu.memory_space<vmem>>, vector<1x8x16x128xf32>,
    %cst_164 = arith.constant dense<0.000000e+00> : vector<128xf32>
    %168 = vector.multi_reduction <add>, %163, %cst_164 [0] : vector<128x128xf32> to vector<128xf32>
    %169 = vector.shape_cast %168 : vector<128xf32> to vector<1x128xf32>
    %170 = arith.addf %95, %169 : vector<1x128xf32>
    %171 = arith.mulf %163, %163 : vector<128x128xf32>
    %cst_165 = arith.constant dense<0.000000e+00> : vector<128xf32>
    %172 = vector.multi_reduction <add>, %171, %cst_165 [0] : vector<128x128xf32> to vector<128xf32>
    %173 = vector.shape_cast %172 : vector<128xf32> to vector<1x128xf32>
    %174 = arith.addf %99, %173 : vector<1x128xf32>
    %175 = vector.shape_cast %170 : vector<1x128xf32> to vector<1x1x128xf32>
    %c0_166 = arith.constant 0 : index
    %c0_167 = arith.constant 0 : index
    %c0_168 = arith.constant 0 : index
    %176 = vector.load %arg6[%c0_166, %c0_167, %c0_168] : memref<1x1x128xf32, #tpu.memory_space<vmem>>, vector<1x1x128xf32>
    tpu.vector_store %arg6[%c0_166, %c0_167, %c0_168], %175 {strides = array<i32>} : memref<1x1x128xf32, #tpu.memory_space<vmem>>, vector<1x1x128xf32>,
    %177 = vector.shape_cast %174 : vector<1x128xf32> to vector<1x1x128xf32>
    %c0_169 = arith.constant 0 : index
    %c0_170 = arith.constant 0 : index
    %c0_171 = arith.constant 0 : index
    %178 = vector.load %arg7[%c0_169, %c0_170, %c0_171] : memref<1x1x128xf32, #tpu.memory_space<vmem>>, vector<1x1x128xf32>
    tpu.vector_store %arg7[%c0_169, %c0_170, %c0_171], %177 {strides = array<i32>} : memref<1x1x128xf32, #tpu.memory_space<vmem>>, vector<1x1x128xf32>,
    return
  }
  func.func @transform_0(%arg0: i32) -> (i32, i32, i32, i32) {
    %c0_i32 = arith.constant 0 : i32
    %c0_i32_0 = arith.constant 0 : i32
    %c0_i32_1 = arith.constant 0 : i32
    %c0_i32_2 = arith.constant 0 : i32
    return %arg0, %c0_i32, %c0_i32_0, %c0_i32_1 : i32, i32, i32, i32
  }
  func.func @transform_1(%arg0: i32) -> (i32, i32, i32) {
    %c0_i32 = arith.constant 0 : i32
    %c0_i32_0 = arith.constant 0 : i32
    %c0_i32_1 = arith.constant 0 : i32
    %c0_i32_2 = arith.constant 0 : i32
    return %c0_i32, %c0_i32_0, %c0_i32_1 : i32, i32, i32
  }
  func.func @transform_2(%arg0: i32) -> (i32, i32, i32) {
    %c0_i32 = arith.constant 0 : i32
    %c0_i32_0 = arith.constant 0 : i32
    %c0_i32_1 = arith.constant 0 : i32
    %c0_i32_2 = arith.constant 0 : i32
    return %c0_i32, %c0_i32_0, %c0_i32_1 : i32, i32, i32
  }
  func.func @transform_3(%arg0: i32) -> (i32, i32, i32) {
    %c0_i32 = arith.constant 0 : i32
    %c0_i32_0 = arith.constant 0 : i32
    %c0_i32_1 = arith.constant 0 : i32
    %c0_i32_2 = arith.constant 0 : i32
    return %c0_i32, %c0_i32_0, %c0_i32_1 : i32, i32, i32
  }
  func.func @transform_4(%arg0: i32) -> (i32, i32, i32, i32) {
    %c0_i32 = arith.constant 0 : i32
    %c0_i32_0 = arith.constant 0 : i32
    %c0_i32_1 = arith.constant 0 : i32
    %c0_i32_2 = arith.constant 0 : i32
    return %arg0, %c0_i32, %c0_i32_0, %c0_i32_1 : i32, i32, i32, i32
  }
  func.func @transform_5(%arg0: i32) -> (i32, i32, i32) {
    %c0_i32 = arith.constant 0 : i32
    %c0_i32_0 = arith.constant 0 : i32
    %c0_i32_1 = arith.constant 0 : i32
    return %arg0, %c0_i32, %c0_i32_0 : i32, i32, i32
  }
  func.func @transform_6(%arg0: i32) -> (i32, i32, i32) {
    %c0_i32 = arith.constant 0 : i32
    %c0_i32_0 = arith.constant 0 : i32
    %c0_i32_1 = arith.constant 0 : i32
    return %arg0, %c0_i32, %c0_i32_0 : i32, i32, i32
  }
}

module attributes {stable_mosaic.version = 11 : i64} {
  func.func @_conv_stats_kernel(%arg0: i32, %arg1: memref<1x16x16x128xf32, #tpu.memory_space<vmem>>, %arg2: memref<1x1x128xf32, #tpu.memory_space<vmem>>, %arg3: memref<1x1x128xf32, #tpu.memory_space<vmem>>, %arg4: memref<9x128x128xbf16, #tpu.memory_space<vmem>>, %arg5: memref<1x16x16x128xf32, #tpu.memory_space<vmem>>, %arg6: memref<1x1x128xf32, #tpu.memory_space<vmem>>, %arg7: memref<1x1x128xf32, #tpu.memory_space<vmem>>, %arg8: memref<3x18x16x128xbf16, #tpu.memory_space<vmem>>) attributes {dimension_semantics = [#tpu.dimension_semantics<parallel>], iteration_bounds = array<i64: 2>, scalar_prefetch = 0 : i64, scratch_operands = 1 : i64, tpu.core_type = #tpu.core_type<tc>, window_params = [{transform_indices = @transform_0, window_bounds = array<i64: 1, 16, 16, 128>}, {pipeline_mode = #tpu.pipeline_mode<synchronous>, transform_indices = @transform_1, window_bounds = array<i64: 1, 1, 128>}, {pipeline_mode = #tpu.pipeline_mode<synchronous>, transform_indices = @transform_2, window_bounds = array<i64: 1, 1, 128>}, {pipeline_mode = #tpu.pipeline_mode<synchronous>, transform_indices = @transform_3, window_bounds = array<i64: 9, 128, 128>}, {transform_indices = @transform_4, window_bounds = array<i64: 1, 16, 16, 128>}, {transform_indices = @transform_5, window_bounds = array<i64: 1, 1, 128>}, {transform_indices = @transform_6, window_bounds = array<i64: 1, 1, 128>}]} {
    %c0 = arith.constant 0 : index
    %c0_0 = arith.constant 0 : index
    %c0_1 = arith.constant 0 : index
    %c0_2 = arith.constant 0 : index
    %0 = vector.load %arg1[%c0, %c0_0, %c0_1, %c0_2] : memref<1x16x16x128xf32, #tpu.memory_space<vmem>>, vector<1x16x16x128xf32>
    %1 = vector.shape_cast %0 : vector<1x16x16x128xf32> to vector<16x16x128xf32>
    %c0_3 = arith.constant 0 : index
    %c0_4 = arith.constant 0 : index
    %c0_5 = arith.constant 0 : index
    %2 = vector.load %arg2[%c0_3, %c0_4, %c0_5] : memref<1x1x128xf32, #tpu.memory_space<vmem>>, vector<1x1x128xf32>
    %3 = vector.broadcast %2 : vector<1x1x128xf32> to vector<16x16x128xf32>
    %4 = arith.mulf %1, %3 : vector<16x16x128xf32>
    %c0_6 = arith.constant 0 : index
    %c0_7 = arith.constant 0 : index
    %c0_8 = arith.constant 0 : index
    %5 = vector.load %arg3[%c0_6, %c0_7, %c0_8] : memref<1x1x128xf32, #tpu.memory_space<vmem>>, vector<1x1x128xf32>
    %6 = vector.broadcast %5 : vector<1x1x128xf32> to vector<16x16x128xf32>
    %7 = arith.addf %4, %6 : vector<16x16x128xf32>
    %cst = arith.constant 0.000000e+00 : f32
    %8 = vector.broadcast %cst : f32 to vector<16x16x128xf32>
    %9 = arith.maximumf %7, %8 : vector<16x16x128xf32>
    %cst_9 = arith.constant 0.000000e+00 : f32
    %10 = vector.broadcast %cst_9 : f32 to vector<1x16x128xf32>
    %cst_10 = arith.constant 0.000000e+00 : f32
    %11 = vector.broadcast %cst_10 : f32 to vector<16x1x128xf32>
    %12 = vector.extract_strided_slice %9 {offsets = [0, 0, 0], sizes = [16, 15, 128], strides = [1, 1, 1]} : vector<16x16x128xf32> to vector<16x15x128xf32>
    %13 = tpu.concatenate %11, %12 in 1 : vector<16x1x128xf32>, vector<16x15x128xf32> -> vector<16x16x128xf32>
    %14 = tpu.concatenate %10, %13, %10 in 0 : vector<1x16x128xf32>, vector<16x16x128xf32>, vector<1x16x128xf32> -> vector<18x16x128xf32>
    %15 = arith.truncf %14 : vector<18x16x128xf32> to vector<18x16x128xbf16>
    %c0_11 = arith.constant 0 : index
    %c0_12 = arith.constant 0 : index
    %c0_13 = arith.constant 0 : index
    %c0_14 = arith.constant 0 : index
    %16 = vector.load %arg8[%c0_11, %c0_12, %c0_13, %c0_14] : memref<3x18x16x128xbf16, #tpu.memory_space<vmem>>, vector<1x18x16x128xbf16>
    %17 = vector.shape_cast %16 : vector<1x18x16x128xbf16> to vector<18x16x128xbf16>
    %18 = vector.shape_cast %15 : vector<18x16x128xbf16> to vector<1x18x16x128xbf16>
    tpu.vector_store %arg8[%c0_11, %c0_12, %c0_13, %c0_14], %18 {strides = array<i32>} : memref<3x18x16x128xbf16, #tpu.memory_space<vmem>>, vector<1x18x16x128xbf16>,
    %19 = tpu.concatenate %10, %9, %10 in 0 : vector<1x16x128xf32>, vector<16x16x128xf32>, vector<1x16x128xf32> -> vector<18x16x128xf32>
    %20 = arith.truncf %19 : vector<18x16x128xf32> to vector<18x16x128xbf16>
    %c1 = arith.constant 1 : index
    %c0_15 = arith.constant 0 : index
    %c0_16 = arith.constant 0 : index
    %c0_17 = arith.constant 0 : index
    %21 = vector.load %arg8[%c1, %c0_15, %c0_16, %c0_17] : memref<3x18x16x128xbf16, #tpu.memory_space<vmem>>, vector<1x18x16x128xbf16>
    %22 = vector.shape_cast %21 : vector<1x18x16x128xbf16> to vector<18x16x128xbf16>
    %23 = vector.shape_cast %20 : vector<18x16x128xbf16> to vector<1x18x16x128xbf16>
    tpu.vector_store %arg8[%c1, %c0_15, %c0_16, %c0_17], %23 {strides = array<i32>} : memref<3x18x16x128xbf16, #tpu.memory_space<vmem>>, vector<1x18x16x128xbf16>,
    %24 = vector.extract_strided_slice %9 {offsets = [0, 1, 0], sizes = [16, 15, 128], strides = [1, 1, 1]} : vector<16x16x128xf32> to vector<16x15x128xf32>
    %25 = tpu.concatenate %24, %11 in 1 : vector<16x15x128xf32>, vector<16x1x128xf32> -> vector<16x16x128xf32>
    %26 = tpu.concatenate %10, %25, %10 in 0 : vector<1x16x128xf32>, vector<16x16x128xf32>, vector<1x16x128xf32> -> vector<18x16x128xf32>
    %27 = arith.truncf %26 : vector<18x16x128xf32> to vector<18x16x128xbf16>
    %c2 = arith.constant 2 : index
    %c0_18 = arith.constant 0 : index
    %c0_19 = arith.constant 0 : index
    %c0_20 = arith.constant 0 : index
    %28 = vector.load %arg8[%c2, %c0_18, %c0_19, %c0_20] : memref<3x18x16x128xbf16, #tpu.memory_space<vmem>>, vector<1x18x16x128xbf16>
    %29 = vector.shape_cast %28 : vector<1x18x16x128xbf16> to vector<18x16x128xbf16>
    %30 = vector.shape_cast %27 : vector<18x16x128xbf16> to vector<1x18x16x128xbf16>
    tpu.vector_store %arg8[%c2, %c0_18, %c0_19, %c0_20], %30 {strides = array<i32>} : memref<3x18x16x128xbf16, #tpu.memory_space<vmem>>, vector<1x18x16x128xbf16>,
    %cst_21 = arith.constant 0.000000e+00 : f32
    %31 = vector.broadcast %cst_21 : f32 to vector<1x128xf32>
    %cst_22 = arith.constant 0.000000e+00 : f32
    %32 = vector.broadcast %cst_22 : f32 to vector<1x128xf32>
    %cst_23 = arith.constant 0.000000e+00 : f32
    %33 = vector.broadcast %cst_23 : f32 to vector<128x128xf32>
    %c0_24 = arith.constant 0 : index
    %c0_25 = arith.constant 0 : index
    %c0_26 = arith.constant 0 : index
    %c0_27 = arith.constant 0 : index
    %34 = vector.load %arg8[%c0_24, %c0_25, %c0_26, %c0_27] : memref<3x18x16x128xbf16, #tpu.memory_space<vmem>>, vector<1x8x16x128xbf16>
    %35 = vector.shape_cast %34 : vector<1x8x16x128xbf16> to vector<8x16x128xbf16>
    %36 = vector.shape_cast %35 : vector<8x16x128xbf16> to vector<128x128xbf16>
    %c0_28 = arith.constant 0 : index
    %c0_29 = arith.constant 0 : index
    %c0_30 = arith.constant 0 : index
    %37 = vector.load %arg4[%c0_28, %c0_29, %c0_30] : memref<9x128x128xbf16, #tpu.memory_space<vmem>>, vector<1x128x128xbf16>
    %38 = vector.shape_cast %37 : vector<1x128x128xbf16> to vector<128x128xbf16>
    %cst_31 = arith.constant dense<0.000000e+00> : vector<128x128xf32>
    %39 = tpu.matmul %36, %38, %cst_31 {dimension_numbers = #tpu.dot_dimension_numbers<[1], [0], [0], [1], [0, 0, 1, 1], [], []>} : vector<128x128xbf16>, vector<128x128xbf16>, vector<128x128xf32> -> vector<128x128xf32>
    %40 = arith.addf %33, %39 : vector<128x128xf32>
    %c1_32 = arith.constant 1 : index
    %c0_33 = arith.constant 0 : index
    %c0_34 = arith.constant 0 : index
    %c0_35 = arith.constant 0 : index
    %41 = vector.load %arg8[%c1_32, %c0_33, %c0_34, %c0_35] : memref<3x18x16x128xbf16, #tpu.memory_space<vmem>>, vector<1x8x16x128xbf16>
    %42 = vector.shape_cast %41 : vector<1x8x16x128xbf16> to vector<8x16x128xbf16>
    %43 = vector.shape_cast %42 : vector<8x16x128xbf16> to vector<128x128xbf16>
    %c1_36 = arith.constant 1 : index
    %c0_37 = arith.constant 0 : index
    %c0_38 = arith.constant 0 : index
    %44 = vector.load %arg4[%c1_36, %c0_37, %c0_38] : memref<9x128x128xbf16, #tpu.memory_space<vmem>>, vector<1x128x128xbf16>
    %45 = vector.shape_cast %44 : vector<1x128x128xbf16> to vector<128x128xbf16>
    %cst_39 = arith.constant dense<0.000000e+00> : vector<128x128xf32>
    %46 = tpu.matmul %43, %45, %cst_39 {dimension_numbers = #tpu.dot_dimension_numbers<[1], [0], [0], [1], [0, 0, 1, 1], [], []>} : vector<128x128xbf16>, vector<128x128xbf16>, vector<128x128xf32> -> vector<128x128xf32>
    %47 = arith.addf %40, %46 : vector<128x128xf32>
    %c2_40 = arith.constant 2 : index
    %c0_41 = arith.constant 0 : index
    %c0_42 = arith.constant 0 : index
    %c0_43 = arith.constant 0 : index
    %48 = vector.load %arg8[%c2_40, %c0_41, %c0_42, %c0_43] : memref<3x18x16x128xbf16, #tpu.memory_space<vmem>>, vector<1x8x16x128xbf16>
    %49 = vector.shape_cast %48 : vector<1x8x16x128xbf16> to vector<8x16x128xbf16>
    %50 = vector.shape_cast %49 : vector<8x16x128xbf16> to vector<128x128xbf16>
    %c2_44 = arith.constant 2 : index
    %c0_45 = arith.constant 0 : index
    %c0_46 = arith.constant 0 : index
    %51 = vector.load %arg4[%c2_44, %c0_45, %c0_46] : memref<9x128x128xbf16, #tpu.memory_space<vmem>>, vector<1x128x128xbf16>
    %52 = vector.shape_cast %51 : vector<1x128x128xbf16> to vector<128x128xbf16>
    %cst_47 = arith.constant dense<0.000000e+00> : vector<128x128xf32>
    %53 = tpu.matmul %50, %52, %cst_47 {dimension_numbers = #tpu.dot_dimension_numbers<[1], [0], [0], [1], [0, 0, 1, 1], [], []>} : vector<128x128xbf16>, vector<128x128xbf16>, vector<128x128xf32> -> vector<128x128xf32>
    %54 = arith.addf %47, %53 : vector<128x128xf32>
    %c0_48 = arith.constant 0 : index
    %c1_49 = arith.constant 1 : index
    %c0_50 = arith.constant 0 : index
    %c0_51 = arith.constant 0 : index
    %55 = vector.load %arg8[%c0_48, %c1_49, %c0_50, %c0_51] : memref<3x18x16x128xbf16, #tpu.memory_space<vmem>>, vector<1x8x16x128xbf16>
    %56 = vector.shape_cast %55 : vector<1x8x16x128xbf16> to vector<8x16x128xbf16>
    %57 = vector.shape_cast %56 : vector<8x16x128xbf16> to vector<128x128xbf16>
    %c3 = arith.constant 3 : index
    %c0_52 = arith.constant 0 : index
    %c0_53 = arith.constant 0 : index
    %58 = vector.load %arg4[%c3, %c0_52, %c0_53] : memref<9x128x128xbf16, #tpu.memory_space<vmem>>, vector<1x128x128xbf16>
    %59 = vector.shape_cast %58 : vector<1x128x128xbf16> to vector<128x128xbf16>
    %cst_54 = arith.constant dense<0.000000e+00> : vector<128x128xf32>
    %60 = tpu.matmul %57, %59, %cst_54 {dimension_numbers = #tpu.dot_dimension_numbers<[1], [0], [0], [1], [0, 0, 1, 1], [], []>} : vector<128x128xbf16>, vector<128x128xbf16>, vector<128x128xf32> -> vector<128x128xf32>
    %61 = arith.addf %54, %60 : vector<128x128xf32>
    %c1_55 = arith.constant 1 : index
    %c1_56 = arith.constant 1 : index
    %c0_57 = arith.constant 0 : index
    %c0_58 = arith.constant 0 : index
    %62 = vector.load %arg8[%c1_55, %c1_56, %c0_57, %c0_58] : memref<3x18x16x128xbf16, #tpu.memory_space<vmem>>, vector<1x8x16x128xbf16>
    %63 = vector.shape_cast %62 : vector<1x8x16x128xbf16> to vector<8x16x128xbf16>
    %64 = vector.shape_cast %63 : vector<8x16x128xbf16> to vector<128x128xbf16>
    %c4 = arith.constant 4 : index
    %c0_59 = arith.constant 0 : index
    %c0_60 = arith.constant 0 : index
    %65 = vector.load %arg4[%c4, %c0_59, %c0_60] : memref<9x128x128xbf16, #tpu.memory_space<vmem>>, vector<1x128x128xbf16>
    %66 = vector.shape_cast %65 : vector<1x128x128xbf16> to vector<128x128xbf16>
    %cst_61 = arith.constant dense<0.000000e+00> : vector<128x128xf32>
    %67 = tpu.matmul %64, %66, %cst_61 {dimension_numbers = #tpu.dot_dimension_numbers<[1], [0], [0], [1], [0, 0, 1, 1], [], []>} : vector<128x128xbf16>, vector<128x128xbf16>, vector<128x128xf32> -> vector<128x128xf32>
    %68 = arith.addf %61, %67 : vector<128x128xf32>
    %c2_62 = arith.constant 2 : index
    %c1_63 = arith.constant 1 : index
    %c0_64 = arith.constant 0 : index
    %c0_65 = arith.constant 0 : index
    %69 = vector.load %arg8[%c2_62, %c1_63, %c0_64, %c0_65] : memref<3x18x16x128xbf16, #tpu.memory_space<vmem>>, vector<1x8x16x128xbf16>
    %70 = vector.shape_cast %69 : vector<1x8x16x128xbf16> to vector<8x16x128xbf16>
    %71 = vector.shape_cast %70 : vector<8x16x128xbf16> to vector<128x128xbf16>
    %c5 = arith.constant 5 : index
    %c0_66 = arith.constant 0 : index
    %c0_67 = arith.constant 0 : index
    %72 = vector.load %arg4[%c5, %c0_66, %c0_67] : memref<9x128x128xbf16, #tpu.memory_space<vmem>>, vector<1x128x128xbf16>
    %73 = vector.shape_cast %72 : vector<1x128x128xbf16> to vector<128x128xbf16>
    %cst_68 = arith.constant dense<0.000000e+00> : vector<128x128xf32>
    %74 = tpu.matmul %71, %73, %cst_68 {dimension_numbers = #tpu.dot_dimension_numbers<[1], [0], [0], [1], [0, 0, 1, 1], [], []>} : vector<128x128xbf16>, vector<128x128xbf16>, vector<128x128xf32> -> vector<128x128xf32>
    %75 = arith.addf %68, %74 : vector<128x128xf32>
    %c0_69 = arith.constant 0 : index
    %c2_70 = arith.constant 2 : index
    %c0_71 = arith.constant 0 : index
    %c0_72 = arith.constant 0 : index
    %76 = vector.load %arg8[%c0_69, %c2_70, %c0_71, %c0_72] : memref<3x18x16x128xbf16, #tpu.memory_space<vmem>>, vector<1x8x16x128xbf16>
    %77 = vector.shape_cast %76 : vector<1x8x16x128xbf16> to vector<8x16x128xbf16>
    %78 = vector.shape_cast %77 : vector<8x16x128xbf16> to vector<128x128xbf16>
    %c6 = arith.constant 6 : index
    %c0_73 = arith.constant 0 : index
    %c0_74 = arith.constant 0 : index
    %79 = vector.load %arg4[%c6, %c0_73, %c0_74] : memref<9x128x128xbf16, #tpu.memory_space<vmem>>, vector<1x128x128xbf16>
    %80 = vector.shape_cast %79 : vector<1x128x128xbf16> to vector<128x128xbf16>
    %cst_75 = arith.constant dense<0.000000e+00> : vector<128x128xf32>
    %81 = tpu.matmul %78, %80, %cst_75 {dimension_numbers = #tpu.dot_dimension_numbers<[1], [0], [0], [1], [0, 0, 1, 1], [], []>} : vector<128x128xbf16>, vector<128x128xbf16>, vector<128x128xf32> -> vector<128x128xf32>
    %82 = arith.addf %75, %81 : vector<128x128xf32>
    %c1_76 = arith.constant 1 : index
    %c2_77 = arith.constant 2 : index
    %c0_78 = arith.constant 0 : index
    %c0_79 = arith.constant 0 : index
    %83 = vector.load %arg8[%c1_76, %c2_77, %c0_78, %c0_79] : memref<3x18x16x128xbf16, #tpu.memory_space<vmem>>, vector<1x8x16x128xbf16>
    %84 = vector.shape_cast %83 : vector<1x8x16x128xbf16> to vector<8x16x128xbf16>
    %85 = vector.shape_cast %84 : vector<8x16x128xbf16> to vector<128x128xbf16>
    %c7 = arith.constant 7 : index
    %c0_80 = arith.constant 0 : index
    %c0_81 = arith.constant 0 : index
    %86 = vector.load %arg4[%c7, %c0_80, %c0_81] : memref<9x128x128xbf16, #tpu.memory_space<vmem>>, vector<1x128x128xbf16>
    %87 = vector.shape_cast %86 : vector<1x128x128xbf16> to vector<128x128xbf16>
    %cst_82 = arith.constant dense<0.000000e+00> : vector<128x128xf32>
    %88 = tpu.matmul %85, %87, %cst_82 {dimension_numbers = #tpu.dot_dimension_numbers<[1], [0], [0], [1], [0, 0, 1, 1], [], []>} : vector<128x128xbf16>, vector<128x128xbf16>, vector<128x128xf32> -> vector<128x128xf32>
    %89 = arith.addf %82, %88 : vector<128x128xf32>
    %c2_83 = arith.constant 2 : index
    %c2_84 = arith.constant 2 : index
    %c0_85 = arith.constant 0 : index
    %c0_86 = arith.constant 0 : index
    %90 = vector.load %arg8[%c2_83, %c2_84, %c0_85, %c0_86] : memref<3x18x16x128xbf16, #tpu.memory_space<vmem>>, vector<1x8x16x128xbf16>
    %91 = vector.shape_cast %90 : vector<1x8x16x128xbf16> to vector<8x16x128xbf16>
    %92 = vector.shape_cast %91 : vector<8x16x128xbf16> to vector<128x128xbf16>
    %c8 = arith.constant 8 : index
    %c0_87 = arith.constant 0 : index
    %c0_88 = arith.constant 0 : index
    %93 = vector.load %arg4[%c8, %c0_87, %c0_88] : memref<9x128x128xbf16, #tpu.memory_space<vmem>>, vector<1x128x128xbf16>
    %94 = vector.shape_cast %93 : vector<1x128x128xbf16> to vector<128x128xbf16>
    %cst_89 = arith.constant dense<0.000000e+00> : vector<128x128xf32>
    %95 = tpu.matmul %92, %94, %cst_89 {dimension_numbers = #tpu.dot_dimension_numbers<[1], [0], [0], [1], [0, 0, 1, 1], [], []>} : vector<128x128xbf16>, vector<128x128xbf16>, vector<128x128xf32> -> vector<128x128xf32>
    %96 = arith.addf %89, %95 : vector<128x128xf32>
    %97 = vector.shape_cast %96 : vector<128x128xf32> to vector<8x16x128xf32>
    %c0_90 = arith.constant 0 : index
    %c0_91 = arith.constant 0 : index
    %c0_92 = arith.constant 0 : index
    %c0_93 = arith.constant 0 : index
    %98 = vector.load %arg5[%c0_90, %c0_91, %c0_92, %c0_93] : memref<1x16x16x128xf32, #tpu.memory_space<vmem>>, vector<1x8x16x128xf32>
    %99 = vector.shape_cast %98 : vector<1x8x16x128xf32> to vector<8x16x128xf32>
    %100 = vector.shape_cast %97 : vector<8x16x128xf32> to vector<1x8x16x128xf32>
    tpu.vector_store %arg5[%c0_90, %c0_91, %c0_92, %c0_93], %100 {strides = array<i32>} : memref<1x16x16x128xf32, #tpu.memory_space<vmem>>, vector<1x8x16x128xf32>,
    %cst_94 = arith.constant dense<0.000000e+00> : vector<128xf32>
    %101 = vector.multi_reduction <add>, %96, %cst_94 [0] : vector<128x128xf32> to vector<128xf32>
    %102 = vector.shape_cast %101 : vector<128xf32> to vector<1x128xf32>
    %103 = arith.addf %31, %102 : vector<1x128xf32>
    %104 = arith.mulf %96, %96 : vector<128x128xf32>
    %cst_95 = arith.constant dense<0.000000e+00> : vector<128xf32>
    %105 = vector.multi_reduction <add>, %104, %cst_95 [0] : vector<128x128xf32> to vector<128xf32>
    %106 = vector.shape_cast %105 : vector<128xf32> to vector<1x128xf32>
    %107 = arith.addf %32, %106 : vector<1x128xf32>
    %cst_96 = arith.constant 0.000000e+00 : f32
    %108 = vector.broadcast %cst_96 : f32 to vector<128x128xf32>
    %c0_97 = arith.constant 0 : index
    %c8_98 = arith.constant 8 : index
    %c0_99 = arith.constant 0 : index
    %c0_100 = arith.constant 0 : index
    %109 = vector.load %arg8[%c0_97, %c8_98, %c0_99, %c0_100] : memref<3x18x16x128xbf16, #tpu.memory_space<vmem>>, vector<1x8x16x128xbf16>
    %110 = vector.shape_cast %109 : vector<1x8x16x128xbf16> to vector<8x16x128xbf16>
    %111 = vector.shape_cast %110 : vector<8x16x128xbf16> to vector<128x128xbf16>
    %c0_101 = arith.constant 0 : index
    %c0_102 = arith.constant 0 : index
    %c0_103 = arith.constant 0 : index
    %112 = vector.load %arg4[%c0_101, %c0_102, %c0_103] : memref<9x128x128xbf16, #tpu.memory_space<vmem>>, vector<1x128x128xbf16>
    %113 = vector.shape_cast %112 : vector<1x128x128xbf16> to vector<128x128xbf16>
    %cst_104 = arith.constant dense<0.000000e+00> : vector<128x128xf32>
    %114 = tpu.matmul %111, %113, %cst_104 {dimension_numbers = #tpu.dot_dimension_numbers<[1], [0], [0], [1], [0, 0, 1, 1], [], []>} : vector<128x128xbf16>, vector<128x128xbf16>, vector<128x128xf32> -> vector<128x128xf32>
    %115 = arith.addf %108, %114 : vector<128x128xf32>
    %c1_105 = arith.constant 1 : index
    %c8_106 = arith.constant 8 : index
    %c0_107 = arith.constant 0 : index
    %c0_108 = arith.constant 0 : index
    %116 = vector.load %arg8[%c1_105, %c8_106, %c0_107, %c0_108] : memref<3x18x16x128xbf16, #tpu.memory_space<vmem>>, vector<1x8x16x128xbf16>
    %117 = vector.shape_cast %116 : vector<1x8x16x128xbf16> to vector<8x16x128xbf16>
    %118 = vector.shape_cast %117 : vector<8x16x128xbf16> to vector<128x128xbf16>
    %c1_109 = arith.constant 1 : index
    %c0_110 = arith.constant 0 : index
    %c0_111 = arith.constant 0 : index
    %119 = vector.load %arg4[%c1_109, %c0_110, %c0_111] : memref<9x128x128xbf16, #tpu.memory_space<vmem>>, vector<1x128x128xbf16>
    %120 = vector.shape_cast %119 : vector<1x128x128xbf16> to vector<128x128xbf16>
    %cst_112 = arith.constant dense<0.000000e+00> : vector<128x128xf32>
    %121 = tpu.matmul %118, %120, %cst_112 {dimension_numbers = #tpu.dot_dimension_numbers<[1], [0], [0], [1], [0, 0, 1, 1], [], []>} : vector<128x128xbf16>, vector<128x128xbf16>, vector<128x128xf32> -> vector<128x128xf32>
    %122 = arith.addf %115, %121 : vector<128x128xf32>
    %c2_113 = arith.constant 2 : index
    %c8_114 = arith.constant 8 : index
    %c0_115 = arith.constant 0 : index
    %c0_116 = arith.constant 0 : index
    %123 = vector.load %arg8[%c2_113, %c8_114, %c0_115, %c0_116] : memref<3x18x16x128xbf16, #tpu.memory_space<vmem>>, vector<1x8x16x128xbf16>
    %124 = vector.shape_cast %123 : vector<1x8x16x128xbf16> to vector<8x16x128xbf16>
    %125 = vector.shape_cast %124 : vector<8x16x128xbf16> to vector<128x128xbf16>
    %c2_117 = arith.constant 2 : index
    %c0_118 = arith.constant 0 : index
    %c0_119 = arith.constant 0 : index
    %126 = vector.load %arg4[%c2_117, %c0_118, %c0_119] : memref<9x128x128xbf16, #tpu.memory_space<vmem>>, vector<1x128x128xbf16>
    %127 = vector.shape_cast %126 : vector<1x128x128xbf16> to vector<128x128xbf16>
    %cst_120 = arith.constant dense<0.000000e+00> : vector<128x128xf32>
    %128 = tpu.matmul %125, %127, %cst_120 {dimension_numbers = #tpu.dot_dimension_numbers<[1], [0], [0], [1], [0, 0, 1, 1], [], []>} : vector<128x128xbf16>, vector<128x128xbf16>, vector<128x128xf32> -> vector<128x128xf32>
    %129 = arith.addf %122, %128 : vector<128x128xf32>
    %c0_121 = arith.constant 0 : index
    %c9 = arith.constant 9 : index
    %c0_122 = arith.constant 0 : index
    %c0_123 = arith.constant 0 : index
    %130 = vector.load %arg8[%c0_121, %c9, %c0_122, %c0_123] : memref<3x18x16x128xbf16, #tpu.memory_space<vmem>>, vector<1x8x16x128xbf16>
    %131 = vector.shape_cast %130 : vector<1x8x16x128xbf16> to vector<8x16x128xbf16>
    %132 = vector.shape_cast %131 : vector<8x16x128xbf16> to vector<128x128xbf16>
    %c3_124 = arith.constant 3 : index
    %c0_125 = arith.constant 0 : index
    %c0_126 = arith.constant 0 : index
    %133 = vector.load %arg4[%c3_124, %c0_125, %c0_126] : memref<9x128x128xbf16, #tpu.memory_space<vmem>>, vector<1x128x128xbf16>
    %134 = vector.shape_cast %133 : vector<1x128x128xbf16> to vector<128x128xbf16>
    %cst_127 = arith.constant dense<0.000000e+00> : vector<128x128xf32>
    %135 = tpu.matmul %132, %134, %cst_127 {dimension_numbers = #tpu.dot_dimension_numbers<[1], [0], [0], [1], [0, 0, 1, 1], [], []>} : vector<128x128xbf16>, vector<128x128xbf16>, vector<128x128xf32> -> vector<128x128xf32>
    %136 = arith.addf %129, %135 : vector<128x128xf32>
    %c1_128 = arith.constant 1 : index
    %c9_129 = arith.constant 9 : index
    %c0_130 = arith.constant 0 : index
    %c0_131 = arith.constant 0 : index
    %137 = vector.load %arg8[%c1_128, %c9_129, %c0_130, %c0_131] : memref<3x18x16x128xbf16, #tpu.memory_space<vmem>>, vector<1x8x16x128xbf16>
    %138 = vector.shape_cast %137 : vector<1x8x16x128xbf16> to vector<8x16x128xbf16>
    %139 = vector.shape_cast %138 : vector<8x16x128xbf16> to vector<128x128xbf16>
    %c4_132 = arith.constant 4 : index
    %c0_133 = arith.constant 0 : index
    %c0_134 = arith.constant 0 : index
    %140 = vector.load %arg4[%c4_132, %c0_133, %c0_134] : memref<9x128x128xbf16, #tpu.memory_space<vmem>>, vector<1x128x128xbf16>
    %141 = vector.shape_cast %140 : vector<1x128x128xbf16> to vector<128x128xbf16>
    %cst_135 = arith.constant dense<0.000000e+00> : vector<128x128xf32>
    %142 = tpu.matmul %139, %141, %cst_135 {dimension_numbers = #tpu.dot_dimension_numbers<[1], [0], [0], [1], [0, 0, 1, 1], [], []>} : vector<128x128xbf16>, vector<128x128xbf16>, vector<128x128xf32> -> vector<128x128xf32>
    %143 = arith.addf %136, %142 : vector<128x128xf32>
    %c2_136 = arith.constant 2 : index
    %c9_137 = arith.constant 9 : index
    %c0_138 = arith.constant 0 : index
    %c0_139 = arith.constant 0 : index
    %144 = vector.load %arg8[%c2_136, %c9_137, %c0_138, %c0_139] : memref<3x18x16x128xbf16, #tpu.memory_space<vmem>>, vector<1x8x16x128xbf16>
    %145 = vector.shape_cast %144 : vector<1x8x16x128xbf16> to vector<8x16x128xbf16>
    %146 = vector.shape_cast %145 : vector<8x16x128xbf16> to vector<128x128xbf16>
    %c5_140 = arith.constant 5 : index
    %c0_141 = arith.constant 0 : index
    %c0_142 = arith.constant 0 : index
    %147 = vector.load %arg4[%c5_140, %c0_141, %c0_142] : memref<9x128x128xbf16, #tpu.memory_space<vmem>>, vector<1x128x128xbf16>
    %148 = vector.shape_cast %147 : vector<1x128x128xbf16> to vector<128x128xbf16>
    %cst_143 = arith.constant dense<0.000000e+00> : vector<128x128xf32>
    %149 = tpu.matmul %146, %148, %cst_143 {dimension_numbers = #tpu.dot_dimension_numbers<[1], [0], [0], [1], [0, 0, 1, 1], [], []>} : vector<128x128xbf16>, vector<128x128xbf16>, vector<128x128xf32> -> vector<128x128xf32>
    %150 = arith.addf %143, %149 : vector<128x128xf32>
    %c0_144 = arith.constant 0 : index
    %c10 = arith.constant 10 : index
    %c0_145 = arith.constant 0 : index
    %c0_146 = arith.constant 0 : index
    %151 = vector.load %arg8[%c0_144, %c10, %c0_145, %c0_146] : memref<3x18x16x128xbf16, #tpu.memory_space<vmem>>, vector<1x8x16x128xbf16>
    %152 = vector.shape_cast %151 : vector<1x8x16x128xbf16> to vector<8x16x128xbf16>
    %153 = vector.shape_cast %152 : vector<8x16x128xbf16> to vector<128x128xbf16>
    %c6_147 = arith.constant 6 : index
    %c0_148 = arith.constant 0 : index
    %c0_149 = arith.constant 0 : index
    %154 = vector.load %arg4[%c6_147, %c0_148, %c0_149] : memref<9x128x128xbf16, #tpu.memory_space<vmem>>, vector<1x128x128xbf16>
    %155 = vector.shape_cast %154 : vector<1x128x128xbf16> to vector<128x128xbf16>
    %cst_150 = arith.constant dense<0.000000e+00> : vector<128x128xf32>
    %156 = tpu.matmul %153, %155, %cst_150 {dimension_numbers = #tpu.dot_dimension_numbers<[1], [0], [0], [1], [0, 0, 1, 1], [], []>} : vector<128x128xbf16>, vector<128x128xbf16>, vector<128x128xf32> -> vector<128x128xf32>
    %157 = arith.addf %150, %156 : vector<128x128xf32>
    %c1_151 = arith.constant 1 : index
    %c10_152 = arith.constant 10 : index
    %c0_153 = arith.constant 0 : index
    %c0_154 = arith.constant 0 : index
    %158 = vector.load %arg8[%c1_151, %c10_152, %c0_153, %c0_154] : memref<3x18x16x128xbf16, #tpu.memory_space<vmem>>, vector<1x8x16x128xbf16>
    %159 = vector.shape_cast %158 : vector<1x8x16x128xbf16> to vector<8x16x128xbf16>
    %160 = vector.shape_cast %159 : vector<8x16x128xbf16> to vector<128x128xbf16>
    %c7_155 = arith.constant 7 : index
    %c0_156 = arith.constant 0 : index
    %c0_157 = arith.constant 0 : index
    %161 = vector.load %arg4[%c7_155, %c0_156, %c0_157] : memref<9x128x128xbf16, #tpu.memory_space<vmem>>, vector<1x128x128xbf16>
    %162 = vector.shape_cast %161 : vector<1x128x128xbf16> to vector<128x128xbf16>
    %cst_158 = arith.constant dense<0.000000e+00> : vector<128x128xf32>
    %163 = tpu.matmul %160, %162, %cst_158 {dimension_numbers = #tpu.dot_dimension_numbers<[1], [0], [0], [1], [0, 0, 1, 1], [], []>} : vector<128x128xbf16>, vector<128x128xbf16>, vector<128x128xf32> -> vector<128x128xf32>
    %164 = arith.addf %157, %163 : vector<128x128xf32>
    %c2_159 = arith.constant 2 : index
    %c10_160 = arith.constant 10 : index
    %c0_161 = arith.constant 0 : index
    %c0_162 = arith.constant 0 : index
    %165 = vector.load %arg8[%c2_159, %c10_160, %c0_161, %c0_162] : memref<3x18x16x128xbf16, #tpu.memory_space<vmem>>, vector<1x8x16x128xbf16>
    %166 = vector.shape_cast %165 : vector<1x8x16x128xbf16> to vector<8x16x128xbf16>
    %167 = vector.shape_cast %166 : vector<8x16x128xbf16> to vector<128x128xbf16>
    %c8_163 = arith.constant 8 : index
    %c0_164 = arith.constant 0 : index
    %c0_165 = arith.constant 0 : index
    %168 = vector.load %arg4[%c8_163, %c0_164, %c0_165] : memref<9x128x128xbf16, #tpu.memory_space<vmem>>, vector<1x128x128xbf16>
    %169 = vector.shape_cast %168 : vector<1x128x128xbf16> to vector<128x128xbf16>
    %cst_166 = arith.constant dense<0.000000e+00> : vector<128x128xf32>
    %170 = tpu.matmul %167, %169, %cst_166 {dimension_numbers = #tpu.dot_dimension_numbers<[1], [0], [0], [1], [0, 0, 1, 1], [], []>} : vector<128x128xbf16>, vector<128x128xbf16>, vector<128x128xf32> -> vector<128x128xf32>
    %171 = arith.addf %164, %170 : vector<128x128xf32>
    %172 = vector.shape_cast %171 : vector<128x128xf32> to vector<8x16x128xf32>
    %c0_167 = arith.constant 0 : index
    %c8_168 = arith.constant 8 : index
    %c0_169 = arith.constant 0 : index
    %c0_170 = arith.constant 0 : index
    %173 = vector.load %arg5[%c0_167, %c8_168, %c0_169, %c0_170] : memref<1x16x16x128xf32, #tpu.memory_space<vmem>>, vector<1x8x16x128xf32>
    %174 = vector.shape_cast %173 : vector<1x8x16x128xf32> to vector<8x16x128xf32>
    %175 = vector.shape_cast %172 : vector<8x16x128xf32> to vector<1x8x16x128xf32>
    tpu.vector_store %arg5[%c0_167, %c8_168, %c0_169, %c0_170], %175 {strides = array<i32>} : memref<1x16x16x128xf32, #tpu.memory_space<vmem>>, vector<1x8x16x128xf32>,
    %cst_171 = arith.constant dense<0.000000e+00> : vector<128xf32>
    %176 = vector.multi_reduction <add>, %171, %cst_171 [0] : vector<128x128xf32> to vector<128xf32>
    %177 = vector.shape_cast %176 : vector<128xf32> to vector<1x128xf32>
    %178 = arith.addf %103, %177 : vector<1x128xf32>
    %179 = arith.mulf %171, %171 : vector<128x128xf32>
    %cst_172 = arith.constant dense<0.000000e+00> : vector<128xf32>
    %180 = vector.multi_reduction <add>, %179, %cst_172 [0] : vector<128x128xf32> to vector<128xf32>
    %181 = vector.shape_cast %180 : vector<128xf32> to vector<1x128xf32>
    %182 = arith.addf %107, %181 : vector<1x128xf32>
    %183 = vector.shape_cast %178 : vector<1x128xf32> to vector<1x1x128xf32>
    %c0_173 = arith.constant 0 : index
    %c0_174 = arith.constant 0 : index
    %c0_175 = arith.constant 0 : index
    %184 = vector.load %arg6[%c0_173, %c0_174, %c0_175] : memref<1x1x128xf32, #tpu.memory_space<vmem>>, vector<1x1x128xf32>
    tpu.vector_store %arg6[%c0_173, %c0_174, %c0_175], %183 {strides = array<i32>} : memref<1x1x128xf32, #tpu.memory_space<vmem>>, vector<1x1x128xf32>,
    %185 = vector.shape_cast %182 : vector<1x128xf32> to vector<1x1x128xf32>
    %c0_176 = arith.constant 0 : index
    %c0_177 = arith.constant 0 : index
    %c0_178 = arith.constant 0 : index
    %186 = vector.load %arg7[%c0_176, %c0_177, %c0_178] : memref<1x1x128xf32, #tpu.memory_space<vmem>>, vector<1x1x128xf32>
    tpu.vector_store %arg7[%c0_176, %c0_177, %c0_178], %185 {strides = array<i32>} : memref<1x1x128xf32, #tpu.memory_space<vmem>>, vector<1x1x128xf32>,
    return
  }
  func.func @transform_0(%arg0: i32) -> (i32, i32, i32, i32) {
    %c0_i32 = arith.constant 0 : i32
    %c0_i32_0 = arith.constant 0 : i32
    %c0_i32_1 = arith.constant 0 : i32
    %c0_i32_2 = arith.constant 0 : i32
    return %arg0, %c0_i32, %c0_i32_0, %c0_i32_1 : i32, i32, i32, i32
  }
  func.func @transform_1(%arg0: i32) -> (i32, i32, i32) {
    %c0_i32 = arith.constant 0 : i32
    %c0_i32_0 = arith.constant 0 : i32
    %c0_i32_1 = arith.constant 0 : i32
    %c0_i32_2 = arith.constant 0 : i32
    return %c0_i32, %c0_i32_0, %c0_i32_1 : i32, i32, i32
  }
  func.func @transform_2(%arg0: i32) -> (i32, i32, i32) {
    %c0_i32 = arith.constant 0 : i32
    %c0_i32_0 = arith.constant 0 : i32
    %c0_i32_1 = arith.constant 0 : i32
    %c0_i32_2 = arith.constant 0 : i32
    return %c0_i32, %c0_i32_0, %c0_i32_1 : i32, i32, i32
  }
  func.func @transform_3(%arg0: i32) -> (i32, i32, i32) {
    %c0_i32 = arith.constant 0 : i32
    %c0_i32_0 = arith.constant 0 : i32
    %c0_i32_1 = arith.constant 0 : i32
    %c0_i32_2 = arith.constant 0 : i32
    return %c0_i32, %c0_i32_0, %c0_i32_1 : i32, i32, i32
  }
  func.func @transform_4(%arg0: i32) -> (i32, i32, i32, i32) {
    %c0_i32 = arith.constant 0 : i32
    %c0_i32_0 = arith.constant 0 : i32
    %c0_i32_1 = arith.constant 0 : i32
    %c0_i32_2 = arith.constant 0 : i32
    return %arg0, %c0_i32, %c0_i32_0, %c0_i32_1 : i32, i32, i32, i32
  }
  func.func @transform_5(%arg0: i32) -> (i32, i32, i32) {
    %c0_i32 = arith.constant 0 : i32
    %c0_i32_0 = arith.constant 0 : i32
    %c0_i32_1 = arith.constant 0 : i32
    return %arg0, %c0_i32, %c0_i32_0 : i32, i32, i32
  }
  func.func @transform_6(%arg0: i32) -> (i32, i32, i32) {
    %c0_i32 = arith.constant 0 : i32
    %c0_i32_0 = arith.constant 0 : i32
    %c0_i32_1 = arith.constant 0 : i32
    return %arg0, %c0_i32, %c0_i32_0 : i32, i32, i32
  }
}

module attributes {stable_mosaic.version = 11 : i64} {
  func.func @_bn_relu_kernel(%arg0: i32, %arg1: memref<512x128xf32, #tpu.memory_space<vmem>>, %arg2: memref<1x128xf32, #tpu.memory_space<vmem>>, %arg3: memref<1x128xf32, #tpu.memory_space<vmem>>, %arg4: memref<512x128xf32, #tpu.memory_space<vmem>>) attributes {dimension_semantics = [#tpu.dimension_semantics<parallel>], iteration_bounds = array<i64: 1>, scalar_prefetch = 0 : i64, scratch_operands = 0 : i64, tpu.core_type = #tpu.core_type<tc>, window_params = [{transform_indices = @transform_0, window_bounds = array<i64: 512, 128>}, {pipeline_mode = #tpu.pipeline_mode<synchronous>, transform_indices = @transform_1, window_bounds = array<i64: 1, 128>}, {pipeline_mode = #tpu.pipeline_mode<synchronous>, transform_indices = @transform_2, window_bounds = array<i64: 1, 128>}, {transform_indices = @transform_3, window_bounds = array<i64: 512, 128>}]} {
    %c0 = arith.constant 0 : index
    %c0_0 = arith.constant 0 : index
    %0 = vector.load %arg1[%c0, %c0_0] : memref<512x128xf32, #tpu.memory_space<vmem>>, vector<512x128xf32>
    %c0_1 = arith.constant 0 : index
    %c0_2 = arith.constant 0 : index
    %1 = vector.load %arg2[%c0_1, %c0_2] : memref<1x128xf32, #tpu.memory_space<vmem>>, vector<1x128xf32>
    %2 = vector.broadcast %1 : vector<1x128xf32> to vector<512x128xf32>
    %3 = arith.mulf %0, %2 : vector<512x128xf32>
    %c0_3 = arith.constant 0 : index
    %c0_4 = arith.constant 0 : index
    %4 = vector.load %arg3[%c0_3, %c0_4] : memref<1x128xf32, #tpu.memory_space<vmem>>, vector<1x128xf32>
    %5 = vector.broadcast %4 : vector<1x128xf32> to vector<512x128xf32>
    %6 = arith.addf %3, %5 : vector<512x128xf32>
    %cst = arith.constant 0.000000e+00 : f32
    %7 = vector.broadcast %cst : f32 to vector<512x128xf32>
    %8 = arith.maximumf %6, %7 : vector<512x128xf32>
    %c0_5 = arith.constant 0 : index
    %c0_6 = arith.constant 0 : index
    %9 = vector.load %arg4[%c0_5, %c0_6] : memref<512x128xf32, #tpu.memory_space<vmem>>, vector<512x128xf32>
    tpu.vector_store %arg4[%c0_5, %c0_6], %8 {strides = array<i32>} : memref<512x128xf32, #tpu.memory_space<vmem>>, vector<512x128xf32>,
    return
  }
  func.func @transform_0(%arg0: i32) -> (i32, i32) {
    %c0_i32 = arith.constant 0 : i32
    %c0_i32_0 = arith.constant 0 : i32
    return %arg0, %c0_i32 : i32, i32
  }
  func.func @transform_1(%arg0: i32) -> (i32, i32) {
    %c0_i32 = arith.constant 0 : i32
    %c0_i32_0 = arith.constant 0 : i32
    %c0_i32_1 = arith.constant 0 : i32
    return %c0_i32, %c0_i32_0 : i32, i32
  }
  func.func @transform_2(%arg0: i32) -> (i32, i32) {
    %c0_i32 = arith.constant 0 : i32
    %c0_i32_0 = arith.constant 0 : i32
    %c0_i32_1 = arith.constant 0 : i32
    return %c0_i32, %c0_i32_0 : i32, i32
  }
  func.func @transform_3(%arg0: i32) -> (i32, i32) {
    %c0_i32 = arith.constant 0 : i32
    %c0_i32_0 = arith.constant 0 : i32
    return %arg0, %c0_i32 : i32, i32
  }
}

</mosaic_0001>

<bundles_post_ra>
// kernel: conv_block.5
= control target key start
LH: loop header
LB: loop body
LE: loop exit
PB: predicated region body
PF: predicated region fallthrough
CT: control target
= control target key end

     0   :  { %s896_s0 = inlined_call_operand.vmem [shape: f32[512,128], index: 0, kind: input, shape index: {}]   ;;  %s897_s1 = inlined_call_operand.vmem [shape: f32[1,128], index: 1, kind: input, shape index: {}]   ;;  %s898_s2 = inlined_call_operand.vmem [shape: f32[1,128], index: 2, kind: input, shape index: {}]   ;;  %s899_s3 = inlined_call_operand.vmem [shape: f32[512,128], index: 3, kind: output, shape index: {}]  }
   0x1   :  { %v14_v0 = vld [vmem:[%s896_s0] sm:$0xff]  ;;  %v15_v4 = vld [vmem:[%s896_s0 + $0x8] sm:$0xff]  ;;  %v16_v5 = vld [vmem:[%s896_s0 + $0x10] sm:$0xff] }
   0x2   :  { %v380_v1 = vld [vmem:[%s897_s1] ss:$0 sm:$0xff]  ;;  %v17_v6 = vld [vmem:[%s896_s0 + $0x18] sm:$0xff]  ;;  %v19_v11 = vld [vmem:[%s896_s0 + $0x28] sm:$0xff] }
   0x3   :  { %v385_v2 = vld [vmem:[%s898_s2] ss:$0 sm:$0xff]  ;;  %v85_v3 = vmul.f32 %v380_v1, %v14_v0  ;;  %v86_v7 = vmul.f32 %v380_v1, %v15_v4  ;;  %v87_v8 = vmul.f32 %v380_v1, %v16_v5  ;;  %v88_v9 = vmul.f32 %v380_v1, %v17_v6  ;;  %v20_v12 = vld [vmem:[%s896_s0 + $0x30] sm:$0xff]  ;;  %v21_v17 = vld [vmem:[%s896_s0 + $0x38] sm:$0xff] }
   0x4   :  { %v18_v10 = vld [vmem:[%s896_s0 + $0x20] sm:$0xff]  ;;  %v90_v15 = vmul.f32 %v380_v1, %v19_v11  ;;  %v91_v16 = vmul.f32 %v380_v1, %v20_v12  ;;  %v92_v21 = vmul.f32 %v380_v1, %v21_v17  ;;  %v23_v27 = vld [vmem:[%s896_s0 + $0x48] sm:$0xff]  ;;  %v24_v28 = vld [vmem:[%s896_s0 + $0x50] sm:$0xff] }
   0x5   :  { %v156_v13 = vadd.f32 %v385_v2, %v85_v3  ;;  %v89_v14 = vmul.f32 %v380_v1, %v18_v10  ;;  %v157_v18 = vadd.f32 %v385_v2, %v86_v7  ;;  %v158_v19 = vadd.f32 %v385_v2, %v87_v8  ;;  %v22_v22 = vld [vmem:[%s896_s0 + $0x40] sm:$0xff]  ;;  %v25_v29 = vld [vmem:[%s896_s0 + $0x58] sm:$0xff]  ;;  %v27_v35 = vld [vmem:[%s896_s0 + $0x68] sm:$0xff] }
   0x6   :  { %v159_v20 = vadd.f32 %v385_v2, %v88_v9  ;;  %v161_v25 = vadd.f32 %v385_v2, %v90_v15  ;;  %v162_v26 = vadd.f32 %v385_v2, %v91_v16  ;;  %v163_v33 = vadd.f32 %v385_v2, %v92_v21  ;;  %v26_v34 = vld [vmem:[%s896_s0 + $0x60] sm:$0xff]  ;;  %v28_v36 = vld [vmem:[%s896_s0 + $0x70] sm:$0xff]  ;;  %v29_v41 = vld [vmem:[%s896_s0 + $0x78] sm:$0xff] }
   0x7   :  { %v220_v23 = vmax.f32 %v156_v13, 0.0  ;;  %v160_v24 = vadd.f32 %v385_v2, %v89_v14  ;;  %v221_v30 = vmax.f32 %v157_v18, 0.0  ;;  %v222_v31 = vmax.f32 %v158_v19, 0.0  ;;  %v30_v54 = vld [vmem:[%s896_s0 + $0x80] sm:$0xff]  ;;  %v31_v59 = vld [vmem:[%s896_s0 + $0x88] sm:$0xff]  ;;  %v32_v60 = vld [vmem:[%s896_s0 + $0x90] sm:$0xff] }
   0x8   :  { %v223_v32 = vmax.f32 %v159_v20, 0.0  ;;  %v225_v38 = vmax.f32 %v161_v25, 0.0  ;;  %v226_v39 = vmax.f32 %v162_v26, 0.0  ;;  %v93_v40 = vmul.f32 %v380_v1, %v22_v22  ;;  %v33_v61 = vld [vmem:[%s896_s0 + $0x98] sm:$0xff]  ;;  %v34_v4 = vld [vmem:[%s896_s0 + $0xa0] sm:$0xff]  ;;  %v35_v5 = vld [vmem:[%s896_s0 + $0xa8] sm:$0xff] }
   0x9   :  { %284 = vst [vmem:[%s899_s3] sm:$0xff] %v220_v23  ;;  %v224_v37 = vmax.f32 %v160_v24, 0.0  ;;  %285 = vst [vmem:[%s899_s3 + $0x8] sm:$0xff] %v221_v30  ;;  %v227_v42 = vmax.f32 %v163_v33, 0.0  ;;  %v94_v43 = vmul.f32 %v380_v1, %v23_v27  ;;  %v95_v44 = vmul.f32 %v380_v1, %v24_v28  ;;  %v36_v6 = vld [vmem:[%s896_s0 + $0xb0] sm:$0xff]  ;;  %v37_v11 = vld [vmem:[%s896_s0 + $0xb8] sm:$0xff] }
   0xa   :  { %286 = vst [vmem:[%s899_s3 + $0x10] sm:$0xff] %v222_v31  ;;  %287 = vst [vmem:[%s899_s3 + $0x18] sm:$0xff] %v223_v32  ;;  %v96_v45 = vmul.f32 %v380_v1, %v25_v29  ;;  %v164_v46 = vadd.f32 %v385_v2, %v93_v40  ;;  %v97_v47 = vmul.f32 %v380_v1, %v26_v34  ;;  %v38_v24 = vld [vmem:[%s896_s0 + $0xc0] sm:$0xff]  ;;  %v39_v29 = vld [vmem:[%s896_s0 + $0xc8] sm:$0xff] }
   0xb   :  { %288 = vst [vmem:[%s899_s3 + $0x20] sm:$0xff] %v224_v37  ;;  %289 = vst [vmem:[%s899_s3 + $0x28] sm:$0xff] %v225_v38  ;;  %v98_v48 = vmul.f32 %v380_v1, %v27_v35  ;;  %v99_v49 = vmul.f32 %v380_v1, %v28_v36  ;;  %v165_v50 = vadd.f32 %v385_v2, %v94_v43  ;;  %v40_v30 = vld [vmem:[%s896_s0 + $0xd0] sm:$0xff]  ;;  %v41_v31 = vld [vmem:[%s896_s0 + $0xd8] sm:$0xff] }
   0xc   :  { %290 = vst [vmem:[%s899_s3 + $0x30] sm:$0xff] %v226_v39  ;;  %291 = vst [vmem:[%s899_s3 + $0x38] sm:$0xff] %v227_v42  ;;  %v166_v51 = vadd.f32 %v385_v2, %v95_v44  ;;  %v167_v52 = vadd.f32 %v385_v2, %v96_v45  ;;  %v100_v53 = vmul.f32 %v380_v1, %v29_v41  ;;  %v228_v55 = vmax.f32 %v164_v46, 0.0  ;;  %v42_v36 = vld [vmem:[%s896_s0 + $0xe0] sm:$0xff]  ;;  %v43_v37 = vld [vmem:[%s896_s0 + $0xe8] sm:$0xff] }
   0xd   :  { %v168_v56 = vadd.f32 %v385_v2, %v97_v47  ;;  %v169_v57 = vadd.f32 %v385_v2, %v98_v48  ;;  %v170_v58 = vadd.f32 %v385_v2, %v99_v49  ;;  %v229_v62 = vmax.f32 %v165_v50, 0.0  ;;  %v44_v38 = vld [vmem:[%s896_s0 + $0xf0] sm:$0xff]  ;;  %v45_v43 = vld [vmem:[%s896_s0 + $0xf8] sm:$0xff] }
   0xe   :  { %v230_v63 = vmax.f32 %v166_v51, 0.0  ;;  %v231_v0 = vmax.f32 %v167_v52, 0.0  ;;  %v171_v3 = vadd.f32 %v385_v2, %v100_v53  ;;  %292 = vst [vmem:[%s899_s3 + $0x40] sm:$0xff] %v228_v55  ;;  %v101_v10 = vmul.f32 %v380_v1, %v30_v54 }
   0xf   :  { %v232_v7 = vmax.f32 %v168_v56, 0.0  ;;  %v233_v8 = vmax.f32 %v169_v57, 0.0  ;;  %v234_v9 = vmax.f32 %v170_v58, 0.0  ;;  %293 = vst [vmem:[%s899_s3 + $0x48] sm:$0xff] %v229_v62  ;;  %v102_v13 = vmul.f32 %v380_v1, %v31_v59  ;;  %v46_v56 = vld [vmem:[%s896_s0 + $0x100] sm:$0xff]  ;;  %v48_v62 = vld [vmem:[%s896_s0 + $0x110] sm:$0xff] }
  0x10   :  { %294 = vst [vmem:[%s899_s3 + $0x50] sm:$0xff] %v230_v63  ;;  %295 = vst [vmem:[%s899_s3 + $0x58] sm:$0xff] %v231_v0  ;;  %v235_v12 = vmax.f32 %v171_v3, 0.0  ;;  %v103_v14 = vmul.f32 %v380_v1, %v32_v60  ;;  %v104_v15 = vmul.f32 %v380_v1, %v33_v61  ;;  %v172_v16 = vadd.f32 %v385_v2, %v101_v10  ;;  %v47_v61 = vld [vmem:[%s896_s0 + $0x108] sm:$0xff]  ;;  %v49_v63 = vld [vmem:[%s896_s0 + $0x118] sm:$0xff] }
  0x11   :  { %296 = vst [vmem:[%s899_s3 + $0x60] sm:$0xff] %v232_v7  ;;  %297 = vst [vmem:[%s899_s3 + $0x68] sm:$0xff] %v233_v8  ;;  %v105_v17 = vmul.f32 %v380_v1, %v34_v4  ;;  %v106_v18 = vmul.f32 %v380_v1, %v35_v5  ;;  %v107_v19 = vmul.f32 %v380_v1, %v36_v6  ;;  %v50_v6 = vld [vmem:[%s896_s0 + $0x120] sm:$0xff]  ;;  %v51_v7 = vld [vmem:[%s896_s0 + $0x128] sm:$0xff] }
  0x12   :  { %298 = vst [vmem:[%s899_s3 + $0x70] sm:$0xff] %v234_v9  ;;  %299 = vst [vmem:[%s899_s3 + $0x78] sm:$0xff] %v235_v12  ;;  %v173_v20 = vadd.f32 %v385_v2, %v102_v13  ;;  %v174_v21 = vadd.f32 %v385_v2, %v103_v14  ;;  %v175_v22 = vadd.f32 %v385_v2, %v104_v15  ;;  %v236_v25 = vmax.f32 %v172_v16, 0.0  ;;  %v52_v8 = vld [vmem:[%s896_s0 + $0x130] sm:$0xff]  ;;  %v53_v13 = vld [vmem:[%s896_s0 + $0x138] sm:$0xff] }
  0x13   :  { %v108_v23 = vmul.f32 %v380_v1, %v37_v11  ;;  %v176_v26 = vadd.f32 %v385_v2, %v105_v17  ;;  %v177_v27 = vadd.f32 %v385_v2, %v106_v18  ;;  %v178_v28 = vadd.f32 %v385_v2, %v107_v19 }
  0x14   :  { %v237_v32 = vmax.f32 %v173_v20, 0.0  ;;  %v238_v33 = vmax.f32 %v174_v21, 0.0  ;;  %v239_v34 = vmax.f32 %v175_v22, 0.0  ;;  %300 = vst [vmem:[%s899_s3 + $0x80] sm:$0xff] %v236_v25  ;;  %v109_v42 = vmul.f32 %v380_v1, %v38_v24 }
  0x15   :  { %v179_v35 = vadd.f32 %v385_v2, %v108_v23  ;;  %v240_v39 = vmax.f32 %v176_v26, 0.0  ;;  %v241_v40 = vmax.f32 %v177_v27, 0.0  ;;  %v242_v41 = vmax.f32 %v178_v28, 0.0  ;;  %v54_v26 = vld [vmem:[%s896_s0 + $0x140] sm:$0xff] }
  0x16   :  { %301 = vst [vmem:[%s899_s3 + $0x88] sm:$0xff] %v237_v32  ;;  %302 = vst [vmem:[%s899_s3 + $0x90] sm:$0xff] %v238_v33  ;;  %v110_v45 = vmul.f32 %v380_v1, %v39_v29  ;;  %v111_v46 = vmul.f32 %v380_v1, %v40_v30  ;;  %v112_v47 = vmul.f32 %v380_v1, %v41_v31  ;;  %v55_v31 = vld [vmem:[%s896_s0 + $0x148] sm:$0xff]  ;;  %v56_v32 = vld [vmem:[%s896_s0 + $0x150] sm:$0xff] }
  0x17   :  { %303 = vst [vmem:[%s899_s3 + $0x98] sm:$0xff] %v239_v34  ;;  %v243_v44 = vmax.f32 %v179_v35, 0.0  ;;  %304 = vst [vmem:[%s899_s3 + $0xa0] sm:$0xff] %v240_v39  ;;  %v180_v48 = vadd.f32 %v385_v2, %v109_v42  ;;  %v113_v49 = vmul.f32 %v380_v1, %v42_v36  ;;  %v114_v50 = vmul.f32 %v380_v1, %v43_v37  ;;  %v57_v33 = vld [vmem:[%s896_s0 + $0x158] sm:$0xff]  ;;  %v59_v39 = vld [vmem:[%s896_s0 + $0x168] sm:$0xff] }
  0x18   :  { %305 = vst [vmem:[%s899_s3 + $0xa8] sm:$0xff] %v241_v40  ;;  %306 = vst [vmem:[%s899_s3 + $0xb0] sm:$0xff] %v242_v41  ;;  %v115_v51 = vmul.f32 %v380_v1, %v44_v38  ;;  %v181_v52 = vadd.f32 %v385_v2, %v110_v45  ;;  %v182_v53 = vadd.f32 %v385_v2, %v111_v46  ;;  %v58_v38 = vld [vmem:[%s896_s0 + $0x160] sm:$0xff]  ;;  %v60_v40 = vld [vmem:[%s896_s0 + $0x170] sm:$0xff] }
  0x19   :  { %307 = vst [vmem:[%s899_s3 + $0xb8] sm:$0xff] %v243_v44  ;;  %v183_v54 = vadd.f32 %v385_v2, %v112_v47  ;;  %v116_v55 = vmul.f32 %v380_v1, %v45_v43  ;;  %v244_v57 = vmax.f32 %v180_v48, 0.0  ;;  %v184_v58 = vadd.f32 %v385_v2, %v113_v49  ;;  %v61_v45 = vld [vmem:[%s896_s0 + $0x178] sm:$0xff] }
  0x1a   :  { %v185_v59 = vadd.f32 %v385_v2, %v114_v50  ;;  %v186_v60 = vadd.f32 %v385_v2, %v115_v51  ;;  %v245_v0 = vmax.f32 %v181_v52, 0.0  ;;  %v246_v3 = vmax.f32 %v182_v53, 0.0 }
  0x1b   :  { %v247_v4 = vmax.f32 %v183_v54, 0.0  ;;  %v187_v5 = vadd.f32 %v385_v2, %v116_v55  ;;  %308 = vst [vmem:[%s899_s3 + $0xc0] sm:$0xff] %v244_v57  ;;  %v248_v9 = vmax.f32 %v184_v58, 0.0  ;;  %v117_v12 = vmul.f32 %v380_v1, %v46_v56  ;;  %v62_v58 = vld [vmem:[%s896_s0 + $0x180] sm:$0xff] }
  0x1c   :  { %v249_v10 = vmax.f32 %v185_v59, 0.0  ;;  %v250_v11 = vmax.f32 %v186_v60, 0.0  ;;  %309 = vst [vmem:[%s899_s3 + $0xc8] sm:$0xff] %v245_v0  ;;  %310 = vst [vmem:[%s899_s3 + $0xd0] sm:$0xff] %v246_v3  ;;  %v118_v15 = vmul.f32 %v380_v1, %v47_v61  ;;  %v119_v16 = vmul.f32 %v380_v1, %v48_v62  ;;  %v64_v0 = vld [vmem:[%s896_s0 + $0x190] sm:$0xff]  ;;  %v65_v3 = vld [vmem:[%s896_s0 + $0x198] sm:$0xff] }
  0x1d   :  { %311 = vst [vmem:[%s899_s3 + $0xd8] sm:$0xff] %v247_v4  ;;  %v251_v14 = vmax.f32 %v187_v5, 0.0  ;;  %v120_v17 = vmul.f32 %v380_v1, %v49_v63  ;;  %312 = vst [vmem:[%s899_s3 + $0xe0] sm:$0xff] %v248_v9  ;;  %v188_v18 = vadd.f32 %v385_v2, %v117_v12  ;;  %v121_v19 = vmul.f32 %v380_v1, %v50_v6  ;;  %v63_v63 = vld [vmem:[%s896_s0 + $0x188] sm:$0xff] }
  0x1e   :  { %313 = vst [vmem:[%s899_s3 + $0xe8] sm:$0xff] %v249_v10  ;;  %314 = vst [vmem:[%s899_s3 + $0xf0] sm:$0xff] %v250_v11  ;;  %v122_v20 = vmul.f32 %v380_v1, %v51_v7  ;;  %v123_v21 = vmul.f32 %v380_v1, %v52_v8  ;;  %v189_v22 = vadd.f32 %v385_v2, %v118_v15  ;;  %v66_v8 = vld [vmem:[%s896_s0 + $0x1a0] sm:$0xff]  ;;  %v67_v9 = vld [vmem:[%s896_s0 + $0x1a8] sm:$0xff] }
  0x1f   :  { %315 = vst [vmem:[%s899_s3 + $0xf8] sm:$0xff] %v251_v14  ;;  %v190_v23 = vadd.f32 %v385_v2, %v119_v16  ;;  %v191_v24 = vadd.f32 %v385_v2, %v120_v17  ;;  %v124_v25 = vmul.f32 %v380_v1, %v53_v13  ;;  %v252_v27 = vmax.f32 %v188_v18, 0.0  ;;  %v68_v10 = vld [vmem:[%s896_s0 + $0x1b0] sm:$0xff]  ;;  %v69_v15 = vld [vmem:[%s896_s0 + $0x1b8] sm:$0xff] }
  0x20   :  { %v192_v28 = vadd.f32 %v385_v2, %v121_v19  ;;  %v193_v29 = vadd.f32 %v385_v2, %v122_v20  ;;  %v194_v30 = vadd.f32 %v385_v2, %v123_v21  ;;  %v253_v34 = vmax.f32 %v189_v22, 0.0 }
  0x21   :  { %v254_v35 = vmax.f32 %v190_v23, 0.0  ;;  %v255_v36 = vmax.f32 %v191_v24, 0.0  ;;  %v195_v37 = vadd.f32 %v385_v2, %v124_v25  ;;  %316 = vst [vmem:[%s899_s3 + $0x100] sm:$0xff] %v252_v27  ;;  %v125_v44 = vmul.f32 %v380_v1, %v54_v26 }
  0x22   :  { %v256_v41 = vmax.f32 %v192_v28, 0.0  ;;  %v257_v42 = vmax.f32 %v193_v29, 0.0  ;;  %v258_v43 = vmax.f32 %v194_v30, 0.0  ;;  %317 = vst [vmem:[%s899_s3 + $0x108] sm:$0xff] %v253_v34  ;;  %v126_v47 = vmul.f32 %v380_v1, %v55_v31  ;;  %v70_v28 = vld [vmem:[%s896_s0 + $0x1c0] sm:$0xff]  ;;  %v72_v34 = vld [vmem:[%s896_s0 + $0x1d0] sm:$0xff] }
  0x23   :  { %318 = vst [vmem:[%s899_s3 + $0x110] sm:$0xff] %v254_v35  ;;  %319 = vst [vmem:[%s899_s3 + $0x118] sm:$0xff] %v255_v36  ;;  %v259_v46 = vmax.f32 %v195_v37, 0.0  ;;  %v127_v48 = vmul.f32 %v380_v1, %v56_v32  ;;  %v128_v49 = vmul.f32 %v380_v1, %v57_v33  ;;  %v196_v50 = vadd.f32 %v385_v2, %v125_v44  ;;  %v71_v33 = vld [vmem:[%s896_s0 + $0x1c8] sm:$0xff]  ;;  %v73_v35 = vld [vmem:[%s896_s0 + $0x1d8] sm:$0xff] }
  0x24   :  { %320 = vst [vmem:[%s899_s3 + $0x120] sm:$0xff] %v256_v41  ;;  %321 = vst [vmem:[%s899_s3 + $0x128] sm:$0xff] %v257_v42  ;;  %v129_v51 = vmul.f32 %v380_v1, %v58_v38  ;;  %v130_v52 = vmul.f32 %v380_v1, %v59_v39  ;;  %v131_v53 = vmul.f32 %v380_v1, %v60_v40  ;;  %v74_v40 = vld [vmem:[%s896_s0 + $0x1e0] sm:$0xff]  ;;  %v75_v41 = vld [vmem:[%s896_s0 + $0x1e8] sm:$0xff] }
  0x25   :  { %322 = vst [vmem:[%s899_s3 + $0x130] sm:$0xff] %v258_v43  ;;  %323 = vst [vmem:[%s899_s3 + $0x138] sm:$0xff] %v259_v46  ;;  %v197_v54 = vadd.f32 %v385_v2, %v126_v47  ;;  %v198_v55 = vadd.f32 %v385_v2, %v127_v48  ;;  %v199_v56 = vadd.f32 %v385_v2, %v128_v49  ;;  %v260_v59 = vmax.f32 %v196_v50, 0.0  ;;  %v76_v42 = vld [vmem:[%s896_s0 + $0x1f0] sm:$0xff]  ;;  %v77_v47 = vld [vmem:[%s896_s0 + $0x1f8] sm:$0xff] }
  0x26   :  { %v132_v57 = vmul.f32 %v380_v1, %v61_v45  ;;  %v200_v60 = vadd.f32 %v385_v2, %v129_v51  ;;  %v201_v61 = vadd.f32 %v385_v2, %v130_v52  ;;  %v202_v62 = vadd.f32 %v385_v2, %v131_v53 }
  0x27   :  { %v261_v4 = vmax.f32 %v197_v54, 0.0  ;;  %v262_v5 = vmax.f32 %v198_v55, 0.0  ;;  %v263_v6 = vmax.f32 %v199_v56, 0.0  ;;  %324 = vst [vmem:[%s899_s3 + $0x140] sm:$0xff] %v260_v59  ;;  %v133_v14 = vmul.f32 %v380_v1, %v62_v58 }
  0x28   :  { %v203_v7 = vadd.f32 %v385_v2, %v132_v57  ;;  %v264_v11 = vmax.f32 %v200_v60, 0.0  ;;  %v265_v12 = vmax.f32 %v201_v61, 0.0  ;;  %v266_v13 = vmax.f32 %v202_v62, 0.0 }
  0x29   :  { %325 = vst [vmem:[%s899_s3 + $0x148] sm:$0xff] %v261_v4  ;;  %326 = vst [vmem:[%s899_s3 + $0x150] sm:$0xff] %v262_v5  ;;  %v134_v17 = vmul.f32 %v380_v1, %v63_v63  ;;  %v135_v18 = vmul.f32 %v380_v1, %v64_v0  ;;  %v136_v19 = vmul.f32 %v380_v1, %v65_v3 }
  0x2a   :  { %327 = vst [vmem:[%s899_s3 + $0x158] sm:$0xff] %v263_v6  ;;  %v267_v16 = vmax.f32 %v203_v7, 0.0  ;;  %328 = vst [vmem:[%s899_s3 + $0x160] sm:$0xff] %v264_v11  ;;  %v204_v20 = vadd.f32 %v385_v2, %v133_v14  ;;  %v137_v21 = vmul.f32 %v380_v1, %v66_v8  ;;  %v138_v22 = vmul.f32 %v380_v1, %v67_v9 }
  0x2b   :  { %329 = vst [vmem:[%s899_s3 + $0x168] sm:$0xff] %v265_v12  ;;  %330 = vst [vmem:[%s899_s3 + $0x170] sm:$0xff] %v266_v13  ;;  %v139_v23 = vmul.f32 %v380_v1, %v68_v10  ;;  %v205_v24 = vadd.f32 %v385_v2, %v134_v17  ;;  %v206_v25 = vadd.f32 %v385_v2, %v135_v18 }
  0x2c   :  { %331 = vst [vmem:[%s899_s3 + $0x178] sm:$0xff] %v267_v16  ;;  %v207_v26 = vadd.f32 %v385_v2, %v136_v19  ;;  %v140_v27 = vmul.f32 %v380_v1, %v69_v15  ;;  %v268_v29 = vmax.f32 %v204_v20, 0.0  ;;  %v208_v30 = vadd.f32 %v385_v2, %v137_v21 }
  0x2d   :  { %v209_v31 = vadd.f32 %v385_v2, %v138_v22  ;;  %v210_v32 = vadd.f32 %v385_v2, %v139_v23  ;;  %v269_v36 = vmax.f32 %v205_v24, 0.0  ;;  %v270_v37 = vmax.f32 %v206_v25, 0.0 }
  0x2e   :  { %v271_v38 = vmax.f32 %v207_v26, 0.0  ;;  %v211_v39 = vadd.f32 %v385_v2, %v140_v27  ;;  %332 = vst [vmem:[%s899_s3 + $0x180] sm:$0xff] %v268_v29  ;;  %v272_v43 = vmax.f32 %v208_v30, 0.0  ;;  %v141_v46 = vmul.f32 %v380_v1, %v70_v28 }
  0x2f   :  { %v273_v44 = vmax.f32 %v209_v31, 0.0  ;;  %v274_v45 = vmax.f32 %v210_v32, 0.0  ;;  %333 = vst [vmem:[%s899_s3 + $0x188] sm:$0xff] %v269_v36  ;;  %334 = vst [vmem:[%s899_s3 + $0x190] sm:$0xff] %v270_v37  ;;  %v142_v49 = vmul.f32 %v380_v1, %v71_v33  ;;  %v143_v50 = vmul.f32 %v380_v1, %v72_v34 }
  0x30   :  { %335 = vst [vmem:[%s899_s3 + $0x198] sm:$0xff] %v271_v38  ;;  %v275_v48 = vmax.f32 %v211_v39, 0.0  ;;  %v144_v51 = vmul.f32 %v380_v1, %v73_v35  ;;  %336 = vst [vmem:[%s899_s3 + $0x1a0] sm:$0xff] %v272_v43  ;;  %v212_v52 = vadd.f32 %v385_v2, %v141_v46  ;;  %v145_v53 = vmul.f32 %v380_v1, %v74_v40 }
  0x31   :  { %337 = vst [vmem:[%s899_s3 + $0x1a8] sm:$0xff] %v273_v44  ;;  %338 = vst [vmem:[%s899_s3 + $0x1b0] sm:$0xff] %v274_v45  ;;  %v146_v54 = vmul.f32 %v380_v1, %v75_v41  ;;  %v147_v55 = vmul.f32 %v380_v1, %v76_v42  ;;  %v213_v56 = vadd.f32 %v385_v2, %v142_v49 }
  0x32   :  { %339 = vst [vmem:[%s899_s3 + $0x1b8] sm:$0xff] %v275_v48  ;;  %v214_v57 = vadd.f32 %v385_v2, %v143_v50  ;;  %v215_v58 = vadd.f32 %v385_v2, %v144_v51  ;;  %v148_v59 = vmul.f32 %v380_v1, %v77_v47  ;;  %v276_v60 = vmax.f32 %v212_v52, 0.0 }
  0x33   :  { %v216_v61 = vadd.f32 %v385_v2, %v145_v53  ;;  %v217_v62 = vadd.f32 %v385_v2, %v146_v54  ;;  %v218_v63 = vadd.f32 %v385_v2, %v147_v55  ;;  %v277_v0 = vmax.f32 %v213_v56, 0.0 }
  0x34   :  { %v278_v3 = vmax.f32 %v214_v57, 0.0  ;;  %v279_v4 = vmax.f32 %v215_v58, 0.0  ;;  %v219_v5 = vadd.f32 %v385_v2, %v148_v59  ;;  %340 = vst [vmem:[%s899_s3 + $0x1c0] sm:$0xff] %v276_v60 }
  0x35   :  { %v280_v6 = vmax.f32 %v216_v61, 0.0  ;;  %v281_v7 = vmax.f32 %v217_v62, 0.0  ;;  %v282_v8 = vmax.f32 %v218_v63, 0.0  ;;  %341 = vst [vmem:[%s899_s3 + $0x1c8] sm:$0xff] %v277_v0 }
  0x36   :  { %342 = vst [vmem:[%s899_s3 + $0x1d0] sm:$0xff] %v278_v3  ;;  %343 = vst [vmem:[%s899_s3 + $0x1d8] sm:$0xff] %v279_v4  ;;  %v283_v1 = vmax.f32 %v219_v5, 0.0 }
  0x37   :  { %344 = vst [vmem:[%s899_s3 + $0x1e0] sm:$0xff] %v280_v6  ;;  %345 = vst [vmem:[%s899_s3 + $0x1e8] sm:$0xff] %v281_v7 }
  0x38   :  { %346 = vst [vmem:[%s899_s3 + $0x1f0] sm:$0xff] %v282_v8  ;;  %347 = vst [vmem:[%s899_s3 + $0x1f8] sm:$0xff] %v283_v1 }

// kernel: conv_block.3
= control target key start
LH: loop header
LB: loop body
LE: loop exit
PB: predicated region body
PF: predicated region fallthrough
CT: control target
= control target key end

     0   :  { %s7847_s21 = smov 0   ;;  %s8960_s0 = inlined_call_operand.vmem [shape: f32[2,16,16,128], index: 0, kind: input, shape index: {}]   ;;  %s8961_s1 = inlined_call_operand.vmem [shape: f32[1,1,128], index: 1, kind: input, shape index: {}]   ;;  %s8962_s2 = inlined_call_operand.vmem [shape: f32[1,1,128], index: 2, kind: input, shape index: {}]   ;;  %s8963_s3 = inlined_call_operand.vmem [shape: bf16[9,128,128], index: 3, kind: input, shape index: {}]   ;;  %s8964_s4 = inlined_call_operand.vmem [shape: f32[2,16,16,128], index: 4, kind: output, shape index: {0}]   ;;  %s8965_s5 = inlined_call_operand.vmem [shape: f32[2,1,128], index: 5, kind: output, shape index: {1}]   ;;  %s8966_s6 = inlined_call_operand.vmem [shape: f32[2,1,128], index: 6, kind: output, shape index: {2}]  }
   0x1 LB: > { %s5587_s1 = sadd.s32 4294967295, %s7809_s21   ;;  %p5591_p0 = scmp.ge.s32.totalorder %s7809_s21, 1  ;;  %s7809_s21 = sphi %s7847_s21, %s17_s21  }
   0x2   : > { %p217_p1 = scmp.lt.s32.totalorder %s7809_s21, 3 }
   0x4   : > { %p218_p2 = pnand %p5591_p0, %p217_p1 }
   0x6   : > { %221 = sbr.rel (%p218_p2) target bundleno = 554 (0x22a), region = 36 }
   0xb   : > { %v7515_v0 = vld [vmem:[%s8963_s3 + $0x78] sm:$0xff]   ;;  %v7811_v2 = vmov 0.0|0.0   ;;  %v7517_v5 = vld [vmem:[%s8963_s3 + $0x70] sm:$0xff]   ;;  %v7519_v7 = vld [vmem:[%s8963_s3 + $0x68] sm:$0xff]   ;;  %p253_p3 = scmp.lt.s32.totalorder %s5587_s1, 1  ;;  %vm768_vm0 = vcmask 1046528  }
   0xc   : > { %v7516_v1 = vld [vmem:[%s8963_s3 + $0x38] sm:$0xff]   ;;  %v5596_v3 = vcombine.low %v7811_v2, %v7811_v2  ;;  %v5597_v4 = vcombine.high %v7811_v2, %v7811_v2  ;;  %6930 = vmatprep.subr.bf16.mxu0 %v7515_v0  ;;  %v7518_v6 = vld [vmem:[%s8963_s3 + $0x30] sm:$0xff]   ;;  %v7520_v8 = vld [vmem:[%s8963_s3 + $0x28] sm:$0xff]   ;;  %vm334_vm1 = vcmask 1040384  }
   0xd   : > { %6962 = vmatprep.subr.bf16.mxu1 %v7516_v1  ;;  %6931 = vmatpush3.bf16.msra.mxu0 %v7515_v0  ;;  %v7521_v9 = vld [vmem:[%s8963_s3 + $0x60] sm:$0xff]   ;;  %s9048_s1 = smov (!%p253_p3, %s5587_s1), 1  ;;  %v7523_v11 = vld [vmem:[%s8963_s3 + $0x58] sm:$0xff]   ;;  %v7525_v13 = vld [vmem:[%s8963_s3 + $0x50] sm:$0xff]  }
   0xe   : > { %732 = vst [vmem:[#allocation2 + $0x90] sm:$0xf] %v5596_v3  ;;  %733 = vst [vmem:[#allocation2 + $0x94] sm:$0xf] %v5597_v4  ;;  %6963 = vmatpush3.bf16.msra.mxu1 %v7516_v1  ;;  %6932 = vmatprep.subr.bf16.mxu0 %v7517_v5  ;;  %v7522_v10 = vld [vmem:[%s8963_s3 + $0x20] sm:$0xff]   ;;  %s6256_s15 = sshll.u32 %s9048_s1, 8  ;;  %s265_s27 = scalar_lea.vmem %s8965_s5, %s9048_s1 }
   0xf   : > { %567 = vst [vmem:[#allocation2] sm:$0xf] %v5596_v3  ;;  %568 = vst [vmem:[#allocation2 + $0x4] sm:$0xf] %v5597_v4  ;;  %6964 = vmatprep.subr.bf16.mxu1 %v7518_v6  ;;  %v7524_v12 = vld [vmem:[%s8963_s3 + $0x18] sm:$0xff]   ;;  %v7526_v14 = vld [vmem:[%s8963_s3 + $0x10] sm:$0xff]   ;;  %s7903_s24 = scalar_lea.vmem %s8960_s0, %s6256_s15  ;;  %s8616_s25 = scalar_lea.vmem %s8964_s4, %s6256_s15 }
  0x10   : > { %601 = vst [vmem:[#allocation2 + $0x88] sm:$0xf] %v5596_v3  ;;  %602 = vst [vmem:[#allocation2 + $0x8c] sm:$0xf] %v5597_v4  ;;  %v270_v17 = vld [vmem:[%s7903_s24] sm:$0xff]  ;;  %v271_v18 = vld [vmem:[%s7903_s24 + $0x8] sm:$0xff]  ;;  %s268_s29 = scalar_lea.vmem %s8966_s6, %s9048_s1 }
  0x11   : > { %766 = vst [vmem:[#allocation2 + $0x118] sm:$0xf] %v5596_v3  ;;  %767 = vst [vmem:[#allocation2 + $0x11c] sm:$0xf] %v5597_v4  ;;  %6933 = vmatpush3.bf16.msra.mxu0 %v7517_v5  ;;  %v336_v19 = vrot.slane %v271_v18, 7  ;;  %v6437_v20 = vpack.c.bf16 %v271_v18, %v270_v17  ;;  %v769_v21 = vrot.slane %v270_v17, 1 }
  0x12   : > { %994 = vst [vmem:[#allocation2 + $0x120] sm:$0xf] %v5596_v3  ;;  %995 = vst [vmem:[#allocation2 + $0x124] sm:$0xf] %v5597_v4  ;;  %6965 = vmatpush3.bf16.msra.mxu1 %v7518_v6  ;;  %6934 = vmatprep.subr.bf16.mxu0 %v7519_v7  ;;  %v770_v22 = vrot.slane %v271_v18, 1  ;;  %v7527_v23 = vld [vmem:[%s8963_s3 + $0x48] sm:$0xff]  }
  0x13   : > { %1028 = vst [vmem:[#allocation2 + $0x1a8] sm:$0xf] %v5596_v3  ;;  %1029 = vst [vmem:[#allocation2 + $0x1ac] sm:$0xf] %v5597_v4  ;;  %6966 = vmatprep.subr.bf16.mxu1 %v7520_v8  ;;  %v335_v24 = vrot.slane %v270_v17, 7  ;;  %v7528_v25 = vld [vmem:[%s8963_s3 + $0x8] sm:$0xff]  }
  0x14   : > { %6610 = vst [vmem:[#allocation2 + $0x98] sm:$0xff] %v6437_v20   ;;  %v771_v26 = vsel %vm768_vm0, %v769_v21, %v770_v22  ;;  %v849_v27 = vsel %vm768_vm0, %v770_v22, 0.0  ;;  %v272_v32 = vld [vmem:[%s7903_s24 + $0x10] sm:$0xff]  ;;  %v273_v33 = vld [vmem:[%s7903_s24 + $0x18] sm:$0xff]  ;;  %v7920_v34 = vld [vmem:[%s7903_s24 + $0x20] sm:$0xff] }
  0x15   : > { %6935 = vmatpush3.bf16.msra.mxu0 %v7519_v7  ;;  %v7531_v15 = vld [vmem:[#allocation2 + $0x90] sm:$0xff]   ;;  %v6517_v28 = vpack.c.bf16 %v849_v27, %v771_v26  ;;  %v337_v29 = vsel %vm334_vm1, %v335_v24, %v336_v19  ;;  %v415_v30 = vsel %vm334_vm1, 0.0, %v335_v24  ;;  %v7529_v35 = vld [vmem:[%s8963_s3 + $0x40] sm:$0xff]   ;;  %v339_v36 = vrot.slane %v273_v33, 7  ;;  %v7926_v39 = vld [vmem:[%s7903_s24 + $0x28] sm:$0xff] }
  0x16   : > { %6967 = vmatpush3.bf16.msra.mxu1 %v7520_v8  ;;  %6936 = vmatprep.subr.bf16.mxu0 %v7521_v9  ;;  %v7532_v16 = vld [vmem:[#allocation2] sm:$0xff]   ;;  %v6357_v31 = vpack.c.bf16 %v337_v29, %v415_v30  ;;  %v6442_v37 = vpack.c.bf16 %v273_v33, %v272_v32  ;;  %v338_v38 = vrot.slane %v272_v32, 7  ;;  %v342_v41 = vrot.slane %v7926_v39, 7  ;;  %v7535_v50 = vld [vmem:[%s8963_s3 + $0xb8] sm:$0xff]   ;;  %v7537_v55 = vld [vmem:[%s8963_s3 + $0xb0] sm:$0xff]  }
  0x17   : > { %6968 = vmatprep.subr.bf16.mxu1 %v7522_v10  ;;  %6946 = vmatprep.mubr.bf16.mxu0 %v7531_v15  ;;  %6626 = vst [vmem:[#allocation2 + $0x128] sm:$0xff] %v6517_v28   ;;  %v7530_v40 = vld [vmem:[%s8963_s3] sm:$0xff]   ;;  %v6447_v42 = vpack.c.bf16 %v7926_v39, %v7920_v34  ;;  %v341_v43 = vrot.slane %v7920_v34, 7  ;;  %v772_v44 = vrot.slane %v272_v32, 1  ;;  %v773_v52 = vrot.slane %v273_v33, 1  ;;  %v7536_v53 = vld [vmem:[%s8963_s3 + $0xf8] sm:$0xff]  }
  0x18   : > { %6978 = vmatprep.mubr.bf16.mxu1 %v7532_v16  ;;  %6594 = vst [vmem:[#allocation2 + $0x8] sm:$0xff] %v6357_v31   ;;  %6611 = vst [vmem:[#allocation2 + $0xa0] sm:$0xff] %v6442_v37   ;;  %v340_v45 = vsel %vm334_vm1, %v338_v38, %v339_v36  ;;  %v416_v46 = vsel %vm334_vm1, 0.0, %v338_v38  ;;  %v775_v56 = vrot.slane %v7920_v34, 1  ;;  %v276_v57 = vld [vmem:[%s7903_s24 + $0x30] sm:$0xff]  ;;  %v277_v58 = vld [vmem:[%s7903_s24 + $0x38] sm:$0xff] }
  0x19   : > { %6937 = vmatpush3.bf16.msra.mxu0 %v7521_v9  ;;  %v6362_v47 = vpack.c.bf16 %v340_v45, %v416_v46  ;;  %6612 = vst [vmem:[#allocation2 + $0xa8] sm:$0xff] %v6447_v42   ;;  %v343_v48 = vsel %vm334_vm1, %v341_v43, %v342_v41  ;;  %v417_v49 = vsel %vm334_vm1, 0.0, %v341_v43  ;;  %v774_v59 = vsel %vm768_vm0, %v772_v44, %v773_v52  ;;  %v7538_v62 = vld [vmem:[%s8963_s3 + $0xf0] sm:$0xff]   ;;  %v278_v2 = vld [vmem:[%s7903_s24 + $0x40] sm:$0xff]  ;;  %v279_v3 = vld [vmem:[%s7903_s24 + $0x48] sm:$0xff] }
  0x1a   : > { %6969 = vmatpush3.bf16.msra.mxu1 %v7522_v10  ;;  %6938 = vmatprep.subr.bf16.mxu0 %v7523_v11  ;;  %v6367_v51 = vpack.c.bf16 %v343_v48, %v417_v49  ;;  %v850_v60 = vsel %vm768_vm0, %v773_v52, 0.0  ;;  %v776_v61 = vrot.slane %v7926_v39, 1  ;;  %v345_v63 = vrot.slane %v277_v58, 7  ;;  %v7545_v24 = vld [vmem:[%s8963_s3 + $0xa0] sm:$0xff]   ;;  %v7551_v36 = vld [vmem:[%s8963_s3 + $0x98] sm:$0xff]   ;;  %v280_v37 = vld [vmem:[%s7903_s24 + $0x50] sm:$0xff] }
  0x1b   : > { %6970 = vmatprep.subr.bf16.mxu1 %v7524_v12  ;;  %6595 = vst [vmem:[#allocation2 + $0x10] sm:$0xff] %v6362_v47   ;;  %v7533_v54 = vld [vmem:[#allocation2 + $0x98] sm:$0xff]   ;;  %v6452_v0 = vpack.c.bf16 %v277_v58, %v276_v57  ;;  %v344_v1 = vrot.slane %v276_v57, 7  ;;  %v348_v5 = vrot.slane %v279_v3, 7  ;;  %v6457_v6 = vpack.c.bf16 %v279_v3, %v278_v2  ;;  %v7546_v29 = vld [vmem:[%s8963_s3 + $0xe0] sm:$0xff]   ;;  %v283_v45 = vld [vmem:[%s7903_s24 + $0x68] sm:$0xff] }
  0x1c   : > { %6596 = vst [vmem:[#allocation2 + $0x18] sm:$0xff] %v6367_v51   ;;  %v6522_v7 = vpack.c.bf16 %v850_v60, %v774_v59  ;;  %v778_v15 = vrot.slane %v276_v57, 1  ;;  %v347_v16 = vrot.slane %v278_v2, 7  ;;  %v851_v18 = vsel %vm768_vm0, %v776_v61, 0.0  ;;  %v281_v41 = vld [vmem:[%s7903_s24 + $0x58] sm:$0xff]  ;;  %v282_v44 = vld [vmem:[%s7903_s24 + $0x60] sm:$0xff] }
  0x1d   : > { %6939 = vmatpush3.bf16.msra.mxu0 %v7523_v11  ;;  %6613 = vst [vmem:[#allocation2 + $0xb0] sm:$0xff] %v6452_v0   ;;  %v346_v9 = vsel %vm334_vm1, %v344_v1, %v345_v63  ;;  %v418_v10 = vsel %vm334_vm1, 0.0, %v344_v1  ;;  %v7543_v11 = vld [vmem:[%s8963_s3 + $0xa8] sm:$0xff]   ;;  %6614 = vst [vmem:[#allocation2 + $0xb8] sm:$0xff] %v6457_v6   ;;  %v781_v19 = vrot.slane %v278_v2, 1  ;;  %v779_v26 = vrot.slane %v277_v58, 1 }
  0x1e   : > { %6971 = vmatpush3.bf16.msra.mxu1 %v7524_v12  ;;  %6940 = vmatprep.subr.bf16.mxu0 %v7525_v13  ;;  %v6372_v12 = vpack.c.bf16 %v346_v9, %v418_v10  ;;  %6627 = vst [vmem:[#allocation2 + $0x130] sm:$0xff] %v6522_v7   ;;  %v349_v20 = vsel %vm334_vm1, %v347_v16, %v348_v5  ;;  %v419_v21 = vsel %vm334_vm1, 0.0, %v347_v16  ;;  %v782_v28 = vrot.slane %v279_v3, 1  ;;  %v7553_v51 = vld [vmem:[%s8963_s3 + $0x90] sm:$0xff]   ;;  %v7559_v3 = vld [vmem:[%s8963_s3 + $0x88] sm:$0xff]   ;;  %v7561_v9 = vld [vmem:[%s8963_s3 + $0x80] sm:$0xff]  }
  0x1f   : > { %6972 = vmatprep.subr.bf16.mxu1 %v7526_v14  ;;  %v7534_v4 = vld [vmem:[#allocation2 + $0x8] sm:$0xff]   ;;  %v7539_v8 = vld [vmem:[#allocation2 + $0xa0] sm:$0xff]   ;;  %v780_v30 = vsel %vm768_vm0, %v778_v15, %v779_v26  ;;  %v852_v31 = vsel %vm768_vm0, %v779_v26, 0.0  ;;  %v784_v42 = vrot.slane %v280_v37, 1  ;;  %v350_v43 = vrot.slane %v280_v37, 7  ;;  %v7567_v16 = vld [vmem:[%s8963_s3 + $0x138] sm:$0xff]  }
  0x20   : > { %6597 = vst [vmem:[#allocation2 + $0x20] sm:$0xff] %v6372_v12   ;;  %v6532_v33 = vpack.c.bf16 %v852_v31, %v780_v30  ;;  %v783_v34 = vsel %vm768_vm0, %v781_v19, %v782_v28  ;;  %v351_v46 = vrot.slane %v281_v41, 7  ;;  %v6462_v47 = vpack.c.bf16 %v281_v41, %v280_v37  ;;  %v7560_v6 = vld [vmem:[%s8963_s3 + $0xc8] sm:$0xff]   ;;  %v7562_v12 = vld [vmem:[%s8963_s3 + $0xc0] sm:$0xff]   ;;  %v7568_v19 = vld [vmem:[%s8963_s3 + $0x178] sm:$0xff]  }
  0x21   : > { %6941 = vmatpush3.bf16.msra.mxu0 %v7525_v13  ;;  %v777_v13 = vsel %vm768_vm0, %v775_v56, %v776_v61  ;;  %v354_v48 = vrot.slane %v283_v45, 7  ;;  %v6467_v49 = vpack.c.bf16 %v283_v45, %v282_v44  ;;  %v420_v52 = vsel %vm334_vm1, 0.0, %v350_v43  ;;  %v7554_v61 = vld [vmem:[%s8963_s3 + $0xd0] sm:$0xff]   ;;  %v7578_v31 = vld [vmem:[%s8963_s3 + $0x160] sm:$0xff]  }
  0x22   : > { %6973 = vmatpush3.bf16.msra.mxu1 %v7526_v14  ;;  %6942 = vmatprep.subr.bf16.mxu0 %v7527_v23  ;;  %v7544_v14 = vld [vmem:[%s8963_s3 + $0xe8] sm:$0xff]   ;;  %v7540_v17 = vld [vmem:[#allocation2 + $0x10] sm:$0xff]   ;;  %v6527_v22 = vpack.c.bf16 %v851_v18, %v777_v13  ;;  %6629 = vst [vmem:[#allocation2 + $0x140] sm:$0xff] %v6532_v33   ;;  %6615 = vst [vmem:[#allocation2 + $0xc0] sm:$0xff] %v6462_v47   ;;  %v785_v56 = vrot.slane %v281_v41, 1  ;;  %v787_v58 = vrot.slane %v282_v44, 1 }
  0x23   : > { %6974 = vmatprep.subr.bf16.mxu1 %v7528_v25  ;;  %v7542_v27 = vld [vmem:[#allocation2 + $0x18] sm:$0xff]   ;;  %6616 = vst [vmem:[#allocation2 + $0xc8] sm:$0xff] %v6467_v49   ;;  %v788_v2 = vrot.slane %v283_v45, 1  ;;  %v7564_v13 = vld [vmem:[#allocation2 + $0x8] sm:$0xff]   ;;  %v7566_v18 = vld [vmem:[#allocation2 + $0x10] sm:$0xff]  }
  0x24   : > { %6628 = vst [vmem:[#allocation2 + $0x138] sm:$0xff] %v6527_v22   ;;  %v7547_v32 = vld [vmem:[#allocation2 + $0xb0] sm:$0xff]   ;;  %v786_v63 = vsel %vm768_vm0, %v784_v42, %v785_v56  ;;  %v854_v0 = vsel %vm768_vm0, %v785_v56, 0.0  ;;  %v7572_v22 = vld [vmem:[#allocation2 + $0x18] sm:$0xff]  }
  0x25   : > { %6943 = vmatpush3.bf16.msra.mxu0 %v7527_v23  ;;  %v7541_v23 = vld [vmem:[#allocation2 + $0xa8] sm:$0xff]   ;;  %v6542_v1 = vpack.c.bf16 %v854_v0, %v786_v63  ;;  %v855_v5 = vsel %vm768_vm0, %v788_v2, 0.0  ;;  %v7583_v33 = vld [vmem:[%s8963_s3 + $0x118] sm:$0xff]  }
  0x26   : > { %6975 = vmatpush3.bf16.msra.mxu1 %v7528_v25  ;;  %6944 = vmatprep.subr.bf16.mxu0 %v7529_v35  ;;  %v6377_v25 = vpack.c.bf16 %v349_v20, %v419_v21  ;;  %v7571_v20 = vld [vmem:[#allocation2 + $0x130] sm:$0xff]   ;;  %v285_v41 = vld [vmem:[%s7903_s24 + $0x78] sm:$0xff]  ;;  %v7603_v0 = vld [vmem:[#allocation2 + $0xa8] sm:$0xff]  }
  0x27   : > { %6976 = vmatprep.subr.bf16.mxu1 %v7530_v40  ;;  %v7548_v39 = vld [vmem:[#allocation2 + $0x20] sm:$0xff]   ;;  %6631 = vst [vmem:[#allocation2 + $0x150] sm:$0xff] %v6542_v1   ;;  %v7569_v21 = vld [vmem:[%s8963_s3 + $0x130] sm:$0xff]  }
  0x28   : > { %6598 = vst [vmem:[#allocation2 + $0x28] sm:$0xff] %v6377_v25   ;;  %v7574_v26 = vld [vmem:[#allocation2 + $0x20] sm:$0xff]   ;;  %v7601_v1 = vld [vmem:[%s8963_s3 + $0x1b0] sm:$0xff]  }
  0x29   : > { %6945 = vmatpush3.bf16.msra.mxu0 %v7529_v35  ;;  %v853_v35 = vsel %vm768_vm0, %v782_v28, 0.0  ;;  %v7579_v28 = vld [vmem:[#allocation2 + $0x140] sm:$0xff]  }
  0x2a   : > { %6977 = vmatpush3.bf16.msra.mxu1 %v7530_v40  ;;  %6994 = vmatprep.subr.bf16.mxu0 %v7535_v50  ;;  %v6537_v38 = vpack.c.bf16 %v853_v35, %v783_v34  ;;  %v7552_v40 = vld [vmem:[%s8963_s3 + $0xd8] sm:$0xff]   ;;  %v7557_v10 = vld [vmem:[#allocation2 + $0xc8] sm:$0xff]  }
  0x2b   : > { %7026 = vmatprep.subr.bf16.mxu1 %v7536_v53  ;;  %v7573_v25 = vld [vmem:[#allocation2 + $0x138] sm:$0xff]  }
  0x2c   : > { %6947 = vmatmul.mubr.bf16.vlgmr.msra.gmra.mxu0 %v7533_v54  ;;  %6630 = vst [vmem:[#allocation2 + $0x148] sm:$0xff] %v6537_v38   ;;  %v7584_v34 = vld [vmem:[%s8963_s3 + $0x158] sm:$0xff]   ;;  %v7586_v38 = vld [vmem:[%s8963_s3 + $0x150] sm:$0xff]  }
  0x2d   : > { %6979 = vmatmul.mubr.bf16.vlgmr.msra.gmra.mxu1 %v7534_v4  ;;  %6995 = vmatpush3.bf16.msra.mxu0 %v7535_v50  ;;  %v7549_v50 = vld [vmem:[#allocation2 + $0xb8] sm:$0xff]   ;;  %v789_v4 = vsel %vm768_vm0, %v787_v58, %v788_v2  ;;  %v7594_v58 = vld [vmem:[%s8963_s3 + $0x140] sm:$0xff]   ;;  %v7598_v2 = vld [vmem:[#allocation2 + $0x130] sm:$0xff]  }
  0x2e   : > { %7027 = vmatpush3.bf16.msra.mxu1 %v7536_v53  ;;  %6996 = vmatprep.subr.bf16.mxu0 %v7537_v55  ;;  %v353_v53 = vrot.slane %v282_v44, 7  ;;  %v6547_v7 = vpack.c.bf16 %v855_v5, %v789_v4  ;;  %v7587_v37 = vld [vmem:[#allocation2 + $0x150] sm:$0xff]   ;;  %v7607_v4 = vld [vmem:[%s8963_s3 + $0x1a8] sm:$0xff]   ;;  %v7604_v5 = vld [vmem:[#allocation2 + $0x138] sm:$0xff]  }
  0x2f   : > { %7028 = vmatprep.subr.bf16.mxu1 %v7538_v62  ;;  %6950 = vmatprep.mubr.bf16.mxu0 %v7539_v8  ;;  %v7550_v54 = vld [vmem:[#allocation2 + $0x28] sm:$0xff]   ;;  %v7555_v8 = vld [vmem:[#allocation2 + $0xc0] sm:$0xff]  }
  0x30   : > { %6982 = vmatprep.mubr.bf16.mxu1 %v7540_v17  ;;  %v355_v59 = vsel %vm334_vm1, %v353_v53, %v354_v48  ;;  %v421_v60 = vsel %vm334_vm1, 0.0, %v353_v53  ;;  %6632 = vst [vmem:[#allocation2 + $0x158] sm:$0xff] %v6547_v7   ;;  %v7565_v17 = vld [vmem:[#allocation2 + $0x128] sm:$0xff]   ;;  %v7595_v53 = vld [vmem:[#allocation2 + $0x98] sm:$0xff]  }
  0x31   : > { %6997 = vmatpush3.bf16.msra.mxu0 %v7537_v55  ;;  %v352_v55 = vsel %vm334_vm1, %v350_v43, %v351_v46  ;;  %v7580_v30 = vld [vmem:[#allocation2 + $0x28] sm:$0xff]   ;;  %v357_v43 = vrot.slane %v285_v41, 7  ;;  %v7611_v7 = vld [vmem:[#allocation2 + $0xb8] sm:$0xff]  }
  0x32   : > { %7029 = vmatpush3.bf16.msra.mxu1 %v7538_v62  ;;  %6998 = vmatprep.subr.bf16.mxu0 %v7543_v11  ;;  %v6382_v57 = vpack.c.bf16 %v352_v55, %v420_v52  ;;  %v6387_v62 = vpack.c.bf16 %v355_v59, %v421_v60  ;;  %v7591_v46 = vld [vmem:[%s8963_s3 + $0x108] sm:$0xff]   ;;  %v791_v52 = vrot.slane %v285_v41, 1  ;;  %v7599_v60 = vld [vmem:[%s8963_s3 + $0x1b8] sm:$0xff]  }
  0x33   : > { %7030 = vmatprep.subr.bf16.mxu1 %v7544_v14  ;;  %v7596_v59 = vld [vmem:[#allocation2 + $0x128] sm:$0xff]  }
  0x34   : > { %6951 = vmatmul.mubr.bf16.gmra.mxu0 %v7541_v23  ;;  %6599 = vst [vmem:[#allocation2 + $0x30] sm:$0xff] %v6382_v57   ;;  %6600 = vst [vmem:[#allocation2 + $0x38] sm:$0xff] %v6387_v62   ;;  %v7570_v23 = vld [vmem:[%s8963_s3 + $0x170] sm:$0xff]   ;;  %v856_v56 = vsel %vm768_vm0, %v791_v52, 0.0  ;;  %v7600_v62 = vld [vmem:[%s8963_s3 + $0x1f8] sm:$0xff]  }
  0x35   : > { %6983 = vmatmul.mubr.bf16.gmra.mxu1 %v7542_v27  ;;  %6999 = vmatpush3.bf16.msra.mxu0 %v7543_v11  ;;  %v7563_v11 = vld [vmem:[#allocation2 + $0x120] sm:$0xff]   ;;  %v7576_v27 = vld [vmem:[%s8963_s3 + $0x168] sm:$0xff]  }
  0x36   : > { %7031 = vmatpush3.bf16.msra.mxu1 %v7544_v14  ;;  %7000 = vmatprep.subr.bf16.mxu0 %v7545_v24 }
  0x37   : > { %7032 = vmatprep.subr.bf16.mxu1 %v7546_v29  ;;  %6954 = vmatprep.mubr.bf16.mxu0 %v7547_v32  ;;  %v7581_v32 = vld [vmem:[#allocation2 + $0x148] sm:$0xff]   ;;  %v7589_v47 = vld [vmem:[#allocation2 + $0x158] sm:$0xff]  }
  0x38   : > { %6986 = vmatprep.mubr.bf16.mxu1 %v7548_v39 }
  0x39   : > { %7001 = vmatpush3.bf16.msra.mxu0 %v7545_v24  ;;  %v7575_v24 = vld [vmem:[%s8963_s3 + $0x128] sm:$0xff]  }
  0x3a   : > { %7033 = vmatpush3.bf16.msra.mxu1 %v7546_v29  ;;  %7002 = vmatprep.subr.bf16.mxu0 %v7551_v36  ;;  %v7577_v29 = vld [vmem:[%s8963_s3 + $0x120] sm:$0xff]  }
  0x3b   : > { %7034 = vmatprep.subr.bf16.mxu1 %v7552_v40  ;;  %v7556_v14 = vld [vmem:[#allocation2 + $0x30] sm:$0xff]   ;;  %v7558_v15 = vld [vmem:[#allocation2 + $0x38] sm:$0xff]  }
  0x3c   : > { %6955 = vmatmul.mubr.bf16.gmra.mxu0 %v7549_v50  ;;  %v7582_v35 = vld [vmem:[#allocation2 + $0x30] sm:$0xff]   ;;  %v7588_v39 = vld [vmem:[#allocation2 + $0x38] sm:$0xff]  }
  0x3d   : > { %6987 = vmatmul.mubr.bf16.gmra.mxu1 %v7550_v54  ;;  %7003 = vmatpush3.bf16.msra.mxu0 %v7551_v36  ;;  %v7585_v36 = vld [vmem:[%s8963_s3 + $0x110] sm:$0xff]   ;;  %v7593_v54 = vld [vmem:[%s8963_s3 + $0x100] sm:$0xff]  }
  0x3e   : > { %7035 = vmatpush3.bf16.msra.mxu1 %v7552_v40  ;;  %7004 = vmatprep.subr.bf16.mxu0 %v7553_v51  ;;  %v284_v40 = vld [vmem:[%s7903_s24 + $0x70] sm:$0xff] }
  0x3f   : > { %7036 = vmatprep.subr.bf16.mxu1 %v7554_v61  ;;  %6958 = vmatprep.mubr.bf16.mxu0 %v7555_v8  ;;  %v356_v42 = vrot.slane %v284_v40, 7  ;;  %v6472_v44 = vpack.c.bf16 %v285_v41, %v284_v40  ;;  %v790_v49 = vrot.slane %v284_v40, 1  ;;  %v7609_v8 = vld [vmem:[%s8963_s3 + $0x1a0] sm:$0xff]   ;;  %v7640_v41 = vld [vmem:[%s8963_s3 + $0x68] sm:$0xff]  }
  0x40   : > { %6990 = vmatprep.mubr.bf16.mxu1 %v7556_v14  ;;  %v7613_v14 = vld [vmem:[#allocation2 + $0xc0] sm:$0xff]  }
  0x41   : > { %7005 = vmatpush3.bf16.msra.mxu0 %v7553_v51  ;;  %v422_v45 = vsel %vm334_vm1, 0.0, %v356_v42  ;;  %v358_v48 = vsel %vm334_vm1, %v356_v42, %v357_v43  ;;  %6617 = vst [vmem:[#allocation2 + $0xd0] sm:$0xff] %v6472_v44   ;;  %v7592_v51 = vld [vmem:[%s8963_s3 + $0x148] sm:$0xff]   ;;  %v792_v55 = vsel %vm768_vm0, %v790_v49, %v791_v52  ;;  %v7641_v40 = vld [vmem:[%s8963_s3 + $0x220] sm:$0xff]   ;;  %v7638_v42 = vld [vmem:[#allocation2 + $0xb8] sm:$0xff]  }
  0x42   : > { %7037 = vmatpush3.bf16.msra.mxu1 %v7554_v61  ;;  %7006 = vmatprep.subr.bf16.mxu0 %v7559_v3  ;;  %v6392_v50 = vpack.c.bf16 %v358_v48, %v422_v45  ;;  %v6552_v57 = vpack.c.bf16 %v856_v56, %v792_v55  ;;  %v7597_v61 = vld [vmem:[#allocation2 + $0xa0] sm:$0xff]   ;;  %v7647_v44 = vld [vmem:[%s8963_s3 + $0x218] sm:$0xff]   ;;  %v7649_v48 = vld [vmem:[%s8963_s3 + $0x210] sm:$0xff]  }
  0x43   : > { %7038 = vmatprep.subr.bf16.mxu1 %v7560_v6  ;;  %v7642_v43 = vld [vmem:[%s8963_s3 + $0x60] sm:$0xff]   ;;  %v7646_v56 = vld [vmem:[#allocation2 + $0xc8] sm:$0xff]  }
  0x44   : > { %6959 = vmatmul.mubr.bf16.gmra.mxu0 %v7557_v10  ;;  %6601 = vst [vmem:[#allocation2 + $0x40] sm:$0xff] %v6392_v50   ;;  %6633 = vst [vmem:[#allocation2 + $0x160] sm:$0xff] %v6552_v57   ;;  %v7606_v10 = vld [vmem:[#allocation2 + $0x140] sm:$0xff]   ;;  %v287_v50 = vld [vmem:[%s7903_s24 + $0x88] sm:$0xff] }
  0x45   : > { %7007 = vmatpush3.bf16.msra.mxu0 %v7559_v3  ;;  %6991 = vmatmul.mubr.bf16.gmra.mxu1 %v7558_v15  ;;  %v7602_v3 = vld [vmem:[%s8963_s3 + $0x1f0] sm:$0xff]   ;;  %v7619_v15 = vld [vmem:[#allocation2 + $0xc8] sm:$0xff]   ;;  %v7644_v45 = vld [vmem:[#allocation2 + $0xc0] sm:$0xff]   ;;  %v360_v52 = vrot.slane %v287_v50, 7 }
  0x46   : > { %7008 = vmatprep.subr.bf16.mxu0 %v7561_v9  ;;  %7039 = vmatpush3.bf16.msra.mxu1 %v7560_v6  ;;  %v7605_v6 = vld [vmem:[#allocation2 + $0xb0] sm:$0xff]   ;;  %v286_v49 = vld [vmem:[%s7903_s24 + $0x80] sm:$0xff] }
  0x47   : > { %7010 = vmatprep.mubr.bf16.mxu0 %v7563_v11  ;;  %7040 = vmatprep.subr.bf16.mxu1 %v7562_v12  ;;  %v7610_v11 = vld [vmem:[%s8963_s3 + $0x1e0] sm:$0xff]   ;;  %v793_v55 = vrot.slane %v286_v49, 1 }
  0x48   : > { %7042 = vmatprep.mubr.bf16.mxu1 %v7564_v13  ;;  %v7612_v13 = vld [vmem:[#allocation2 + $0x148] sm:$0xff]  }
  0x49   : > { %7009 = vmatpush3.bf16.msra.mxu0 %v7561_v9  ;;  %v7608_v9 = vld [vmem:[%s8963_s3 + $0x1e8] sm:$0xff]  }
  0x4a   : > { %7058 = vmatprep.subr.bf16.mxu0 %v7567_v16  ;;  %7041 = vmatpush3.bf16.msra.mxu1 %v7562_v12  ;;  %v7615_v12 = vld [vmem:[%s8963_s3 + $0x198] sm:$0xff]  }
  0x4b   : > { %7090 = vmatprep.subr.bf16.mxu1 %v7568_v19  ;;  %v7590_v63 = vld [vmem:[#allocation2 + $0x40] sm:$0xff]  }
  0x4c   : > { %7011 = vmatmul.mubr.bf16.vlgmr.msra.gmra.mxu0 %v7565_v17  ;;  %v7616_v17 = vld [vmem:[%s8963_s3 + $0x1d8] sm:$0xff]  }
  0x4d   : > { %7059 = vmatpush3.bf16.msra.mxu0 %v7567_v16  ;;  %7014 = vmatprep.mubr.bf16.mxu0 %v7571_v20  ;;  %v7617_v16 = vld [vmem:[%s8963_s3 + $0x190] sm:$0xff]   ;;  %v7623_v20 = vld [vmem:[%s8963_s3 + $0x188] sm:$0xff]  }
  0x4e   : > { %7043 = vmatmul.mubr.bf16.vlgmr.msra.gmra.mxu1 %v7566_v18  ;;  %7060 = vmatprep.subr.bf16.mxu0 %v7569_v21  ;;  %v7614_v18 = vld [vmem:[#allocation2 + $0x150] sm:$0xff]  }
  0x4f   : > { %7091 = vmatpush3.bf16.msra.mxu1 %v7568_v19  ;;  %7046 = vmatprep.mubr.bf16.mxu1 %v7572_v22  ;;  %v7618_v19 = vld [vmem:[%s8963_s3 + $0x1d0] sm:$0xff]  }
  0x50   : > { %7092 = vmatprep.subr.bf16.mxu1 %v7570_v23  ;;  %v7621_v22 = vld [vmem:[#allocation2 + $0xd0] sm:$0xff]  }
  0x51   : > { %7061 = vmatpush3.bf16.msra.mxu0 %v7569_v21  ;;  %v7620_v21 = vld [vmem:[#allocation2 + $0x158] sm:$0xff]  }
  0x52   : > { %7062 = vmatprep.subr.bf16.mxu0 %v7575_v24 }
  0x53   : > { %7093 = vmatpush3.bf16.msra.mxu1 %v7570_v23  ;;  %v7627_v23 = vld [vmem:[#allocation2 + $0x10] sm:$0xff]  }
  0x54   : > { %7015 = vmatmul.mubr.bf16.gmra.mxu0 %v7573_v25  ;;  %7094 = vmatprep.subr.bf16.mxu1 %v7576_v27  ;;  %v7624_v25 = vld [vmem:[%s8963_s3 + $0x1c8] sm:$0xff]  }
  0x55   : > { %7063 = vmatpush3.bf16.msra.mxu0 %v7575_v24  ;;  %7018 = vmatprep.mubr.bf16.mxu0 %v7579_v28  ;;  %v7625_v24 = vld [vmem:[%s8963_s3 + $0x180] sm:$0xff]   ;;  %v7631_v28 = vld [vmem:[%s8963_s3 + $0x238] sm:$0xff]  }
  0x56   : > { %7047 = vmatmul.mubr.bf16.gmra.mxu1 %v7574_v26  ;;  %7064 = vmatprep.subr.bf16.mxu0 %v7577_v29  ;;  %v7622_v26 = vld [vmem:[#allocation2 + $0x160] sm:$0xff]  }
  0x57   : > { %7095 = vmatpush3.bf16.msra.mxu1 %v7576_v27  ;;  %7050 = vmatprep.mubr.bf16.mxu1 %v7580_v30  ;;  %v7626_v27 = vld [vmem:[%s8963_s3 + $0x1c0] sm:$0xff]   ;;  %v7629_v30 = vld [vmem:[#allocation2 + $0x18] sm:$0xff]  }
  0x58   : > { %7096 = vmatprep.subr.bf16.mxu1 %v7578_v31 }
  0x59   : > { %7065 = vmatpush3.bf16.msra.mxu0 %v7577_v29  ;;  %v7628_v29 = vld [vmem:[#allocation2 + $0xa0] sm:$0xff]  }
  0x5a   : > { %7066 = vmatprep.subr.bf16.mxu0 %v7583_v33 }
  0x5b   : > { %7097 = vmatpush3.bf16.msra.mxu1 %v7578_v31  ;;  %v7635_v31 = vld [vmem:[#allocation2 + $0x20] sm:$0xff]  }
  0x5c   : > { %7019 = vmatmul.mubr.bf16.gmra.mxu0 %v7581_v32  ;;  %7098 = vmatprep.subr.bf16.mxu1 %v7584_v34  ;;  %v7633_v32 = vld [vmem:[%s8963_s3 + $0x230] sm:$0xff]  }
  0x5d   : > { %7067 = vmatpush3.bf16.msra.mxu0 %v7583_v33  ;;  %7022 = vmatprep.mubr.bf16.mxu0 %v7587_v37  ;;  %v7632_v33 = vld [vmem:[%s8963_s3 + $0x78] sm:$0xff]   ;;  %v7636_v37 = vld [vmem:[#allocation2 + $0xb0] sm:$0xff]  }
  0x5e   : > { %7051 = vmatmul.mubr.bf16.gmra.mxu1 %v7582_v35  ;;  %7068 = vmatprep.subr.bf16.mxu0 %v7585_v36  ;;  %v7634_v35 = vld [vmem:[%s8963_s3 + $0x70] sm:$0xff]  }
  0x5f   : > { %7099 = vmatpush3.bf16.msra.mxu1 %v7584_v34  ;;  %7054 = vmatprep.mubr.bf16.mxu1 %v7588_v39  ;;  %v7630_v34 = vld [vmem:[#allocation2 + $0xa8] sm:$0xff]   ;;  %v7643_v39 = vld [vmem:[#allocation2 + $0x30] sm:$0xff]  }
  0x60   : > { %7100 = vmatprep.subr.bf16.mxu1 %v7586_v38 }
  0x61   : > { %7069 = vmatpush3.bf16.msra.mxu0 %v7585_v36  ;;  %v7639_v36 = vld [vmem:[%s8963_s3 + $0x228] sm:$0xff]  }
  0x62   : > { %7070 = vmatprep.subr.bf16.mxu0 %v7591_v46 }
  0x63   : > { %7101 = vmatpush3.bf16.msra.mxu1 %v7586_v38  ;;  %v7637_v38 = vld [vmem:[#allocation2 + $0x28] sm:$0xff]  }
  0x64   : > { %7023 = vmatmul.mubr.bf16.gmra.mxu0 %v7589_v47  ;;  %7102 = vmatprep.subr.bf16.mxu1 %v7592_v51  ;;  %v7651_v47 = vld [vmem:[#allocation2 + $0x40] sm:$0xff]  }
  0x65   : > { %7071 = vmatpush3.bf16.msra.mxu0 %v7591_v46  ;;  %7074 = vmatprep.mubr.bf16.mxu0 %v7595_v53  ;;  %v7645_v46 = vld [vmem:[#allocation2 + $0x38] sm:$0xff]   ;;  %v6477_v53 = vpack.c.bf16 %v287_v50, %v286_v49 }
  0x66   : > { %7072 = vmatprep.subr.bf16.mxu0 %v7593_v54  ;;  %7055 = vmatmul.mubr.bf16.gmra.mxu1 %v7590_v63  ;;  %v7650_v63 = vld [vmem:[%s8963_s3 + $0x50] sm:$0xff]  }
  0x67   : > { %7103 = vmatpush3.bf16.msra.mxu1 %v7592_v51  ;;  %7106 = vmatprep.mubr.bf16.mxu1 %v7596_v59  ;;  %v359_v51 = vrot.slane %v286_v49, 7  ;;  %6618 = vst [vmem:[#allocation2 + $0xd8] sm:$0xff] %v6477_v53   ;;  %v295_v53 = vld [vmem:[%s7903_s24 + $0xc8] sm:$0xff] }
  0x68   : > { %7104 = vmatprep.subr.bf16.mxu1 %v7594_v58 }
  0x69   : > { %7073 = vmatpush3.bf16.msra.mxu0 %v7593_v54  ;;  %v7648_v54 = vld [vmem:[%s8963_s3 + $0x58] sm:$0xff]   ;;  %v361_v57 = vsel %vm334_vm1, %v359_v51, %v360_v52  ;;  %v294_v52 = vld [vmem:[%s7903_s24 + $0xc0] sm:$0xff] }
  0x6a   : > { %7122 = vmatprep.subr.bf16.mxu0 %v7599_v60 }
  0x6b   : > { %7105 = vmatpush3.bf16.msra.mxu1 %v7594_v58  ;;  %v423_v58 = vsel %vm334_vm1, 0.0, %v359_v51  ;;  %v7673_v51 = vld [vmem:[%s8963_s3 + $0x20] sm:$0xff]  }
  0x6c   : > { %7075 = vmatmul.mubr.bf16.vlgmr.msra.gmra.mxu0 %v7597_v61  ;;  %7154 = vmatprep.subr.bf16.mxu1 %v7600_v62  ;;  %v6397_v59 = vpack.c.bf16 %v361_v57, %v423_v58  ;;  %v794_v61 = vrot.slane %v287_v50, 1  ;;  %v7674_v58 = vld [vmem:[%s8963_s3 + $0xa0] sm:$0xff]  }
  0x6d   : > { %7123 = vmatpush3.bf16.msra.mxu0 %v7599_v60  ;;  %7078 = vmatprep.mubr.bf16.mxu0 %v7603_v0  ;;  %v7655_v60 = vld [vmem:[%s8963_s3 + $0x208] sm:$0xff]  }
  0x6e   : > { %7124 = vmatprep.subr.bf16.mxu0 %v7601_v1  ;;  %7107 = vmatmul.mubr.bf16.vlgmr.msra.gmra.mxu1 %v7598_v2  ;;  %6602 = vst [vmem:[#allocation2 + $0x48] sm:$0xff] %v6397_v59   ;;  %v795_v0 = vsel %vm768_vm0, %v793_v55, %v794_v61  ;;  %v6497_v59 = vpack.c.bf16 %v295_v53, %v294_v52 }
  0x6f   : > { %7155 = vmatpush3.bf16.msra.mxu1 %v7600_v62  ;;  %7110 = vmatprep.mubr.bf16.mxu1 %v7604_v5  ;;  %v7652_v62 = vld [vmem:[#allocation2 + $0xd0] sm:$0xff]  }
  0x70   : > { %7156 = vmatprep.subr.bf16.mxu1 %v7602_v3  ;;  %v7659_v5 = vld [vmem:[#allocation2 + $0x130] sm:$0xff]   ;;  %6622 = vst [vmem:[#allocation2 + $0xf8] sm:$0xff] %v6497_v59  }
  0x71   : > { %7125 = vmatpush3.bf16.msra.mxu0 %v7601_v1  ;;  %v857_v1 = vsel %vm768_vm0, %v794_v61, 0.0  ;;  %v7697_v59 = vld [vmem:[%s8963_s3 + $0xf0] sm:$0xff]  }
  0x72   : > { %7126 = vmatprep.subr.bf16.mxu0 %v7607_v4  ;;  %v6557_v2 = vpack.c.bf16 %v857_v1, %v795_v0  ;;  %v805_v1 = vrot.slane %v294_v52, 1 }
  0x73   : > { %7157 = vmatpush3.bf16.msra.mxu1 %v7602_v3  ;;  %v7657_v3 = vld [vmem:[%s8963_s3 + $0x200] sm:$0xff]  }
  0x74   : > { %7079 = vmatmul.mubr.bf16.gmra.mxu0 %v7605_v6  ;;  %7158 = vmatprep.subr.bf16.mxu1 %v7608_v9  ;;  %6634 = vst [vmem:[#allocation2 + $0x168] sm:$0xff] %v6557_v2   ;;  %v7654_v6 = vld [vmem:[#allocation2 + $0xd8] sm:$0xff]  }
  0x75   : > { %7127 = vmatpush3.bf16.msra.mxu0 %v7607_v4  ;;  %7082 = vmatprep.mubr.bf16.mxu0 %v7611_v7  ;;  %v7656_v4 = vld [vmem:[%s8963_s3 + $0x48] sm:$0xff]   ;;  %v7658_v7 = vld [vmem:[%s8963_s3 + $0x40] sm:$0xff]  }
  0x76   : > { %7128 = vmatprep.subr.bf16.mxu0 %v7609_v8  ;;  %7111 = vmatmul.mubr.bf16.gmra.mxu1 %v7606_v10  ;;  %v7663_v10 = vld [vmem:[%s8963_s3 + $0x38] sm:$0xff]  }
  0x77   : > { %7159 = vmatpush3.bf16.msra.mxu1 %v7608_v9  ;;  %7114 = vmatprep.mubr.bf16.mxu1 %v7612_v13  ;;  %v7660_v9 = vld [vmem:[#allocation2 + $0xd0] sm:$0xff]   ;;  %v7661_v13 = vld [vmem:[#allocation2 + $0x138] sm:$0xff]  }
  0x78   : > { %7160 = vmatprep.subr.bf16.mxu1 %v7610_v11 }
  0x79   : > { %7129 = vmatpush3.bf16.msra.mxu0 %v7609_v8  ;;  %v7653_v8 = vld [vmem:[#allocation2 + $0x48] sm:$0xff]  }
  0x7a   : > { %7130 = vmatprep.subr.bf16.mxu0 %v7615_v12 }
  0x7b   : > { %7161 = vmatpush3.bf16.msra.mxu1 %v7610_v11  ;;  %v288_v11 = vld [vmem:[%s7903_s24 + $0x90] sm:$0xff] }
  0x7c   : > { %7083 = vmatmul.mubr.bf16.gmra.mxu0 %v7613_v14  ;;  %7162 = vmatprep.subr.bf16.mxu1 %v7616_v17 }
  0x7d   : > { %7131 = vmatpush3.bf16.msra.mxu0 %v7615_v12  ;;  %7086 = vmatprep.mubr.bf16.mxu0 %v7619_v15  ;;  %v289_v12 = vld [vmem:[%s7903_s24 + $0x98] sm:$0xff] }
  0x7e   : > { %7132 = vmatprep.subr.bf16.mxu0 %v7617_v16  ;;  %7115 = vmatmul.mubr.bf16.gmra.mxu1 %v7614_v18  ;;  %v363_v14 = vrot.slane %v289_v12, 7  ;;  %v6482_v15 = vpack.c.bf16 %v289_v12, %v288_v11  ;;  %v7664_v18 = vld [vmem:[%s8963_s3 + $0xb8] sm:$0xff]  }
  0x7f   : > { %7163 = vmatpush3.bf16.msra.mxu1 %v7616_v17  ;;  %7118 = vmatprep.mubr.bf16.mxu1 %v7620_v21  ;;  %v7662_v17 = vld [vmem:[#allocation2 + $0xd8] sm:$0xff]   ;;  %v362_v21 = vrot.slane %v288_v11, 7 }
  0x80   : > { %7164 = vmatprep.subr.bf16.mxu1 %v7618_v19  ;;  %6619 = vst [vmem:[#allocation2 + $0xe0] sm:$0xff] %v6482_v15   ;;  %v297_v15 = vld [vmem:[%s7903_s24 + $0xd8] sm:$0xff] }
  0x81   : > { %7133 = vmatpush3.bf16.msra.mxu0 %v7617_v16  ;;  %v796_v16 = vrot.slane %v288_v11, 1 }
  0x82   : > { %7134 = vmatprep.subr.bf16.mxu0 %v7623_v20 }
  0x83   : > { %7165 = vmatpush3.bf16.msra.mxu1 %v7618_v19  ;;  %v290_v19 = vld [vmem:[%s7903_s24 + $0xa0] sm:$0xff] }
  0x84   : > { %7087 = vmatmul.mubr.bf16.gmra.mxu0 %v7621_v22  ;;  %7166 = vmatprep.subr.bf16.mxu1 %v7624_v25  ;;  %v797_v22 = vrot.slane %v289_v12, 1 }
  0x85   : > { %7135 = vmatpush3.bf16.msra.mxu0 %v7623_v20  ;;  %7138 = vmatprep.mubr.bf16.mxu0 %v7627_v23  ;;  %v291_v20 = vld [vmem:[%s7903_s24 + $0xa8] sm:$0xff]  ;;  %v7665_v23 = vld [vmem:[%s8963_s3 + $0x30] sm:$0xff]  }
  0x86   : > { %7136 = vmatprep.subr.bf16.mxu0 %v7625_v24  ;;  %7119 = vmatmul.mubr.bf16.gmra.mxu1 %v7622_v26  ;;  %v366_v26 = vrot.slane %v291_v20, 7 }
  0x87   : > { %7167 = vmatpush3.bf16.msra.mxu1 %v7624_v25  ;;  %7170 = vmatprep.mubr.bf16.mxu1 %v7628_v29  ;;  %v7666_v25 = vld [vmem:[%s8963_s3 + $0xb0] sm:$0xff]   ;;  %v798_v29 = vsel %vm768_vm0, %v796_v16, %v797_v22 }
  0x88   : > { %7168 = vmatprep.subr.bf16.mxu1 %v7626_v27 }
  0x89   : > { %7137 = vmatpush3.bf16.msra.mxu0 %v7625_v24  ;;  %v6487_v24 = vpack.c.bf16 %v291_v20, %v290_v19 }
  0x8a   : > { %7186 = vmatprep.subr.bf16.mxu0 %v7631_v28 }
  0x8b   : > { %7169 = vmatpush3.bf16.msra.mxu1 %v7626_v27  ;;  %v364_v27 = vsel %vm334_vm1, %v362_v21, %v363_v14  ;;  %6620 = vst [vmem:[#allocation2 + $0xe8] sm:$0xff] %v6487_v24   ;;  %v296_v14 = vld [vmem:[%s7903_s24 + $0xd0] sm:$0xff] }
  0x8c   : > { %7139 = vmatmul.mubr.bf16.vlgmr.msra.gmra.mxu0 %v7629_v30  ;;  %7218 = vmatprep.subr.bf16.mxu1 %v7632_v33  ;;  %v7667_v30 = vld [vmem:[#allocation2 + $0x140] sm:$0xff]  }
  0x8d   : > { %7187 = vmatpush3.bf16.msra.mxu0 %v7631_v28  ;;  %7142 = vmatprep.mubr.bf16.mxu0 %v7635_v31  ;;  %v424_v28 = vsel %vm334_vm1, 0.0, %v362_v21  ;;  %v375_v21 = vrot.slane %v297_v15, 7 }
  0x8e   : > { %7188 = vmatprep.subr.bf16.mxu0 %v7633_v32  ;;  %7171 = vmatmul.mubr.bf16.vlgmr.msra.gmra.mxu1 %v7630_v34  ;;  %v6402_v31 = vpack.c.bf16 %v364_v27, %v424_v28  ;;  %v374_v27 = vrot.slane %v296_v14, 7  ;;  %v808_v28 = vrot.slane %v296_v14, 1 }
  0x8f   : > { %7219 = vmatpush3.bf16.msra.mxu1 %v7632_v33  ;;  %7174 = vmatprep.mubr.bf16.mxu1 %v7636_v37  ;;  %v799_v33 = vrot.slane %v290_v19, 1  ;;  %v800_v37 = vrot.slane %v291_v20, 1  ;;  %v7683_v20 = vld [vmem:[#allocation2 + $0x160] sm:$0xff]  }
  0x90   : > { %7220 = vmatprep.subr.bf16.mxu1 %v7634_v35  ;;  %6603 = vst [vmem:[#allocation2 + $0x50] sm:$0xff] %v6402_v31  }
  0x91   : > { %7189 = vmatpush3.bf16.msra.mxu0 %v7633_v32  ;;  %v858_v32 = vsel %vm768_vm0, %v797_v22, 0.0  ;;  %v801_v49 = vsel %vm768_vm0, %v799_v33, %v800_v37  ;;  %v859_v50 = vsel %vm768_vm0, %v800_v37, 0.0  ;;  %v6502_v22 = vpack.c.bf16 %v297_v15, %v296_v14 }
  0x92   : > { %7190 = vmatprep.subr.bf16.mxu0 %v7639_v36  ;;  %v6562_v34 = vpack.c.bf16 %v858_v32, %v798_v29  ;;  %v7670_v57 = vld [vmem:[#allocation2 + $0xe8] sm:$0xff]   ;;  %v376_v32 = vsel %vm334_vm1, %v374_v27, %v375_v21  ;;  %v428_v33 = vsel %vm334_vm1, 0.0, %v374_v27  ;;  %v809_v37 = vrot.slane %v297_v15, 1  ;;  %v7714_v15 = vld [vmem:[%s8963_s3 + $0x110] sm:$0xff]  }
  0x93   : > { %7221 = vmatpush3.bf16.msra.mxu1 %v7634_v35  ;;  %v365_v35 = vrot.slane %v290_v19, 7  ;;  %v7682_v19 = vld [vmem:[%s8963_s3 + $0x90] sm:$0xff]   ;;  %6623 = vst [vmem:[#allocation2 + $0x100] sm:$0xff] %v6502_v22   ;;  %v7724_v22 = vld [vmem:[#allocation2 + $0xd8] sm:$0xff]  }
  0x94   : > { %7143 = vmatmul.mubr.bf16.gmra.mxu0 %v7637_v38  ;;  %7222 = vmatprep.subr.bf16.mxu1 %v7640_v41  ;;  %v7672_v38 = vld [vmem:[%s8963_s3 + $0xa8] sm:$0xff]   ;;  %6635 = vst [vmem:[#allocation2 + $0x170] sm:$0xff] %v6562_v34  }
  0x95   : > { %7191 = vmatpush3.bf16.msra.mxu0 %v7639_v36  ;;  %7146 = vmatprep.mubr.bf16.mxu0 %v7643_v39  ;;  %v7671_v36 = vld [vmem:[%s8963_s3 + $0x28] sm:$0xff]   ;;  %v292_v39 = vld [vmem:[%s7903_s24 + $0xb0] sm:$0xff] }
  0x96   : > { %7192 = vmatprep.subr.bf16.mxu0 %v7641_v40  ;;  %7175 = vmatmul.mubr.bf16.gmra.mxu1 %v7638_v42  ;;  %v425_v42 = vsel %vm334_vm1, 0.0, %v365_v35  ;;  %v368_v55 = vrot.slane %v292_v39, 7  ;;  %v7685_v34 = vld [vmem:[#allocation2 + $0x168] sm:$0xff]  }
  0x97   : > { %7223 = vmatpush3.bf16.msra.mxu1 %v7640_v41  ;;  %7178 = vmatprep.mubr.bf16.mxu1 %v7644_v45  ;;  %v367_v41 = vsel %vm334_vm1, %v365_v35, %v366_v26  ;;  %v299_v26 = vld [vmem:[%s7903_s24 + $0xe8] sm:$0xff]  ;;  %v7725_v27 = vld [vmem:[#allocation2 + $0x50] sm:$0xff]  }
  0x98   : > { %7224 = vmatprep.subr.bf16.mxu1 %v7642_v43  ;;  %v426_v0 = vsel %vm334_vm1, 0.0, %v368_v55  ;;  %v378_v31 = vrot.slane %v299_v26, 7  ;;  %v7687_v35 = vld [vmem:[%s8963_s3 + $0x8] sm:$0xff]  }
  0x99   : > { %7193 = vmatpush3.bf16.msra.mxu0 %v7641_v40  ;;  %v293_v40 = vld [vmem:[%s7903_s24 + $0xb8] sm:$0xff] }
  0x9a   : > { %7194 = vmatprep.subr.bf16.mxu0 %v7647_v44  ;;  %v6492_v45 = vpack.c.bf16 %v293_v40, %v292_v39 }
  0x9b   : > { %7225 = vmatpush3.bf16.msra.mxu1 %v7642_v43  ;;  %v7669_v43 = vld [vmem:[#allocation2 + $0x148] sm:$0xff]  }
  0x9c   : > { %7147 = vmatmul.mubr.bf16.gmra.mxu0 %v7645_v46  ;;  %7226 = vmatprep.subr.bf16.mxu1 %v7648_v54  ;;  %v802_v46 = vrot.slane %v292_v39, 1  ;;  %6621 = vst [vmem:[#allocation2 + $0xf0] sm:$0xff] %v6492_v45  }
  0x9d   : > { %7195 = vmatpush3.bf16.msra.mxu0 %v7647_v44  ;;  %7150 = vmatprep.mubr.bf16.mxu0 %v7651_v47  ;;  %v369_v44 = vrot.slane %v293_v40, 7  ;;  %v6407_v47 = vpack.c.bf16 %v367_v41, %v425_v42  ;;  %v810_v41 = vsel %vm768_vm0, %v808_v28, %v809_v37  ;;  %v862_v42 = vsel %vm768_vm0, %v809_v37, 0.0 }
  0x9e   : > { %7196 = vmatprep.subr.bf16.mxu0 %v7649_v48  ;;  %7179 = vmatmul.mubr.bf16.gmra.mxu1 %v7646_v56  ;;  %v803_v56 = vrot.slane %v293_v40, 1  ;;  %v7689_v40 = vld [vmem:[%s8963_s3] sm:$0xff]  }
  0x9f   : > { %7227 = vmatpush3.bf16.msra.mxu1 %v7648_v54  ;;  %7182 = vmatprep.mubr.bf16.mxu1 %v7652_v62  ;;  %6604 = vst [vmem:[#allocation2 + $0x58] sm:$0xff] %v6407_v47   ;;  %v6567_v54 = vpack.c.bf16 %v859_v50, %v801_v49  ;;  %v370_v61 = vsel %vm334_vm1, %v368_v55, %v369_v44  ;;  %v7684_v47 = vld [vmem:[#allocation2 + $0x100] sm:$0xff]   ;;  %v812_v49 = vrot.slane %v299_v26, 1 }
  0xa0   : > { %7228 = vmatprep.subr.bf16.mxu1 %v7650_v63  ;;  %v804_v62 = vsel %vm768_vm0, %v802_v46, %v803_v56  ;;  %v6412_v2 = vpack.c.bf16 %v370_v61, %v426_v0  ;;  %v6582_v44 = vpack.c.bf16 %v862_v42, %v810_v41  ;;  %v7690_v50 = vld [vmem:[%s8963_s3 + $0x80] sm:$0xff]   ;;  %v7694_v61 = vld [vmem:[#allocation2 + $0x168] sm:$0xff]   ;;  %v7730_v41 = vld [vmem:[%s8963_s3 + $0x1b0] sm:$0xff]  }
  0xa1   : > { %7197 = vmatpush3.bf16.msra.mxu0 %v7649_v48  ;;  %v7668_v48 = vld [vmem:[#allocation2 + $0xe0] sm:$0xff]   ;;  %6636 = vst [vmem:[#allocation2 + $0x178] sm:$0xff] %v6567_v54   ;;  %v7703_v0 = vld [vmem:[%s8963_s3 + $0xe8] sm:$0xff]  }
  0xa2   : > { %7198 = vmatprep.subr.bf16.mxu0 %v7655_v60  ;;  %6605 = vst [vmem:[#allocation2 + $0x60] sm:$0xff] %v6412_v2   ;;  %6639 = vst [vmem:[#allocation2 + $0x190] sm:$0xff] %v6582_v44   ;;  %v7704_v2 = vld [vmem:[%s8963_s3 + $0x128] sm:$0xff]  }
  0xa3   : > { %7229 = vmatpush3.bf16.msra.mxu1 %v7650_v63  ;;  %v372_v63 = vrot.slane %v295_v53, 7 }
  0xa4   : > { %7230 = vmatprep.subr.bf16.mxu1 %v7656_v4  ;;  %7151 = vmatmul.mubr.bf16.gmra.mxu0 %v7653_v8  ;;  %v7680_v8 = vld [vmem:[%s8963_s3 + $0x98] sm:$0xff]  }
  0xa5   : > { %7199 = vmatpush3.bf16.msra.mxu0 %v7655_v60  ;;  %7202 = vmatprep.mubr.bf16.mxu0 %v7659_v5  ;;  %v7675_v60 = vld [vmem:[#allocation2 + $0x150] sm:$0xff]  }
  0xa6   : > { %7200 = vmatprep.subr.bf16.mxu0 %v7657_v3  ;;  %7183 = vmatmul.mubr.bf16.gmra.mxu1 %v7654_v6  ;;  %v371_v6 = vrot.slane %v294_v52, 7 }
  0xa7   : > { %7231 = vmatpush3.bf16.msra.mxu1 %v7656_v4  ;;  %7234 = vmatprep.mubr.bf16.mxu1 %v7660_v9  ;;  %v7679_v4 = vld [vmem:[%s8963_s3 + $0x18] sm:$0xff]   ;;  %v806_v9 = vrot.slane %v295_v53, 1  ;;  %v863_v53 = vsel %vm768_vm0, %v812_v49, 0.0 }
  0xa8   : > { %7232 = vmatprep.subr.bf16.mxu1 %v7658_v7  ;;  %v373_v11 = vsel %vm334_vm1, %v371_v6, %v372_v63  ;;  %v427_v12 = vsel %vm334_vm1, 0.0, %v371_v6  ;;  %v7698_v63 = vld [vmem:[%s8963_s3 + $0x130] sm:$0xff]  }
  0xa9   : > { %7201 = vmatpush3.bf16.msra.mxu0 %v7657_v3  ;;  %v860_v3 = vsel %vm768_vm0, %v803_v56, 0.0  ;;  %v6417_v16 = vpack.c.bf16 %v373_v11, %v427_v12  ;;  %v7695_v56 = vld [vmem:[%s8963_s3 + $0xf8] sm:$0xff]   ;;  %v7713_v11 = vld [vmem:[%s8963_s3 + $0xd0] sm:$0xff]  }
  0xaa   : > { %7250 = vmatprep.subr.bf16.mxu0 %v7663_v10  ;;  %v6572_v5 = vpack.c.bf16 %v860_v3, %v804_v62  ;;  %v7700_v62 = vld [vmem:[#allocation2 + $0x170] sm:$0xff]   ;;  %v7705_v3 = vld [vmem:[%s8963_s3 + $0xe0] sm:$0xff]  }
  0xab   : > { %7233 = vmatpush3.bf16.msra.mxu1 %v7658_v7  ;;  %v7677_v7 = vld [vmem:[#allocation2 + $0x158] sm:$0xff]   ;;  %6606 = vst [vmem:[#allocation2 + $0x68] sm:$0xff] %v6417_v16   ;;  %v7716_v14 = vld [vmem:[#allocation2 + $0x190] sm:$0xff]   ;;  %v7719_v16 = vld [vmem:[%s8963_s3 + $0xc8] sm:$0xff]  }
  0xac   : > { %7282 = vmatprep.subr.bf16.mxu1 %v7664_v18  ;;  %7203 = vmatmul.mubr.bf16.vlgmr.msra.gmra.mxu0 %v7661_v13  ;;  %6637 = vst [vmem:[#allocation2 + $0x180] sm:$0xff] %v6572_v5   ;;  %v7681_v13 = vld [vmem:[%s8963_s3 + $0x10] sm:$0xff]   ;;  %v7702_v5 = vld [vmem:[#allocation2 + $0x178] sm:$0xff]  }
  0xad   : > { %7251 = vmatpush3.bf16.msra.mxu0 %v7663_v10  ;;  %7206 = vmatprep.mubr.bf16.mxu0 %v7667_v30  ;;  %v7676_v10 = vld [vmem:[#allocation2 + $0xf0] sm:$0xff]  }
  0xae   : > { %7235 = vmatmul.mubr.bf16.vlgmr.msra.gmra.mxu1 %v7662_v17  ;;  %7252 = vmatprep.subr.bf16.mxu0 %v7665_v23  ;;  %v807_v17 = vsel %vm768_vm0, %v805_v1, %v806_v9  ;;  %v7701_v1 = vld [vmem:[#allocation2 + $0x58] sm:$0xff]  }
  0xaf   : > { %7283 = vmatpush3.bf16.msra.mxu1 %v7664_v18  ;;  %7238 = vmatprep.mubr.bf16.mxu1 %v7668_v48  ;;  %v861_v18 = vsel %vm768_vm0, %v806_v9, 0.0 }
  0xb0   : > { %7284 = vmatprep.subr.bf16.mxu1 %v7666_v25  ;;  %v6577_v24 = vpack.c.bf16 %v861_v18, %v807_v17  ;;  %v7720_v18 = vld [vmem:[%s8963_s3 + $0x108] sm:$0xff]  }
  0xb1   : > { %7253 = vmatpush3.bf16.msra.mxu0 %v7665_v23  ;;  %v298_v23 = vld [vmem:[%s7903_s24 + $0xe0] sm:$0xff] }
  0xb2   : > { %7254 = vmatprep.subr.bf16.mxu0 %v7671_v36  ;;  %6638 = vst [vmem:[#allocation2 + $0x188] sm:$0xff] %v6577_v24   ;;  %v6507_v29 = vpack.c.bf16 %v299_v26, %v298_v23  ;;  %v811_v30 = vrot.slane %v298_v23, 1  ;;  %v377_v39 = vrot.slane %v298_v23, 7  ;;  %v7709_v9 = vld [vmem:[#allocation2 + $0x68] sm:$0xff]   ;;  %v7722_v23 = vld [vmem:[%s8963_s3 + $0x100] sm:$0xff]  }
  0xb3   : > { %7285 = vmatpush3.bf16.msra.mxu1 %v7666_v25  ;;  %v7678_v25 = vld [vmem:[#allocation2 + $0xf8] sm:$0xff]   ;;  %v7708_v6 = vld [vmem:[#allocation2 + $0x180] sm:$0xff]  }
  0xb4   : > { %7286 = vmatprep.subr.bf16.mxu1 %v7672_v38  ;;  %7207 = vmatmul.mubr.bf16.gmra.mxu0 %v7669_v43  ;;  %6624 = vst [vmem:[#allocation2 + $0x108] sm:$0xff] %v6507_v29   ;;  %v7691_v43 = vld [vmem:[#allocation2 + $0x40] sm:$0xff]   ;;  %v379_v45 = vsel %vm334_vm1, %v377_v39, %v378_v31  ;;  %v429_v46 = vsel %vm334_vm1, 0.0, %v377_v39  ;;  %v813_v52 = vsel %vm768_vm0, %v811_v30, %v812_v49  ;;  %v7728_v29 = vld [vmem:[%s8963_s3 + $0x1b8] sm:$0xff]   ;;  %v7736_v49 = vld [vmem:[%s8963_s3 + $0x1a8] sm:$0xff]  }
  0xb5   : > { %7255 = vmatpush3.bf16.msra.mxu0 %v7671_v36  ;;  %7210 = vmatprep.mubr.bf16.mxu0 %v7675_v60  ;;  %v6422_v36 = vpack.c.bf16 %v376_v32, %v428_v33  ;;  %v6427_v48 = vpack.c.bf16 %v379_v45, %v429_v46  ;;  %v6587_v55 = vpack.c.bf16 %v863_v53, %v813_v52  ;;  %v7699_v60 = vld [vmem:[#allocation2 + $0x50] sm:$0xff]   ;;  %v7735_v45 = vld [vmem:[%s8963_s3 + $0x168] sm:$0xff]   ;;  %v7737_v52 = vld [vmem:[%s8963_s3 + $0x160] sm:$0xff]  }
  0xb6   : > { %7239 = vmatmul.mubr.bf16.gmra.mxu1 %v7670_v57  ;;  %7256 = vmatprep.subr.bf16.mxu0 %v7673_v51  ;;  %v7696_v57 = vld [vmem:[%s8963_s3 + $0x138] sm:$0xff]   ;;  %v7729_v32 = vld [vmem:[%s8963_s3 + $0x170] sm:$0xff]  }
  0xb7   : > { %7287 = vmatpush3.bf16.msra.mxu1 %v7672_v38  ;;  %7242 = vmatprep.mubr.bf16.mxu1 %v7676_v10  ;;  %v7688_v38 = vld [vmem:[%s8963_s3 + $0x88] sm:$0xff]   ;;  %6607 = vst [vmem:[#allocation2 + $0x70] sm:$0xff] %v6422_v36   ;;  %6608 = vst [vmem:[#allocation2 + $0x78] sm:$0xff] %v6427_v48   ;;  %v7712_v10 = vld [vmem:[%s8963_s3 + $0x118] sm:$0xff]  }
  0xb8   : > { %7288 = vmatprep.subr.bf16.mxu1 %v7674_v58  ;;  %6640 = vst [vmem:[#allocation2 + $0x198] sm:$0xff] %v6587_v55   ;;  %v7726_v36 = vld [vmem:[#allocation2 + $0xe0] sm:$0xff]   ;;  %v7739_v55 = vld [vmem:[#allocation2 + $0x68] sm:$0xff]  }
  0xb9   : > { %7257 = vmatpush3.bf16.msra.mxu0 %v7673_v51  ;;  %v7692_v51 = vld [vmem:[#allocation2 + $0x160] sm:$0xff]  }
  0xba   : > { %7258 = vmatprep.subr.bf16.mxu0 %v7679_v4 }
  0xbb   : > { %7289 = vmatpush3.bf16.msra.mxu1 %v7674_v58  ;;  %v7686_v54 = vld [vmem:[#allocation2 + $0x108] sm:$0xff]  }
  0xbc   : > { %7290 = vmatprep.subr.bf16.mxu1 %v7680_v8  ;;  %7211 = vmatmul.mubr.bf16.gmra.mxu0 %v7677_v7  ;;  %v7693_v58 = vld [vmem:[#allocation2 + $0x48] sm:$0xff]   ;;  %v7706_v7 = vld [vmem:[%s8963_s3 + $0x120] sm:$0xff]  }
  0xbd   : > { %7259 = vmatpush3.bf16.msra.mxu0 %v7679_v4  ;;  %7214 = vmatprep.mubr.bf16.mxu0 %v7683_v20  ;;  %v7707_v4 = vld [vmem:[#allocation2 + $0x60] sm:$0xff]   ;;  %v7723_v20 = vld [vmem:[#allocation2 + $0x48] sm:$0xff]  }
  0xbe   : > { %7243 = vmatmul.mubr.bf16.gmra.mxu1 %v7678_v25  ;;  %7260 = vmatprep.subr.bf16.mxu0 %v7681_v13  ;;  %v7715_v12 = vld [vmem:[#allocation2 + $0x70] sm:$0xff]   ;;  %v7717_v17 = vld [vmem:[#allocation2 + $0x78] sm:$0xff]  }
  0xbf   : > { %7291 = vmatpush3.bf16.msra.mxu1 %v7680_v8  ;;  %7246 = vmatprep.mubr.bf16.mxu1 %v7684_v47  ;;  %v7711_v8 = vld [vmem:[%s8963_s3 + $0xd8] sm:$0xff]   ;;  %v7733_v47 = vld [vmem:[#allocation2 + $0x60] sm:$0xff]  }
  0xc0   : > { %7292 = vmatprep.subr.bf16.mxu1 %v7682_v19  ;;  %v7718_v21 = vld [vmem:[#allocation2 + $0x198] sm:$0xff]  }
  0xc1   : > { %7261 = vmatpush3.bf16.msra.mxu0 %v7681_v13  ;;  %v7710_v13 = vld [vmem:[#allocation2 + $0x188] sm:$0xff]   ;;  %v7727_v25 = vld [vmem:[%s8963_s3 + $0x178] sm:$0xff]  }
  0xc2   : > { %7262 = vmatprep.subr.bf16.mxu0 %v7687_v35 }
  0xc3   : > { %7293 = vmatpush3.bf16.msra.mxu1 %v7682_v19  ;;  %v7721_v19 = vld [vmem:[%s8963_s3 + $0xc0] sm:$0xff]  }
  0xc4   : > { %7294 = vmatprep.subr.bf16.mxu1 %v7688_v38  ;;  %7215 = vmatmul.mubr.bf16.gmra.mxu0 %v7685_v34 }
  0xc5   : > { %7263 = vmatpush3.bf16.msra.mxu0 %v7687_v35  ;;  %7266 = vmatprep.mubr.bf16.mxu0 %v7691_v43  ;;  %v7731_v35 = vld [vmem:[#allocation2 + $0x58] sm:$0xff]  }
  0xc6   : > { %7264 = vmatprep.subr.bf16.mxu0 %v7689_v40  ;;  %7247 = vmatmul.mubr.bf16.gmra.mxu1 %v7686_v54 }
  0xc7   : > { %7295 = vmatpush3.bf16.msra.mxu1 %v7688_v38  ;;  %7298 = vmatprep.mubr.bf16.mxu1 %v7692_v51 }
  0xc8   : > { %7296 = vmatprep.subr.bf16.mxu1 %v7690_v50 }
  0xc9   : > { %7265 = vmatpush3.bf16.msra.mxu0 %v7689_v40  ;;  %v7732_v40 = vld [vmem:[#allocation2 + $0xe8] sm:$0xff]  }
  0xca   : > { %7314 = vmatprep.subr.bf16.mxu0 %v7695_v56 }
  0xcb   : > { %7297 = vmatpush3.bf16.msra.mxu1 %v7690_v50 }
  0xcc   : > { %7346 = vmatprep.subr.bf16.mxu1 %v7696_v57  ;;  %7267 = vmatmul.mubr.bf16.vlgmr.msra.gmra.mxu0 %v7693_v58 }
  0xcd   : > { %7315 = vmatpush3.bf16.msra.mxu0 %v7695_v56  ;;  %7270 = vmatprep.mubr.bf16.mxu0 %v7699_v60  ;;  %v7734_v56 = vld [vmem:[#allocation2 + $0xf0] sm:$0xff]   ;;  %v7740_v60 = vld [vmem:[#allocation2 + $0xf8] sm:$0xff]  }
  0xce   : > { %7316 = vmatprep.subr.bf16.mxu0 %v7697_v59  ;;  %7299 = vmatmul.mubr.bf16.vlgmr.msra.gmra.mxu1 %v7694_v61  ;;  %v7738_v61 = vld [vmem:[%s8963_s3 + $0x1a0] sm:$0xff]  }
  0xcf   : > { %7347 = vmatpush3.bf16.msra.mxu1 %v7696_v57  ;;  %7302 = vmatprep.mubr.bf16.mxu1 %v7700_v62 }
  0xd0   : > { %7348 = vmatprep.subr.bf16.mxu1 %v7698_v63 }
  0xd1   : > { %7317 = vmatpush3.bf16.msra.mxu0 %v7697_v59 }
  0xd2   : > { %7318 = vmatprep.subr.bf16.mxu0 %v7703_v0 }
  0xd3   : > { %7349 = vmatpush3.bf16.msra.mxu1 %v7698_v63 }
  0xd4   : > { %7271 = vmatmul.mubr.bf16.gmra.mxu0 %v7701_v1  ;;  %7350 = vmatprep.subr.bf16.mxu1 %v7704_v2  ;;  %v7743_v1 = vld [vmem:[%s8963_s3 + $0x158] sm:$0xff]  }
  0xd5   : > { %7319 = vmatpush3.bf16.msra.mxu0 %v7703_v0  ;;  %7274 = vmatprep.mubr.bf16.mxu0 %v7707_v4 }
  0xd6   : > { %7320 = vmatprep.subr.bf16.mxu0 %v7705_v3  ;;  %7303 = vmatmul.mubr.bf16.gmra.mxu1 %v7702_v5  ;;  %v7744_v5 = vld [vmem:[%s8963_s3 + $0x198] sm:$0xff]  }
  0xd7   : > { %7351 = vmatpush3.bf16.msra.mxu1 %v7704_v2  ;;  %7306 = vmatprep.mubr.bf16.mxu1 %v7708_v6 }
  0xd8   : > { %7352 = vmatprep.subr.bf16.mxu1 %v7706_v7 }
  0xd9   : > { %7321 = vmatpush3.bf16.msra.mxu0 %v7705_v3  ;;  %v7741_v3 = vld [vmem:[#allocation2 + $0x70] sm:$0xff]  }
  0xda   : > { %7322 = vmatprep.subr.bf16.mxu0 %v7711_v8 }
  0xdb   : > { %7353 = vmatpush3.bf16.msra.mxu1 %v7706_v7  ;;  %v7742_v7 = vld [vmem:[#allocation2 + $0x100] sm:$0xff]  }
  0xdc   : > { %7275 = vmatmul.mubr.bf16.gmra.mxu0 %v7709_v9  ;;  %7354 = vmatprep.subr.bf16.mxu1 %v7712_v10  ;;  %v7745_v9 = vld [vmem:[%s8963_s3 + $0x150] sm:$0xff]  }
  0xdd   : > { %7323 = vmatpush3.bf16.msra.mxu0 %v7711_v8  ;;  %7278 = vmatprep.mubr.bf16.mxu0 %v7715_v12  ;;  %v7747_v12 = vld [vmem:[#allocation2 + $0x78] sm:$0xff]  }
  0xde   : > { %7324 = vmatprep.subr.bf16.mxu0 %v7713_v11  ;;  %7307 = vmatmul.mubr.bf16.gmra.mxu1 %v7710_v13 }
  0xdf   : > { %7355 = vmatpush3.bf16.msra.mxu1 %v7712_v10  ;;  %7310 = vmatprep.mubr.bf16.mxu1 %v7716_v14  ;;  %v7746_v14 = vld [vmem:[%s8963_s3 + $0x190] sm:$0xff]  }
  0xe0   : > { %7356 = vmatprep.subr.bf16.mxu1 %v7714_v15 }
  0xe1   : > { %7325 = vmatpush3.bf16.msra.mxu0 %v7713_v11 }
  0xe2   : > { %7326 = vmatprep.subr.bf16.mxu0 %v7719_v16 }
  0xe3   : > { %7357 = vmatpush3.bf16.msra.mxu1 %v7714_v15  ;;  %v300_v15 = vld [vmem:[%s7903_s24 + $0xf0] sm:$0xff] }
  0xe4   : > { %7279 = vmatmul.mubr.bf16.gmra.mxu0 %v7717_v17  ;;  %7358 = vmatprep.subr.bf16.mxu1 %v7720_v18 }
  0xe5   : > { %7327 = vmatpush3.bf16.msra.mxu0 %v7719_v16  ;;  %7330 = vmatprep.mubr.bf16.mxu0 %v7723_v20  ;;  %v301_v16 = vld [vmem:[%s7903_s24 + $0xf8] sm:$0xff]  ;;  %v380_v20 = vrot.slane %v300_v15, 7 }
  0xe6   : > { %7328 = vmatprep.subr.bf16.mxu0 %v7721_v19  ;;  %7311 = vmatmul.mubr.bf16.gmra.mxu1 %v7718_v21  ;;  %v381_v21 = vrot.slane %v301_v16, 7 }
  0xe7   : > { %7359 = vmatpush3.bf16.msra.mxu1 %v7720_v18  ;;  %7362 = vmatprep.mubr.bf16.mxu1 %v7724_v22  ;;  %v814_v22 = vrot.slane %v300_v15, 1 }
  0xe8   : > { %7360 = vmatprep.subr.bf16.mxu1 %v7722_v23 }
  0xe9   : > { %7329 = vmatpush3.bf16.msra.mxu0 %v7721_v19  ;;  %v7748_v19 = vld [vmem:[#allocation2 + $0x108] sm:$0xff]  }
  0xea   : > { %7378 = vmatprep.subr.bf16.mxu0 %v7727_v25 }
  0xeb   : > { %7361 = vmatpush3.bf16.msra.mxu1 %v7722_v23 }
  0xec   : > { %v6948_v24 = vpop.f32.mrf.mxu0  ;;  %7331 = vmatmul.mubr.bf16.vlgmr.msra.gmra.mxu0 %v7725_v27  ;;  %7410 = vmatprep.subr.bf16.mxu1 %v7728_v29  ;;  %v382_v27 = vsel %vm334_vm1, %v380_v20, %v381_v21 }
  0xed   : > { %v6980_v26 = vpop.f32.mrf.mxu1  ;;  %7379 = vmatpush3.bf16.msra.mxu0 %v7727_v25  ;;  %7334 = vmatprep.mubr.bf16.mxu0 %v7731_v35 }
  0xee   : > { %v8308_v28 = vadd.f32 %v6980_v26, %v6948_v24  ;;  %v1225_v30 = vpop.f32.mrf.mxu0  ;;  %7380 = vmatprep.subr.bf16.mxu0 %v7729_v32  ;;  %7363 = vmatmul.mubr.bf16.vlgmr.msra.gmra.mxu1 %v7726_v36  ;;  %v6512_v24 = vpack.c.bf16 %v301_v16, %v300_v15  ;;  %v7764_v15 = vld [vmem:[#allocation2 + $0x60] sm:$0xff]  }
  0xef   : > { %v1418_v31 = vpop.f32.mrf.mxu1  ;;  %7411 = vmatpush3.bf16.msra.mxu1 %v7728_v29  ;;  %7366 = vmatprep.mubr.bf16.mxu1 %v7732_v40  ;;  %v430_v29 = vsel %vm334_vm1, 0.0, %v380_v20 }
  0xf0   : > { %v8316_v33 = vadd.f32 %v1418_v31, %v1225_v30  ;;  %v6949_v34 = vpop.f32.mrf.mxu0  ;;  %7412 = vmatprep.subr.bf16.mxu1 %v7730_v41  ;;  %v7751_v30 = vld [vmem:[%s8963_s3 + $0x148] sm:$0xff]   ;;  %v6432_v31 = vpack.c.bf16 %v382_v27, %v430_v29  ;;  %6625 = vst [vmem:[#allocation2 + $0x110] sm:$0xff] %v6512_v24  }
  0xf1   : > { %v6981_v37 = vpop.f32.mrf.mxu1  ;;  %7381 = vmatpush3.bf16.msra.mxu0 %v7729_v32  ;;  %v815_v32 = vrot.slane %v301_v16, 1  ;;  %v7762_v16 = vld [vmem:[%s8963_s3 + $0x230] sm:$0xff]   ;;  %v7768_v27 = vld [vmem:[%s8963_s3 + $0x228] sm:$0xff]  }
  0xf2   : > { %v8318_v38 = vadd.f32 %v6981_v37, %v6949_v34  ;;  %v1228_v39 = vpop.f32.mrf.mxu0  ;;  %7382 = vmatprep.subr.bf16.mxu0 %v7735_v45  ;;  %6609 = vst [vmem:[#allocation2 + $0x80] sm:$0xff] %v6432_v31   ;;  %v7752_v37 = vld [vmem:[%s8963_s3 + $0x188] sm:$0xff]  }
  0xf3   : > { %v1421_v42 = vpop.f32.mrf.mxu1  ;;  %7413 = vmatpush3.bf16.msra.mxu1 %v7730_v41  ;;  %v864_v40 = vsel %vm768_vm0, %v815_v32, 0.0 }
  0xf4   : > { %v8323_v43 = vadd.f32 %v1421_v42, %v1228_v39  ;;  %v6952_v44 = vpop.f32.mrf.mxu0  ;;  %7335 = vmatmul.mubr.bf16.gmra.mxu0 %v7733_v47  ;;  %7414 = vmatprep.subr.bf16.mxu1 %v7736_v49  ;;  %v816_v39 = vsel %vm768_vm0, %v814_v22, %v815_v32  ;;  %v7761_v22 = vld [vmem:[%s8963_s3 + $0x1f0] sm:$0xff]  }
  0xf5   : > { %v6984_v46 = vpop.f32.mrf.mxu1  ;;  %7383 = vmatpush3.bf16.msra.mxu0 %v7735_v45  ;;  %7338 = vmatprep.mubr.bf16.mxu0 %v7739_v55  ;;  %v6592_v45 = vpack.c.bf16 %v864_v40, %v816_v39 }
  0xf6   : > { %v8328_v48 = vadd.f32 %v6984_v46, %v6952_v44  ;;  %v1241_v50 = vpop.f32.mrf.mxu0  ;;  %7384 = vmatprep.subr.bf16.mxu0 %v7737_v52  ;;  %7367 = vmatmul.mubr.bf16.gmra.mxu1 %v7734_v56  ;;  %v7753_v44 = vld [vmem:[%s8963_s3 + $0x140] sm:$0xff]  }
  0xf7   : > { %v1434_v51 = vpop.f32.mrf.mxu1  ;;  %7415 = vmatpush3.bf16.msra.mxu1 %v7736_v49  ;;  %7370 = vmatprep.mubr.bf16.mxu1 %v7740_v60  ;;  %v7754_v49 = vld [vmem:[%s8963_s3 + $0x180] sm:$0xff]   ;;  %6641 = vst [vmem:[#allocation2 + $0x1a0] sm:$0xff] %v6592_v45   ;;  %v7750_v55 = vld [vmem:[#allocation2 + $0x110] sm:$0xff]  }
  0xf8   : > { %v8336_v53 = vadd.f32 %v1434_v51, %v1241_v50  ;;  %v6953_v54 = vpop.f32.mrf.mxu0  ;;  %7416 = vmatprep.subr.bf16.mxu1 %v7738_v61 }
  0xf9   : > { %v6985_v57 = vpop.f32.mrf.mxu1  ;;  %7385 = vmatpush3.bf16.msra.mxu0 %v7737_v52  ;;  %v7755_v52 = vld [vmem:[#allocation2 + $0x168] sm:$0xff]  }
  0xfa   : > { %v8338_v58 = vadd.f32 %v6985_v57, %v6953_v54  ;;  %v1244_v59 = vpop.f32.mrf.mxu0  ;;  %7386 = vmatprep.subr.bf16.mxu0 %v7743_v1  ;;  %v7756_v54 = vld [vmem:[#allocation2 + $0x50] sm:$0xff]  }
  0xfb   : > { %v1437_v62 = vpop.f32.mrf.mxu1  ;;  %7417 = vmatpush3.bf16.msra.mxu1 %v7738_v61  ;;  %v7759_v61 = vld [vmem:[%s8963_s3 + $0x1f8] sm:$0xff]  }
  0xfc   : > { %v8343_v63 = vadd.f32 %v1437_v62, %v1244_v59  ;;  %v6956_v0 = vpop.f32.mrf.mxu0  ;;  %7339 = vmatmul.mubr.bf16.gmra.mxu0 %v7741_v3  ;;  %7418 = vmatprep.subr.bf16.mxu1 %v7744_v5  ;;  %v7749_v62 = vld [vmem:[#allocation2 + $0x80] sm:$0xff]  }
  0xfd   : > { %v6988_v2 = vpop.f32.mrf.mxu1  ;;  %7387 = vmatpush3.bf16.msra.mxu0 %v7743_v1  ;;  %7342 = vmatprep.mubr.bf16.mxu0 %v7747_v12 }
  0xfe   : > { %v8348_v4 = vadd.f32 %v6988_v2, %v6956_v0  ;;  %v1257_v6 = vpop.f32.mrf.mxu0  ;;  %7388 = vmatprep.subr.bf16.mxu0 %v7745_v9  ;;  %7371 = vmatmul.mubr.bf16.gmra.mxu1 %v7742_v7 }
  0xff   : > { %v1450_v8 = vpop.f32.mrf.mxu1  ;;  %7419 = vmatpush3.bf16.msra.mxu1 %v7744_v5  ;;  %7374 = vmatprep.mubr.bf16.mxu1 %v7748_v19 }
 0x100   : > { %v8356_v10 = vadd.f32 %v1450_v8, %v1257_v6  ;;  %v6957_v11 = vpop.f32.mrf.mxu0  ;;  %7420 = vmatprep.subr.bf16.mxu1 %v7746_v14 }
 0x101   : > { %v6989_v13 = vpop.f32.mrf.mxu1  ;;  %7389 = vmatpush3.bf16.msra.mxu0 %v7745_v9  ;;  %v7757_v9 = vld [vmem:[#allocation2 + $0x170] sm:$0xff]  }
 0x102   : > { %v8363_v17 = vadd.f32 %v6989_v13, %v6957_v11  ;;  %v1260_v18 = vpop.f32.mrf.mxu0  ;;  %7390 = vmatprep.subr.bf16.mxu0 %v7751_v30  ;;  %v7758_v11 = vld [vmem:[#allocation2 + $0x58] sm:$0xff]  }
 0x103   : > { %v1453_v23 = vpop.f32.mrf.mxu1  ;;  %7421 = vmatpush3.bf16.msra.mxu1 %v7746_v14 }
 0x104   : > { %v8365_v25 = vadd.f32 %v1453_v23, %v1260_v18  ;;  %v6960_v26 = vpop.f32.mrf.mxu0  ;;  %7422 = vmatprep.subr.bf16.mxu1 %v7752_v37  ;;  %7343 = vmatmul.mubr.bf16.gmra.mxu0 %v7749_v62 }
 0x105   : > { %v6992_v34 = vpop.f32.mrf.mxu1  ;;  %7391 = vmatpush3.bf16.msra.mxu0 %v7751_v30  ;;  %7394 = vmatprep.mubr.bf16.mxu0 %v7755_v52  ;;  %v7766_v30 = vld [vmem:[#allocation2 + $0x68] sm:$0xff]  }
 0x106   : > { %v1273_v35 = vpop.f32.mrf.mxu0  ;;  %v8372_v36 = vadd.f32 %v6992_v34, %v6960_v26  ;;  %7392 = vmatprep.subr.bf16.mxu0 %v7753_v44  ;;  %7375 = vmatmul.mubr.bf16.gmra.mxu1 %v7750_v55  ;;  %v7765_v34 = vld [vmem:[#allocation2 + $0x180] sm:$0xff]  }
 0x107   : > { %v1466_v41 = vpop.f32.mrf.mxu1  ;;  %7423 = vmatpush3.bf16.msra.mxu1 %v7752_v37  ;;  %7426 = vmatprep.mubr.bf16.mxu1 %v7756_v54 }
 0x108   : > { %v6961_v42 = vpop.f32.mrf.mxu0  ;;  %v8382_v46 = vadd.f32 %v1466_v41, %v1273_v35  ;;  %7424 = vmatprep.subr.bf16.mxu1 %v7754_v49  ;;  %v7772_v41 = vld [vmem:[#allocation2 + $0x70] sm:$0xff]  }
 0x109   : > { %v6993_v47 = vpop.f32.mrf.mxu1  ;;  %7393 = vmatpush3.bf16.msra.mxu0 %v7753_v44 }
 0x10a   : > { %v1276_v50 = vpop.f32.mrf.mxu0  ;;  %v8387_v51 = vadd.f32 %v6993_v47, %v6961_v42  ;;  %7442 = vmatprep.subr.bf16.mxu0 %v7759_v61  ;;  %v7770_v42 = vld [vmem:[%s8963_s3 + $0x220] sm:$0xff]   ;;  %v7771_v47 = vld [vmem:[#allocation2 + $0x188] sm:$0xff]  }
 0x10b   : > { %v1469_v56 = vpop.f32.mrf.mxu1  ;;  %7425 = vmatpush3.bf16.msra.mxu1 %v7754_v49 }
 0x10c   : > { %v7012_v57 = vpop.f32.mrf.mxu0  ;;  %v8389_v59 = vadd.f32 %v1469_v56, %v1276_v50  ;;  %7395 = vmatmul.mubr.bf16.vlgmr.msra.gmra.mxu0 %v7757_v9 }
 0x10d   : > { %v1709_v60 = vadd.f32 %v7012_v57, %v8308_v28  ;;  %v7760_v28 = vld [vmem:[%s8963_s3 + $0x238] sm:$0xff]   ;;  %7443 = vmatpush3.bf16.msra.mxu0 %v7759_v61 }
 0x10e   : > { %v7044_v0 = vpop.f32.mrf.mxu1  ;;  %v1644_v1 = vpop.f32.mrf.mxu0  ;;  %7474 = vmatprep.subr.bf16.mxu1 %v7760_v28  ;;  %7427 = vmatmul.mubr.bf16.vlgmr.msra.gmra.mxu1 %v7758_v11 }
 0x10f   : > { %v8395_v2 = vadd.f32 %v7044_v0, %v1709_v60  ;;  %v1707_v3 = vadd.f32 %v1644_v1, %v8316_v33  ;;  %7475 = vmatpush3.bf16.msra.mxu1 %v7760_v28  ;;  %7430 = vmatprep.mubr.bf16.mxu1 %v7764_v15  ;;  %v7774_v60 = vld [vmem:[#allocation2 + $0x78] sm:$0xff]   ;;  %v7773_v0 = vld [vmem:[#allocation2 + $0x190] sm:$0xff]  }
 0x110   : > { %v1887_v5 = vpop.f32.mrf.mxu1  ;;  %v7013_v6 = vpop.f32.mrf.mxu0  ;;  %7476 = vmatprep.subr.bf16.mxu1 %v7762_v16  ;;  %7444 = vmatprep.subr.bf16.mxu0 %v7761_v22 }
 0x111   : > { %v8401_v7 = vadd.f32 %v1887_v5, %v1707_v3  ;;  %v1710_v8 = vadd.f32 %v7013_v6, %v8318_v38  ;;  %v7763_v38 = vld [vmem:[#allocation2 + $0x178] sm:$0xff]   ;;  %7445 = vmatpush3.bf16.msra.mxu0 %v7761_v22  ;;  %v7780_v6 = vld [vmem:[#allocation2 + $0x80] sm:$0xff]  }
 0x112   : > { %v7045_v12 = vpop.f32.mrf.mxu1  ;;  %v1647_v13 = vpop.f32.mrf.mxu0  ;;  %7398 = vmatprep.mubr.bf16.mxu0 %v7763_v38  ;;  %v7781_v38 = vld [vmem:[#allocation2 + $0x1a0] sm:$0xff]  }
 0x113   : > { %v8404_v33 = vadd.f32 %v7045_v12, %v1710_v8  ;;  %v1708_v14 = vadd.f32 %v1647_v13, %v8323_v43  ;;  %7477 = vmatpush3.bf16.msra.mxu1 %v7762_v16  ;;  %v7778_v8 = vld [vmem:[%s8963_s3 + $0x210] sm:$0xff]   ;;  %v7779_v12 = vld [vmem:[#allocation2 + $0x198] sm:$0xff]   ;;  %v7784_v16 = vld [vmem:[%s8963_s3 + $0x208] sm:$0xff]  }
 0x114   : > { %v1890_v18 = vpop.f32.mrf.mxu1  ;;  %v7016_v19 = vpop.f32.mrf.mxu0  ;;  %7478 = vmatprep.subr.bf16.mxu1 %v7768_v27  ;;  %7399 = vmatmul.mubr.bf16.gmra.mxu0 %v7765_v34 }
 0x115   : > { %v8410_v20 = vadd.f32 %v1890_v18, %v1708_v14  ;;  %v1713_v21 = vadd.f32 %v7016_v19, %v8328_v48  ;;  %7402 = vmatprep.mubr.bf16.mxu0 %v7771_v47  ;;  %v7789_v47 = vld [vmem:[#allocation2 + $0xe8] sm:$0xff]  }
 0x116   : > { %v7048_v23 = vpop.f32.mrf.mxu1  ;;  %v1660_v43 = vpop.f32.mrf.mxu0  ;;  %7431 = vmatmul.mubr.bf16.gmra.mxu1 %v7766_v30 }
 0x117   : > { %v8416_v24 = vadd.f32 %v7048_v23, %v1713_v21  ;;  %v1711_v26 = vadd.f32 %v1660_v43, %v8336_v53  ;;  %v7767_v53 = vld [vmem:[%s8963_s3 + $0x1e8] sm:$0xff]   ;;  %7479 = vmatpush3.bf16.msra.mxu1 %v7768_v27  ;;  %7434 = vmatprep.mubr.bf16.mxu1 %v7772_v41  ;;  %v7788_v43 = vld [vmem:[#allocation2 + $0x170] sm:$0xff]   ;;  %v7786_v27 = vld [vmem:[%s8963_s3 + $0x200] sm:$0xff]  }
 0x118   : > { %v1903_v48 = vpop.f32.mrf.mxu1  ;;  %v7017_v29 = vpop.f32.mrf.mxu0  ;;  %7446 = vmatprep.subr.bf16.mxu0 %v7767_v53  ;;  %7480 = vmatprep.subr.bf16.mxu1 %v7770_v42  ;;  %v7783_v21 = vld [vmem:[%s8963_s3 + $0x1c8] sm:$0xff]   ;;  %v7790_v41 = vld [vmem:[#allocation2 + $0x178] sm:$0xff]  }
 0x119   : > { %v8422_v31 = vadd.f32 %v1903_v48, %v1711_v26  ;;  %v1714_v32 = vadd.f32 %v7017_v29, %v8338_v58  ;;  %7447 = vmatpush3.bf16.msra.mxu0 %v7767_v53  ;;  %v7787_v48 = vld [vmem:[#allocation2 + $0xe0] sm:$0xff]  }
 0x11a   : > { %v7049_v35 = vpop.f32.mrf.mxu1  ;;  %v1663_v37 = vpop.f32.mrf.mxu0 }
 0x11b   : > { %v8428_v39 = vadd.f32 %v7049_v35, %v1714_v32  ;;  %v1712_v40 = vadd.f32 %v1663_v37, %v8343_v63  ;;  %v7769_v63 = vld [vmem:[%s8963_s3 + $0x1e0] sm:$0xff]   ;;  %7481 = vmatpush3.bf16.msra.mxu1 %v7770_v42 }
 0x11c   : > { %v1906_v58 = vpop.f32.mrf.mxu1  ;;  %v7020_v44 = vpop.f32.mrf.mxu0  ;;  %7448 = vmatprep.subr.bf16.mxu0 %v7769_v63  ;;  %7403 = vmatmul.mubr.bf16.gmra.mxu0 %v7773_v0  ;;  %v7796_v0 = vld [vmem:[#allocation2 + $0x190] sm:$0xff]  }
 0x11d   : > { %v8434_v45 = vadd.f32 %v1906_v58, %v1712_v40  ;;  %v1717_v49 = vadd.f32 %v7020_v44, %v8348_v4  ;;  %v7776_v4 = vld [vmem:[%s8963_s3 + $0x218] sm:$0xff]   ;;  %7449 = vmatpush3.bf16.msra.mxu0 %v7769_v63  ;;  %7406 = vmatprep.mubr.bf16.mxu0 %v7779_v12  ;;  %v7792_v44 = vld [vmem:[#allocation2 + $0x180] sm:$0xff]   ;;  %v7791_v63 = vld [vmem:[#allocation2 + $0xf0] sm:$0xff]  }
 0x11e   : > { %v7052_v50 = vpop.f32.mrf.mxu1  ;;  %v1676_v52 = vpop.f32.mrf.mxu0  ;;  %7482 = vmatprep.subr.bf16.mxu1 %v7776_v4  ;;  %7435 = vmatmul.mubr.bf16.gmra.mxu1 %v7774_v60  ;;  %v7798_v12 = vld [vmem:[#allocation2 + $0x198] sm:$0xff]  }
 0x11f   : > { %v8440_v54 = vadd.f32 %v7052_v50, %v1717_v49  ;;  %v1715_v55 = vadd.f32 %v1676_v52, %v8356_v10  ;;  %v7775_v10 = vld [vmem:[%s8963_s3 + $0x1d8] sm:$0xff]   ;;  %7483 = vmatpush3.bf16.msra.mxu1 %v7776_v4  ;;  %7438 = vmatprep.mubr.bf16.mxu1 %v7780_v6 }
 0x120   : > { %v1919_v56 = vpop.f32.mrf.mxu1  ;;  %v7021_v57 = vpop.f32.mrf.mxu0  ;;  %7450 = vmatprep.subr.bf16.mxu0 %v7775_v10  ;;  %7484 = vmatprep.subr.bf16.mxu1 %v7778_v8 }
 0x121   : > { %v8446_v61 = vadd.f32 %v1919_v56, %v1715_v55  ;;  %v1718_v62 = vadd.f32 %v7021_v57, %v8363_v17  ;;  %7451 = vmatpush3.bf16.msra.mxu0 %v7775_v10  ;;  %v7794_v57 = vld [vmem:[#allocation2 + $0x188] sm:$0xff]   ;;  %v7793_v10 = vld [vmem:[#allocation2 + $0xf8] sm:$0xff]  }
 0x122   : > { %v7053_v1 = vpop.f32.mrf.mxu1  ;;  %v1679_v3 = vpop.f32.mrf.mxu0 }
 0x123   : > { %v8452_v28 = vadd.f32 %v7053_v1, %v1718_v62  ;;  %v1716_v5 = vadd.f32 %v1679_v3, %v8365_v25  ;;  %v7777_v25 = vld [vmem:[%s8963_s3 + $0x1d0] sm:$0xff]   ;;  %7485 = vmatpush3.bf16.msra.mxu1 %v7778_v8  ;;  %v7795_v3 = vld [vmem:[#allocation2 + $0x100] sm:$0xff]  }
 0x124   : > { %v1922_v17 = vpop.f32.mrf.mxu1  ;;  %v7024_v9 = vpop.f32.mrf.mxu0  ;;  %7452 = vmatprep.subr.bf16.mxu0 %v7777_v25  ;;  %7486 = vmatprep.subr.bf16.mxu1 %v7784_v16 }
 0x125   : > { %v8458_v11 = vadd.f32 %v1922_v17, %v1716_v5  ;;  %v1721_v13 = vadd.f32 %v7024_v9, %v8372_v36  ;;  %v7782_v36 = vld [vmem:[#allocation2 + $0x88] sm:$0xff]   ;;  %7453 = vmatpush3.bf16.msra.mxu0 %v7777_v25 }
 0x126   : > { %v1692_v14 = vpop.f32.mrf.mxu0  ;;  %7439 = vmatmul.mubr.bf16.gmra.mxu1 %v7782_v36  ;;  %7454 = vmatprep.subr.bf16.mxu0 %v7783_v21 }
 0x127   : > { %v1719_v15 = vadd.f32 %v1692_v14, %v8382_v46  ;;  %v7056_v46 = vpop.f32.mrf.mxu1  ;;  %7487 = vmatpush3.bf16.msra.mxu1 %v7784_v16  ;;  %7490 = vmatprep.mubr.bf16.mxu1 %v7788_v43  ;;  %v7800_v14 = vld [vmem:[#allocation2 + $0x1a0] sm:$0xff]  }
 0x128   : > { %v7025_v18 = vpop.f32.mrf.mxu0  ;;  %v8473_v26 = vadd.f32 %v7056_v46, %v1721_v13  ;;  %7407 = vmatmul.mubr.bf16.gmra.mxu0 %v7781_v38  ;;  %7488 = vmatprep.subr.bf16.mxu1 %v7786_v27  ;;  %v7802_v46 = vld [vmem:[#allocation2 + $0x1a8] sm:$0xff]  }
 0x129   : > { %v1722_v19 = vadd.f32 %v7025_v18, %v8387_v51  ;;  %v1935_v51 = vpop.f32.mrf.mxu1  ;;  %7455 = vmatpush3.bf16.msra.mxu0 %v7783_v21  ;;  %7458 = vmatprep.mubr.bf16.mxu0 %v7787_v48  ;;  %v7799_v18 = vld [vmem:[#allocation2 + $0x110] sm:$0xff]  }
 0x12a   : > { %v1695_v22 = vpop.f32.mrf.mxu0  ;;  %v8480_v30 = vadd.f32 %v1935_v51, %v1719_v15  ;;  %v7797_v15 = vld [vmem:[#allocation2 + $0x108] sm:$0xff]  }
 0x12b   : > { %v1720_v23 = vadd.f32 %v1695_v22, %v8389_v59  ;;  %v7785_v59 = vld [vmem:[%s8963_s3 + $0x1c0] sm:$0xff]   ;;  %v7057_v32 = vpop.f32.mrf.mxu1  ;;  %7489 = vmatpush3.bf16.msra.mxu1 %v7786_v27  ;;  %v7801_v27 = vld [vmem:[#allocation2 + $0x118] sm:$0xff]  }
 0x12c   : > { %v8478_v29 = vpop.f32.mrf.mxu0  ;;  %8969 = vst [vmem:[#allocation3_spill] sm:$0xff] %v8480_v30  ;;  %v8487_v53 = vadd.f32 %v7057_v32, %v1722_v19  ;;  %7456 = vmatprep.subr.bf16.mxu0 %v7785_v59 }
 0x12d   : > { %v1938_v35 = vpop.f32.mrf.mxu1  ;;  %7457 = vmatpush3.bf16.msra.mxu0 %v7785_v59 }
 0x12e   : > { %v8485_v34 = vpop.f32.mrf.mxu0  ;;  %8970 = vst [vmem:[#allocation4_spill] sm:$0xff] %v8487_v53  ;;  %v8491_v40 = vadd.f32 %v1938_v35, %v1720_v23  ;;  %7491 = vmatmul.mubr.bf16.vlgmr.msra.gmra.mxu1 %v7790_v41  ;;  %v2195_v53 = vadd.f32 %v8478_v29, %v8395_v2 }
 0x12f   : > { %v8493_v42 = vpop.f32.mrf.mxu1  ;;  %7494 = vmatprep.mubr.bf16.mxu1 %v7792_v44 }
 0x130   : > { %v8489_v37 = vpop.f32.mrf.mxu0  ;;  %8971 = vst [vmem:[#allocation5_spill] sm:$0xff] %v8491_v40  ;;  %7459 = vmatmul.mubr.bf16.vlgmr.msra.gmra.mxu0 %v7789_v47 }
 0x131   : > { %v8497_v49 = vpop.f32.mrf.mxu1  ;;  %7462 = vmatprep.mubr.bf16.mxu0 %v7791_v63 }
 0x132   : > { %v8495_v58 = vpop.f32.mrf.mxu0 }
 0x133   : > { %v8501_v52 = vpop.f32.mrf.mxu1  ;;  %v2194_v29 = vadd.f32 %v8495_v58, %v8410_v20 }
 0x134   : > { %v8499_v50 = vpop.f32.mrf.mxu0 }
 0x135   : > { %v8505_v4 = vpop.f32.mrf.mxu1 }
 0x136   : > { %v8503_v55 = vpop.f32.mrf.mxu0  ;;  %7495 = vmatmul.mubr.bf16.gmra.mxu1 %v7794_v57  ;;  %v2437_v20 = vadd.f32 %v8505_v4, %v2194_v29 }
 0x137   : > { %v8509_v60 = vpop.f32.mrf.mxu1  ;;  %7498 = vmatprep.mubr.bf16.mxu1 %v7796_v0 }
 0x138   : > { %v8507_v56 = vpop.f32.mrf.mxu0  ;;  %7463 = vmatmul.mubr.bf16.gmra.mxu0 %v7793_v10 }
 0x139   : > { %v8513_v1 = vpop.f32.mrf.mxu1  ;;  %7466 = vmatprep.mubr.bf16.mxu0 %v7795_v3 }
 0x13a   : > { %v8511_v62 = vpop.f32.mrf.mxu0 }
 0x13b   : > { %v8517_v6 = vpop.f32.mrf.mxu1 }
 0x13c   : > { %v8515_v5 = vpop.f32.mrf.mxu0 }
 0x13d   : > { %v8521_v17 = vpop.f32.mrf.mxu1 }
 0x13e   : > { %v8519_v8 = vpop.f32.mrf.mxu0  ;;  %7499 = vmatmul.mubr.bf16.gmra.mxu1 %v7798_v12 }
 0x13f   : > { %v8525_v13 = vpop.f32.mrf.mxu1  ;;  %7502 = vmatprep.mubr.bf16.mxu1 %v7800_v14 }
 0x140   : > { %v8523_v9 = vpop.f32.mrf.mxu0  ;;  %7467 = vmatmul.mubr.bf16.gmra.mxu0 %v7797_v15 }
 0x141   : > { %v8529_v16 = vpop.f32.mrf.mxu1  ;;  %7470 = vmatprep.mubr.bf16.mxu0 %v7799_v18 }
 0x142   : > { %v8527_v25 = vpop.f32.mrf.mxu0 }
 0x143   : > { %v8533_v19 = vpop.f32.mrf.mxu1 }
 0x144   : > { %v8531_v36 = vpop.f32.mrf.mxu0 }
 0x145   : > { %v8537_v21 = vpop.f32.mrf.mxu1 }
 0x146   : > { %v8535_v38 = vpop.f32.mrf.mxu0  ;;  %8973 = vst [vmem:[#allocation7_spill] sm:$0xff] %v8537_v21  ;;  %7503 = vmatmul.mubr.bf16.gmra.mxu1 %v7802_v46 }
 0x147   : > { %8972 = vst [vmem:[#allocation6_spill] sm:$0xff] %v8535_v38  ;;  %v8541_v23 = vpop.f32.mrf.mxu1  ;;  %v2193_v38 = vadd.f32 %v8485_v34, %v8401_v7 }
 0x148   : > { %v8539_v22 = vpop.f32.mrf.mxu0  ;;  %8975 = vst [vmem:[#allocation9_spill] sm:$0xff] %v8541_v23  ;;  %7471 = vmatmul.mubr.bf16.gmra.mxu0 %v7801_v27 }
 0x149   : > { %8974 = vst [vmem:[#allocation8_spill] sm:$0xff] %v8539_v22  ;;  %v8545_v51 = vpop.f32.mrf.mxu1  ;;  %v2436_v2 = vadd.f32 %v8497_v49, %v2193_v38  ;;  %v2197_v49 = vadd.f32 %v8503_v55, %v8422_v31 }
 0x14a   : > { %v8543_v43 = vpop.f32.mrf.mxu0  ;;  %8977 = vst [vmem:[#allocation11_spill] sm:$0xff] %v8545_v51 }
 0x14b   : > { %8976 = vst [vmem:[#allocation10_spill] sm:$0xff] %v8543_v43  ;;  %v8547_v59 = vpop.f32.mrf.mxu1 }
 0x14c   : > { %v7140_v48 = vpop.f32.mrf.mxu0  ;;  %8978 = vst [vmem:[#allocation12_spill] sm:$0xff] %v8547_v59 }
 0x14d   : > { %v8549_v35 = vpop.f32.mrf.mxu1 }
 0x14e   : > { %v2616_v32 = vpop.f32.mrf.mxu0  ;;  %8979 = vst [vmem:[#allocation13_spill] sm:$0xff] %v8549_v35 }
 0x14f   : > { %v7172_v44 = vpop.f32.mrf.mxu1 }
 0x150   : > { %v7141_v41 = vpop.f32.mrf.mxu0 }
 0x151   : > { %v2859_v63 = vpop.f32.mrf.mxu1 }
 0x152   : > { %v2619_v47 = vpop.f32.mrf.mxu0 }
 0x153   : > { %v7173_v0 = vpop.f32.mrf.mxu1 }
 0x154   : > { %v7144_v57 = vpop.f32.mrf.mxu0 }
 0x155   : > { %v2862_v3 = vpop.f32.mrf.mxu1 }
 0x156   : > { %v2632_v10 = vpop.f32.mrf.mxu0 }
 0x157   : > { %v8551_v14 = vpop.f32.mrf.mxu1 }
 0x158   : > { %v7145_v12 = vpop.f32.mrf.mxu0 }
 0x159   : > { %v8555_v18 = vpop.f32.mrf.mxu1 }
 0x15a   : > { %v8553_v15 = vpop.f32.mrf.mxu0 }
 0x15b   : > { %v8559_v27 = vpop.f32.mrf.mxu1 }
 0x15c   : > { %v8557_v46 = vpop.f32.mrf.mxu0 }
 0x15d   : > { %v8563_v59 = vpop.f32.mrf.mxu1 }
 0x15e   : > { %v8561_v35 = vpop.f32.mrf.mxu0 }
 0x15f   : > { %v8567_v40 = vpop.f32.mrf.mxu1 }
 0x160   : > { %v8565_v43 = vpop.f32.mrf.mxu0  ;;  %8981 = vst [vmem:[#allocation15_spill] sm:$0xff] %v8567_v40  ;;  %v2196_v40 = vadd.f32 %v8489_v37, %v8404_v33  ;;  %v2199_v33 = vadd.f32 %v8499_v50, %v8416_v24  ;;  %v2679_v37 = vadd.f32 %v2616_v32, %v2436_v2  ;;  %v2440_v32 = vadd.f32 %v8513_v1, %v2197_v49 }
 0x161   : > { %8980 = vst [vmem:[#allocation14_spill] sm:$0xff] %v8565_v43  ;;  %v8569_v51 = vpop.f32.mrf.mxu1  ;;  %v2438_v43 = vadd.f32 %v8493_v42, %v2195_v53 }
 0x162   : > { %8982 = vst [vmem:[#allocation16_spill] sm:$0xff] %v8569_v51  ;;  %v8571_v22 = vpop.f32.mrf.mxu0  ;;  %v2439_v53 = vadd.f32 %v8501_v52, %v2196_v40  ;;  %v2200_v40 = vadd.f32 %v8507_v56, %v8428_v39  ;;  %v2442_v31 = vadd.f32 %v8509_v60, %v2199_v33  ;;  %v2922_v50 = vadd.f32 %v2859_v63, %v2679_v37 }
 0x163   : > { %8983 = vst [vmem:[#allocation17_spill] sm:$0xff] %v8571_v22  ;;  %v8575_v23 = vpop.f32.mrf.mxu1  ;;  %v2681_v7 = vadd.f32 %v7140_v48, %v2438_v43  ;;  %v2680_v52 = vadd.f32 %v2619_v47, %v2437_v20  ;;  %v2198_v39 = vadd.f32 %v8511_v62, %v8434_v45  ;;  %v2203_v47 = vadd.f32 %v8515_v5, %v8440_v54 }
 0x164   : > { %v8581_v21 = vpop.f32.mrf.mxu0  ;;  %v2682_v43 = vadd.f32 %v7141_v41, %v2439_v53  ;;  %v2443_v60 = vadd.f32 %v8517_v6, %v2200_v40  ;;  %v2683_v63 = vadd.f32 %v2632_v10, %v2440_v32  ;;  %v2204_v10 = vadd.f32 %v8523_v9, %v8452_v28 }
 0x165   : > { %v8579_v30 = vpop.f32.mrf.mxu1  ;;  %v2924_v58 = vadd.f32 %v7172_v44, %v2681_v7  ;;  %v2685_v44 = vadd.f32 %v7144_v57, %v2442_v31  ;;  %v2923_v53 = vadd.f32 %v2862_v3, %v2680_v52  ;;  %v2441_v62 = vadd.f32 %v8521_v17, %v2198_v39 }
 0x166   : > { %8984 = vst [vmem:[#allocation18_spill] sm:$0xff] %v8579_v30  ;;  %v8588_v22 = vpop.f32.mrf.mxu0  ;;  %v2925_v41 = vadd.f32 %v7173_v0, %v2682_v43  ;;  %v2201_v57 = vadd.f32 %v8519_v8, %v8446_v61  ;;  %v2686_v0 = vadd.f32 %v7145_v12, %v2443_v60  ;;  %v2446_v5 = vadd.f32 %v8525_v13, %v2203_v47 }
 0x167   : > { %v8586_v51 = vpop.f32.mrf.mxu1  ;;  %v2928_v6 = vadd.f32 %v8551_v14, %v2685_v44  ;;  %v2926_v3 = vadd.f32 %v8555_v18, %v2683_v63  ;;  %v2684_v17 = vadd.f32 %v8553_v15, %v2441_v62  ;;  %v2202_v13 = vadd.f32 %v8527_v25, %v8458_v11  ;;  %v8986_v44 = vld [vmem:[#allocation3_spill] sm:$0xff]  ;;  %v8990_v62 = vld [vmem:[#allocation9_spill] sm:$0xff] }
 0x168   : > { %v8595_v30 = vpop.f32.mrf.mxu0  ;;  %v2929_v28 = vadd.f32 %v8559_v27, %v2686_v0  ;;  %v2689_v9 = vadd.f32 %v8557_v46, %v2446_v5  ;;  %v8988_v60 = vld [vmem:[#allocation15_spill] sm:$0xff]  ;;  %v8991_v0 = vld [vmem:[#allocation4_spill] sm:$0xff] }
 0x169   : > { %v8593_v34 = vpop.f32.mrf.mxu1  ;;  %v2927_v11 = vadd.f32 %v8563_v59, %v2684_v17 }
 0x16a   : > { %v8604_v38 = vpop.f32.mrf.mxu0 }
 0x16b   : > { %v8600_v42 = vpop.f32.mrf.mxu1 }
 0x16c   : > { %v7204_v24 = vpop.f32.mrf.mxu0 }
 0x16d   : > { %v8607_v48 = vpop.f32.mrf.mxu1  ;;  %v3167_v55 = vadd.f32 %v7204_v24, %v2924_v58  ;;  %v2444_v58 = vadd.f32 %v8529_v16, %v2201_v57  ;;  %v2207_v16 = vadd.f32 %v8531_v36, %v8473_v26  ;;  %v2932_v26 = vadd.f32 %v8988_v60, %v2689_v9  ;;  %v8989_v36 = vld [vmem:[#allocation14_spill] sm:$0xff]  ;;  %v8996_v9 = vld [vmem:[#allocation5_spill] sm:$0xff] }
 0x16e   : > { %v3102_v56 = vpop.f32.mrf.mxu0  ;;  %v9000_v60 = vld [vmem:[#allocation13_spill] sm:$0xff] }
 0x16f   : > { %v8619_v4 = vpop.f32.mrf.mxu1  ;;  %3183 = vst [vmem:[%s8616_s25 + $0x10] sm:$0xff] %v3167_v55  ;;  %v3165_v2 = vadd.f32 %v3102_v56, %v2922_v50  ;;  %v3221_v18 = vmul.f32 %v3167_v55, %v3167_v55  ;;  %v2447_v50 = vadd.f32 %v8533_v19, %v2204_v10  ;;  %v2687_v25 = vadd.f32 %v8561_v35, %v2444_v58  ;;  %v8985_v56 = vld [vmem:[#allocation7_spill] sm:$0xff]  ;;  %v8987_v19 = vld [vmem:[#allocation6_spill] sm:$0xff]  ;;  %v8994_v10 = vld [vmem:[#allocation17_spill] sm:$0xff] }
 0x170   : > { %v7205_v7 = vpop.f32.mrf.mxu0  ;;  %v2450_v57 = vadd.f32 %v8990_v62, %v2207_v16 }
 0x171   : > { %v8625_v29 = vpop.f32.mrf.mxu1  ;;  %3181 = vst [vmem:[%s8616_s25] sm:$0xff] %v3165_v2  ;;  %v3168_v1 = vadd.f32 %v7205_v7, %v2925_v41  ;;  %v3219_v61 = vmul.f32 %v3165_v2, %v3165_v2  ;;  %v2445_v41 = vadd.f32 %v8985_v56, %v2202_v13  ;;  %v2690_v59 = vadd.f32 %v8989_v36, %v2447_v50  ;;  %v8995_v13 = vld [vmem:[#allocation11_spill] sm:$0xff] }
 0x172   : > { %v3105_v33 = vpop.f32.mrf.mxu0 }
 0x173   : > { %v8631_v45 = vpop.f32.mrf.mxu1  ;;  %3184 = vst [vmem:[%s8616_s25 + $0x18] sm:$0xff] %v3168_v1  ;;  %v3166_v37 = vadd.f32 %v3105_v33, %v2923_v53  ;;  %v3222_v46 = vmul.f32 %v3168_v1, %v3168_v1  ;;  %v8992_v33 = vld [vmem:[#allocation8_spill] sm:$0xff] }
 0x174   : > { %v7208_v49 = vpop.f32.mrf.mxu0 }
 0x175   : > { %v8638_v54 = vpop.f32.mrf.mxu1  ;;  %3182 = vst [vmem:[%s8616_s25 + $0x8] sm:$0xff] %v3166_v37  ;;  %v3197_v8 = vadd.f32 %v3166_v37, %v3165_v2  ;;  %v3220_v12 = vmul.f32 %v3166_v37, %v3166_v37  ;;  %v3171_v14 = vadd.f32 %v7208_v49, %v2928_v6  ;;  %v2205_v2 = vadd.f32 %v8987_v19, %v8986_v44  ;;  %v8993_v37 = vld [vmem:[#allocation16_spill] sm:$0xff] }
 0x176   : > { %v3118_v15 = vpop.f32.mrf.mxu0  ;;  %v2208_v6 = vadd.f32 %v8992_v33, %v8991_v0  ;;  %v2930_v5 = vadd.f32 %v8993_v37, %v2687_v25 }
 0x177   : > { %v8646_v20 = vpop.f32.mrf.mxu1  ;;  %v3198_v43 = vadd.f32 %v3197_v8, %v3167_v55  ;;  %v3235_v40 = vadd.f32 %v3220_v12, %v3219_v61  ;;  %3187 = vst [vmem:[%s8616_s25 + $0x30] sm:$0xff] %v3171_v14  ;;  %v3169_v24 = vadd.f32 %v3118_v15, %v2926_v3  ;;  %v2688_v3 = vadd.f32 %v8994_v10, %v2445_v41  ;;  %v8997_v15 = vld [vmem:[#allocation10_spill] sm:$0xff] }
 0x178   : > { %v7209_v27 = vpop.f32.mrf.mxu0  ;;  %v3225_v50 = vmul.f32 %v3171_v14, %v3171_v14 }
 0x179   : > { %v8654_v31 = vpop.f32.mrf.mxu1  ;;  %v3236_v52 = vadd.f32 %v3235_v40, %v3221_v18  ;;  %3185 = vst [vmem:[%s8616_s25 + $0x20] sm:$0xff] %v3169_v24  ;;  %v3199_v55 = vadd.f32 %v3198_v43, %v3168_v1  ;;  %v3172_v32 = vadd.f32 %v7209_v27, %v2929_v28  ;;  %v3223_v63 = vmul.f32 %v3169_v24, %v3169_v24 }
 0x17a   : > { %v3121_v35 = vpop.f32.mrf.mxu0  ;;  %v2448_v28 = vadd.f32 %v8995_v13, %v2205_v2  ;;  %v2206_v18 = vadd.f32 %v8997_v15, %v8996_v9  ;;  %v2933_v43 = vadd.f32 %v8575_v23, %v2690_v59  ;;  %v2693_v40 = vadd.f32 %v8581_v21, %v2450_v57 }
 0x17b   : > { %v8662_v39 = vpop.f32.mrf.mxu1  ;;  %v3200_v47 = vadd.f32 %v3199_v55, %v3169_v24  ;;  %v3237_v7 = vadd.f32 %v3236_v52, %v3222_v46  ;;  %3188 = vst [vmem:[%s8616_s25 + $0x38] sm:$0xff] %v3172_v32  ;;  %v3170_v53 = vadd.f32 %v3121_v35, %v2927_v11  ;;  %v8998_v46 = vld [vmem:[#allocation12_spill] sm:$0xff]  ;;  %v8999_v55 = vld [vmem:[#allocation18_spill] sm:$0xff]  ;;  %v3226_v19 = vmul.f32 %v3172_v32, %v3172_v32 }
 0x17c   : > { %v7212_v17 = vpop.f32.mrf.mxu0  ;;  %v2451_v52 = vadd.f32 %v8998_v46, %v2208_v6  ;;  %v2931_v56 = vadd.f32 %v8999_v55, %v2688_v3  ;;  %v2691_v41 = vadd.f32 %v8588_v22, %v2448_v28  ;;  %v2936_v36 = vadd.f32 %v8586_v51, %v2693_v40 }
 0x17d   : > { %v8670_v1 = vpop.f32.mrf.mxu1  ;;  %v3238_v49 = vadd.f32 %v3237_v7, %v3223_v63  ;;  %3186 = vst [vmem:[%s8616_s25 + $0x28] sm:$0xff] %v3170_v53  ;;  %v3201_v61 = vadd.f32 %v3200_v47, %v3170_v53  ;;  %v3224_v8 = vmul.f32 %v3170_v53, %v3170_v53  ;;  %v3175_v12 = vadd.f32 %v7212_v17, %v2932_v26 }
 0x17e   : > { %v3134_v24 = vpop.f32.mrf.mxu0  ;;  %v2449_v26 = vadd.f32 %v9000_v60, %v2206_v18  ;;  %v2694_v59 = vadd.f32 %v8595_v30, %v2451_v52 }
 0x17f   : > { %v8678_v58 = vpop.f32.mrf.mxu1  ;;  %v3202_v16 = vadd.f32 %v3201_v61, %v3171_v14  ;;  %v3239_v11 = vadd.f32 %v3238_v49, %v3224_v8  ;;  %3191 = vst [vmem:[%s8616_s25 + $0x50] sm:$0xff] %v3175_v12  ;;  %v3173_v25 = vadd.f32 %v3134_v24, %v2930_v5  ;;  %v3229_v5 = vmul.f32 %v3175_v12, %v3175_v12 }
 0x180   : > { %v7213_v44 = vpop.f32.mrf.mxu0  ;;  %v2692_v62 = vadd.f32 %v8604_v38, %v2449_v26  ;;  %v2937_v6 = vadd.f32 %v8600_v42, %v2694_v59 }
 0x181   : > { %v8686_v27 = vpop.f32.mrf.mxu1  ;;  %v3240_v23 = vadd.f32 %v3239_v11, %v3225_v50  ;;  %3189 = vst [vmem:[%s8616_s25 + $0x40] sm:$0xff] %v3173_v25  ;;  %v3203_v21 = vadd.f32 %v3202_v16, %v3172_v32  ;;  %v3176_v2 = vadd.f32 %v7213_v44, %v2933_v43  ;;  %v3227_v63 = vmul.f32 %v3173_v25, %v3173_v25 }
 0x182   : > { %v3137_v35 = vpop.f32.mrf.mxu0  ;;  %v2934_v32 = vadd.f32 %v8593_v34, %v2691_v41  ;;  %v2935_v38 = vadd.f32 %v8607_v48, %v2692_v62 }
 0x183   : > { %v8692_v14 = vpop.f32.mrf.mxu1  ;;  %v3204_v47 = vadd.f32 %v3203_v21, %v3173_v25  ;;  %v3241_v7 = vadd.f32 %v3240_v23, %v3226_v19  ;;  %3192 = vst [vmem:[%s8616_s25 + $0x58] sm:$0xff] %v3176_v2  ;;  %v3174_v22 = vadd.f32 %v3137_v35, %v2931_v56  ;;  %v3230_v61 = vmul.f32 %v3176_v2, %v3176_v2 }
 0x184   : > { %v7216_v57 = vpop.f32.mrf.mxu0 }
 0x185   : > { %v8698_v53 = vpop.f32.mrf.mxu1  ;;  %v3242_v0 = vadd.f32 %v3241_v7, %v3227_v63  ;;  %3190 = vst [vmem:[%s8616_s25 + $0x48] sm:$0xff] %v3174_v22  ;;  %v3205_v51 = vadd.f32 %v3204_v47, %v3174_v22  ;;  %v3228_v33 = vmul.f32 %v3174_v22, %v3174_v22  ;;  %v3179_v30 = vadd.f32 %v7216_v57, %v2936_v36 }
 0x186   : > { %v3150_v37 = vpop.f32.mrf.mxu0 }
 0x187   : > { %v3206_v10 = vadd.f32 %v3205_v51, %v3175_v12  ;;  %v3243_v3 = vadd.f32 %v3242_v0, %v3228_v33  ;;  %3195 = vst [vmem:[%s8616_s25 + $0x70] sm:$0xff] %v3179_v30  ;;  %v8705_v17 = vpop.f32.mrf.mxu1  ;;  %v3177_v34 = vadd.f32 %v3150_v37, %v2934_v32  ;;  %v3233_v52 = vmul.f32 %v3179_v30, %v3179_v30 }
 0x188   : > { %v7217_v49 = vpop.f32.mrf.mxu0 }
 0x189   : > { %v3244_v8 = vadd.f32 %v3243_v3, %v3229_v5  ;;  %3193 = vst [vmem:[%s8616_s25 + $0x60] sm:$0xff] %v3177_v34  ;;  %v3207_v13 = vadd.f32 %v3206_v10, %v3176_v2  ;;  %v8709_v28 = vpop.f32.mrf.mxu1  ;;  %v3180_v42 = vadd.f32 %v7217_v49, %v2937_v6  ;;  %v3231_v12 = vmul.f32 %v3177_v34, %v3177_v34 }
 0x18a   : > { %v3153_v9 = vpop.f32.mrf.mxu0 }
 0x18b   : > { %v3208_v15 = vadd.f32 %v3207_v13, %v3177_v34  ;;  %v3245_v18 = vadd.f32 %v3244_v8, %v3230_v61  ;;  %3196 = vst [vmem:[%s8616_s25 + $0x78] sm:$0xff] %v3180_v42  ;;  %v8712_v43 = vpop.f32.mrf.mxu1  ;;  %v3178_v40 = vadd.f32 %v3153_v9, %v2935_v38  ;;  %v3234_v21 = vmul.f32 %v3180_v42, %v3180_v42 }
 0x18c   : > { %v7268_v24 = vpop.f32.mrf.mxu0 }
 0x18d   : > { %v3246_v50 = vadd.f32 %v3245_v18, %v3231_v12  ;;  %3194 = vst [vmem:[%s8616_s25 + $0x68] sm:$0xff] %v3178_v40  ;;  %v3209_v48 = vadd.f32 %v3208_v15, %v3178_v40  ;;  %v3232_v16 = vmul.f32 %v3178_v40, %v3178_v40  ;;  %v8715_v11 = vpop.f32.mrf.mxu1  ;;  %v3655_v25 = vadd.f32 %v7268_v24, %v8619_v4 }
 0x18e   : > { %v3646_v46 = vpop.f32.mrf.mxu0 }
 0x18f   : > { %v3210_v55 = vadd.f32 %v3209_v48, %v3179_v30  ;;  %v3247_v56 = vadd.f32 %v3246_v50, %v3232_v16  ;;  %v7300_v41 = vpop.f32.mrf.mxu1  ;;  %v3647_v44 = vadd.f32 %v3646_v46, %v8625_v29 }
 0x190   : > { %v8719_v19 = vadd.f32 %v7300_v41, %v3655_v25  ;;  %v7269_v23 = vpop.f32.mrf.mxu0 }
 0x191   : > { %v8721_v2 = vadd.f32 %v3210_v55, %v3180_v42  ;;  %v3248_v60 = vadd.f32 %v3247_v56, %v3233_v52  ;;  %v3872_v26 = vpop.f32.mrf.mxu1  ;;  %v3658_v36 = vadd.f32 %v7269_v23, %v8631_v45 }
 0x192   : > { %v8724_v59 = vadd.f32 %v3872_v26, %v3647_v44  ;;  %v3649_v4 = vpop.f32.mrf.mxu0 }
 0x193   : > { %9001 = vst [vmem:[#allocation7_spill] sm:$0xff] %v8721_v2  ;;  %v8726_v35 = vadd.f32 %v3248_v60, %v3234_v21  ;;  %v7301_v47 = vpop.f32.mrf.mxu1  ;;  %v3650_v63 = vadd.f32 %v3649_v4, %v8638_v54 }
 0x194   : > { %v8729_v7 = vadd.f32 %v7301_v47, %v3658_v36  ;;  %v7272_v29 = vpop.f32.mrf.mxu0 }
 0x195   : > { %9002 = vst [vmem:[#allocation3_spill] sm:$0xff] %v8726_v35  ;;  %v3875_v22 = vpop.f32.mrf.mxu1  ;;  %v3671_v32 = vadd.f32 %v7272_v29, %v8646_v20 }
 0x196   : > { %v8732_v62 = vadd.f32 %v3875_v22, %v3650_v63  ;;  %v3662_v57 = vpop.f32.mrf.mxu0 }
 0x197   : > { %v7304_v0 = vpop.f32.mrf.mxu1  ;;  %v3663_v45 = vadd.f32 %v3662_v57, %v8654_v31 }
 0x198   : > { %v8735_v51 = vadd.f32 %v7304_v0, %v3671_v32  ;;  %v7273_v33 = vpop.f32.mrf.mxu0 }
 0x199   : > { %v3888_v30 = vpop.f32.mrf.mxu1  ;;  %v3674_v6 = vadd.f32 %v7273_v33, %v8662_v39 }
 0x19a   : > { %v8738_v37 = vadd.f32 %v3888_v30, %v3663_v45  ;;  %v3665_v54 = vpop.f32.mrf.mxu0 }
 0x19b   : > { %v7305_v5 = vpop.f32.mrf.mxu1  ;;  %v3666_v10 = vadd.f32 %v3665_v54, %v8670_v1 }
 0x19c   : > { %v8741_v3 = vadd.f32 %v7305_v5, %v3674_v6  ;;  %v7276_v20 = vpop.f32.mrf.mxu0 }
 0x19d   : > { %v3891_v34 = vpop.f32.mrf.mxu1  ;;  %v3687_v38 = vadd.f32 %v7276_v20, %v8678_v58 }
 0x19e   : > { %v8744_v49 = vadd.f32 %v3891_v34, %v3666_v10  ;;  %v3678_v31 = vpop.f32.mrf.mxu0 }
 0x19f   : > { %v7308_v61 = vpop.f32.mrf.mxu1  ;;  %v3679_v8 = vadd.f32 %v3678_v31, %v8686_v27 }
 0x1a0   : > { %v8747_v13 = vadd.f32 %v7308_v61, %v3687_v38  ;;  %v7277_v39 = vpop.f32.mrf.mxu0 }
 0x1a1   : > { %v3904_v42 = vpop.f32.mrf.mxu1  ;;  %v3690_v9 = vadd.f32 %v7277_v39, %v8692_v14 }
 0x1a2   : > { %v8750_v15 = vadd.f32 %v3904_v42, %v3679_v8  ;;  %v3681_v1 = vpop.f32.mrf.mxu0 }
 0x1a3   : > { %v7309_v12 = vpop.f32.mrf.mxu1  ;;  %v3682_v18 = vadd.f32 %v3681_v1, %v8698_v53 }
 0x1a4   : > { %v8753_v40 = vadd.f32 %v7309_v12, %v3690_v9  ;;  %v7280_v58 = vpop.f32.mrf.mxu0 }
 0x1a5   : > { %v3907_v24 = vpop.f32.mrf.mxu1  ;;  %v3703_v50 = vadd.f32 %v7280_v58, %v8705_v17 }
 0x1a6   : > { %v8756_v48 = vadd.f32 %v3907_v24, %v3682_v18  ;;  %v3694_v27 = vpop.f32.mrf.mxu0 }
 0x1a7   : > { %v7312_v16 = vpop.f32.mrf.mxu1  ;;  %v3695_v25 = vadd.f32 %v3694_v27, %v8709_v28 }
 0x1a8   : > { %v8759_v46 = vadd.f32 %v7312_v16, %v3703_v50  ;;  %v7281_v14 = vpop.f32.mrf.mxu0 }
 0x1a9   : > { %v3920_v52 = vpop.f32.mrf.mxu1  ;;  %v3706_v55 = vadd.f32 %v7281_v14, %v8712_v43 }
 0x1aa   : > { %v8762_v56 = vadd.f32 %v3920_v52, %v3695_v25  ;;  %v3697_v53 = vpop.f32.mrf.mxu0 }
 0x1ab   : > { %v7313_v41 = vpop.f32.mrf.mxu1  ;;  %v3698_v44 = vadd.f32 %v3697_v53, %v8715_v11 }
 0x1ac   : > { %9003 = vst [vmem:[#allocation6_spill] sm:$0xff] %v8762_v56  ;;  %v8765_v23 = vadd.f32 %v7313_v41, %v3706_v55  ;;  %v7332_v17 = vpop.f32.mrf.mxu0 }
 0x1ad   : > { %v3923_v21 = vpop.f32.mrf.mxu1 }
 0x1ae   : > { %9004 = vst [vmem:[#allocation15_spill] sm:$0xff] %v8765_v23  ;;  %v8767_v60 = vadd.f32 %v3923_v21, %v3698_v44  ;;  %v4114_v26 = vpop.f32.mrf.mxu0 }
 0x1af   : > { %v7364_v28 = vpop.f32.mrf.mxu1 }
 0x1b0   : > { %9005 = vst [vmem:[#allocation14_spill] sm:$0xff] %v8767_v60  ;;  %v7333_v36 = vpop.f32.mrf.mxu0 }
 0x1b1   : > { %v4356_v4 = vpop.f32.mrf.mxu1 }
 0x1b2   : > { %v4117_v47 = vpop.f32.mrf.mxu0 }
 0x1b3   : > { %v8769_v63 = vpop.f32.mrf.mxu1 }
 0x1b4   : > { %v8771_v43 = vpop.f32.mrf.mxu0 }
 0x1b5   : > { %v8773_v29 = vpop.f32.mrf.mxu1 }
 0x1b6   : > { %v8775_v22 = vpop.f32.mrf.mxu0 }
 0x1b7   : > { %v8777_v11 = vpop.f32.mrf.mxu1 }
 0x1b8   : > { %v8779_v32 = vpop.f32.mrf.mxu0 }
 0x1b9   : > { %v8781_v57 = vpop.f32.mrf.mxu1 }
 0x1ba   : > { %v8783_v0 = vpop.f32.mrf.mxu0 }
 0x1bb   : > { %v8785_v45 = vpop.f32.mrf.mxu1 }
 0x1bc   : > { %v8787_v33 = vpop.f32.mrf.mxu0 }
 0x1bd   : > { %v8789_v30 = vpop.f32.mrf.mxu1 }
 0x1be   : > { %v8791_v6 = vpop.f32.mrf.mxu0 }
 0x1bf   : > { %v8793_v54 = vpop.f32.mrf.mxu1 }
 0x1c0   : > { %v8797_v10 = vpop.f32.mrf.mxu0 }
 0x1c1   : > { %v8795_v5 = vpop.f32.mrf.mxu1 }
 0x1c2   : > { %v8803_v38 = vpop.f32.mrf.mxu0 }
 0x1c3   : > { %v8799_v20 = vpop.f32.mrf.mxu1 }
 0x1c4   : > { %v8807_v61 = vpop.f32.mrf.mxu0 }
 0x1c5   : > { %v8801_v34 = vpop.f32.mrf.mxu1 }
 0x1c6   : > { %v8811_v39 = vpop.f32.mrf.mxu0 }
 0x1c7   : > { %v8805_v31 = vpop.f32.mrf.mxu1  ;;  %9007 = vst [vmem:[#allocation4_spill] sm:$0xff] %v8811_v39 }
 0x1c8   : > { %v8815_v9 = vpop.f32.mrf.mxu0 }
 0x1c9   : > { %v8809_v8 = vpop.f32.mrf.mxu1  ;;  %9009 = vst [vmem:[#allocation16_spill] sm:$0xff] %v8815_v9 }
 0x1ca   : > { %9006 = vst [vmem:[#allocation9_spill] sm:$0xff] %v8809_v8  ;;  %v8819_v12 = vpop.f32.mrf.mxu0 }
 0x1cb   : > { %v8813_v42 = vpop.f32.mrf.mxu1  ;;  %9011 = vst [vmem:[#allocation11_spill] sm:$0xff] %v8819_v12 }
 0x1cc   : > { %9008 = vst [vmem:[#allocation8_spill] sm:$0xff] %v8813_v42  ;;  %v7396_v58 = vpop.f32.mrf.mxu0 }
 0x1cd   : > { %v8817_v1 = vpop.f32.mrf.mxu1 }
 0x1ce   : > { %9010 = vst [vmem:[#allocation17_spill] sm:$0xff] %v8817_v1  ;;  %v4598_v50 = vpop.f32.mrf.mxu0 }
 0x1cf   : > { %v7428_v18 = vpop.f32.mrf.mxu1 }
 0x1d0   : > { %v7397_v16 = vpop.f32.mrf.mxu0 }
 0x1d1   : > { %v4840_v24 = vpop.f32.mrf.mxu1 }
 0x1d2   : > { %v4601_v14 = vpop.f32.mrf.mxu0 }
 0x1d3   : > { %v7429_v27 = vpop.f32.mrf.mxu1 }
 0x1d4   : > { %v7400_v55 = vpop.f32.mrf.mxu0 }
 0x1d5   : > { %v4843_v25 = vpop.f32.mrf.mxu1 }
 0x1d6   : > { %v4614_v41 = vpop.f32.mrf.mxu0 }
 0x1d7   : > { %v8821_v52 = vpop.f32.mrf.mxu1 }
 0x1d8   : > { %v8827_v21 = vpop.f32.mrf.mxu0 }
 0x1d9   : > { %v8823_v53 = vpop.f32.mrf.mxu1 }
 0x1da   : > { %v8831_v2 = vpop.f32.mrf.mxu0 }
 0x1db   : > { %v8825_v44 = vpop.f32.mrf.mxu1 }
 0x1dc   : > { %9012 = vst [vmem:[#allocation5_spill] sm:$0xff] %v8825_v44  ;;  %v8835_v12 = vpop.f32.mrf.mxu0  ;;  %v4179_v44 = vadd.f32 %v7332_v17, %v8719_v19  ;;  %v4178_v19 = vadd.f32 %v4117_v47, %v8732_v62 }
 0x1dd   : > { %v8829_v35 = vpop.f32.mrf.mxu1  ;;  %9015 = vst [vmem:[#allocation18_spill] sm:$0xff] %v8835_v12 }
 0x1de   : > { %9013 = vst [vmem:[#allocation10_spill] sm:$0xff] %v8829_v35  ;;  %v8839_v42 = vpop.f32.mrf.mxu0 }
 0x1df   : > { %v8833_v1 = vpop.f32.mrf.mxu1  ;;  %9017 = vst [vmem:[#allocation19_spill] sm:$0xff] %v8839_v42  ;;  %v4180_v42 = vadd.f32 %v7333_v36, %v8729_v7  ;;  %v4181_v7 = vadd.f32 %v8775_v22, %v8738_v37  ;;  %v4184_v37 = vadd.f32 %v8779_v32, %v8741_v3 }
 0x1e0   : > { %9014 = vst [vmem:[#allocation12_spill] sm:$0xff] %v8833_v1  ;;  %v8843_v9 = vpop.f32.mrf.mxu0  ;;  %v4177_v1 = vadd.f32 %v4114_v26, %v8724_v59  ;;  %v4183_v26 = vadd.f32 %v8771_v43, %v8735_v51 }
 0x1e1   : > { %v8837_v60 = vpop.f32.mrf.mxu1  ;;  %9019 = vst [vmem:[#allocation21_spill] sm:$0xff] %v8843_v9  ;;  %v4422_v59 = vadd.f32 %v8769_v63, %v4180_v42  ;;  %v4423_v51 = vadd.f32 %v8781_v57, %v4181_v7  ;;  %v4188_v57 = vadd.f32 %v8797_v10, %v8753_v40 }
 0x1e2   : > { %9016 = vst [vmem:[#allocation13_spill] sm:$0xff] %v8837_v60  ;;  %v8848_v39 = vpop.f32.mrf.mxu0  ;;  %v4421_v60 = vadd.f32 %v7364_v28, %v4179_v44 }
 0x1e3   : > { %v8841_v8 = vpop.f32.mrf.mxu1  ;;  %9021 = vst [vmem:[#allocation23_spill] sm:$0xff] %v8848_v39 }
 0x1e4   : > { %9018 = vst [vmem:[#allocation20_spill] sm:$0xff] %v8841_v8  ;;  %v4663_v17 = vadd.f32 %v7396_v58, %v4421_v60  ;;  %v4664_v60 = vadd.f32 %v7397_v16, %v4422_v59  ;;  %v4425_v58 = vadd.f32 %v8777_v11, %v4183_v26  ;;  %v4187_v11 = vadd.f32 %v8787_v33, %v8747_v13  ;;  %v9024_v26 = vld [vmem:[#allocation18_spill] sm:$0xff] }
 0x1e5   : > { %v8845_v23 = vpop.f32.mrf.mxu1  ;;  %v4186_v13 = vadd.f32 %v8803_v38, %v8756_v48 }
 0x1e6   : > { %9020 = vst [vmem:[#allocation22_spill] sm:$0xff] %v8845_v23  ;;  %v4419_v23 = vadd.f32 %v4356_v4, %v4177_v1  ;;  %v4420_v4 = vadd.f32 %v8773_v29, %v4178_v19  ;;  %v4905_v62 = vadd.f32 %v7428_v18, %v4663_v17  ;;  %v4906_v22 = vadd.f32 %v7429_v27, %v4664_v60 }
 0x1e7   : > { %v8850_v35 = vpop.f32.mrf.mxu1  ;;  %v4667_v18 = vadd.f32 %v7400_v55, %v4425_v58  ;;  %v4426_v55 = vadd.f32 %v8785_v45, %v4184_v37  ;;  %v4428_v59 = vadd.f32 %v8801_v34, %v4186_v13  ;;  %v9029_v34 = vld [vmem:[#allocation5_spill] sm:$0xff] }
 0x1e8   : > { %9022 = vst [vmem:[#allocation24_spill] sm:$0xff] %v8850_v35  ;;  %v8853_v56 = vpop.f32.mrf.mxu0  ;;  %v4661_v28 = vadd.f32 %v4598_v50, %v4419_v23  ;;  %v4662_v63 = vadd.f32 %v4601_v14, %v4420_v4  ;;  %v4182_v23 = vadd.f32 %v8783_v0, %v8744_v49  ;;  %v4665_v49 = vadd.f32 %v4614_v41, %v4423_v51  ;;  %v9034_v13 = vld [vmem:[#allocation9_spill] sm:$0xff] }
 0x1e9   : > { %v8855_v12 = vpop.f32.mrf.mxu1  ;;  %v4429_v41 = vadd.f32 %v8793_v54, %v4187_v11  ;;  %v9032_v11 = vld [vmem:[#allocation19_spill] sm:$0xff] }
 0x1ea   : > { %v8858_v8 = vpop.f32.mrf.mxu0  ;;  %v4904_v14 = vadd.f32 %v4843_v25, %v4662_v63 }
 0x1eb   : > { %v8860_v9 = vpop.f32.mrf.mxu1 }
 0x1ec   : > { %v8863_v39 = vpop.f32.mrf.mxu0 }
 0x1ed   : > { %v8865_v35 = vpop.f32.mrf.mxu1 }
 0x1ee   : > { %9023 = vst [vmem:[#allocation25_spill] sm:$0xff] %v8865_v35  ;;  %v8872_v36 = vpop.f32.mrf.mxu0  ;;  %v4903_v35 = vadd.f32 %v4840_v24, %v4661_v28  ;;  %v4185_v24 = vadd.f32 %v8791_v6, %v8750_v15  ;;  %v4191_v15 = vadd.f32 %v8807_v61, %v8759_v46  ;;  %v4909_v6 = vadd.f32 %v8821_v52, %v4667_v18  ;;  %v9031_v18 = vld [vmem:[#allocation12_spill] sm:$0xff] }
 0x1ef   : > { %v7492_v44 = vpop.f32.mrf.mxu1  ;;  %v4430_v46 = vadd.f32 %v8799_v20, %v4188_v57  ;;  %v4907_v61 = vadd.f32 %v8823_v53, %v4665_v49  ;;  %v9026_v53 = vld [vmem:[#allocation4_spill] sm:$0xff]  ;;  %v9033_v57 = vld [vmem:[#allocation21_spill] sm:$0xff] }
 0x1f0   : > { %v7460_v47 = vpop.f32.mrf.mxu0  ;;  %v4427_v45 = vadd.f32 %v8795_v5, %v4185_v24  ;;  %v4433_v54 = vadd.f32 %v8805_v31, %v4191_v15  ;;  %v4671_v5 = vadd.f32 %v9024_v26, %v4429_v41  ;;  %v9030_v31 = vld [vmem:[#allocation10_spill] sm:$0xff]  ;;  %v9035_v15 = vld [vmem:[#allocation23_spill] sm:$0xff] }
 0x1f1   : > { %v5324_v1 = vpop.f32.mrf.mxu1  ;;  %v5147_v42 = vadd.f32 %v7460_v47, %v4905_v62  ;;  %v9025_v62 = vld [vmem:[#allocation6_spill] sm:$0xff]  ;;  %v9027_v47 = vld [vmem:[#allocation15_spill] sm:$0xff] }
 0x1f2   : > { %v5082_v43 = vpop.f32.mrf.mxu0  ;;  %v4189_v60 = vadd.f32 %v9026_v53, %v9025_v62  ;;  %v4669_v24 = vadd.f32 %v9032_v11, %v4427_v45  ;;  %v9041_v62 = vld [vmem:[#allocation22_spill] sm:$0xff] }
 0x1f3   : > { %v7493_v29 = vpop.f32.mrf.mxu1  ;;  %v5389_v50 = vadd.f32 %v7492_v44, %v5147_v42  ;;  %v5145_v16 = vadd.f32 %v5082_v43, %v4903_v35  ;;  %v4424_v35 = vadd.f32 %v8789_v30, %v4182_v23  ;;  %v4668_v30 = vadd.f32 %v8827_v21, %v4426_v55 }
 0x1f4   : > { %v7461_v3 = vpop.f32.mrf.mxu0 }
 0x1f5   : > { %v5327_v32 = vpop.f32.mrf.mxu1  ;;  %6240 = vst [vmem:[%s8616_s25 + $0x90] sm:$0xff] %v5389_v50  ;;  %v5387_v0 = vadd.f32 %v5324_v1, %v5145_v16  ;;  %v5148_v27 = vadd.f32 %v7461_v3, %v4906_v22  ;;  %v4666_v48 = vadd.f32 %v8831_v2, %v4424_v35  ;;  %v9028_v1 = vld [vmem:[#allocation16_spill] sm:$0xff]  ;;  %v4910_v63 = vadd.f32 %v9029_v34, %v4668_v30 }
 0x1f6   : > { %v5085_v33 = vpop.f32.mrf.mxu0  ;;  %v4192_v58 = vadd.f32 %v9028_v1, %v9027_v47  ;;  %v5444_v23 = vmul.f32 %v5389_v50, %v5389_v50  ;;  %v4913_v16 = vadd.f32 %v9031_v18, %v4671_v5  ;;  %v4672_v3 = vadd.f32 %v9033_v57, %v4430_v46  ;;  %v9040_v5 = vld [vmem:[#allocation20_spill] sm:$0xff] }
 0x1f7   : > { %v7496_v40 = vpop.f32.mrf.mxu1  ;;  %6238 = vst [vmem:[%s8616_s25 + $0x80] sm:$0xff] %v5387_v0  ;;  %v5390_v10 = vadd.f32 %v7493_v29, %v5148_v27  ;;  %v5146_v25 = vadd.f32 %v5085_v33, %v4904_v14  ;;  %v5442_v28 = vmul.f32 %v5387_v0, %v5387_v0  ;;  %v4908_v42 = vadd.f32 %v9030_v31, %v4666_v48 }
 0x1f8   : > { %v7464_v38 = vpop.f32.mrf.mxu0  ;;  %v4670_v33 = vadd.f32 %v9035_v15, %v4428_v59 }
 0x1f9   : > { %v5340_v19 = vpop.f32.mrf.mxu1  ;;  %6241 = vst [vmem:[%s8616_s25 + $0x98] sm:$0xff] %v5390_v10  ;;  %v5388_v52 = vadd.f32 %v5327_v32, %v5146_v25  ;;  %v5151_v17 = vadd.f32 %v7464_v38, %v4909_v6 }
 0x1fa   : > { %v5098_v7 = vpop.f32.mrf.mxu0  ;;  %v4912_v53 = vadd.f32 %v9041_v62, %v4670_v33 }
 0x1fb   : > { %v7497_v21 = vpop.f32.mrf.mxu1  ;;  %6239 = vst [vmem:[%s8616_s25 + $0x88] sm:$0xff] %v5388_v52  ;;  %v5420_v2 = vadd.f32 %v5388_v52, %v5387_v0  ;;  %v5443_v44 = vmul.f32 %v5388_v52, %v5388_v52  ;;  %v5393_v4 = vadd.f32 %v7496_v40, %v5151_v17  ;;  %v5149_v20 = vadd.f32 %v5098_v7, %v4907_v61  ;;  %v9037_v61 = vld [vmem:[#allocation14_spill] sm:$0xff]  ;;  %v9038_v52 = vld [vmem:[#allocation11_spill] sm:$0xff]  ;;  %v9039_v17 = vld [vmem:[#allocation13_spill] sm:$0xff] }
 0x1fc   : > { %v7465_v51 = vpop.f32.mrf.mxu0  ;;  %v5445_v0 = vmul.f32 %v5390_v10, %v5390_v10  ;;  %v4911_v26 = vadd.f32 %v9039_v17, %v4669_v24  ;;  %v9043_v24 = vld [vmem:[#allocation24_spill] sm:$0xff]  ;;  %v9045_v17 = vld [vmem:[#allocation7_spill] sm:$0xff] }
 0x1fd   : > { %v5343_v37 = vpop.f32.mrf.mxu1  ;;  %v5421_v43 = vadd.f32 %v5420_v2, %v5389_v50  ;;  %v5458_v29 = vadd.f32 %v5443_v44, %v5442_v28  ;;  %6244 = vst [vmem:[%s8616_s25 + $0xb0] sm:$0xff] %v5393_v4  ;;  %v5391_v22 = vadd.f32 %v5340_v19, %v5149_v20  ;;  %v5152_v32 = vadd.f32 %v7465_v51, %v4910_v63  ;;  %v9036_v19 = vld [vmem:[#allocation8_spill] sm:$0xff] }
 0x1fe   : > { %v5101_v14 = vpop.f32.mrf.mxu0  ;;  %v4431_v50 = vadd.f32 %v9034_v13, %v4189_v60  ;;  %v4434_v46 = vadd.f32 %v9036_v19, %v4192_v58  ;;  %v4914_v28 = vadd.f32 %v9040_v5, %v4672_v3  ;;  %v4675_v60 = vadd.f32 %v8853_v56, %v4433_v54 }
 0x1ff   : > { %v7500_v49 = vpop.f32.mrf.mxu1  ;;  %v5459_v27 = vadd.f32 %v5458_v29, %v5444_v23  ;;  %6242 = vst [vmem:[%s8616_s25 + $0xa0] sm:$0xff] %v5391_v22  ;;  %v5422_v55 = vadd.f32 %v5421_v43, %v5390_v10  ;;  %v5150_v35 = vadd.f32 %v5101_v14, %v4908_v42  ;;  %v5446_v40 = vmul.f32 %v5391_v22, %v5391_v22 }
 0x200   : > { %v5394_v6 = vadd.f32 %v7497_v21, %v5152_v32  ;;  %v7468_v25 = vpop.f32.mrf.mxu0  ;;  %v4190_v10 = vadd.f32 %v9038_v52, %v9037_v61  ;;  %v4673_v47 = vadd.f32 %v8858_v8, %v4431_v50  ;;  %v5448_v63 = vmul.f32 %v5393_v4, %v5393_v4 }
 0x201   : > { %v5356_v41 = vpop.f32.mrf.mxu1  ;;  %v5423_v45 = vadd.f32 %v5422_v55, %v5391_v22  ;;  %v5460_v30 = vadd.f32 %v5459_v27, %v5445_v0  ;;  %v5392_v48 = vadd.f32 %v5343_v37, %v5150_v35  ;;  %v5155_v38 = vadd.f32 %v7468_v25, %v4913_v16  ;;  %v9042_v16 = vld [vmem:[#allocation17_spill] sm:$0xff] }
 0x202   : > { %6245 = vst [vmem:[%s8616_s25 + $0xb8] sm:$0xff] %v5394_v6  ;;  %v5114_v59 = vpop.f32.mrf.mxu0  ;;  %v4676_v37 = vadd.f32 %v8863_v39, %v4434_v46  ;;  %v5449_v23 = vmul.f32 %v5394_v6, %v5394_v6  ;;  %v4432_v11 = vadd.f32 %v9042_v16, %v4190_v10  ;;  %v4915_v57 = vadd.f32 %v8855_v12, %v4673_v47 }
 0x203   : > { %v7501_v7 = vpop.f32.mrf.mxu1  ;;  %v5461_v21 = vadd.f32 %v5460_v30, %v5446_v40  ;;  %6243 = vst [vmem:[%s8616_s25 + $0xa8] sm:$0xff] %v5392_v48  ;;  %v5424_v2 = vadd.f32 %v5423_v45, %v5392_v48  ;;  %v5447_v44 = vmul.f32 %v5392_v48, %v5392_v48  ;;  %v5397_v20 = vadd.f32 %v7500_v49, %v5155_v38  ;;  %v9044_v38 = vld [vmem:[#allocation25_spill] sm:$0xff] }
 0x204   : > { %v5153_v1 = vadd.f32 %v5114_v59, %v4911_v26  ;;  %v7469_v58 = vpop.f32.mrf.mxu0  ;;  %v4918_v27 = vadd.f32 %v8860_v9, %v4676_v37  ;;  %v4674_v55 = vadd.f32 %v8872_v36, %v4432_v11  ;;  %v3212_v26 = vrot.slane %v9045_v17, 4 }
 0x205   : > { %v5359_v34 = vpop.f32.mrf.mxu1  ;;  %v5425_v31 = vadd.f32 %v5424_v2, %v5393_v4  ;;  %v5462_v42 = vadd.f32 %v5461_v21, %v5447_v44  ;;  %6248 = vst [vmem:[%s8616_s25 + $0xd0] sm:$0xff] %v5397_v20  ;;  %v5156_v51 = vadd.f32 %v7469_v58, %v4914_v28  ;;  %v4917_v4 = vadd.f32 %v9043_v24, %v4675_v60  ;;  %v9046_v2 = vld [vmem:[#allocation3_spill] sm:$0xff] }
 0x206   : > { %v5395_v43 = vadd.f32 %v5356_v41, %v5153_v1  ;;  %v5117_v29 = vpop.f32.mrf.mxu0  ;;  %v5452_v40 = vmul.f32 %v5397_v20, %v5397_v20  ;;  %v4916_v36 = vadd.f32 %v9044_v38, %v4674_v55  ;;  %v3250_v44 = vrot.slane %v9046_v2, 4 }
 0x207   : > { %v7504_v22 = vpop.f32.mrf.mxu1  ;;  %v5463_v18 = vadd.f32 %v5462_v42, %v5448_v63  ;;  %v5426_v56 = vadd.f32 %v5425_v31, %v5394_v6  ;;  %v5398_v54 = vadd.f32 %v7501_v7, %v5156_v51  ;;  %v5154_v8 = vadd.f32 %v5117_v29, %v4912_v53 }
 0x208   : > { %6246 = vst [vmem:[%s8616_s25 + $0xc0] sm:$0xff] %v5395_v43  ;;  %v7472_v3 = vpop.f32.mrf.mxu0  ;;  %v5450_v39 = vmul.f32 %v5395_v43, %v5395_v43  ;;  %v3213_v53 = vadd.f32 %v3212_v26, %v9045_v17  ;;  %v3251_v1 = vadd.f32 %v3250_v44, %v9046_v2 }
 0x209   : > { %v5427_v32 = vadd.f32 %v5426_v56, %v5395_v43  ;;  %v5464_v14 = vadd.f32 %v5463_v18, %v5449_v23  ;;  %6249 = vst [vmem:[%s8616_s25 + $0xd8] sm:$0xff] %v5398_v54  ;;  %v5396_v49 = vadd.f32 %v5359_v34, %v5154_v8  ;;  %v5372_v0 = vpop.f32.mrf.mxu1  ;;  %v5159_v35 = vadd.f32 %v7472_v3, %v4917_v4 }
 0x20a   : > { %v5130_v13 = vpop.f32.mrf.mxu0  ;;  %v5453_v46 = vmul.f32 %v5398_v54, %v5398_v54  ;;  %v3214_v31 = vrot.slane %v3213_v53, 2  ;;  %v3252_v23 = vrot.slane %v3251_v1, 2 }
 0x20b   : > { %v5465_v50 = vadd.f32 %v5464_v14, %v5450_v39  ;;  %6247 = vst [vmem:[%s8616_s25 + $0xc8] sm:$0xff] %v5396_v49  ;;  %v5428_v15 = vadd.f32 %v5427_v32, %v5396_v49  ;;  %v5451_v12 = vmul.f32 %v5396_v49, %v5396_v49  ;;  %v5157_v33 = vadd.f32 %v5130_v13, %v4915_v57  ;;  %v7505_v9 = vpop.f32.mrf.mxu1 }
 0x20c   : > { %v5401_v6 = vadd.f32 %v7504_v22, %v5159_v35  ;;  %v7473_v25 = vpop.f32.mrf.mxu0  ;;  %v3215_v22 = vadd.f32 %v3214_v31, %v3213_v53 }
 0x20d   : > { %v5429_v41 = vadd.f32 %v5428_v15, %v5397_v20  ;;  %v5466_v45 = vadd.f32 %v5465_v50, %v5451_v12  ;;  %v5399_v30 = vadd.f32 %v5372_v0, %v5157_v33  ;;  %v5160_v48 = vadd.f32 %v7473_v25, %v4918_v27  ;;  %v5375_v21 = vpop.f32.mrf.mxu1 }
 0x20e   : > { %6252 = vst [vmem:[%s8616_s25 + $0xf0] sm:$0xff] %v5401_v6  ;;  %v5133_v19 = vpop.f32.mrf.mxu0  ;;  %v5456_v58 = vmul.f32 %v5401_v6, %v5401_v6  ;;  %v3216_v11 = vrot.slane %v3215_v22, 1 }
 0x20f   : > { %v5467_v61 = vadd.f32 %v5466_v45, %v5452_v40  ;;  %6250 = vst [vmem:[%s8616_s25 + $0xe0] sm:$0xff] %v5399_v30  ;;  %v5430_v52 = vadd.f32 %v5429_v41, %v5398_v54  ;;  %v5402_v10 = vadd.f32 %v7505_v9, %v5160_v48  ;;  %v5158_v5 = vadd.f32 %v5133_v19, %v4916_v36 }
 0x210   : > { %v5454_v59 = vmul.f32 %v5399_v30, %v5399_v30  ;;  %v3253_v54 = vadd.f32 %v3252_v23, %v3251_v1  ;;  %v3217_v39 = vadd.f32 %v3216_v11, %v3215_v22 }
 0x211   : > { %v5431_v28 = vadd.f32 %v5430_v52, %v5399_v30  ;;  %v5468_v7 = vadd.f32 %v5467_v61, %v5453_v46  ;;  %6253 = vst [vmem:[%s8616_s25 + $0xf8] sm:$0xff] %v5402_v10  ;;  %v5400_v20 = vadd.f32 %v5375_v21, %v5158_v5  ;;  %v5457_v42 = vmul.f32 %v5402_v10, %v5402_v10 }
 0x212   : > { %v3254_v57 = vrot.slane %v3253_v54, 1 }
 0x213   : > { %v5469_v62 = vadd.f32 %v5468_v7, %v5454_v59  ;;  %6251 = vst [vmem:[%s8616_s25 + $0xe8] sm:$0xff] %v5400_v20  ;;  %v5432_v60 = vadd.f32 %v5431_v28, %v5400_v20  ;;  %v5455_v47 = vmul.f32 %v5400_v20, %v5400_v20 }
 0x214   : > { %v3255_v0 = vadd.f32 %v3254_v57, %v3253_v54 }
 0x215   : > { %v5433_v34 = vadd.f32 %v5432_v60, %v5401_v6  ;;  %v5470_v63 = vadd.f32 %v5469_v62, %v5455_v47 }
 0x217   : > { %v5434_v51 = vadd.f32 %v5433_v34, %v5402_v10  ;;  %v5471_v37 = vadd.f32 %v5470_v63, %v5456_v58 }
 0x219   : > { %v5435_v43 = vrot.slane %v5434_v51, 4  ;;  %v5472_v29 = vadd.f32 %v5471_v37, %v5457_v42 }
 0x21b   : > { %v5436_v18 = vadd.f32 %v5435_v43, %v5434_v51  ;;  %v5473_v56 = vrot.slane %v5472_v29, 4 }
 0x21d   : > { %v5437_v8 = vrot.slane %v5436_v18, 2  ;;  %v5474_v16 = vadd.f32 %v5473_v56, %v5472_v29 }
 0x21f   : > { %v5438_v24 = vadd.f32 %v5437_v8, %v5436_v18  ;;  %v5475_v4 = vrot.slane %v5474_v16, 2 }
 0x221   : > { %v5439_v3 = vrot.slane %v5438_v24, 1  ;;  %v5476_v32 = vadd.f32 %v5475_v4, %v5474_v16 }
 0x223   : > { %v5440_v14 = vadd.f32 %v5439_v3, %v5438_v24  ;;  %v5477_v49 = vrot.slane %v5476_v32, 1 }
 0x225   : > { %v5441_v27 = vadd.f32 %v5440_v14, %v3217_v39  ;;  %v5478_v55 = vadd.f32 %v5477_v49, %v5476_v32 }
 0x227   : > { %v5479_v35 = vadd.f32 %v5478_v55, %v3255_v0  ;;  %5480 = vst [vmem:[%s265_s27] sm:$0x1] %v5441_v27 }
 0x229   : > { %5481 = vst [vmem:[%s268_s29] sm:$0x1] %v5479_v35 }
 0x22a PF: > { %s17_s21 = sadd.s32 1, %s7809_s21  }
 0x22b   : > { %p14_p4 = scmp.ge.s32.totalorder %s17_s21, 4  }
 0x22d   :  { %16 = sbr.rel (!%p14_p4) target bundleno = 1 (0x1), region = 116 }

// kernel: conv_block.4
= control target key start
LH: loop header
LB: loop body
LE: loop exit
PB: predicated region body
PF: predicated region fallthrough
CT: control target
= control target key end

     0   :  { %s7963_s21 = smov 0   ;;  %s9273_s0 = inlined_call_operand.vmem [shape: f32[2,16,16,128], index: 0, kind: input, shape index: {}]   ;;  %s9274_s1 = inlined_call_operand.vmem [shape: f32[1,1,128], index: 1, kind: input, shape index: {}]   ;;  %s9275_s2 = inlined_call_operand.vmem [shape: f32[1,1,128], index: 2, kind: input, shape index: {}]   ;;  %s9276_s3 = inlined_call_operand.vmem [shape: bf16[9,128,128], index: 3, kind: input, shape index: {}]   ;;  %s9277_s4 = inlined_call_operand.vmem [shape: f32[2,16,16,128], index: 4, kind: output, shape index: {0}]   ;;  %s9278_s5 = inlined_call_operand.vmem [shape: f32[2,1,128], index: 5, kind: output, shape index: {1}]   ;;  %s9279_s6 = inlined_call_operand.vmem [shape: f32[2,1,128], index: 6, kind: output, shape index: {2}]  }
   0x1 LB: > { %s5697_s22 = sadd.s32 4294967295, %s7925_s21   ;;  %p5701_p0 = scmp.ge.s32.totalorder %s7925_s21, 1  ;;  %s7925_s21 = sphi %s7963_s21, %s17_s21  }
   0x2   : > { %p217_p1 = scmp.lt.s32.totalorder %s7925_s21, 3 }
   0x4   : > { %p218_p2 = pnand %p5701_p0, %p217_p1 }
   0x6   : > { %221 = sbr.rel (%p218_p2) target bundleno = 557 (0x22d), region = 36 }
   0xb   : > { %v7627_v0 = vld [vmem:[%s9276_s3 + $0x78] sm:$0xff]   ;;  %v7927_v2 = vmov 0.0|0.0   ;;  %v7629_v5 = vld [vmem:[%s9276_s3 + $0x70] sm:$0xff]   ;;  %v7631_v7 = vld [vmem:[%s9276_s3 + $0x68] sm:$0xff]   ;;  %p253_p3 = scmp.lt.s32.totalorder %s5697_s22, 1  ;;  %vm444_vm0 = vcmask 1040384  }
   0xc   : > { %v7628_v1 = vld [vmem:[%s9276_s3 + $0x38] sm:$0xff]   ;;  %v5708_v3 = vcombine.low %v7927_v2, %v7927_v2  ;;  %v5709_v4 = vcombine.high %v7927_v2, %v7927_v2  ;;  %7042 = vmatprep.subr.bf16.mxu0 %v7627_v0  ;;  %v7630_v6 = vld [vmem:[%s9276_s3 + $0x30] sm:$0xff]   ;;  %v7632_v8 = vld [vmem:[%s9276_s3 + $0x28] sm:$0xff]   ;;  %vm878_vm1 = vcmask 1046528  }
   0xd   : > { %7074 = vmatprep.subr.bf16.mxu1 %v7628_v1  ;;  %7043 = vmatpush3.bf16.msra.mxu0 %v7627_v0  ;;  %v7633_v9 = vld [vmem:[%s9276_s3 + $0x60] sm:$0xff]   ;;  %s9367_s22 = smov (!%p253_p3, %s5697_s22), 1  ;;  %v7635_v11 = vld [vmem:[%s9276_s3 + $0x58] sm:$0xff]   ;;  %v7637_v13 = vld [vmem:[%s9276_s3 + $0x50] sm:$0xff]  }
   0xe   : > { %842 = vst [vmem:[#allocation2 + $0x90] sm:$0xf] %v5708_v3  ;;  %843 = vst [vmem:[#allocation2 + $0x94] sm:$0xf] %v5709_v4  ;;  %7075 = vmatpush3.bf16.msra.mxu1 %v7628_v1  ;;  %7044 = vmatprep.subr.bf16.mxu0 %v7629_v5  ;;  %v7634_v10 = vld [vmem:[%s9276_s3 + $0x20] sm:$0xff]   ;;  %s6368_s17 = sshll.u32 %s9367_s22, 8  ;;  %s265_s25 = scalar_lea.vmem %s9278_s5, %s9367_s22 }
   0xf   : > { %677 = vst [vmem:[#allocation2] sm:$0xf] %v5708_v3  ;;  %678 = vst [vmem:[#allocation2 + $0x4] sm:$0xf] %v5709_v4  ;;  %7076 = vmatprep.subr.bf16.mxu1 %v7630_v6  ;;  %v7636_v12 = vld [vmem:[%s9276_s3 + $0x18] sm:$0xff]   ;;  %v7638_v14 = vld [vmem:[%s9276_s3 + $0x10] sm:$0xff]   ;;  %s8019_s28 = scalar_lea.vmem %s9273_s0, %s6368_s17  ;;  %s8928_s23 = scalar_lea.vmem %s9277_s4, %s6368_s17 }
  0x10   : > { %711 = vst [vmem:[#allocation2 + $0x88] sm:$0xf] %v5708_v3  ;;  %712 = vst [vmem:[#allocation2 + $0x8c] sm:$0xf] %v5709_v4  ;;  %v270_v17 = vld [vmem:[%s8019_s28] sm:$0xff]  ;;  %v271_v18 = vld [vmem:[%s8019_s28 + $0x8] sm:$0xff]  ;;  %s268_s29 = scalar_lea.vmem %s9279_s6, %s9367_s22 }
  0x11   : > { %876 = vst [vmem:[#allocation2 + $0x118] sm:$0xf] %v5708_v3  ;;  %877 = vst [vmem:[#allocation2 + $0x11c] sm:$0xf] %v5709_v4  ;;  %7045 = vmatpush3.bf16.msra.mxu0 %v7629_v5  ;;  %v8026_v19 = vld [vmem:[%s9274_s1] ss:$0 sm:$0xff] }
  0x12   : > { %1104 = vst [vmem:[#allocation2 + $0x120] sm:$0xf] %v5708_v3  ;;  %1105 = vst [vmem:[#allocation2 + $0x124] sm:$0xf] %v5709_v4  ;;  %7077 = vmatpush3.bf16.msra.mxu1 %v7630_v6  ;;  %7046 = vmatprep.subr.bf16.mxu0 %v7631_v7  ;;  %v309_v20 = vmul.f32 %v8026_v19, %v270_v17  ;;  %v310_v21 = vmul.f32 %v8026_v19, %v271_v18  ;;  %v8033_v22 = vld [vmem:[%s9275_s2] ss:$0 sm:$0xff] }
  0x13   : > { %1138 = vst [vmem:[#allocation2 + $0x1a8] sm:$0xf] %v5708_v3  ;;  %1139 = vst [vmem:[#allocation2 + $0x1ac] sm:$0xf] %v5709_v4  ;;  %7078 = vmatprep.subr.bf16.mxu1 %v7632_v8  ;;  %v7639_v23 = vld [vmem:[%s9276_s3 + $0x48] sm:$0xff]   ;;  %v7641_v27 = vld [vmem:[%s9276_s3 + $0x40] sm:$0xff]  }
  0x14   : > { %v7640_v24 = vld [vmem:[%s9276_s3 + $0x8] sm:$0xff]   ;;  %v348_v25 = vadd.f32 %v8033_v22, %v309_v20  ;;  %v349_v26 = vadd.f32 %v8033_v22, %v310_v21  ;;  %v272_v30 = vld [vmem:[%s8019_s28 + $0x10] sm:$0xff]  ;;  %v273_v31 = vld [vmem:[%s8019_s28 + $0x18] sm:$0xff] }
  0x15   : > { %7047 = vmatpush3.bf16.msra.mxu0 %v7631_v7  ;;  %v7643_v15 = vld [vmem:[#allocation2 + $0x90] sm:$0xff]   ;;  %v311_v32 = vmul.f32 %v8026_v19, %v272_v30  ;;  %v312_v33 = vmul.f32 %v8026_v19, %v273_v31  ;;  %v274_v34 = vld [vmem:[%s8019_s28 + $0x20] sm:$0xff]  ;;  %v275_v35 = vld [vmem:[%s8019_s28 + $0x28] sm:$0xff] }
  0x16   : > { %7079 = vmatpush3.bf16.msra.mxu1 %v7632_v8  ;;  %7048 = vmatprep.subr.bf16.mxu0 %v7633_v9  ;;  %v7644_v16 = vld [vmem:[#allocation2] sm:$0xff]   ;;  %v380_v28 = vmax.f32 %v348_v25, 0.0  ;;  %v381_v29 = vmax.f32 %v349_v26, 0.0  ;;  %v313_v44 = vmul.f32 %v8026_v19, %v274_v34  ;;  %v7647_v46 = vld [vmem:[%s9276_s3 + $0xb8] sm:$0xff]   ;;  %v314_v47 = vmul.f32 %v8026_v19, %v275_v35  ;;  %v276_v55 = vld [vmem:[%s8019_s28 + $0x30] sm:$0xff] }
  0x17   : > { %7080 = vmatprep.subr.bf16.mxu1 %v7634_v10  ;;  %7058 = vmatprep.mubr.bf16.mxu0 %v7643_v15  ;;  %v7642_v36 = vld [vmem:[%s9276_s3] sm:$0xff]   ;;  %v350_v42 = vadd.f32 %v8033_v22, %v311_v32  ;;  %v351_v43 = vadd.f32 %v8033_v22, %v312_v33  ;;  %v8072_v53 = vld [vmem:[%s9276_s3 + $0xf8] sm:$0xff]   ;;  %v279_v0 = vld [vmem:[%s8019_s28 + $0x48] sm:$0xff]  ;;  %v315_v2 = vmul.f32 %v8026_v19, %v276_v55 }
  0x18   : > { %7090 = vmatprep.mubr.bf16.mxu1 %v7644_v16  ;;  %v6549_v37 = vpack.c.bf16 %v381_v29, %v380_v28  ;;  %v879_v38 = vrot.slane %v380_v28, 1  ;;  %v880_v39 = vrot.slane %v381_v29, 1  ;;  %v445_v40 = vrot.slane %v380_v28, 7  ;;  %v277_v56 = vld [vmem:[%s8019_s28 + $0x38] sm:$0xff]  ;;  %v278_v63 = vld [vmem:[%s8019_s28 + $0x40] sm:$0xff]  ;;  %v7655_v32 = vld [vmem:[%s9276_s3 + $0xa8] sm:$0xff]  }
  0x19   : > { %7049 = vmatpush3.bf16.msra.mxu0 %v7633_v9  ;;  %v446_v41 = vrot.slane %v381_v29, 7  ;;  %v8064_v49 = vmax.f32 %v350_v42, 0.0  ;;  %v8066_v50 = vmax.f32 %v351_v43, 0.0  ;;  %v352_v51 = vadd.f32 %v8033_v22, %v313_v44  ;;  %v7649_v9 = vld [vmem:[%s9276_s3 + $0xb0] sm:$0xff]   ;;  %v281_v30 = vld [vmem:[%s8019_s28 + $0x58] sm:$0xff]  ;;  %v282_v31 = vld [vmem:[%s8019_s28 + $0x60] sm:$0xff] }
  0x1a   : > { %7081 = vmatpush3.bf16.msra.mxu1 %v7634_v10  ;;  %7050 = vmatprep.subr.bf16.mxu0 %v7635_v11  ;;  %6722 = vst [vmem:[#allocation2 + $0x98] sm:$0xff] %v6549_v37   ;;  %v525_v45 = vsel %vm444_vm0, 0.0, %v445_v40  ;;  %v353_v54 = vadd.f32 %v8033_v22, %v314_v47  ;;  %v881_v57 = vsel %vm878_vm1, %v879_v38, %v880_v39  ;;  %v959_v58 = vsel %vm878_vm1, %v880_v39, 0.0  ;;  %v280_v29 = vld [vmem:[%s8019_s28 + $0x50] sm:$0xff] }
  0x1b   : > { %7082 = vmatprep.subr.bf16.mxu1 %v7636_v12  ;;  %v447_v48 = vsel %vm444_vm0, %v445_v40, %v446_v41  ;;  %v6554_v59 = vpack.c.bf16 %v8066_v50, %v8064_v49  ;;  %v448_v60 = vrot.slane %v8064_v49, 7  ;;  %v449_v61 = vrot.slane %v8066_v50, 7 }
  0x1c   : > { %v6469_v52 = vpack.c.bf16 %v447_v48, %v525_v45  ;;  %v8083_v62 = vmax.f32 %v352_v51, 0.0  ;;  %v8087_v1 = vmax.f32 %v353_v54, 0.0  ;;  %v316_v3 = vmul.f32 %v8026_v19, %v277_v56  ;;  %v7656_v48 = vld [vmem:[%s9276_s3 + $0xe8] sm:$0xff]   ;;  %v7657_v56 = vld [vmem:[%s9276_s3 + $0xa0] sm:$0xff]  }
  0x1d   : > { %7051 = vmatpush3.bf16.msra.mxu0 %v7635_v11  ;;  %v317_v4 = vmul.f32 %v8026_v19, %v278_v63  ;;  %6723 = vst [vmem:[#allocation2 + $0xa0] sm:$0xff] %v6554_v59   ;;  %v450_v5 = vsel %vm444_vm0, %v448_v60, %v449_v61  ;;  %v526_v6 = vsel %vm444_vm0, 0.0, %v448_v60  ;;  %v318_v8 = vmul.f32 %v8026_v19, %v279_v0 }
  0x1e   : > { %7083 = vmatpush3.bf16.msra.mxu1 %v7636_v12  ;;  %7052 = vmatprep.subr.bf16.mxu0 %v7637_v13  ;;  %6706 = vst [vmem:[#allocation2 + $0x8] sm:$0xff] %v6469_v52   ;;  %v451_v7 = vrot.slane %v8083_v62, 7  ;;  %v6474_v10 = vpack.c.bf16 %v450_v5, %v526_v6  ;;  %v6559_v11 = vpack.c.bf16 %v8087_v1, %v8083_v62  ;;  %v452_v12 = vrot.slane %v8087_v1, 7  ;;  %v7658_v5 = vld [vmem:[%s9276_s3 + $0xe0] sm:$0xff]  }
  0x1f   : > { %7084 = vmatprep.subr.bf16.mxu1 %v7638_v14  ;;  %v355_v16 = vadd.f32 %v8033_v22, %v316_v3  ;;  %v356_v17 = vadd.f32 %v8033_v22, %v317_v4  ;;  %v357_v18 = vadd.f32 %v8033_v22, %v318_v8  ;;  %v319_v34 = vmul.f32 %v8026_v19, %v280_v29 }
  0x20   : > { %v527_v15 = vsel %vm444_vm0, 0.0, %v451_v7  ;;  %6707 = vst [vmem:[#allocation2 + $0x10] sm:$0xff] %v6474_v10   ;;  %6724 = vst [vmem:[#allocation2 + $0xa8] sm:$0xff] %v6559_v11   ;;  %v453_v20 = vsel %vm444_vm0, %v451_v7, %v452_v12  ;;  %v320_v35 = vmul.f32 %v8026_v19, %v281_v30  ;;  %v321_v37 = vmul.f32 %v8026_v19, %v282_v31  ;;  %v7663_v10 = vld [vmem:[%s9276_s3 + $0x98] sm:$0xff]  }
  0x21   : > { %7053 = vmatpush3.bf16.msra.mxu0 %v7637_v13  ;;  %v354_v13 = vadd.f32 %v8033_v22, %v315_v2  ;;  %v6479_v25 = vpack.c.bf16 %v453_v20, %v527_v15  ;;  %v8114_v26 = vmax.f32 %v355_v16, 0.0  ;;  %v8118_v28 = vmax.f32 %v357_v18, 0.0 }
  0x22   : > { %7085 = vmatpush3.bf16.msra.mxu1 %v7638_v14  ;;  %7054 = vmatprep.subr.bf16.mxu0 %v7639_v23  ;;  %v7645_v14 = vld [vmem:[#allocation2 + $0x98] sm:$0xff]   ;;  %v358_v45 = vadd.f32 %v8033_v22, %v319_v34  ;;  %v360_v47 = vadd.f32 %v8033_v22, %v321_v37  ;;  %v882_v18 = vrot.slane %v8064_v49, 1 }
  0x23   : > { %7086 = vmatprep.subr.bf16.mxu1 %v7640_v24  ;;  %v8109_v21 = vmax.f32 %v354_v13, 0.0  ;;  %6708 = vst [vmem:[#allocation2 + $0x18] sm:$0xff] %v6479_v25   ;;  %v455_v40 = vrot.slane %v8114_v26, 7  ;;  %v458_v54 = vrot.slane %v8118_v28, 7  ;;  %v883_v25 = vrot.slane %v8066_v50, 1 }
  0x24   : > { %v7651_v43 = vld [vmem:[#allocation2 + $0xa0] sm:$0xff]   ;;  %v8156_v60 = vmax.f32 %v360_v47, 0.0  ;;  %v885_v50 = vrot.slane %v8083_v62, 1 }
  0x25   : > { %7055 = vmatpush3.bf16.msra.mxu0 %v7639_v23  ;;  %v6629_v23 = vpack.c.bf16 %v959_v58, %v881_v57  ;;  %v454_v33 = vrot.slane %v8109_v21, 7  ;;  %v7646_v38 = vld [vmem:[#allocation2 + $0x8] sm:$0xff]   ;;  %v6564_v39 = vpack.c.bf16 %v8114_v26, %v8109_v21  ;;  %v8152_v58 = vmax.f32 %v358_v45, 0.0 }
  0x26   : > { %7087 = vmatpush3.bf16.msra.mxu1 %v7640_v24  ;;  %7056 = vmatprep.subr.bf16.mxu0 %v7641_v27  ;;  %v7650_v24 = vld [vmem:[%s9276_s3 + $0xf0] sm:$0xff]   ;;  %v463_v8 = vrot.slane %v8156_v60, 7  ;;  %v884_v49 = vsel %vm878_vm1, %v882_v18, %v883_v25  ;;  %v960_v31 = vsel %vm878_vm1, %v883_v25, 0.0  ;;  %v888_v37 = vrot.slane %v8109_v21, 1  ;;  %v7696_v25 = vld [vmem:[%s9276_s3 + $0x158] sm:$0xff]  }
  0x27   : > { %7088 = vmatprep.subr.bf16.mxu1 %v7642_v36  ;;  %6738 = vst [vmem:[#allocation2 + $0x128] sm:$0xff] %v6629_v23   ;;  %v528_v44 = vsel %vm444_vm0, 0.0, %v454_v33  ;;  %6725 = vst [vmem:[#allocation2 + $0xb0] sm:$0xff] %v6564_v39   ;;  %v456_v51 = vsel %vm444_vm0, %v454_v33, %v455_v40  ;;  %v7652_v61 = vld [vmem:[#allocation2 + $0x10] sm:$0xff]   ;;  %v460_v4 = vrot.slane %v8152_v58, 7  ;;  %v7664_v23 = vld [vmem:[%s9276_s3 + $0xd8] sm:$0xff]   ;;  %v6634_v33 = vpack.c.bf16 %v960_v31, %v884_v49 }
  0x28   : > { %v6484_v57 = vpack.c.bf16 %v456_v51, %v528_v44  ;;  %v531_v15 = vsel %vm444_vm0, 0.0, %v463_v8  ;;  %v7675_v51 = vld [vmem:[#allocation2 + $0x120] sm:$0xff]   ;;  %v284_v49 = vld [vmem:[%s8019_s28 + $0x70] sm:$0xff]  ;;  %v285_v31 = vld [vmem:[%s8019_s28 + $0x78] sm:$0xff] }
  0x29   : > { %7057 = vmatpush3.bf16.msra.mxu0 %v7641_v27  ;;  %v8116_v27 = vmax.f32 %v356_v17, 0.0  ;;  %v530_v11 = vsel %vm444_vm0, 0.0, %v460_v4  ;;  %6739 = vst [vmem:[#allocation2 + $0x130] sm:$0xff] %v6634_v33   ;;  %v323_v33 = vmul.f32 %v8026_v19, %v284_v49  ;;  %v7740_v49 = vld [vmem:[#allocation2 + $0xa0] sm:$0xff]  }
  0x2a   : > { %7089 = vmatpush3.bf16.msra.mxu1 %v7642_v36  ;;  %7106 = vmatprep.subr.bf16.mxu0 %v7647_v46  ;;  %v283_v36 = vld [vmem:[%s8019_s28 + $0x68] sm:$0xff]  ;;  %6709 = vst [vmem:[#allocation2 + $0x20] sm:$0xff] %v6484_v57  }
  0x2b   : > { %7138 = vmatprep.subr.bf16.mxu1 %v8072_v53  ;;  %v6569_v41 = vpack.c.bf16 %v8118_v28, %v8116_v27  ;;  %v322_v42 = vmul.f32 %v8026_v19, %v283_v36  ;;  %v457_v52 = vrot.slane %v8116_v27, 7 }
  0x2c   : > { %7059 = vmatmul.mubr.bf16.vlgmr.msra.gmra.mxu0 %v7645_v14 }
  0x2d   : > { %7107 = vmatpush3.bf16.msra.mxu0 %v7647_v46  ;;  %v359_v46 = vadd.f32 %v8033_v22, %v320_v35  ;;  %7091 = vmatmul.mubr.bf16.vlgmr.msra.gmra.mxu1 %v7646_v38  ;;  %6726 = vst [vmem:[#allocation2 + $0xb8] sm:$0xff] %v6569_v41   ;;  %v361_v55 = vadd.f32 %v8033_v22, %v322_v42  ;;  %v529_v0 = vsel %vm444_vm0, 0.0, %v457_v52  ;;  %v886_v35 = vrot.slane %v8087_v1, 1  ;;  %v7666_v38 = vld [vmem:[%s9276_s3 + $0xd0] sm:$0xff]   ;;  %v7671_v1 = vld [vmem:[%s9276_s3 + $0x88] sm:$0xff]  }
  0x2e   : > { %7108 = vmatprep.subr.bf16.mxu0 %v7649_v9  ;;  %7139 = vmatpush3.bf16.msra.mxu1 %v8072_v53  ;;  %v459_v63 = vsel %vm444_vm0, %v457_v52, %v458_v54  ;;  %v7653_v53 = vld [vmem:[#allocation2 + $0xa8] sm:$0xff]   ;;  %v7659_v16 = vld [vmem:[#allocation2 + $0xb0] sm:$0xff]   ;;  %v889_v41 = vrot.slane %v8114_v26, 1  ;;  %v7673_v26 = vld [vmem:[%s9276_s3 + $0x80] sm:$0xff]  }
  0x2f   : > { %v8154_v59 = vmax.f32 %v359_v46, 0.0  ;;  %7140 = vmatprep.subr.bf16.mxu1 %v7650_v24  ;;  %7062 = vmatprep.mubr.bf16.mxu0 %v7651_v43  ;;  %v6489_v2 = vpack.c.bf16 %v459_v63, %v529_v0  ;;  %v8167_v7 = vmax.f32 %v361_v55, 0.0  ;;  %v887_v39 = vsel %vm878_vm1, %v885_v50, %v886_v35  ;;  %v7672_v42 = vld [vmem:[%s9276_s3 + $0xc8] sm:$0xff]   ;;  %v7679_v63 = vld [vmem:[%s9276_s3 + $0x138] sm:$0xff]  }
  0x30   : > { %7094 = vmatprep.mubr.bf16.mxu1 %v7652_v61  ;;  %v961_v62 = vsel %vm878_vm1, %v886_v35, 0.0  ;;  %v891_v43 = vrot.slane %v8116_v27, 1  ;;  %v890_v45 = vsel %vm878_vm1, %v888_v37, %v889_v41  ;;  %v962_v46 = vsel %vm878_vm1, %v889_v41, 0.0  ;;  %v7705_v41 = vld [vmem:[%s9276_s3 + $0x100] sm:$0xff]  }
  0x31   : > { %7109 = vmatpush3.bf16.msra.mxu0 %v7649_v9  ;;  %v6574_v3 = vpack.c.bf16 %v8154_v59, %v8152_v58  ;;  %v461_v6 = vrot.slane %v8154_v59, 7  ;;  %v7654_v9 = vld [vmem:[#allocation2 + $0x18] sm:$0xff]   ;;  %6710 = vst [vmem:[#allocation2 + $0x28] sm:$0xff] %v6489_v2   ;;  %v6579_v13 = vpack.c.bf16 %v8167_v7, %v8156_v60  ;;  %v464_v14 = vrot.slane %v8167_v7, 7  ;;  %v7660_v30 = vld [vmem:[#allocation2 + $0x20] sm:$0xff]  }
  0x32   : > { %7110 = vmatprep.subr.bf16.mxu0 %v7655_v32  ;;  %7141 = vmatpush3.bf16.msra.mxu1 %v7650_v24  ;;  %v6639_v40 = vpack.c.bf16 %v961_v62, %v887_v39  ;;  %v6644_v47 = vpack.c.bf16 %v962_v46, %v890_v45  ;;  %v894_v27 = vrot.slane %v8152_v58, 1  ;;  %v895_v61 = vrot.slane %v8154_v59, 1  ;;  %v7677_v59 = vld [vmem:[#allocation2 + $0x128] sm:$0xff]  }
  0x33   : > { %6727 = vst [vmem:[#allocation2 + $0xc0] sm:$0xff] %v6574_v3   ;;  %7142 = vmatprep.subr.bf16.mxu1 %v7656_v48  ;;  %v462_v12 = vsel %vm444_vm0, %v460_v4, %v461_v6  ;;  %6728 = vst [vmem:[#allocation2 + $0xc8] sm:$0xff] %v6579_v13   ;;  %v465_v24 = vsel %vm444_vm0, %v463_v8, %v464_v14  ;;  %v897_v58 = vrot.slane %v8156_v60, 1  ;;  %v898_v3 = vrot.slane %v8167_v7, 1  ;;  %v7680_v60 = vld [vmem:[%s9276_s3 + $0x178] sm:$0xff]   ;;  %v7681_v4 = vld [vmem:[%s9276_s3 + $0x130] sm:$0xff]  }
  0x34   : > { %7063 = vmatmul.mubr.bf16.gmra.mxu0 %v7653_v53  ;;  %v6494_v17 = vpack.c.bf16 %v462_v12, %v530_v11  ;;  %v7661_v20 = vld [vmem:[#allocation2 + $0xb8] sm:$0xff]   ;;  %v6499_v29 = vpack.c.bf16 %v465_v24, %v531_v15  ;;  %6740 = vst [vmem:[#allocation2 + $0x138] sm:$0xff] %v6639_v40   ;;  %6741 = vst [vmem:[#allocation2 + $0x140] sm:$0xff] %v6644_v47   ;;  %v896_v0 = vsel %vm878_vm1, %v894_v27, %v895_v61  ;;  %v7683_v8 = vld [vmem:[#allocation2 + $0x130] sm:$0xff]  }
  0x35   : > { %7111 = vmatpush3.bf16.msra.mxu0 %v7655_v32  ;;  %7095 = vmatmul.mubr.bf16.gmra.mxu1 %v7654_v9  ;;  %v7665_v32 = vld [vmem:[%s9276_s3 + $0x90] sm:$0xff]   ;;  %v964_v53 = vsel %vm878_vm1, %v895_v61, 0.0  ;;  %v965_v6 = vsel %vm878_vm1, %v898_v3, 0.0  ;;  %v7687_v12 = vld [vmem:[%s9276_s3 + $0x128] sm:$0xff]   ;;  %v7689_v15 = vld [vmem:[%s9276_s3 + $0x120] sm:$0xff]   ;;  %v324_v50 = vmul.f32 %v8026_v19, %v285_v31 }
  0x36   : > { %7112 = vmatprep.subr.bf16.mxu0 %v7657_v56  ;;  %7143 = vmatpush3.bf16.msra.mxu1 %v7656_v48  ;;  %6711 = vst [vmem:[#allocation2 + $0x30] sm:$0xff] %v6494_v17   ;;  %6712 = vst [vmem:[#allocation2 + $0x38] sm:$0xff] %v6499_v29   ;;  %v892_v48 = vrot.slane %v8118_v28, 1  ;;  %v7674_v28 = vld [vmem:[%s9276_s3 + $0xc0] sm:$0xff]   ;;  %v6654_v2 = vpack.c.bf16 %v964_v53, %v896_v0  ;;  %v7678_v9 = vld [vmem:[#allocation2 + $0x10] sm:$0xff]  }
  0x37   : > { %7066 = vmatprep.mubr.bf16.mxu0 %v7659_v16  ;;  %7144 = vmatprep.subr.bf16.mxu1 %v7658_v5  ;;  %v7682_v11 = vld [vmem:[%s9276_s3 + $0x170] sm:$0xff]   ;;  %v7688_v14 = vld [vmem:[%s9276_s3 + $0x168] sm:$0xff]   ;;  %v7686_v17 = vld [vmem:[#allocation2 + $0x20] sm:$0xff]   ;;  %v363_v37 = vadd.f32 %v8033_v22, %v324_v50 }
  0x38   : > { %7098 = vmatprep.mubr.bf16.mxu1 %v7660_v30  ;;  %v7662_v34 = vld [vmem:[#allocation2 + $0x28] sm:$0xff]   ;;  %v893_v54 = vsel %vm878_vm1, %v891_v43, %v892_v48  ;;  %v963_v55 = vsel %vm878_vm1, %v892_v48, 0.0  ;;  %6743 = vst [vmem:[#allocation2 + $0x150] sm:$0xff] %v6654_v2   ;;  %v7697_v30 = vld [vmem:[%s9276_s3 + $0x110] sm:$0xff]   ;;  %v7706_v47 = vld [vmem:[%s9276_s3 + $0x140] sm:$0xff]  }
  0x39   : > { %7113 = vmatpush3.bf16.msra.mxu0 %v7657_v56  ;;  %v7676_v56 = vld [vmem:[#allocation2 + $0x8] sm:$0xff]   ;;  %v6649_v57 = vpack.c.bf16 %v963_v55, %v893_v54  ;;  %v395_v39 = vmax.f32 %v363_v37, 0.0  ;;  %v7711_v48 = vld [vmem:[%s9276_s3 + $0x1b8] sm:$0xff]   ;;  %v7709_v54 = vld [vmem:[#allocation2 + $0xa0] sm:$0xff]  }
  0x3a   : > { %7114 = vmatprep.subr.bf16.mxu0 %v7663_v10  ;;  %7145 = vmatpush3.bf16.msra.mxu1 %v7658_v5  ;;  %v7667_v36 = vld [vmem:[#allocation2 + $0xc0] sm:$0xff]   ;;  %v7669_v44 = vld [vmem:[#allocation2 + $0xc8] sm:$0xff]   ;;  %v899_v5 = vsel %vm878_vm1, %v897_v58, %v898_v3  ;;  %v7717_v0 = vld [vmem:[#allocation2 + $0xb0] sm:$0xff]  }
  0x3b   : > { %7146 = vmatprep.subr.bf16.mxu1 %v7664_v23  ;;  %6742 = vst [vmem:[#allocation2 + $0x148] sm:$0xff] %v6649_v57   ;;  %v6659_v7 = vpack.c.bf16 %v965_v6, %v899_v5  ;;  %v7685_v13 = vld [vmem:[#allocation2 + $0x138] sm:$0xff]   ;;  %v7691_v16 = vld [vmem:[#allocation2 + $0x140] sm:$0xff]   ;;  %v7692_v18 = vld [vmem:[#allocation2 + $0x28] sm:$0xff]   ;;  %v467_v40 = vrot.slane %v395_v39, 7 }
  0x3c   : > { %7067 = vmatmul.mubr.bf16.gmra.mxu0 %v7661_v20  ;;  %v7690_v20 = vld [vmem:[%s9276_s3 + $0x160] sm:$0xff]   ;;  %v7708_v55 = vld [vmem:[#allocation2 + $0x128] sm:$0xff]   ;;  %v7713_v57 = vld [vmem:[%s9276_s3 + $0x1b0] sm:$0xff]  }
  0x3d   : > { %7115 = vmatpush3.bf16.msra.mxu0 %v7663_v10  ;;  %7070 = vmatprep.mubr.bf16.mxu0 %v7667_v36  ;;  %v7668_v21 = vld [vmem:[#allocation2 + $0x30] sm:$0xff]   ;;  %v7670_v52 = vld [vmem:[#allocation2 + $0x38] sm:$0xff]   ;;  %6744 = vst [vmem:[#allocation2 + $0x158] sm:$0xff] %v6659_v7   ;;  %v362_v36 = vadd.f32 %v8033_v22, %v323_v33  ;;  %v7704_v22 = vld [vmem:[%s9276_s3 + $0x148] sm:$0xff]  }
  0x3e   : > { %7116 = vmatprep.subr.bf16.mxu0 %v7665_v32  ;;  %7099 = vmatmul.mubr.bf16.gmra.mxu1 %v7662_v34  ;;  %v7684_v10 = vld [vmem:[#allocation2 + $0x18] sm:$0xff]   ;;  %v7694_v29 = vld [vmem:[#allocation2 + $0x30] sm:$0xff]   ;;  %v7715_v61 = vld [vmem:[#allocation2 + $0xa8] sm:$0xff]  }
  0x3f   : > { %7147 = vmatpush3.bf16.msra.mxu1 %v7664_v23  ;;  %7102 = vmatprep.mubr.bf16.mxu1 %v7668_v21  ;;  %v7695_v23 = vld [vmem:[%s9276_s3 + $0x118] sm:$0xff]   ;;  %v7698_v34 = vld [vmem:[%s9276_s3 + $0x150] sm:$0xff]   ;;  %v394_v19 = vmax.f32 %v362_v36, 0.0  ;;  %v7719_v58 = vld [vmem:[%s9276_s3 + $0x1a8] sm:$0xff]  }
  0x40   : > { %7148 = vmatprep.subr.bf16.mxu1 %v7666_v38  ;;  %v7700_v35 = vld [vmem:[#allocation2 + $0x38] sm:$0xff]   ;;  %v7714_v3 = vld [vmem:[%s9276_s3 + $0x1f0] sm:$0xff]   ;;  %v7718_v5 = vld [vmem:[#allocation2 + $0x140] sm:$0xff]  }
  0x41   : > { %7117 = vmatpush3.bf16.msra.mxu0 %v7665_v32  ;;  %v7699_v32 = vld [vmem:[#allocation2 + $0x150] sm:$0xff]   ;;  %v6584_v21 = vpack.c.bf16 %v395_v39, %v394_v19  ;;  %v900_v46 = vrot.slane %v394_v19, 1  ;;  %v7723_v53 = vld [vmem:[#allocation2 + $0xb8] sm:$0xff]   ;;  %v7725_v6 = vld [vmem:[#allocation2 + $0xc0] sm:$0xff]  }
  0x42   : > { %7118 = vmatprep.subr.bf16.mxu0 %v7671_v1  ;;  %v7693_v24 = vld [vmem:[#allocation2 + $0x148] sm:$0xff]   ;;  %v7716_v2 = vld [vmem:[#allocation2 + $0x138] sm:$0xff]   ;;  %v7729_v7 = vld [vmem:[%s9276_s3 + $0x190] sm:$0xff]  }
  0x43   : > { %7149 = vmatpush3.bf16.msra.mxu1 %v7666_v38  ;;  %v7703_v38 = vld [vmem:[%s9276_s3 + $0x108] sm:$0xff]   ;;  %6729 = vst [vmem:[#allocation2 + $0xd0] sm:$0xff] %v6584_v21   ;;  %v7738_v31 = vld [vmem:[%s9276_s3 + $0x1c0] sm:$0xff]   ;;  %v7744_v33 = vld [vmem:[%s9276_s3 + $0x78] sm:$0xff]  }
  0x44   : > { %7071 = vmatmul.mubr.bf16.gmra.mxu0 %v7669_v44  ;;  %7150 = vmatprep.subr.bf16.mxu1 %v7672_v42  ;;  %v7701_v62 = vld [vmem:[#allocation2 + $0x158] sm:$0xff]   ;;  %v7742_v50 = vld [vmem:[#allocation2 + $0xa8] sm:$0xff]   ;;  %v7753_v36 = vld [vmem:[%s9276_s3 + $0x220] sm:$0xff]  }
  0x45   : > { %7119 = vmatpush3.bf16.msra.mxu0 %v7671_v1  ;;  %7122 = vmatprep.mubr.bf16.mxu0 %v7675_v51  ;;  %v466_v1 = vrot.slane %v394_v19, 7  ;;  %v7707_v44 = vld [vmem:[#allocation2 + $0x98] sm:$0xff]   ;;  %v7748_v37 = vld [vmem:[#allocation2 + $0xb0] sm:$0xff]  }
  0x46   : > { %7120 = vmatprep.subr.bf16.mxu0 %v7673_v26  ;;  %7103 = vmatmul.mubr.bf16.gmra.mxu1 %v7670_v52  ;;  %v7759_v19 = vld [vmem:[%s9276_s3 + $0x218] sm:$0xff]   ;;  %v7761_v21 = vld [vmem:[%s9276_s3 + $0x210] sm:$0xff]  }
  0x47   : > { %7151 = vmatpush3.bf16.msra.mxu1 %v7672_v42  ;;  %7154 = vmatprep.mubr.bf16.mxu1 %v7676_v56  ;;  %v468_v42 = vsel %vm444_vm0, %v466_v1, %v467_v40  ;;  %v532_v43 = vsel %vm444_vm0, 0.0, %v466_v1  ;;  %v7712_v56 = vld [vmem:[%s9276_s3 + $0x1f8] sm:$0xff]  }
  0x48   : > { %7152 = vmatprep.subr.bf16.mxu1 %v7674_v28  ;;  %v6504_v45 = vpack.c.bf16 %v468_v42, %v532_v43  ;;  %v7757_v1 = vld [vmem:[#allocation2 + $0x38] sm:$0xff]   ;;  %v8363_v42 = vld [vmem:[%s9274_s1] ss:$0 sm:$0xff] }
  0x49   : > { %7121 = vmatpush3.bf16.msra.mxu0 %v7673_v26  ;;  %v901_v26 = vrot.slane %v395_v39, 1  ;;  %v7752_v39 = vld [vmem:[%s9276_s3 + $0x68] sm:$0xff]  }
  0x4a   : > { %7170 = vmatprep.subr.bf16.mxu0 %v7679_v63  ;;  %6713 = vst [vmem:[#allocation2 + $0x40] sm:$0xff] %v6504_v45   ;;  %v7756_v45 = vld [vmem:[#allocation2 + $0xc0] sm:$0xff]  }
  0x4b   : > { %7153 = vmatpush3.bf16.msra.mxu1 %v7674_v28  ;;  %v902_v51 = vsel %vm878_vm1, %v900_v46, %v901_v26  ;;  %v966_v27 = vsel %vm878_vm1, %v901_v26, 0.0  ;;  %v7754_v46 = vld [vmem:[%s9276_s3 + $0x60] sm:$0xff]  }
  0x4c   : > { %7123 = vmatmul.mubr.bf16.vlgmr.msra.gmra.mxu0 %v7677_v59  ;;  %7202 = vmatprep.subr.bf16.mxu1 %v7680_v60  ;;  %v6664_v52 = vpack.c.bf16 %v966_v27, %v902_v51  ;;  %v7721_v59 = vld [vmem:[%s9276_s3 + $0x1a0] sm:$0xff]   ;;  %v7767_v51 = vld [vmem:[%s9276_s3 + $0x208] sm:$0xff]  }
  0x4d   : > { %7171 = vmatpush3.bf16.msra.mxu0 %v7679_v63  ;;  %7126 = vmatprep.mubr.bf16.mxu0 %v7683_v8  ;;  %v7710_v63 = vld [vmem:[#allocation2 + $0x130] sm:$0xff]   ;;  %v7731_v8 = vld [vmem:[#allocation2 + $0xc8] sm:$0xff]   ;;  %v8373_v26 = vld [vmem:[%s9275_s2] ss:$0 sm:$0xff] }
  0x4e   : > { %7172 = vmatprep.subr.bf16.mxu0 %v7681_v4  ;;  %7155 = vmatmul.mubr.bf16.vlgmr.msra.gmra.mxu1 %v7678_v9  ;;  %6745 = vst [vmem:[#allocation2 + $0x160] sm:$0xff] %v6664_v52   ;;  %v7724_v9 = vld [vmem:[#allocation2 + $0x148] sm:$0xff]  }
  0x4f   : > { %7203 = vmatpush3.bf16.msra.mxu1 %v7680_v60  ;;  %7158 = vmatprep.mubr.bf16.mxu1 %v7684_v10  ;;  %v7727_v60 = vld [vmem:[%s9276_s3 + $0x198] sm:$0xff]   ;;  %v7722_v10 = vld [vmem:[%s9276_s3 + $0x1e0] sm:$0xff]  }
  0x50   : > { %7204 = vmatprep.subr.bf16.mxu1 %v7682_v11 }
  0x51   : > { %7173 = vmatpush3.bf16.msra.mxu0 %v7681_v4  ;;  %v7702_v28 = vld [vmem:[#allocation2 + $0x40] sm:$0xff]   ;;  %v7720_v4 = vld [vmem:[%s9276_s3 + $0x1e8] sm:$0xff]  }
  0x52   : > { %7174 = vmatprep.subr.bf16.mxu0 %v7687_v12  ;;  %v7763_v40 = vld [vmem:[#allocation2 + $0x40] sm:$0xff]  }
  0x53   : > { %7205 = vmatpush3.bf16.msra.mxu1 %v7682_v11  ;;  %v7735_v11 = vld [vmem:[%s9276_s3 + $0x188] sm:$0xff]  }
  0x54   : > { %7127 = vmatmul.mubr.bf16.gmra.mxu0 %v7685_v13  ;;  %7206 = vmatprep.subr.bf16.mxu1 %v7688_v14  ;;  %v7726_v13 = vld [vmem:[#allocation2 + $0x150] sm:$0xff]  }
  0x55   : > { %7175 = vmatpush3.bf16.msra.mxu0 %v7687_v12  ;;  %7130 = vmatprep.mubr.bf16.mxu0 %v7691_v16  ;;  %v7728_v12 = vld [vmem:[%s9276_s3 + $0x1d8] sm:$0xff]   ;;  %v7737_v16 = vld [vmem:[%s9276_s3 + $0x180] sm:$0xff]  }
  0x56   : > { %7176 = vmatprep.subr.bf16.mxu0 %v7689_v15  ;;  %7159 = vmatmul.mubr.bf16.gmra.mxu1 %v7686_v17  ;;  %v7732_v17 = vld [vmem:[#allocation2 + $0x158] sm:$0xff]  }
  0x57   : > { %7207 = vmatpush3.bf16.msra.mxu1 %v7688_v14  ;;  %7162 = vmatprep.mubr.bf16.mxu1 %v7692_v18  ;;  %v7733_v14 = vld [vmem:[#allocation2 + $0xd0] sm:$0xff]  }
  0x58   : > { %7208 = vmatprep.subr.bf16.mxu1 %v7690_v20  ;;  %v7730_v18 = vld [vmem:[%s9276_s3 + $0x1d0] sm:$0xff]  }
  0x59   : > { %7177 = vmatpush3.bf16.msra.mxu0 %v7689_v15  ;;  %v7739_v15 = vld [vmem:[#allocation2 + $0x10] sm:$0xff]  }
  0x5a   : > { %7178 = vmatprep.subr.bf16.mxu0 %v7695_v23 }
  0x5b   : > { %7209 = vmatpush3.bf16.msra.mxu1 %v7690_v20  ;;  %v7743_v20 = vld [vmem:[%s9276_s3 + $0x238] sm:$0xff]  }
  0x5c   : > { %7131 = vmatmul.mubr.bf16.gmra.mxu0 %v7693_v24  ;;  %7210 = vmatprep.subr.bf16.mxu1 %v7696_v25  ;;  %v7734_v24 = vld [vmem:[#allocation2 + $0x160] sm:$0xff]  }
  0x5d   : > { %7179 = vmatpush3.bf16.msra.mxu0 %v7695_v23  ;;  %7134 = vmatprep.mubr.bf16.mxu0 %v7699_v32  ;;  %v7736_v23 = vld [vmem:[%s9276_s3 + $0x1c8] sm:$0xff]  }
  0x5e   : > { %7180 = vmatprep.subr.bf16.mxu0 %v7697_v30  ;;  %7163 = vmatmul.mubr.bf16.gmra.mxu1 %v7694_v29  ;;  %v7747_v29 = vld [vmem:[#allocation2 + $0x20] sm:$0xff]   ;;  %v7751_v32 = vld [vmem:[%s9276_s3 + $0x228] sm:$0xff]  }
  0x5f   : > { %7211 = vmatpush3.bf16.msra.mxu1 %v7696_v25  ;;  %7166 = vmatprep.mubr.bf16.mxu1 %v7700_v35  ;;  %v7741_v25 = vld [vmem:[#allocation2 + $0x18] sm:$0xff]   ;;  %v7755_v35 = vld [vmem:[#allocation2 + $0x30] sm:$0xff]  }
  0x60   : > { %7212 = vmatprep.subr.bf16.mxu1 %v7698_v34 }
  0x61   : > { %7181 = vmatpush3.bf16.msra.mxu0 %v7697_v30  ;;  %v7745_v30 = vld [vmem:[%s9276_s3 + $0x230] sm:$0xff]  }
  0x62   : > { %7182 = vmatprep.subr.bf16.mxu0 %v7703_v38 }
  0x63   : > { %7213 = vmatpush3.bf16.msra.mxu1 %v7698_v34  ;;  %v7749_v34 = vld [vmem:[#allocation2 + $0x28] sm:$0xff]  }
  0x64   : > { %7135 = vmatmul.mubr.bf16.gmra.mxu0 %v7701_v62  ;;  %7214 = vmatprep.subr.bf16.mxu1 %v7704_v22  ;;  %v7750_v62 = vld [vmem:[#allocation2 + $0xb8] sm:$0xff]  }
  0x65   : > { %7183 = vmatpush3.bf16.msra.mxu0 %v7703_v38  ;;  %7186 = vmatprep.mubr.bf16.mxu0 %v7707_v44  ;;  %v7746_v38 = vld [vmem:[%s9276_s3 + $0x70] sm:$0xff]  }
  0x66   : > { %7184 = vmatprep.subr.bf16.mxu0 %v7705_v41  ;;  %7167 = vmatmul.mubr.bf16.gmra.mxu1 %v7702_v28 }
  0x67   : > { %7215 = vmatpush3.bf16.msra.mxu1 %v7704_v22  ;;  %7218 = vmatprep.mubr.bf16.mxu1 %v7708_v55  ;;  %v286_v22 = vld [vmem:[%s8019_s28 + $0x80] sm:$0xff]  ;;  %v7760_v55 = vld [vmem:[%s9276_s3 + $0x58] sm:$0xff]  }
  0x68   : > { %7216 = vmatprep.subr.bf16.mxu1 %v7706_v47  ;;  %v325_v43 = vmul.f32 %v8363_v42, %v286_v22 }
  0x69   : > { %7185 = vmatpush3.bf16.msra.mxu0 %v7705_v41  ;;  %v287_v41 = vld [vmem:[%s8019_s28 + $0x88] sm:$0xff] }
  0x6a   : > { %7234 = vmatprep.subr.bf16.mxu0 %v7711_v48  ;;  %v326_v44 = vmul.f32 %v8363_v42, %v287_v41 }
  0x6b   : > { %7217 = vmatpush3.bf16.msra.mxu1 %v7706_v47  ;;  %v364_v47 = vadd.f32 %v8373_v26, %v325_v43 }
  0x6c   : > { %7187 = vmatmul.mubr.bf16.vlgmr.msra.gmra.mxu0 %v7709_v54  ;;  %7266 = vmatprep.subr.bf16.mxu1 %v7712_v56  ;;  %v7758_v54 = vld [vmem:[#allocation2 + $0xc8] sm:$0xff]  }
  0x6d   : > { %7235 = vmatpush3.bf16.msra.mxu0 %v7711_v48  ;;  %7190 = vmatprep.mubr.bf16.mxu0 %v7715_v61  ;;  %v365_v48 = vadd.f32 %v8373_v26, %v326_v44  ;;  %v396_v27 = vmax.f32 %v364_v47, 0.0 }
  0x6e   : > { %7236 = vmatprep.subr.bf16.mxu0 %v7713_v57  ;;  %7219 = vmatmul.mubr.bf16.vlgmr.msra.gmra.mxu1 %v7710_v63  ;;  %v7769_v63 = vld [vmem:[%s9276_s3 + $0x200] sm:$0xff]  }
  0x6f   : > { %7267 = vmatpush3.bf16.msra.mxu1 %v7712_v56  ;;  %7222 = vmatprep.mubr.bf16.mxu1 %v7716_v2  ;;  %v397_v52 = vmax.f32 %v365_v48, 0.0  ;;  %v469_v56 = vrot.slane %v396_v27, 7  ;;  %v7762_v2 = vld [vmem:[%s9276_s3 + $0x50] sm:$0xff]   ;;  %v295_v48 = vld [vmem:[%s8019_s28 + $0xc8] sm:$0xff] }
  0x70   : > { %7268 = vmatprep.subr.bf16.mxu1 %v7714_v3 }
  0x71   : > { %7237 = vmatpush3.bf16.msra.mxu0 %v7713_v57  ;;  %v470_v57 = vrot.slane %v397_v52, 7  ;;  %v6589_v61 = vpack.c.bf16 %v397_v52, %v396_v27 }
  0x72   : > { %7238 = vmatprep.subr.bf16.mxu0 %v7719_v58 }
  0x73   : > { %7269 = vmatpush3.bf16.msra.mxu1 %v7714_v3  ;;  %v471_v28 = vsel %vm444_vm0, %v469_v56, %v470_v57  ;;  %6730 = vst [vmem:[#allocation2 + $0xd8] sm:$0xff] %v6589_v61   ;;  %v904_v3 = vrot.slane %v397_v52, 1  ;;  %v334_v57 = vmul.f32 %v8363_v42, %v295_v48 }
  0x74   : > { %7191 = vmatmul.mubr.bf16.gmra.mxu0 %v7717_v0  ;;  %7270 = vmatprep.subr.bf16.mxu1 %v7720_v4  ;;  %v7764_v0 = vld [vmem:[#allocation2 + $0xd0] sm:$0xff]  }
  0x75   : > { %7239 = vmatpush3.bf16.msra.mxu0 %v7719_v58  ;;  %7194 = vmatprep.mubr.bf16.mxu0 %v7723_v53  ;;  %v533_v58 = vsel %vm444_vm0, 0.0, %v469_v56 }
  0x76   : > { %7240 = vmatprep.subr.bf16.mxu0 %v7721_v59  ;;  %7223 = vmatmul.mubr.bf16.gmra.mxu1 %v7718_v5  ;;  %v6509_v53 = vpack.c.bf16 %v471_v28, %v533_v58  ;;  %v289_v5 = vld [vmem:[%s8019_s28 + $0x98] sm:$0xff]  ;;  %v7779_v28 = vld [vmem:[#allocation2 + $0x140] sm:$0xff]  }
  0x77   : > { %7271 = vmatpush3.bf16.msra.mxu1 %v7720_v4  ;;  %7226 = vmatprep.mubr.bf16.mxu1 %v7724_v9  ;;  %v288_v4 = vld [vmem:[%s8019_s28 + $0x90] sm:$0xff] }
  0x78   : > { %7272 = vmatprep.subr.bf16.mxu1 %v7722_v10  ;;  %6714 = vst [vmem:[#allocation2 + $0x48] sm:$0xff] %v6509_v53   ;;  %v327_v9 = vmul.f32 %v8363_v42, %v288_v4 }
  0x79   : > { %7241 = vmatpush3.bf16.msra.mxu0 %v7721_v59  ;;  %v903_v59 = vrot.slane %v396_v27, 1 }
  0x7a   : > { %7242 = vmatprep.subr.bf16.mxu0 %v7727_v60  ;;  %v7774_v41 = vld [vmem:[#allocation2 + $0xd8] sm:$0xff]  }
  0x7b   : > { %7273 = vmatpush3.bf16.msra.mxu1 %v7722_v10  ;;  %v328_v10 = vmul.f32 %v8363_v42, %v289_v5  ;;  %v7781_v5 = vld [vmem:[#allocation2 + $0x148] sm:$0xff]  }
  0x7c   : > { %7195 = vmatmul.mubr.bf16.gmra.mxu0 %v7725_v6  ;;  %7274 = vmatprep.subr.bf16.mxu1 %v7728_v12  ;;  %v905_v6 = vsel %vm878_vm1, %v903_v59, %v904_v3  ;;  %v373_v59 = vadd.f32 %v8373_v26, %v334_v57 }
  0x7d   : > { %7243 = vmatpush3.bf16.msra.mxu0 %v7727_v60  ;;  %7198 = vmatprep.mubr.bf16.mxu0 %v7731_v8  ;;  %v8394_v60 = vld [vmem:[%s9276_s3 + $0x38] sm:$0xff]   ;;  %v967_v8 = vsel %vm878_vm1, %v904_v3, 0.0 }
  0x7e   : > { %7244 = vmatprep.subr.bf16.mxu0 %v7729_v7  ;;  %7227 = vmatmul.mubr.bf16.gmra.mxu1 %v7726_v13  ;;  %v291_v13 = vld [vmem:[%s8019_s28 + $0xa8] sm:$0xff] }
  0x7f   : > { %7275 = vmatpush3.bf16.msra.mxu1 %v7728_v12  ;;  %7230 = vmatprep.mubr.bf16.mxu1 %v7732_v17  ;;  %v290_v12 = vld [vmem:[%s8019_s28 + $0xa0] sm:$0xff]  ;;  %v330_v17 = vmul.f32 %v8363_v42, %v291_v13  ;;  %v297_v13 = vld [vmem:[%s8019_s28 + $0xd8] sm:$0xff] }
  0x80   : > { %7276 = vmatprep.subr.bf16.mxu1 %v7730_v18 }
  0x81   : > { %7245 = vmatpush3.bf16.msra.mxu0 %v7729_v7  ;;  %v7768_v7 = vld [vmem:[%s9276_s3 + $0x48] sm:$0xff]  }
  0x82   : > { %7246 = vmatprep.subr.bf16.mxu0 %v7735_v11 }
  0x83   : > { %7277 = vmatpush3.bf16.msra.mxu1 %v7730_v18  ;;  %v7766_v18 = vld [vmem:[#allocation2 + $0xd8] sm:$0xff]  }
  0x84   : > { %7199 = vmatmul.mubr.bf16.gmra.mxu0 %v7733_v14  ;;  %7278 = vmatprep.subr.bf16.mxu1 %v7736_v23  ;;  %v366_v14 = vadd.f32 %v8373_v26, %v327_v9 }
  0x85   : > { %7247 = vmatpush3.bf16.msra.mxu0 %v7735_v11  ;;  %7250 = vmatprep.mubr.bf16.mxu0 %v7739_v15  ;;  %v6669_v11 = vpack.c.bf16 %v967_v8, %v905_v6  ;;  %v367_v15 = vadd.f32 %v8373_v26, %v328_v10  ;;  %v7784_v6 = vld [vmem:[%s9276_s3 + $0xa8] sm:$0xff]   ;;  %v8463_v8 = vmax.f32 %v373_v59, 0.0  ;;  %v7785_v10 = vld [vmem:[%s9276_s3 + $0x20] sm:$0xff]  }
  0x86   : > { %7248 = vmatprep.subr.bf16.mxu0 %v7737_v16  ;;  %7231 = vmatmul.mubr.bf16.gmra.mxu1 %v7734_v24  ;;  %v7772_v24 = vld [vmem:[#allocation2 + $0xd0] sm:$0xff]  }
  0x87   : > { %7279 = vmatpush3.bf16.msra.mxu1 %v7736_v23  ;;  %7282 = vmatprep.mubr.bf16.mxu1 %v7740_v49  ;;  %6746 = vst [vmem:[#allocation2 + $0x168] sm:$0xff] %v6669_v11   ;;  %v7771_v23 = vld [vmem:[#allocation2 + $0x130] sm:$0xff]   ;;  %v369_v49 = vadd.f32 %v8373_v26, %v330_v17  ;;  %v7786_v17 = vld [vmem:[%s9276_s3 + $0xa0] sm:$0xff]  }
  0x88   : > { %7280 = vmatprep.subr.bf16.mxu1 %v7738_v31 }
  0x89   : > { %7249 = vmatpush3.bf16.msra.mxu0 %v7737_v16  ;;  %v329_v16 = vmul.f32 %v8363_v42, %v290_v12  ;;  %v296_v12 = vld [vmem:[%s8019_s28 + $0xd0] sm:$0xff] }
  0x8a   : > { %7298 = vmatprep.subr.bf16.mxu0 %v7743_v20 }
  0x8b   : > { %7281 = vmatpush3.bf16.msra.mxu1 %v7738_v31  ;;  %v7765_v31 = vld [vmem:[#allocation2 + $0x48] sm:$0xff]  }
  0x8c   : > { %7251 = vmatmul.mubr.bf16.vlgmr.msra.gmra.mxu0 %v7741_v25  ;;  %7330 = vmatprep.subr.bf16.mxu1 %v7744_v33  ;;  %v398_v25 = vmax.f32 %v366_v14, 0.0 }
  0x8d   : > { %7299 = vmatpush3.bf16.msra.mxu0 %v7743_v20  ;;  %7254 = vmatprep.mubr.bf16.mxu0 %v7747_v29  ;;  %v7770_v20 = vld [vmem:[%s9276_s3 + $0x40] sm:$0xff]   ;;  %v399_v29 = vmax.f32 %v367_v15, 0.0 }
  0x8e   : > { %7300 = vmatprep.subr.bf16.mxu0 %v7745_v30  ;;  %7283 = vmatmul.mubr.bf16.vlgmr.msra.gmra.mxu1 %v7742_v50  ;;  %v8419_v50 = vmax.f32 %v369_v49, 0.0 }
  0x8f   : > { %7331 = vmatpush3.bf16.msra.mxu1 %v7744_v33  ;;  %7286 = vmatprep.mubr.bf16.mxu1 %v7748_v37  ;;  %v7773_v37 = vld [vmem:[#allocation2 + $0x138] sm:$0xff]   ;;  %v907_v22 = vrot.slane %v399_v29, 1 }
  0x90   : > { %7332 = vmatprep.subr.bf16.mxu1 %v7746_v38 }
  0x91   : > { %7301 = vmatpush3.bf16.msra.mxu0 %v7745_v30  ;;  %v368_v30 = vadd.f32 %v8373_v26, %v329_v16  ;;  %v968_v52 = vsel %vm878_vm1, %v907_v22, 0.0  ;;  %v910_v16 = vrot.slane %v8419_v50, 1 }
  0x92   : > { %7302 = vmatprep.subr.bf16.mxu0 %v7751_v32 }
  0x93   : > { %7333 = vmatpush3.bf16.msra.mxu1 %v7746_v38  ;;  %v8417_v33 = vmax.f32 %v368_v30, 0.0  ;;  %v7776_v38 = vld [vmem:[%s9276_s3 + $0xb8] sm:$0xff]   ;;  %v969_v49 = vsel %vm878_vm1, %v910_v16, 0.0 }
  0x94   : > { %7255 = vmatmul.mubr.bf16.gmra.mxu0 %v7749_v34  ;;  %7334 = vmatprep.subr.bf16.mxu1 %v7752_v39  ;;  %v472_v34 = vrot.slane %v398_v25, 7 }
  0x95   : > { %7303 = vmatpush3.bf16.msra.mxu0 %v7751_v32  ;;  %7258 = vmatprep.mubr.bf16.mxu0 %v7755_v35  ;;  %v6594_v32 = vpack.c.bf16 %v399_v29, %v398_v25  ;;  %v6599_v35 = vpack.c.bf16 %v8419_v50, %v8417_v33  ;;  %v475_v47 = vrot.slane %v8417_v33, 7  ;;  %v909_v15 = vrot.slane %v8417_v33, 1 }
  0x96   : > { %7304 = vmatprep.subr.bf16.mxu0 %v7753_v36  ;;  %7287 = vmatmul.mubr.bf16.gmra.mxu1 %v7750_v62  ;;  %v293_v62 = vld [vmem:[%s8019_s28 + $0xb8] sm:$0xff] }
  0x97   : > { %7335 = vmatpush3.bf16.msra.mxu1 %v7752_v39  ;;  %7290 = vmatprep.mubr.bf16.mxu1 %v7756_v45  ;;  %6731 = vst [vmem:[#allocation2 + $0xe0] sm:$0xff] %v6594_v32   ;;  %6732 = vst [vmem:[#allocation2 + $0xe8] sm:$0xff] %v6599_v35   ;;  %v292_v39 = vld [vmem:[%s8019_s28 + $0xb0] sm:$0xff]  ;;  %v332_v44 = vmul.f32 %v8363_v42, %v293_v62  ;;  %v294_v45 = vld [vmem:[%s8019_s28 + $0xc0] sm:$0xff]  ;;  %v535_v14 = vsel %vm444_vm0, 0.0, %v475_v47  ;;  %v911_v30 = vsel %vm878_vm1, %v909_v15, %v910_v16 }
  0x98   : > { %7336 = vmatprep.subr.bf16.mxu1 %v7754_v46  ;;  %v331_v43 = vmul.f32 %v8363_v42, %v292_v39  ;;  %v7787_v32 = vld [vmem:[#allocation2 + $0x150] sm:$0xff]   ;;  %v7807_v15 = vld [vmem:[%s9276_s3 + $0xf8] sm:$0xff]  }
  0x99   : > { %7305 = vmatpush3.bf16.msra.mxu0 %v7753_v36  ;;  %v473_v36 = vrot.slane %v399_v29, 7  ;;  %v371_v56 = vadd.f32 %v8373_v26, %v332_v44  ;;  %v299_v29 = vld [vmem:[%s8019_s28 + $0xe8] sm:$0xff] }
  0x9a   : > { %7306 = vmatprep.subr.bf16.mxu0 %v7759_v19  ;;  %v338_v35 = vmul.f32 %v8363_v42, %v299_v29 }
  0x9b   : > { %7337 = vmatpush3.bf16.msra.mxu1 %v7754_v46  ;;  %v8456_v3 = vmax.f32 %v371_v56, 0.0 }
  0x9c   : > { %7259 = vmatmul.mubr.bf16.gmra.mxu0 %v7757_v1  ;;  %7338 = vmatprep.subr.bf16.mxu1 %v7760_v55  ;;  %v474_v1 = vsel %vm444_vm0, %v472_v34, %v473_v36  ;;  %v6679_v36 = vpack.c.bf16 %v969_v49, %v911_v30  ;;  %v7809_v30 = vld [vmem:[%s9276_s3 + $0xf0] sm:$0xff]  }
  0x9d   : > { %7307 = vmatpush3.bf16.msra.mxu0 %v7759_v19  ;;  %7262 = vmatprep.mubr.bf16.mxu0 %v7763_v40  ;;  %v534_v19 = vsel %vm444_vm0, 0.0, %v472_v34  ;;  %v906_v40 = vrot.slane %v398_v25, 1  ;;  %v298_v25 = vld [vmem:[%s8019_s28 + $0xe0] sm:$0xff] }
  0x9e   : > { %7308 = vmatprep.subr.bf16.mxu0 %v7761_v21  ;;  %7291 = vmatmul.mubr.bf16.gmra.mxu1 %v7758_v54  ;;  %v6514_v46 = vpack.c.bf16 %v474_v1, %v534_v19  ;;  %v7778_v54 = vld [vmem:[%s9276_s3 + $0xb0] sm:$0xff]   ;;  %v7782_v9 = vld [vmem:[#allocation2 + $0xe8] sm:$0xff]   ;;  %v337_v34 = vmul.f32 %v8363_v42, %v298_v25  ;;  %v7791_v19 = vld [vmem:[%s9276_s3 + $0x18] sm:$0xff]   ;;  %v377_v1 = vadd.f32 %v8373_v26, %v338_v35 }
  0x9f   : > { %7339 = vmatpush3.bf16.msra.mxu1 %v7760_v55  ;;  %7294 = vmatprep.mubr.bf16.mxu1 %v7764_v0  ;;  %v908_v27 = vsel %vm878_vm1, %v906_v40, %v907_v22  ;;  %v370_v55 = vadd.f32 %v8373_v26, %v331_v43  ;;  %v7780_v0 = vld [vmem:[#allocation2 + $0xe0] sm:$0xff]   ;;  %6748 = vst [vmem:[#allocation2 + $0x178] sm:$0xff] %v6679_v36   ;;  %v7789_v22 = vld [vmem:[#allocation2 + $0x158] sm:$0xff]   ;;  %v7806_v25 = vld [vmem:[#allocation2 + $0x168] sm:$0xff]  }
  0xa0   : > { %7340 = vmatprep.subr.bf16.mxu1 %v7762_v2  ;;  %6715 = vst [vmem:[#allocation2 + $0x50] sm:$0xff] %v6514_v46   ;;  %v6674_v61 = vpack.c.bf16 %v968_v52, %v908_v27  ;;  %v8511_v44 = vmax.f32 %v377_v1, 0.0  ;;  %v7794_v46 = vld [vmem:[%s9276_s3 + $0x90] sm:$0xff]   ;;  %v913_v27 = vrot.slane %v8456_v3, 1  ;;  %v7795_v52 = vld [vmem:[#allocation2 + $0x160] sm:$0xff]   ;;  %v7816_v1 = vld [vmem:[%s9276_s3 + $0x128] sm:$0xff]  }
  0xa1   : > { %7309 = vmatpush3.bf16.msra.mxu0 %v7761_v21  ;;  %v7777_v21 = vld [vmem:[%s9276_s3 + $0x30] sm:$0xff]   ;;  %v8449_v53 = vmax.f32 %v370_v55, 0.0 }
  0xa2   : > { %7310 = vmatprep.subr.bf16.mxu0 %v7767_v51  ;;  %6747 = vst [vmem:[#allocation2 + $0x170] sm:$0xff] %v6674_v61   ;;  %v970_v55 = vsel %vm878_vm1, %v913_v27, 0.0  ;;  %v482_v61 = vrot.slane %v8463_v8, 7 }
  0xa3   : > { %7341 = vmatpush3.bf16.msra.mxu1 %v7762_v2  ;;  %v7783_v2 = vld [vmem:[%s9276_s3 + $0x28] sm:$0xff]  }
  0xa4   : > { %7342 = vmatprep.subr.bf16.mxu1 %v7768_v7  ;;  %7263 = vmatmul.mubr.bf16.gmra.mxu0 %v7765_v31  ;;  %v479_v31 = vrot.slane %v8456_v3, 7 }
  0xa5   : > { %7311 = vmatpush3.bf16.msra.mxu0 %v7767_v51  ;;  %7314 = vmatprep.mubr.bf16.mxu0 %v7771_v23  ;;  %v333_v51 = vmul.f32 %v8363_v42, %v294_v45 }
  0xa6   : > { %7312 = vmatprep.subr.bf16.mxu0 %v7769_v63  ;;  %7295 = vmatmul.mubr.bf16.gmra.mxu1 %v7766_v18  ;;  %v335_v18 = vmul.f32 %v8363_v42, %v296_v12  ;;  %v7804_v12 = vld [vmem:[#allocation2 + $0x160] sm:$0xff]  }
  0xa7   : > { %7343 = vmatpush3.bf16.msra.mxu1 %v7768_v7  ;;  %7346 = vmatprep.mubr.bf16.mxu1 %v7772_v24  ;;  %v372_v58 = vadd.f32 %v8373_v26, %v333_v51  ;;  %v6604_v7 = vpack.c.bf16 %v8456_v3, %v8449_v53  ;;  %v478_v24 = vrot.slane %v8449_v53, 7  ;;  %v7801_v3 = vld [vmem:[%s9276_s3] sm:$0xff]  }
  0xa8   : > { %7344 = vmatprep.subr.bf16.mxu1 %v7770_v20  ;;  %v374_v33 = vadd.f32 %v8373_v26, %v335_v18  ;;  %v7805_v18 = vld [vmem:[#allocation2 + $0x48] sm:$0xff]  }
  0xa9   : > { %7313 = vmatpush3.bf16.msra.mxu0 %v7769_v63  ;;  %v476_v63 = vrot.slane %v8419_v50, 7  ;;  %v8458_v4 = vmax.f32 %v372_v58, 0.0  ;;  %6733 = vst [vmem:[#allocation2 + $0xf0] sm:$0xff] %v6604_v7   ;;  %v7799_v58 = vld [vmem:[%s9276_s3 + $0x8] sm:$0xff]   ;;  %v7803_v7 = vld [vmem:[#allocation2 + $0x40] sm:$0xff]   ;;  %v7812_v36 = vld [vmem:[#allocation2 + $0x170] sm:$0xff]  }
  0xaa   : > { %7362 = vmatprep.subr.bf16.mxu0 %v8394_v60  ;;  %v8498_v39 = vmax.f32 %v374_v33, 0.0 }
  0xab   : > { %7345 = vmatpush3.bf16.msra.mxu1 %v7770_v20  ;;  %v6609_v11 = vpack.c.bf16 %v8463_v8, %v8458_v4  ;;  %v336_v20 = vmul.f32 %v8363_v42, %v297_v13  ;;  %v376_v42 = vadd.f32 %v8373_v26, %v337_v34  ;;  %v481_v57 = vrot.slane %v8458_v4, 7  ;;  %v7811_v34 = vld [vmem:[#allocation2 + $0x50] sm:$0xff]  }
  0xac   : > { %7394 = vmatprep.subr.bf16.mxu1 %v7776_v38  ;;  %7315 = vmatmul.mubr.bf16.vlgmr.msra.gmra.mxu0 %v7773_v37  ;;  %v480_v37 = vsel %vm444_vm0, %v478_v24, %v479_v31  ;;  %v915_v59 = vrot.slane %v8458_v4, 1 }
  0xad   : > { %7363 = vmatpush3.bf16.msra.mxu0 %v8394_v60  ;;  %v477_v60 = vsel %vm444_vm0, %v475_v47, %v476_v63  ;;  %7318 = vmatprep.mubr.bf16.mxu0 %v7779_v28  ;;  %6734 = vst [vmem:[#allocation2 + $0xf8] sm:$0xff] %v6609_v11   ;;  %v375_v50 = vadd.f32 %v8373_v26, %v336_v20  ;;  %v8509_v43 = vmax.f32 %v376_v42, 0.0  ;;  %v7793_v26 = vld [vmem:[%s9276_s3 + $0x10] sm:$0xff]   ;;  %v912_v47 = vrot.slane %v8449_v53, 1  ;;  %v7797_v28 = vld [vmem:[#allocation2 + $0x168] sm:$0xff]   ;;  %v7808_v20 = vld [vmem:[%s9276_s3 + $0x138] sm:$0xff]  }
  0xae   : > { %7347 = vmatmul.mubr.bf16.vlgmr.msra.gmra.mxu1 %v7774_v41  ;;  %7364 = vmatprep.subr.bf16.mxu0 %v7777_v21  ;;  %v6519_v23 = vpack.c.bf16 %v477_v60, %v535_v14  ;;  %v7792_v41 = vld [vmem:[%s9276_s3 + $0x98] sm:$0xff]   ;;  %v537_v63 = vsel %vm444_vm0, 0.0, %v481_v57  ;;  %v483_v53 = vsel %vm444_vm0, %v481_v57, %v482_v61  ;;  %v916_v60 = vrot.slane %v8463_v8, 1  ;;  %v7832_v61 = vld [vmem:[%s9276_s3 + $0x108] sm:$0xff]  }
  0xaf   : > { %7395 = vmatpush3.bf16.msra.mxu1 %v7776_v38  ;;  %7350 = vmatprep.mubr.bf16.mxu1 %v7780_v0  ;;  %v536_v38 = vsel %vm444_vm0, 0.0, %v478_v24  ;;  %v8500_v62 = vmax.f32 %v375_v50, 0.0  ;;  %v6619_v51 = vpack.c.bf16 %v8511_v44, %v8509_v43  ;;  %v7800_v0 = vld [vmem:[%s9276_s3 + $0x88] sm:$0xff]   ;;  %v487_v29 = vrot.slane %v8509_v43, 7 }
  0xb0   : > { %7396 = vmatprep.subr.bf16.mxu1 %v7778_v54  ;;  %6716 = vst [vmem:[#allocation2 + $0x58] sm:$0xff] %v6519_v23   ;;  %v6524_v40 = vpack.c.bf16 %v480_v37, %v536_v38  ;;  %v7788_v45 = vld [vmem:[#allocation2 + $0xf0] sm:$0xff]   ;;  %v917_v4 = vsel %vm878_vm1, %v915_v59, %v916_v60  ;;  %v971_v11 = vsel %vm878_vm1, %v916_v60, 0.0  ;;  %v488_v50 = vrot.slane %v8511_v44, 7  ;;  %v7836_v59 = vld [vmem:[#allocation2 + $0xd8] sm:$0xff]  }
  0xb1   : > { %7365 = vmatpush3.bf16.msra.mxu0 %v7777_v21  ;;  %v6614_v21 = vpack.c.bf16 %v8500_v62, %v8498_v39  ;;  %6736 = vst [vmem:[#allocation2 + $0x108] sm:$0xff] %v6619_v51   ;;  %v6689_v13 = vpack.c.bf16 %v971_v11, %v917_v4  ;;  %v485_v14 = vrot.slane %v8500_v62, 7  ;;  %v919_v24 = vrot.slane %v8500_v62, 1  ;;  %v7815_v62 = vld [vmem:[%s9276_s3 + $0xe8] sm:$0xff]  }
  0xb2   : > { %7366 = vmatprep.subr.bf16.mxu0 %v7783_v2  ;;  %6717 = vst [vmem:[#allocation2 + $0x60] sm:$0xff] %v6524_v40   ;;  %v539_v35 = vsel %vm444_vm0, 0.0, %v487_v29  ;;  %v489_v37 = vsel %vm444_vm0, %v487_v29, %v488_v50  ;;  %v921_v38 = vrot.slane %v8509_v43, 1  ;;  %v7817_v43 = vld [vmem:[%s9276_s3 + $0xe0] sm:$0xff]   ;;  %v7847_v29 = vld [vmem:[%s9276_s3 + $0x168] sm:$0xff]  }
  0xb3   : > { %7397 = vmatpush3.bf16.msra.mxu1 %v7778_v54  ;;  %6735 = vst [vmem:[#allocation2 + $0x100] sm:$0xff] %v6614_v21   ;;  %v914_v54 = vsel %vm878_vm1, %v912_v47, %v913_v27  ;;  %6750 = vst [vmem:[#allocation2 + $0x188] sm:$0xff] %v6689_v13   ;;  %v972_v31 = vsel %vm878_vm1, %v919_v24, 0.0  ;;  %v7825_v27 = vld [vmem:[%s9276_s3 + $0xd0] sm:$0xff]  }
  0xb4   : > { %7398 = vmatprep.subr.bf16.mxu1 %v7784_v6  ;;  %7319 = vmatmul.mubr.bf16.gmra.mxu0 %v7781_v5  ;;  %v7790_v48 = vld [vmem:[#allocation2 + $0xf8] sm:$0xff]   ;;  %v6684_v56 = vpack.c.bf16 %v970_v55, %v914_v54  ;;  %v7802_v5 = vld [vmem:[%s9276_s3 + $0x80] sm:$0xff]   ;;  %v7841_v13 = vld [vmem:[%s9276_s3 + $0x170] sm:$0xff]  }
  0xb5   : > { %7367 = vmatpush3.bf16.msra.mxu0 %v7783_v2  ;;  %7322 = vmatprep.mubr.bf16.mxu0 %v7787_v32  ;;  %v7810_v32 = vld [vmem:[%s9276_s3 + $0x130] sm:$0xff]  }
  0xb6   : > { %7351 = vmatmul.mubr.bf16.gmra.mxu1 %v7782_v9  ;;  %7368 = vmatprep.subr.bf16.mxu0 %v7785_v10  ;;  %6749 = vst [vmem:[#allocation2 + $0x180] sm:$0xff] %v6684_v56   ;;  %v484_v9 = vrot.slane %v8498_v39, 7  ;;  %v7831_v56 = vld [vmem:[%s9276_s3 + $0xc8] sm:$0xff]  }
  0xb7   : > { %7399 = vmatpush3.bf16.msra.mxu1 %v7784_v6  ;;  %7354 = vmatprep.mubr.bf16.mxu1 %v7788_v45  ;;  %v6529_v6 = vpack.c.bf16 %v483_v53, %v537_v63  ;;  %v7813_v42 = vld [vmem:[#allocation2 + $0x58] sm:$0xff]   ;;  %v7834_v63 = vld [vmem:[%s9276_s3 + $0x100] sm:$0xff]   ;;  %v7835_v53 = vld [vmem:[#allocation2 + $0x48] sm:$0xff]  }
  0xb8   : > { %7400 = vmatprep.subr.bf16.mxu1 %v7786_v17  ;;  %v538_v8 = vsel %vm444_vm0, 0.0, %v484_v9  ;;  %v486_v16 = vsel %vm444_vm0, %v484_v9, %v485_v14  ;;  %v7840_v9 = vld [vmem:[%s9276_s3 + $0x1b8] sm:$0xff]  }
  0xb9   : > { %7369 = vmatpush3.bf16.msra.mxu0 %v7785_v10  ;;  %v7798_v10 = vld [vmem:[#allocation2 + $0x108] sm:$0xff]   ;;  %6718 = vst [vmem:[#allocation2 + $0x68] sm:$0xff] %v6529_v6   ;;  %v6534_v23 = vpack.c.bf16 %v486_v16, %v538_v8  ;;  %v7819_v45 = vld [vmem:[#allocation2 + $0x60] sm:$0xff]   ;;  %v7842_v8 = vld [vmem:[%s9276_s3 + $0x1b0] sm:$0xff]  }
  0xba   : > { %7370 = vmatprep.subr.bf16.mxu0 %v7791_v19  ;;  %v7796_v2 = vld [vmem:[#allocation2 + $0x100] sm:$0xff]   ;;  %v7822_v51 = vld [vmem:[#allocation2 + $0x188] sm:$0xff]   ;;  %v7843_v16 = vld [vmem:[#allocation2 + $0x58] sm:$0xff]  }
  0xbb   : > { %7401 = vmatpush3.bf16.msra.mxu1 %v7786_v17  ;;  %v918_v17 = vrot.slane %v8498_v39, 1  ;;  %6719 = vst [vmem:[#allocation2 + $0x70] sm:$0xff] %v6534_v23   ;;  %v922_v39 = vrot.slane %v8511_v44, 1  ;;  %v7818_v44 = vld [vmem:[%s9276_s3 + $0x120] sm:$0xff]  }
  0xbc   : > { %7402 = vmatprep.subr.bf16.mxu1 %v7792_v41  ;;  %7323 = vmatmul.mubr.bf16.gmra.mxu0 %v7789_v22 }
  0xbd   : > { %7371 = vmatpush3.bf16.msra.mxu0 %v7791_v19  ;;  %7326 = vmatprep.mubr.bf16.mxu0 %v7795_v52  ;;  %v920_v49 = vsel %vm878_vm1, %v918_v17, %v919_v24  ;;  %v6539_v19 = vpack.c.bf16 %v489_v37, %v539_v35  ;;  %v923_v40 = vsel %vm878_vm1, %v921_v38, %v922_v39  ;;  %v973_v22 = vsel %vm878_vm1, %v922_v39, 0.0  ;;  %v7826_v52 = vld [vmem:[%s9276_s3 + $0x110] sm:$0xff]   ;;  %v7849_v35 = vld [vmem:[%s9276_s3 + $0x160] sm:$0xff]  }
  0xbe   : > { %7355 = vmatmul.mubr.bf16.gmra.mxu1 %v7790_v48  ;;  %7372 = vmatprep.subr.bf16.mxu0 %v7793_v26  ;;  %v6694_v33 = vpack.c.bf16 %v972_v31, %v920_v49  ;;  %v6699_v21 = vpack.c.bf16 %v973_v22, %v923_v40  ;;  %v7824_v48 = vld [vmem:[%s9276_s3 + $0x118] sm:$0xff]   ;;  %v7845_v49 = vld [vmem:[#allocation2 + $0x60] sm:$0xff]   ;;  %v7848_v31 = vld [vmem:[%s9276_s3 + $0x1a8] sm:$0xff]  }
  0xbf   : > { %7403 = vmatpush3.bf16.msra.mxu1 %v7792_v41  ;;  %7358 = vmatprep.mubr.bf16.mxu1 %v7796_v2  ;;  %6720 = vst [vmem:[#allocation2 + $0x78] sm:$0xff] %v6539_v19   ;;  %v7814_v41 = vld [vmem:[#allocation2 + $0x178] sm:$0xff]   ;;  %v7850_v38 = vld [vmem:[%s9276_s3 + $0x1a0] sm:$0xff]  }
  0xc0   : > { %7404 = vmatprep.subr.bf16.mxu1 %v7794_v46  ;;  %6751 = vst [vmem:[#allocation2 + $0x190] sm:$0xff] %v6694_v33   ;;  %6752 = vst [vmem:[#allocation2 + $0x198] sm:$0xff] %v6699_v21   ;;  %v7821_v47 = vld [vmem:[#allocation2 + $0x68] sm:$0xff]   ;;  %v7846_v33 = vld [vmem:[#allocation2 + $0xf0] sm:$0xff]  }
  0xc1   : > { %7373 = vmatpush3.bf16.msra.mxu0 %v7793_v26  ;;  %v7820_v26 = vld [vmem:[#allocation2 + $0x180] sm:$0xff]   ;;  %v7851_v39 = vld [vmem:[#allocation2 + $0x68] sm:$0xff]   ;;  %v7855_v22 = vld [vmem:[%s9276_s3 + $0x158] sm:$0xff]  }
  0xc2   : > { %7374 = vmatprep.subr.bf16.mxu0 %v7799_v58  ;;  %v7827_v54 = vld [vmem:[#allocation2 + $0x70] sm:$0xff]  }
  0xc3   : > { %7405 = vmatpush3.bf16.msra.mxu1 %v7794_v46  ;;  %v7823_v46 = vld [vmem:[%s9276_s3 + $0xd8] sm:$0xff]   ;;  %v300_v21 = vld [vmem:[%s8019_s28 + $0xf0] sm:$0xff] }
  0xc4   : > { %7406 = vmatprep.subr.bf16.mxu1 %v7800_v0  ;;  %7327 = vmatmul.mubr.bf16.gmra.mxu0 %v7797_v28 }
  0xc5   : > { %7375 = vmatpush3.bf16.msra.mxu0 %v7799_v58  ;;  %7378 = vmatprep.mubr.bf16.mxu0 %v7803_v7  ;;  %v7833_v58 = vld [vmem:[%s9276_s3 + $0xc0] sm:$0xff]   ;;  %v7837_v7 = vld [vmem:[#allocation2 + $0x50] sm:$0xff]  }
  0xc6   : > { %7359 = vmatmul.mubr.bf16.gmra.mxu1 %v7798_v10  ;;  %7376 = vmatprep.subr.bf16.mxu0 %v7801_v3  ;;  %v7829_v57 = vld [vmem:[#allocation2 + $0x78] sm:$0xff]   ;;  %v7838_v10 = vld [vmem:[#allocation2 + $0xe0] sm:$0xff]  }
  0xc7   : > { %7407 = vmatpush3.bf16.msra.mxu1 %v7800_v0  ;;  %7410 = vmatprep.mubr.bf16.mxu1 %v7804_v12  ;;  %v7828_v55 = vld [vmem:[#allocation2 + $0x190] sm:$0xff]   ;;  %v7830_v28 = vld [vmem:[#allocation2 + $0x198] sm:$0xff]  }
  0xc8   : > { %7408 = vmatprep.subr.bf16.mxu1 %v7802_v5 }
  0xc9   : > { %7377 = vmatpush3.bf16.msra.mxu0 %v7801_v3 }
  0xca   : > { %7426 = vmatprep.subr.bf16.mxu0 %v7807_v15 }
  0xcb   : > { %7409 = vmatpush3.bf16.msra.mxu1 %v7802_v5  ;;  %v7839_v5 = vld [vmem:[%s9276_s3 + $0x178] sm:$0xff]  }
  0xcc   : > { %7458 = vmatprep.subr.bf16.mxu1 %v7808_v20  ;;  %7379 = vmatmul.mubr.bf16.vlgmr.msra.gmra.mxu0 %v7805_v18 }
  0xcd   : > { %7427 = vmatpush3.bf16.msra.mxu0 %v7807_v15  ;;  %7382 = vmatprep.mubr.bf16.mxu0 %v7811_v34 }
  0xce   : > { %7411 = vmatmul.mubr.bf16.vlgmr.msra.gmra.mxu1 %v7806_v25  ;;  %7428 = vmatprep.subr.bf16.mxu0 %v7809_v30 }
  0xcf   : > { %7459 = vmatpush3.bf16.msra.mxu1 %v7808_v20  ;;  %7414 = vmatprep.mubr.bf16.mxu1 %v7812_v36  ;;  %v7844_v20 = vld [vmem:[#allocation2 + $0xe8] sm:$0xff]  }
  0xd0   : > { %7460 = vmatprep.subr.bf16.mxu1 %v7810_v32 }
  0xd1   : > { %7429 = vmatpush3.bf16.msra.mxu0 %v7809_v30 }
  0xd2   : > { %7430 = vmatprep.subr.bf16.mxu0 %v7815_v62 }
  0xd3   : > { %7461 = vmatpush3.bf16.msra.mxu1 %v7810_v32 }
  0xd4   : > { %7462 = vmatprep.subr.bf16.mxu1 %v7816_v1  ;;  %7383 = vmatmul.mubr.bf16.gmra.mxu0 %v7813_v42 }
  0xd5   : > { %7431 = vmatpush3.bf16.msra.mxu0 %v7815_v62  ;;  %7386 = vmatprep.mubr.bf16.mxu0 %v7819_v45  ;;  %v7917_v45 = vld [vmem:[%s9274_s1] ss:$0 sm:$0xff] }
  0xd6   : > { %7415 = vmatmul.mubr.bf16.gmra.mxu1 %v7814_v41  ;;  %7432 = vmatprep.subr.bf16.mxu0 %v7817_v43 }
  0xd7   : > { %7463 = vmatpush3.bf16.msra.mxu1 %v7816_v1  ;;  %7418 = vmatprep.mubr.bf16.mxu1 %v7820_v26  ;;  %v7852_v1 = vld [vmem:[#allocation2 + $0xf8] sm:$0xff]   ;;  %v339_v26 = vmul.f32 %v7917_v45, %v300_v21  ;;  %v7868_v21 = vld [vmem:[#allocation2 + $0x50] sm:$0xff]  }
  0xd8   : > { %7464 = vmatprep.subr.bf16.mxu1 %v7818_v44 }
  0xd9   : > { %7433 = vmatpush3.bf16.msra.mxu0 %v7817_v43 }
  0xda   : > { %7434 = vmatprep.subr.bf16.mxu0 %v7823_v46 }
  0xdb   : > { %7465 = vmatpush3.bf16.msra.mxu1 %v7818_v44  ;;  %v301_v44 = vld [vmem:[%s8019_s28 + $0xf8] sm:$0xff] }
  0xdc   : > { %7466 = vmatprep.subr.bf16.mxu1 %v7824_v48  ;;  %7387 = vmatmul.mubr.bf16.gmra.mxu0 %v7821_v47  ;;  %v7853_v47 = vld [vmem:[#allocation2 + $0x70] sm:$0xff]  }
  0xdd   : > { %7435 = vmatpush3.bf16.msra.mxu0 %v7823_v46  ;;  %7390 = vmatprep.mubr.bf16.mxu0 %v7827_v54 }
  0xde   : > { %7419 = vmatmul.mubr.bf16.gmra.mxu1 %v7822_v51  ;;  %7436 = vmatprep.subr.bf16.mxu0 %v7825_v27 }
  0xdf   : > { %7467 = vmatpush3.bf16.msra.mxu1 %v7824_v48  ;;  %7422 = vmatprep.mubr.bf16.mxu1 %v7828_v55  ;;  %v7856_v48 = vld [vmem:[%s9276_s3 + $0x198] sm:$0xff]   ;;  %v7918_v55 = vld [vmem:[%s9275_s2] ss:$0 sm:$0xff] }
  0xe0   : > { %7468 = vmatprep.subr.bf16.mxu1 %v7826_v52 }
  0xe1   : > { %7437 = vmatpush3.bf16.msra.mxu0 %v7825_v27  ;;  %v340_v27 = vmul.f32 %v7917_v45, %v301_v44  ;;  %v7867_v45 = vld [vmem:[#allocation2 + $0x168] sm:$0xff]  }
  0xe2   : > { %7438 = vmatprep.subr.bf16.mxu0 %v7831_v56 }
  0xe3   : > { %7469 = vmatpush3.bf16.msra.mxu1 %v7826_v52  ;;  %v7854_v52 = vld [vmem:[#allocation2 + $0x100] sm:$0xff]  }
  0xe4   : > { %7470 = vmatprep.subr.bf16.mxu1 %v7832_v61  ;;  %7391 = vmatmul.mubr.bf16.gmra.mxu0 %v7829_v57 }
  0xe5   : > { %7439 = vmatpush3.bf16.msra.mxu0 %v7831_v56  ;;  %7442 = vmatprep.mubr.bf16.mxu0 %v7835_v53  ;;  %v378_v56 = vadd.f32 %v7918_v55, %v339_v26 }
  0xe6   : > { %7423 = vmatmul.mubr.bf16.gmra.mxu1 %v7830_v28  ;;  %7440 = vmatprep.subr.bf16.mxu0 %v7833_v58 }
  0xe7   : > { %7471 = vmatpush3.bf16.msra.mxu1 %v7832_v61  ;;  %7474 = vmatprep.mubr.bf16.mxu1 %v7836_v59  ;;  %v7857_v61 = vld [vmem:[%s9276_s3 + $0x150] sm:$0xff]   ;;  %v410_v53 = vmax.f32 %v378_v56, 0.0 }
  0xe8   : > { %7472 = vmatprep.subr.bf16.mxu1 %v7834_v63 }
  0xe9   : > { %7441 = vmatpush3.bf16.msra.mxu0 %v7833_v58  ;;  %v379_v58 = vadd.f32 %v7918_v55, %v340_v27  ;;  %v7872_v27 = vld [vmem:[%s9276_s3 + $0x238] sm:$0xff]  }
  0xea   : > { %7490 = vmatprep.subr.bf16.mxu0 %v7839_v5 }
  0xeb   : > { %7473 = vmatpush3.bf16.msra.mxu1 %v7834_v63 }
  0xec   : > { %v7060_v0 = vpop.f32.mrf.mxu0  ;;  %7522 = vmatprep.subr.bf16.mxu1 %v7840_v9  ;;  %7443 = vmatmul.mubr.bf16.vlgmr.msra.gmra.mxu0 %v7837_v7  ;;  %v7860_v7 = vld [vmem:[#allocation2 + $0x108] sm:$0xff]  }
  0xed   : > { %v7092_v3 = vpop.f32.mrf.mxu1  ;;  %7491 = vmatpush3.bf16.msra.mxu0 %v7839_v5  ;;  %7446 = vmatprep.mubr.bf16.mxu0 %v7843_v16  ;;  %v411_v5 = vmax.f32 %v379_v58, 0.0  ;;  %v7863_v16 = vld [vmem:[%s9276_s3 + $0x148] sm:$0xff]  }
  0xee   : > { %v1335_v2 = vpop.f32.mrf.mxu0  ;;  %v8612_v60 = vadd.f32 %v7092_v3, %v7060_v0  ;;  %7475 = vmatmul.mubr.bf16.vlgmr.msra.gmra.mxu1 %v7838_v10  ;;  %7492 = vmatprep.subr.bf16.mxu0 %v7841_v13  ;;  %v7858_v0 = vld [vmem:[%s9276_s3 + $0x190] sm:$0xff]  }
  0xef   : > { %v1528_v4 = vpop.f32.mrf.mxu1  ;;  %7523 = vmatpush3.bf16.msra.mxu1 %v7840_v9  ;;  %7478 = vmatprep.mubr.bf16.mxu1 %v7844_v20  ;;  %v490_v9 = vrot.slane %v410_v53, 7  ;;  %v7864_v20 = vld [vmem:[%s9276_s3 + $0x188] sm:$0xff]  }
  0xf0   : > { %v7061_v6 = vpop.f32.mrf.mxu0  ;;  %v8617_v12 = vadd.f32 %v1528_v4, %v1335_v2  ;;  %7524 = vmatprep.subr.bf16.mxu1 %v7842_v8  ;;  %v7859_v2 = vld [vmem:[#allocation2 + $0x78] sm:$0xff]   ;;  %v491_v4 = vrot.slane %v411_v5, 7 }
  0xf1   : > { %v7093_v14 = vpop.f32.mrf.mxu1  ;;  %7493 = vmatpush3.bf16.msra.mxu0 %v7841_v13 }
  0xf2   : > { %v1338_v11 = vpop.f32.mrf.mxu0  ;;  %v8625_v15 = vadd.f32 %v7093_v14, %v7061_v6  ;;  %7494 = vmatprep.subr.bf16.mxu0 %v7847_v29 }
  0xf3   : > { %v1531_v18 = vpop.f32.mrf.mxu1  ;;  %7525 = vmatpush3.bf16.msra.mxu1 %v7842_v8  ;;  %v540_v8 = vsel %vm444_vm0, 0.0, %v490_v9 }
  0xf4   : > { %v7064_v17 = vpop.f32.mrf.mxu0  ;;  %v8627_v23 = vadd.f32 %v1531_v18, %v1338_v11  ;;  %7526 = vmatprep.subr.bf16.mxu1 %v7848_v31  ;;  %7447 = vmatmul.mubr.bf16.gmra.mxu0 %v7845_v49  ;;  %v6624_v11 = vpack.c.bf16 %v411_v5, %v410_v53  ;;  %v492_v18 = vsel %vm444_vm0, %v490_v9, %v491_v4  ;;  %v7869_v9 = vld [vmem:[#allocation2 + $0x170] sm:$0xff]  }
  0xf5   : > { %v7096_v25 = vpop.f32.mrf.mxu1  ;;  %7495 = vmatpush3.bf16.msra.mxu0 %v7847_v29  ;;  %7450 = vmatprep.mubr.bf16.mxu0 %v7851_v39  ;;  %v6544_v29 = vpack.c.bf16 %v492_v18, %v540_v8  ;;  %v7866_v39 = vld [vmem:[%s9276_s3 + $0x180] sm:$0xff]   ;;  %v7873_v8 = vld [vmem:[%s9276_s3 + $0x1f0] sm:$0xff]  }
  0xf6   : > { %v1351_v24 = vpop.f32.mrf.mxu0  ;;  %v8632_v30 = vadd.f32 %v7096_v25, %v7064_v17  ;;  %7479 = vmatmul.mubr.bf16.gmra.mxu1 %v7846_v33  ;;  %7496 = vmatprep.subr.bf16.mxu0 %v7849_v35  ;;  %6737 = vst [vmem:[#allocation2 + $0x110] sm:$0xff] %v6624_v11   ;;  %v924_v25 = vrot.slane %v410_v53, 1 }
  0xf7   : > { %v1544_v50 = vpop.f32.mrf.mxu1  ;;  %7527 = vmatpush3.bf16.msra.mxu1 %v7848_v31  ;;  %7482 = vmatprep.mubr.bf16.mxu1 %v7852_v1  ;;  %v925_v31 = vrot.slane %v411_v5, 1  ;;  %6721 = vst [vmem:[#allocation2 + $0x80] sm:$0xff] %v6544_v29  }
  0xf8   : > { %v7065_v32 = vpop.f32.mrf.mxu0  ;;  %v8637_v34 = vadd.f32 %v1544_v50, %v1351_v24  ;;  %7528 = vmatprep.subr.bf16.mxu1 %v7850_v38 }
  0xf9   : > { %v7097_v37 = vpop.f32.mrf.mxu1  ;;  %7497 = vmatpush3.bf16.msra.mxu0 %v7849_v35  ;;  %v7865_v35 = vld [vmem:[%s9276_s3 + $0x140] sm:$0xff]  }
  0xfa   : > { %v1354_v36 = vpop.f32.mrf.mxu0  ;;  %v8645_v19 = vadd.f32 %v7097_v37, %v7065_v32  ;;  %7498 = vmatprep.subr.bf16.mxu0 %v7855_v22  ;;  %v974_v37 = vsel %vm878_vm1, %v925_v31, 0.0 }
  0xfb   : > { %v1547_v42 = vpop.f32.mrf.mxu1  ;;  %7529 = vmatpush3.bf16.msra.mxu1 %v7850_v38 }
  0xfc   : > { %v7068_v62 = vpop.f32.mrf.mxu0  ;;  %v8647_v40 = vadd.f32 %v1547_v42, %v1354_v36  ;;  %7530 = vmatprep.subr.bf16.mxu1 %v7856_v48  ;;  %7451 = vmatmul.mubr.bf16.gmra.mxu0 %v7853_v47  ;;  %v926_v36 = vsel %vm878_vm1, %v924_v25, %v925_v31  ;;  %v7878_v25 = vld [vmem:[#allocation2 + $0x68] sm:$0xff]  }
  0xfd   : > { %7499 = vmatpush3.bf16.msra.mxu0 %v7855_v22  ;;  %7454 = vmatprep.mubr.bf16.mxu0 %v7859_v2  ;;  %v6704_v42 = vpack.c.bf16 %v974_v37, %v926_v36  ;;  %v7862_v44 = vld [vmem:[#allocation2 + $0x110] sm:$0xff]  }
  0xfe   : > { %v1367_v41 = vpop.f32.mrf.mxu0  ;;  %v7100_v43 = vpop.f32.mrf.mxu1  ;;  %7483 = vmatmul.mubr.bf16.gmra.mxu1 %v7854_v52  ;;  %7500 = vmatprep.subr.bf16.mxu0 %v7857_v61  ;;  %v7861_v55 = vld [vmem:[#allocation2 + $0x80] sm:$0xff]   ;;  %v7884_v36 = vld [vmem:[#allocation2 + $0x70] sm:$0xff]  }
  0xff   : > { %v8657_v46 = vadd.f32 %v7100_v43, %v7068_v62  ;;  %7531 = vmatpush3.bf16.msra.mxu1 %v7856_v48  ;;  %7486 = vmatprep.mubr.bf16.mxu1 %v7860_v7  ;;  %6753 = vst [vmem:[#allocation2 + $0x1a0] sm:$0xff] %v6704_v42  }
 0x100   : > { %v7069_v51 = vpop.f32.mrf.mxu0  ;;  %v1560_v54 = vpop.f32.mrf.mxu1  ;;  %7532 = vmatprep.subr.bf16.mxu1 %v7858_v0 }
 0x101   : > { %v8665_v57 = vadd.f32 %v1560_v54, %v1367_v41  ;;  %7501 = vmatpush3.bf16.msra.mxu0 %v7857_v61 }
 0x102   : > { %v1370_v28 = vpop.f32.mrf.mxu0  ;;  %v7101_v63 = vpop.f32.mrf.mxu1  ;;  %7502 = vmatprep.subr.bf16.mxu0 %v7863_v16 }
 0x103   : > { %v8673_v59 = vadd.f32 %v7101_v63, %v7069_v51  ;;  %7533 = vmatpush3.bf16.msra.mxu1 %v7858_v0  ;;  %v7870_v0 = vld [vmem:[#allocation2 + $0x58] sm:$0xff]  }
 0x104   : > { %v7072_v3 = vpop.f32.mrf.mxu0  ;;  %v1563_v6 = vpop.f32.mrf.mxu1  ;;  %7534 = vmatprep.subr.bf16.mxu1 %v7864_v20  ;;  %7455 = vmatmul.mubr.bf16.gmra.mxu0 %v7861_v55 }
 0x105   : > { %v8675_v10 = vadd.f32 %v1563_v6, %v1370_v28  ;;  %7503 = vmatpush3.bf16.msra.mxu0 %v7863_v16  ;;  %7506 = vmatprep.mubr.bf16.mxu0 %v7867_v45  ;;  %v7874_v6 = vld [vmem:[%s9276_s3 + $0x230] sm:$0xff]  }
 0x106   : > { %v1383_v13 = vpop.f32.mrf.mxu0  ;;  %v7104_v14 = vpop.f32.mrf.mxu1  ;;  %7504 = vmatprep.subr.bf16.mxu0 %v7865_v35  ;;  %7487 = vmatmul.mubr.bf16.gmra.mxu1 %v7862_v44 }
 0x107   : > { %v8681_v17 = vadd.f32 %v7104_v14, %v7072_v3  ;;  %7535 = vmatpush3.bf16.msra.mxu1 %v7864_v20  ;;  %7538 = vmatprep.mubr.bf16.mxu1 %v7868_v21  ;;  %v7876_v3 = vld [vmem:[#allocation2 + $0x60] sm:$0xff]  }
 0x108   : > { %v7073_v24 = vpop.f32.mrf.mxu0  ;;  %v1576_v49 = vpop.f32.mrf.mxu1  ;;  %7536 = vmatprep.subr.bf16.mxu1 %v7866_v39 }
 0x109   : > { %v8687_v32 = vadd.f32 %v1576_v49, %v1383_v13  ;;  %7505 = vmatpush3.bf16.msra.mxu0 %v7865_v35  ;;  %v7875_v13 = vld [vmem:[#allocation2 + $0x178] sm:$0xff]   ;;  %v7879_v49 = vld [vmem:[%s9276_s3 + $0x1e8] sm:$0xff]  }
 0x10a   : > { %v1386_v33 = vpop.f32.mrf.mxu0  ;;  %v7105_v50 = vpop.f32.mrf.mxu1 }
 0x10b   : > { %v8694_v38 = vadd.f32 %v7105_v50, %v7073_v24  ;;  %7537 = vmatpush3.bf16.msra.mxu1 %v7866_v39 }
 0x10c   : > { %v7124_v62 = vpop.f32.mrf.mxu0  ;;  %v1579_v1 = vpop.f32.mrf.mxu1  ;;  %7586 = vmatprep.subr.bf16.mxu1 %v7872_v27  ;;  %7507 = vmatmul.mubr.bf16.vlgmr.msra.gmra.mxu0 %v7869_v9  ;;  %v7898_v9 = vld [vmem:[%s9276_s3 + $0x200] sm:$0xff]  }
 0x10d   : > { %v1819_v22 = vadd.f32 %v7124_v62, %v8612_v60  ;;  %v8700_v41 = vadd.f32 %v1579_v1, %v1386_v33  ;;  %v7871_v60 = vld [vmem:[%s9276_s3 + $0x1f8] sm:$0xff]   ;;  %7510 = vmatprep.mubr.bf16.mxu0 %v7875_v13  ;;  %v7877_v62 = vld [vmem:[#allocation2 + $0x180] sm:$0xff]   ;;  %v7900_v13 = vld [vmem:[#allocation2 + $0x170] sm:$0xff]  }
 0x10e   : > { %v1754_v43 = vpop.f32.mrf.mxu0  ;;  %v7156_v26 = vpop.f32.mrf.mxu1  ;;  %7554 = vmatprep.subr.bf16.mxu0 %v7871_v60  ;;  %7539 = vmatmul.mubr.bf16.vlgmr.msra.gmra.mxu1 %v7870_v0 }
 0x10f   : > { %v1817_v47 = vadd.f32 %v1754_v43, %v8617_v12  ;;  %v8703_v48 = vadd.f32 %v7156_v26, %v1819_v22  ;;  %7587 = vmatpush3.bf16.msra.mxu1 %v7872_v27  ;;  %7542 = vmatprep.mubr.bf16.mxu1 %v7876_v3  ;;  %v7881_v43 = vld [vmem:[%s9276_s3 + $0x1e0] sm:$0xff]   ;;  %v7887_v27 = vld [vmem:[%s9276_s3 + $0x1d8] sm:$0xff]  }
 0x110   : > { %v7125_v51 = vpop.f32.mrf.mxu0  ;;  %v1997_v52 = vpop.f32.mrf.mxu1  ;;  %7588 = vmatprep.subr.bf16.mxu1 %v7874_v6  ;;  %7555 = vmatpush3.bf16.msra.mxu0 %v7871_v60 }
 0x111   : > { %v1820_v54 = vadd.f32 %v7125_v51, %v8625_v15  ;;  %v8712_v12 = vadd.f32 %v1997_v52, %v1817_v47  ;;  %7556 = vmatprep.subr.bf16.mxu0 %v7873_v8 }
 0x112   : > { %v1757_v56 = vpop.f32.mrf.mxu0  ;;  %v7157_v61 = vpop.f32.mrf.mxu1 }
 0x113   : > { %v1818_v28 = vadd.f32 %v1757_v56, %v8627_v23  ;;  %v8715_v58 = vadd.f32 %v7157_v61, %v1820_v54  ;;  %7589 = vmatpush3.bf16.msra.mxu1 %v7874_v6  ;;  %v7892_v61 = vld [vmem:[#allocation2 + $0x80] sm:$0xff]   ;;  %v7894_v6 = vld [vmem:[#allocation2 + $0x88] sm:$0xff]  }
 0x114   : > { %v7128_v63 = vpop.f32.mrf.mxu0  ;;  %v2000_v53 = vpop.f32.mrf.mxu1  ;;  %7557 = vmatpush3.bf16.msra.mxu0 %v7873_v8 }
 0x115   : > { %v1823_v15 = vadd.f32 %v7128_v63, %v8632_v30  ;;  %v8718_v2 = vadd.f32 %v2000_v53, %v1818_v28  ;;  %7558 = vmatprep.subr.bf16.mxu0 %v7879_v49  ;;  %7511 = vmatmul.mubr.bf16.gmra.mxu0 %v7877_v62  ;;  %v7885_v63 = vld [vmem:[#allocation2 + $0x190] sm:$0xff]   ;;  %v7891_v53 = vld [vmem:[#allocation2 + $0x198] sm:$0xff]  }
 0x116   : > { %v1770_v5 = vpop.f32.mrf.mxu0  ;;  %v7160_v23 = vpop.f32.mrf.mxu1  ;;  %7543 = vmatmul.mubr.bf16.gmra.mxu1 %v7878_v25 }
 0x117   : > { %v1821_v7 = vadd.f32 %v1770_v5, %v8637_v34  ;;  %v8724_v4 = vadd.f32 %v7160_v23, %v1823_v15  ;;  %v7880_v34 = vld [vmem:[%s9276_s3 + $0x228] sm:$0xff]   ;;  %7546 = vmatprep.mubr.bf16.mxu1 %v7884_v36  ;;  %v7889_v15 = vld [vmem:[%s9276_s3 + $0x1d0] sm:$0xff]   ;;  %v7904_v36 = vld [vmem:[#allocation2 + $0x180] sm:$0xff]  }
 0x118   : > { %v7129_v11 = vpop.f32.mrf.mxu0  ;;  %v2013_v14 = vpop.f32.mrf.mxu1  ;;  %7590 = vmatprep.subr.bf16.mxu1 %v7880_v34  ;;  %7559 = vmatpush3.bf16.msra.mxu0 %v7879_v49 }
 0x119   : > { %v1824_v30 = vadd.f32 %v7129_v11, %v8645_v19  ;;  %v8730_v16 = vadd.f32 %v2013_v14, %v1821_v7  ;;  %7591 = vmatpush3.bf16.msra.mxu1 %v7880_v34  ;;  %7560 = vmatprep.subr.bf16.mxu0 %v7881_v43  ;;  %v7893_v14 = vld [vmem:[#allocation2 + $0x1a0] sm:$0xff]  }
 0x11a   : > { %v1773_v18 = vpop.f32.mrf.mxu0  ;;  %v7161_v20 = vpop.f32.mrf.mxu1  ;;  %v7899_v34 = vld [vmem:[#allocation2 + $0xe0] sm:$0xff]  }
 0x11b   : > { %v1822_v24 = vadd.f32 %v1773_v18, %v8647_v40  ;;  %v8736_v19 = vadd.f32 %v7161_v20, %v1824_v30  ;;  %v7882_v40 = vld [vmem:[%s9276_s3 + $0x220] sm:$0xff]  }
 0x11c   : > { %v7132_v29 = vpop.f32.mrf.mxu0  ;;  %v2016_v31 = vpop.f32.mrf.mxu1  ;;  %7592 = vmatprep.subr.bf16.mxu1 %v7882_v40  ;;  %7561 = vmatpush3.bf16.msra.mxu0 %v7881_v43 }
 0x11d   : > { %v1827_v33 = vadd.f32 %v7132_v29, %v8657_v46  ;;  %v8745_v50 = vadd.f32 %v2016_v31, %v1822_v24  ;;  %v7883_v46 = vld [vmem:[#allocation2 + $0x188] sm:$0xff]   ;;  %7593 = vmatpush3.bf16.msra.mxu1 %v7882_v40  ;;  %7562 = vmatprep.subr.bf16.mxu0 %v7887_v27  ;;  %v7897_v24 = vld [vmem:[%s9276_s3 + $0x1c0] sm:$0xff]   ;;  %v7902_v40 = vld [vmem:[#allocation2 + $0x178] sm:$0xff]  }
 0x11e   : > { %v1786_v35 = vpop.f32.mrf.mxu0  ;;  %v7164_v37 = vpop.f32.mrf.mxu1  ;;  %7514 = vmatprep.mubr.bf16.mxu0 %v7883_v46  ;;  %v7903_v46 = vld [vmem:[#allocation2 + $0xf0] sm:$0xff]  }
 0x11f   : > { %v1825_v39 = vadd.f32 %v1786_v35, %v8665_v57  ;;  %v8748_v42 = vadd.f32 %v7164_v37, %v1827_v33  ;;  %v7888_v57 = vld [vmem:[%s9276_s3 + $0x218] sm:$0xff]   ;;  %7515 = vmatmul.mubr.bf16.gmra.mxu0 %v7885_v63 }
 0x120   : > { %v7133_v1 = vpop.f32.mrf.mxu0  ;;  %v2029_v22 = vpop.f32.mrf.mxu1  ;;  %7594 = vmatprep.subr.bf16.mxu1 %v7888_v57  ;;  %7563 = vmatpush3.bf16.msra.mxu0 %v7887_v27  ;;  %v7910_v63 = vld [vmem:[#allocation2 + $0x198] sm:$0xff]  }
 0x121   : > { %v1828_v21 = vadd.f32 %v7133_v1, %v8673_v59  ;;  %v8754_v44 = vadd.f32 %v2029_v22, %v1825_v39  ;;  %v7886_v59 = vld [vmem:[#allocation2 + $0x78] sm:$0xff]   ;;  %7595 = vmatpush3.bf16.msra.mxu1 %v7888_v57  ;;  %7518 = vmatprep.mubr.bf16.mxu0 %v7891_v53  ;;  %v7901_v39 = vld [vmem:[#allocation2 + $0xe8] sm:$0xff]   ;;  %v7912_v53 = vld [vmem:[#allocation2 + $0x1a0] sm:$0xff]  }
 0x122   : > { %v1789_v45 = vpop.f32.mrf.mxu0  ;;  %v7165_v26 = vpop.f32.mrf.mxu1  ;;  %7547 = vmatmul.mubr.bf16.gmra.mxu1 %v7886_v59  ;;  %7564 = vmatprep.subr.bf16.mxu0 %v7889_v15  ;;  %v7906_v57 = vld [vmem:[#allocation2 + $0x188] sm:$0xff]  }
 0x123   : > { %v1826_v47 = vadd.f32 %v1789_v45, %v8675_v10  ;;  %v8760_v60 = vadd.f32 %v7165_v26, %v1828_v21  ;;  %v7890_v10 = vld [vmem:[%s9276_s3 + $0x210] sm:$0xff]   ;;  %7550 = vmatprep.mubr.bf16.mxu1 %v7892_v61 }
 0x124   : > { %v7136_v51 = vpop.f32.mrf.mxu0  ;;  %v2032_v52 = vpop.f32.mrf.mxu1  ;;  %7596 = vmatprep.subr.bf16.mxu1 %v7890_v10  ;;  %7565 = vmatpush3.bf16.msra.mxu0 %v7889_v15  ;;  %v7909_v15 = vld [vmem:[#allocation2 + $0x108] sm:$0xff]  }
 0x125   : > { %v1831_v54 = vadd.f32 %v7136_v51, %v8681_v17  ;;  %v8769_v55 = vadd.f32 %v2032_v52, %v1826_v47  ;;  %7597 = vmatpush3.bf16.msra.mxu1 %v7890_v10  ;;  %v7908_v47 = vld [vmem:[#allocation2 + $0x190] sm:$0xff]   ;;  %v7905_v51 = vld [vmem:[#allocation2 + $0xf8] sm:$0xff]  }
 0x126   : > { %v1802_v56 = vpop.f32.mrf.mxu0  ;;  %v7168_v7 = vpop.f32.mrf.mxu1 }
 0x127   : > { %v1829_v28 = vadd.f32 %v1802_v56, %v8687_v32  ;;  %v7896_v32 = vld [vmem:[%s9276_s3 + $0x208] sm:$0xff]   ;;  %7519 = vmatmul.mubr.bf16.gmra.mxu0 %v7893_v14 }
 0x128   : > { %v7137_v0 = vpop.f32.mrf.mxu0  ;;  %7598 = vmatprep.subr.bf16.mxu1 %v7896_v32  ;;  %v2045_v30 = vpop.f32.mrf.mxu1  ;;  %7570 = vmatprep.mubr.bf16.mxu0 %v7899_v34  ;;  %v7913_v34 = vld [vmem:[#allocation2 + $0x118] sm:$0xff]  }
 0x129   : > { %v1832_v17 = vadd.f32 %v7137_v0, %v8694_v38  ;;  %v7895_v38 = vld [vmem:[%s9276_s3 + $0x1c8] sm:$0xff]   ;;  %v8794_v18 = vadd.f32 %v2045_v30, %v1829_v28  ;;  %7599 = vmatpush3.bf16.msra.mxu1 %v7896_v32 }
 0x12a   : > { %v1805_v3 = vpop.f32.mrf.mxu0  ;;  %7551 = vmatmul.mubr.bf16.gmra.mxu1 %v7894_v6  ;;  %7566 = vmatprep.subr.bf16.mxu0 %v7895_v38  ;;  %v7169_v20 = vpop.f32.mrf.mxu1 }
 0x12b   : > { %v1830_v5 = vadd.f32 %v1805_v3, %v8700_v41  ;;  %v8790_v41 = vadd.f32 %v7168_v7, %v1831_v54  ;;  %9282 = vst [vmem:[#allocation3_spill] sm:$0xff] %v8794_v18  ;;  %v8801_v29 = vadd.f32 %v7169_v20, %v1832_v17  ;;  %7600 = vmatprep.subr.bf16.mxu1 %v7898_v9  ;;  %v7907_v54 = vld [vmem:[#allocation2 + $0x100] sm:$0xff]  }
 0x12c   : > { %v8780_v23 = vpop.f32.mrf.mxu0  ;;  %7602 = vmatprep.mubr.bf16.mxu1 %v7900_v13  ;;  %v2048_v49 = vpop.f32.mrf.mxu1  ;;  %7567 = vmatpush3.bf16.msra.mxu0 %v7895_v38  ;;  %v7914_v13 = vld [vmem:[#allocation2 + $0x1a8] sm:$0xff]  }
 0x12d   : > { %9283 = vst [vmem:[#allocation4_spill] sm:$0xff] %v8801_v29  ;;  %v8805_v33 = vadd.f32 %v2048_v49, %v1830_v5  ;;  %7568 = vmatprep.subr.bf16.mxu0 %v7897_v24  ;;  %7601 = vmatpush3.bf16.msra.mxu1 %v7898_v9  ;;  %v7911_v5 = vld [vmem:[#allocation2 + $0x110] sm:$0xff]  }
 0x12e   : > { %v8788_v11 = vpop.f32.mrf.mxu0  ;;  %v8807_v35 = vpop.f32.mrf.mxu1 }
 0x12f   : > { %9284 = vst [vmem:[#allocation5_spill] sm:$0xff] %v8805_v33  ;;  %v2303_v18 = vadd.f32 %v8788_v11, %v8712_v12 }
 0x130   : > { %v8792_v8 = vpop.f32.mrf.mxu0  ;;  %v8811_v62 = vpop.f32.mrf.mxu1  ;;  %7569 = vmatpush3.bf16.msra.mxu0 %v7897_v24 }
 0x132   : > { %v8799_v25 = vpop.f32.mrf.mxu0  ;;  %7603 = vmatmul.mubr.bf16.vlgmr.msra.gmra.mxu1 %v7902_v40  ;;  %v8815_v22 = vpop.f32.mrf.mxu1 }
 0x133   : > { %7606 = vmatprep.mubr.bf16.mxu1 %v7904_v36  ;;  %7571 = vmatmul.mubr.bf16.vlgmr.msra.gmra.mxu0 %v7901_v39 }
 0x134   : > { %v8803_v31 = vpop.f32.mrf.mxu0  ;;  %v8819_v43 = vpop.f32.mrf.mxu1  ;;  %7574 = vmatprep.mubr.bf16.mxu0 %v7903_v46 }
 0x136   : > { %v8809_v37 = vpop.f32.mrf.mxu0  ;;  %v8823_v26 = vpop.f32.mrf.mxu1 }
 0x138   : > { %v8813_v1 = vpop.f32.mrf.mxu0  ;;  %v8827_v27 = vpop.f32.mrf.mxu1 }
 0x13a   : > { %v8817_v21 = vpop.f32.mrf.mxu0  ;;  %7607 = vmatmul.mubr.bf16.gmra.mxu1 %v7906_v57  ;;  %v8831_v10 = vpop.f32.mrf.mxu1 }
 0x13b   : > { %7610 = vmatprep.mubr.bf16.mxu1 %v7908_v47  ;;  %7575 = vmatmul.mubr.bf16.gmra.mxu0 %v7905_v51 }
 0x13c   : > { %v8821_v45 = vpop.f32.mrf.mxu0  ;;  %v8835_v61 = vpop.f32.mrf.mxu1  ;;  %7578 = vmatprep.mubr.bf16.mxu0 %v7907_v54 }
 0x13e   : > { %v8825_v59 = vpop.f32.mrf.mxu0  ;;  %v8839_v0 = vpop.f32.mrf.mxu1 }
 0x140   : > { %v8829_v52 = vpop.f32.mrf.mxu0  ;;  %v8843_v3 = vpop.f32.mrf.mxu1 }
 0x142   : > { %v8833_v56 = vpop.f32.mrf.mxu0  ;;  %7611 = vmatmul.mubr.bf16.gmra.mxu1 %v7910_v63  ;;  %v8847_v6 = vpop.f32.mrf.mxu1 }
 0x143   : > { %7614 = vmatprep.mubr.bf16.mxu1 %v7912_v53  ;;  %7579 = vmatmul.mubr.bf16.gmra.mxu0 %v7909_v15 }
 0x144   : > { %v8837_v28 = vpop.f32.mrf.mxu0  ;;  %v8851_v7 = vpop.f32.mrf.mxu1  ;;  %7582 = vmatprep.mubr.bf16.mxu0 %v7911_v5 }
 0x145   : > { %9288 = vst [vmem:[#allocation9_spill] sm:$0xff] %v8851_v7 }
 0x146   : > { %v8841_v17 = vpop.f32.mrf.mxu0  ;;  %v8853_v14 = vpop.f32.mrf.mxu1 }
 0x147   : > { %9285 = vst [vmem:[#allocation6_spill] sm:$0xff] %v8841_v17  ;;  %9289 = vst [vmem:[#allocation10_spill] sm:$0xff] %v8853_v14  ;;  %v2305_v14 = vadd.f32 %v8780_v23, %v8703_v48  ;;  %v2546_v48 = vadd.f32 %v8811_v62, %v2303_v18  ;;  %v2304_v23 = vadd.f32 %v8799_v25, %v8718_v2 }
 0x148   : > { %v8845_v32 = vpop.f32.mrf.mxu0  ;;  %v8855_v20 = vpop.f32.mrf.mxu1  ;;  %v2310_v62 = vadd.f32 %v8813_v1, %v8736_v19  ;;  %v2308_v19 = vadd.f32 %v8817_v21, %v8745_v50 }
 0x149   : > { %9286 = vst [vmem:[#allocation7_spill] sm:$0xff] %v8845_v32  ;;  %9290 = vst [vmem:[#allocation11_spill] sm:$0xff] %v8855_v20  ;;  %v2547_v2 = vadd.f32 %v8819_v43, %v2304_v23 }
 0x14a   : > { %v8849_v38 = vpop.f32.mrf.mxu0  ;;  %7615 = vmatmul.mubr.bf16.gmra.mxu1 %v7914_v13  ;;  %v8857_v49 = vpop.f32.mrf.mxu1  ;;  %v2551_v21 = vadd.f32 %v8835_v61, %v2308_v19 }
 0x14b   : > { %9287 = vst [vmem:[#allocation8_spill] sm:$0xff] %v8849_v38  ;;  %9291 = vst [vmem:[#allocation12_spill] sm:$0xff] %v8857_v49  ;;  %7583 = vmatmul.mubr.bf16.gmra.mxu0 %v7913_v34 }
 0x14c   : > { %v7252_v9 = vpop.f32.mrf.mxu0  ;;  %v8859_v36 = vpop.f32.mrf.mxu1  ;;  %v9301_v19 = vld [vmem:[#allocation9_spill] sm:$0xff] }
 0x14d   : > { %9292 = vst [vmem:[#allocation13_spill] sm:$0xff] %v8859_v36 }
 0x14e   : > { %v2726_v30 = vpop.f32.mrf.mxu0  ;;  %v7284_v46 = vpop.f32.mrf.mxu1 }
 0x150   : > { %v7253_v24 = vpop.f32.mrf.mxu0  ;;  %v2969_v47 = vpop.f32.mrf.mxu1 }
 0x152   : > { %v2729_v40 = vpop.f32.mrf.mxu0  ;;  %v7285_v54 = vpop.f32.mrf.mxu1 }
 0x154   : > { %v7256_v39 = vpop.f32.mrf.mxu0  ;;  %v2972_v53 = vpop.f32.mrf.mxu1 }
 0x156   : > { %v2742_v57 = vpop.f32.mrf.mxu0  ;;  %v8865_v15 = vpop.f32.mrf.mxu1 }
 0x158   : > { %v8861_v51 = vpop.f32.mrf.mxu0  ;;  %v8869_v13 = vpop.f32.mrf.mxu1 }
 0x15a   : > { %v8863_v63 = vpop.f32.mrf.mxu0  ;;  %v8871_v49 = vpop.f32.mrf.mxu1 }
 0x15b   : > { %v2794_v61 = vadd.f32 %v8863_v63, %v2551_v21 }
 0x15c   : > { %v8867_v5 = vpop.f32.mrf.mxu0  ;;  %v8875_v36 = vpop.f32.mrf.mxu1 }
 0x15e   : > { %v8873_v34 = vpop.f32.mrf.mxu0  ;;  %v8877_v38 = vpop.f32.mrf.mxu1 }
 0x15f   : > { %9293 = vst [vmem:[#allocation14_spill] sm:$0xff] %v8873_v34 }
 0x160   : > { %v8879_v33 = vpop.f32.mrf.mxu0  ;;  %v8881_v20 = vpop.f32.mrf.mxu1 }
 0x161   : > { %9294 = vst [vmem:[#allocation15_spill] sm:$0xff] %v8879_v33  ;;  %9295 = vst [vmem:[#allocation16_spill] sm:$0xff] %v8881_v20  ;;  %v2548_v33 = vadd.f32 %v8807_v35, %v2305_v14  ;;  %v2306_v20 = vadd.f32 %v8792_v8, %v8715_v58  ;;  %v2309_v58 = vadd.f32 %v8803_v31, %v8724_v4 }
 0x162   : > { %v8883_v32 = vpop.f32.mrf.mxu1  ;;  %v8885_v29 = vpop.f32.mrf.mxu0  ;;  %v2789_v8 = vadd.f32 %v2726_v30, %v2546_v48  ;;  %v2307_v14 = vadd.f32 %v8809_v37, %v8730_v16  ;;  %v2553_v48 = vadd.f32 %v8831_v10, %v2310_v62 }
 0x163   : > { %9296 = vst [vmem:[#allocation17_spill] sm:$0xff] %v8883_v32  ;;  %9297 = vst [vmem:[#allocation18_spill] sm:$0xff] %v8885_v29  ;;  %v2791_v12 = vadd.f32 %v7252_v9, %v2548_v33  ;;  %v2549_v35 = vadd.f32 %v8815_v22, %v2306_v20  ;;  %v2552_v31 = vadd.f32 %v8823_v26, %v2309_v58 }
 0x164   : > { %v8889_v17 = vpop.f32.mrf.mxu1  ;;  %v8893_v7 = vpop.f32.mrf.mxu0  ;;  %v3032_v37 = vadd.f32 %v2969_v47, %v2789_v8  ;;  %v2790_v22 = vadd.f32 %v2729_v40, %v2547_v2  ;;  %v2550_v9 = vadd.f32 %v8827_v27, %v2307_v14  ;;  %v2313_v26 = vadd.f32 %v8821_v45, %v8748_v42 }
 0x165   : > { %9298 = vst [vmem:[#allocation19_spill] sm:$0xff] %v8889_v17  ;;  %v3034_v25 = vadd.f32 %v7284_v46, %v2791_v12  ;;  %v2792_v33 = vadd.f32 %v7253_v24, %v2549_v35  ;;  %v2795_v24 = vadd.f32 %v7256_v39, %v2552_v31  ;;  %v2311_v39 = vadd.f32 %v8825_v59, %v8754_v44 }
 0x166   : > { %v8895_v34 = vpop.f32.mrf.mxu1  ;;  %v8900_v32 = vpop.f32.mrf.mxu0  ;;  %v2793_v40 = vadd.f32 %v2742_v57, %v2550_v9  ;;  %v3033_v27 = vadd.f32 %v2972_v53, %v2790_v22  ;;  %v2556_v57 = vadd.f32 %v8839_v0, %v2313_v26  ;;  %v2314_v53 = vadd.f32 %v8829_v52, %v8760_v60 }
 0x167   : > { %v3035_v20 = vadd.f32 %v7285_v54, %v2792_v33  ;;  %v2796_v54 = vadd.f32 %v8861_v51, %v2553_v48  ;;  %v3038_v42 = vadd.f32 %v8865_v15, %v2795_v24  ;;  %v2554_v14 = vadd.f32 %v8843_v3, %v2311_v39  ;;  %v9306_v39 = vld [vmem:[#allocation4_spill] sm:$0xff] }
 0x168   : > { %v8902_v29 = vpop.f32.mrf.mxu1  ;;  %v8907_v11 = vpop.f32.mrf.mxu0  ;;  %v3036_v35 = vadd.f32 %v8869_v13, %v2793_v40  ;;  %v2312_v0 = vadd.f32 %v8833_v56, %v8769_v55  ;;  %v2799_v52 = vadd.f32 %v8867_v5, %v2556_v57  ;;  %v2317_v3 = vadd.f32 %v8837_v28, %v8790_v41  ;;  %v9300_v56 = vld [vmem:[#allocation14_spill] sm:$0xff]  ;;  %v9304_v28 = vld [vmem:[#allocation15_spill] sm:$0xff] }
 0x169   : > { %9299 = vst [vmem:[#allocation20_spill] sm:$0xff] %v8902_v29  ;;  %v3039_v60 = vadd.f32 %v8871_v49, %v2796_v54  ;;  %v3037_v55 = vadd.f32 %v8875_v36, %v2794_v61  ;;  %v2797_v49 = vadd.f32 %v9300_v56, %v2554_v14  ;;  %v9307_v54 = vld [vmem:[#allocation7_spill] sm:$0xff] }
 0x16a   : > { %v8909_v17 = vpop.f32.mrf.mxu1  ;;  %v8916_v29 = vpop.f32.mrf.mxu0  ;;  %v3042_v41 = vadd.f32 %v8877_v38, %v2799_v52  ;;  %v9309_v57 = vld [vmem:[#allocation18_spill] sm:$0xff] }
 0x16c   : > { %v8918_v18 = vpop.f32.mrf.mxu1  ;;  %v7316_v4 = vpop.f32.mrf.mxu0 }
 0x16d   : > { %v3277_v43 = vadd.f32 %v7316_v4, %v3034_v25  ;;  %v2557_v4 = vadd.f32 %v8847_v6, %v2314_v53  ;;  %v9303_v6 = vld [vmem:[#allocation6_spill] sm:$0xff] }
 0x16e   : > { %v8930_v16 = vpop.f32.mrf.mxu1  ;;  %v3212_v1 = vpop.f32.mrf.mxu0 }
 0x16f   : > { %3293 = vst [vmem:[%s8928_s23 + $0x10] sm:$0xff] %v3277_v43  ;;  %v3275_v46 = vadd.f32 %v3212_v1, %v3032_v37  ;;  %v3331_v2 = vmul.f32 %v3277_v43, %v3277_v43  ;;  %v2555_v1 = vadd.f32 %v9301_v19, %v2312_v0  ;;  %v2800_v36 = vadd.f32 %v9304_v28, %v2557_v4  ;;  %v9311_v0 = vld [vmem:[#allocation5_spill] sm:$0xff] }
 0x170   : > { %v8936_v30 = vpop.f32.mrf.mxu1  ;;  %v7317_v47 = vpop.f32.mrf.mxu0 }
 0x171   : > { %3291 = vst [vmem:[%s8928_s23] sm:$0xff] %v3275_v46  ;;  %v3278_v50 = vadd.f32 %v7317_v47, %v3035_v20  ;;  %v3329_v59 = vmul.f32 %v3275_v46, %v3275_v46  ;;  %v9302_v20 = vld [vmem:[#allocation3_spill] sm:$0xff]  ;;  %v2798_v38 = vadd.f32 %v9309_v57, %v2555_v1 }
 0x172   : > { %v8942_v23 = vpop.f32.mrf.mxu1  ;;  %v3215_v12 = vpop.f32.mrf.mxu0  ;;  %v2315_v24 = vadd.f32 %v9303_v6, %v9302_v20 }
 0x173   : > { %3294 = vst [vmem:[%s8928_s23 + $0x18] sm:$0xff] %v3278_v50  ;;  %v3276_v45 = vadd.f32 %v3215_v12, %v3033_v27  ;;  %v3332_v37 = vmul.f32 %v3278_v50, %v3278_v50  ;;  %v2318_v12 = vadd.f32 %v9307_v54, %v9306_v39 }
 0x174   : > { %v8949_v10 = vpop.f32.mrf.mxu1  ;;  %v7320_v58 = vpop.f32.mrf.mxu0 }
 0x175   : > { %3292 = vst [vmem:[%s8928_s23 + $0x8] sm:$0xff] %v3276_v45  ;;  %v3307_v51 = vadd.f32 %v3276_v45, %v3275_v46  ;;  %v3330_v8 = vmul.f32 %v3276_v45, %v3276_v45  ;;  %v3281_v15 = vadd.f32 %v7320_v58, %v3038_v42  ;;  %v9308_v42 = vld [vmem:[#allocation16_spill] sm:$0xff] }
 0x176   : > { %v8958_v44 = vpop.f32.mrf.mxu1  ;;  %v3228_v63 = vpop.f32.mrf.mxu0  ;;  %v3040_v45 = vadd.f32 %v9308_v42, %v2797_v49  ;;  %v9314_v49 = vld [vmem:[#allocation12_spill] sm:$0xff] }
 0x177   : > { %v3308_v25 = vadd.f32 %v3307_v51, %v3277_v43  ;;  %v3345_v33 = vadd.f32 %v3330_v8, %v3329_v59  ;;  %3297 = vst [vmem:[%s8928_s23 + $0x30] sm:$0xff] %v3281_v15  ;;  %v3279_v62 = vadd.f32 %v3228_v63, %v3036_v35  ;;  %v9310_v8 = vld [vmem:[#allocation11_spill] sm:$0xff]  ;;  %v9313_v63 = vld [vmem:[#allocation17_spill] sm:$0xff]  ;;  %v3335_v4 = vmul.f32 %v3281_v15, %v3281_v15 }
 0x178   : > { %v8966_v13 = vpop.f32.mrf.mxu1  ;;  %v7321_v31 = vpop.f32.mrf.mxu0  ;;  %v2558_v14 = vadd.f32 %v9310_v8, %v2315_v24 }
 0x179   : > { %v3346_v22 = vadd.f32 %v3345_v33, %v3331_v2  ;;  %3295 = vst [vmem:[%s8928_s23 + $0x20] sm:$0xff] %v3279_v62  ;;  %v3309_v43 = vadd.f32 %v3308_v25, %v3278_v50  ;;  %v3282_v9 = vadd.f32 %v7321_v31, %v3039_v60  ;;  %v3333_v40 = vmul.f32 %v3279_v62, %v3279_v62  ;;  %v9305_v50 = vld [vmem:[#allocation10_spill] sm:$0xff]  ;;  %v9312_v60 = vld [vmem:[#allocation8_spill] sm:$0xff] }
 0x17a   : > { %v8974_v5 = vpop.f32.mrf.mxu1  ;;  %v3231_v46 = vpop.f32.mrf.mxu0  ;;  %v2560_v21 = vadd.f32 %v9305_v50, %v2317_v3  ;;  %v2316_v52 = vadd.f32 %v9312_v60, %v9311_v0  ;;  %v3043_v2 = vadd.f32 %v9313_v63, %v2800_v36  ;;  %v2561_v31 = vadd.f32 %v9314_v49, %v2318_v12  ;;  %v9317_v50 = vld [vmem:[#allocation20_spill] sm:$0xff] }
 0x17b   : > { %v3310_v26 = vadd.f32 %v3309_v43, %v3279_v62  ;;  %v3347_v47 = vadd.f32 %v3346_v22, %v3332_v37  ;;  %3298 = vst [vmem:[%s8928_s23 + $0x38] sm:$0xff] %v3282_v9  ;;  %v3280_v27 = vadd.f32 %v3231_v46, %v3037_v55  ;;  %v9315_v37 = vld [vmem:[#allocation19_spill] sm:$0xff]  ;;  %v2801_v43 = vadd.f32 %v8900_v32, %v2558_v14 }
 0x17c   : > { %v8982_v48 = vpop.f32.mrf.mxu1  ;;  %v7324_v53 = vpop.f32.mrf.mxu0  ;;  %v2803_v25 = vadd.f32 %v8893_v7, %v2560_v21  ;;  %v3041_v22 = vadd.f32 %v9315_v37, %v2798_v38  ;;  %v3336_v20 = vmul.f32 %v3282_v9, %v3282_v9  ;;  %v2804_v36 = vadd.f32 %v8907_v11, %v2561_v31 }
 0x17d   : > { %v3348_v61 = vadd.f32 %v3347_v47, %v3333_v40  ;;  %3296 = vst [vmem:[%s8928_s23 + $0x28] sm:$0xff] %v3280_v27  ;;  %v3311_v58 = vadd.f32 %v3310_v26, %v3280_v27  ;;  %v3334_v59 = vmul.f32 %v3280_v27, %v3280_v27  ;;  %v3285_v51 = vadd.f32 %v7324_v53, %v3042_v41  ;;  %v9316_v41 = vld [vmem:[#allocation13_spill] sm:$0xff] }
 0x17e   : > { %v8990_v35 = vpop.f32.mrf.mxu1  ;;  %v3244_v33 = vpop.f32.mrf.mxu0  ;;  %v3046_v28 = vadd.f32 %v8895_v34, %v2803_v25  ;;  %v3044_v21 = vadd.f32 %v9317_v50, %v2801_v43 }
 0x17f   : > { %v3312_v3 = vadd.f32 %v3311_v58, %v3281_v15  ;;  %v3349_v55 = vadd.f32 %v3348_v61, %v3334_v59  ;;  %3301 = vst [vmem:[%s8928_s23 + $0x50] sm:$0xff] %v3285_v51  ;;  %v3283_v56 = vadd.f32 %v3244_v33, %v3040_v45  ;;  %v2559_v15 = vadd.f32 %v9316_v41, %v2316_v52 }
 0x180   : > { %v8998_v62 = vpop.f32.mrf.mxu1  ;;  %v7325_v19 = vpop.f32.mrf.mxu0  ;;  %v3047_v45 = vadd.f32 %v8909_v17, %v2804_v36  ;;  %v3339_v53 = vmul.f32 %v3285_v51, %v3285_v51 }
 0x181   : > { %v3350_v7 = vadd.f32 %v3349_v55, %v3335_v4  ;;  %3299 = vst [vmem:[%s8928_s23 + $0x40] sm:$0xff] %v3283_v56  ;;  %v3313_v6 = vadd.f32 %v3312_v3, %v3282_v9  ;;  %v3286_v24 = vadd.f32 %v7325_v19, %v3043_v2  ;;  %v3337_v40 = vmul.f32 %v3283_v56, %v3283_v56 }
 0x182   : > { %v9004_v1 = vpop.f32.mrf.mxu1  ;;  %v3247_v46 = vpop.f32.mrf.mxu0  ;;  %v2802_v9 = vadd.f32 %v8916_v29, %v2559_v15 }
 0x183   : > { %v3314_v32 = vadd.f32 %v3313_v6, %v3283_v56  ;;  %v3351_v47 = vadd.f32 %v3350_v7, %v3336_v20  ;;  %3302 = vst [vmem:[%s8928_s23 + $0x58] sm:$0xff] %v3286_v24  ;;  %v3284_v27 = vadd.f32 %v3247_v46, %v3041_v22  ;;  %v3340_v0 = vmul.f32 %v3286_v24, %v3286_v24 }
 0x184   : > { %v9010_v26 = vpop.f32.mrf.mxu1  ;;  %v7328_v39 = vpop.f32.mrf.mxu0  ;;  %v3045_v59 = vadd.f32 %v8918_v18, %v2802_v9 }
 0x185   : > { %v3352_v12 = vadd.f32 %v3351_v47, %v3337_v40  ;;  %3300 = vst [vmem:[%s8928_s23 + $0x48] sm:$0xff] %v3284_v27  ;;  %v3315_v34 = vadd.f32 %v3314_v32, %v3284_v27  ;;  %v3338_v11 = vmul.f32 %v3284_v27, %v3284_v27  ;;  %v3289_v42 = vadd.f32 %v7328_v39, %v3046_v28 }
 0x186   : > { %v9015_v54 = vpop.f32.mrf.mxu1  ;;  %v3260_v57 = vpop.f32.mrf.mxu0 }
 0x187   : > { %v3316_v61 = vadd.f32 %v3315_v34, %v3285_v51  ;;  %v3353_v58 = vadd.f32 %v3352_v12, %v3338_v11  ;;  %3305 = vst [vmem:[%s8928_s23 + $0x70] sm:$0xff] %v3289_v42  ;;  %v3287_v29 = vadd.f32 %v3260_v57, %v3044_v21  ;;  %v3343_v37 = vmul.f32 %v3289_v42, %v3289_v42 }
 0x188   : > { %v9019_v38 = vpop.f32.mrf.mxu1  ;;  %v7329_v8 = vpop.f32.mrf.mxu0 }
 0x189   : > { %v3354_v60 = vadd.f32 %v3353_v58, %v3339_v53  ;;  %3303 = vst [vmem:[%s8928_s23 + $0x60] sm:$0xff] %v3287_v29  ;;  %v3317_v52 = vadd.f32 %v3316_v61, %v3286_v24  ;;  %v3290_v17 = vadd.f32 %v7329_v8, %v3047_v45  ;;  %v3341_v51 = vmul.f32 %v3287_v29, %v3287_v29 }
 0x18a   : > { %v9023_v14 = vpop.f32.mrf.mxu1  ;;  %v3263_v63 = vpop.f32.mrf.mxu0 }
 0x18b   : > { %v3318_v25 = vadd.f32 %v3317_v52, %v3287_v29  ;;  %v3355_v33 = vadd.f32 %v3354_v60, %v3340_v0  ;;  %3306 = vst [vmem:[%s8928_s23 + $0x78] sm:$0xff] %v3290_v17  ;;  %v3288_v4 = vadd.f32 %v3263_v63, %v3045_v59  ;;  %v3344_v24 = vmul.f32 %v3290_v17, %v3290_v17 }
 0x18c   : > { %v9026_v2 = vpop.f32.mrf.mxu1  ;;  %v7380_v3 = vpop.f32.mrf.mxu0 }
 0x18d   : > { %v3356_v18 = vadd.f32 %v3355_v33, %v3341_v51  ;;  %3304 = vst [vmem:[%s8928_s23 + $0x68] sm:$0xff] %v3288_v4  ;;  %v3319_v56 = vadd.f32 %v3318_v25, %v3288_v4  ;;  %v3342_v49 = vmul.f32 %v3288_v4, %v3288_v4  ;;  %v3765_v31 = vadd.f32 %v7380_v3, %v8930_v16 }
 0x18e   : > { %v7412_v55 = vpop.f32.mrf.mxu1  ;;  %v3756_v22 = vpop.f32.mrf.mxu0 }
 0x18f   : > { %v3320_v19 = vadd.f32 %v3319_v56, %v3289_v42  ;;  %v3357_v20 = vadd.f32 %v3356_v18, %v3342_v49  ;;  %v9031_v7 = vadd.f32 %v7412_v55, %v3765_v31  ;;  %v3757_v6 = vadd.f32 %v3756_v22, %v8936_v30 }
 0x190   : > { %v3982_v43 = vpop.f32.mrf.mxu1  ;;  %v7381_v41 = vpop.f32.mrf.mxu0 }
 0x191   : > { %v9034_v28 = vadd.f32 %v3320_v19, %v3290_v17  ;;  %v3358_v36 = vadd.f32 %v3357_v20, %v3343_v37  ;;  %v9036_v46 = vadd.f32 %v3982_v43, %v3757_v6  ;;  %v3768_v32 = vadd.f32 %v7381_v41, %v8942_v23 }
 0x192   : > { %v7413_v15 = vpop.f32.mrf.mxu1  ;;  %v3759_v16 = vpop.f32.mrf.mxu0 }
 0x193   : > { %9318 = vst [vmem:[#allocation14_spill] sm:$0xff] %v9034_v28  ;;  %v9039_v47 = vadd.f32 %v3358_v36, %v3344_v24  ;;  %v9041_v27 = vadd.f32 %v7413_v15, %v3768_v32  ;;  %v3760_v50 = vadd.f32 %v3759_v16, %v8949_v10 }
 0x194   : > { %v3985_v40 = vpop.f32.mrf.mxu1  ;;  %v7384_v21 = vpop.f32.mrf.mxu0 }
 0x195   : > { %9319 = vst [vmem:[#allocation9_spill] sm:$0xff] %v9039_v47  ;;  %v9044_v9 = vadd.f32 %v3985_v40, %v3760_v50  ;;  %v3781_v39 = vadd.f32 %v7384_v21, %v8958_v44 }
 0x196   : > { %v7416_v30 = vpop.f32.mrf.mxu1  ;;  %v3772_v12 = vpop.f32.mrf.mxu0 }
 0x197   : > { %v9047_v11 = vadd.f32 %v7416_v30, %v3781_v39  ;;  %v3773_v23 = vadd.f32 %v3772_v12, %v8966_v13 }
 0x198   : > { %v3998_v34 = vpop.f32.mrf.mxu1  ;;  %v7385_v42 = vpop.f32.mrf.mxu0 }
 0x199   : > { %v9050_v57 = vadd.f32 %v3998_v34, %v3773_v23  ;;  %v3784_v53 = vadd.f32 %v7385_v42, %v8974_v5 }
 0x19a   : > { %v7417_v45 = vpop.f32.mrf.mxu1  ;;  %v3775_v61 = vpop.f32.mrf.mxu0 }
 0x19b   : > { %v9053_v58 = vadd.f32 %v7417_v45, %v3784_v53  ;;  %v3776_v29 = vadd.f32 %v3775_v61, %v8982_v48 }
 0x19c   : > { %v4001_v10 = vpop.f32.mrf.mxu1  ;;  %v7388_v59 = vpop.f32.mrf.mxu0 }
 0x19d   : > { %v9056_v8 = vadd.f32 %v4001_v10, %v3776_v29  ;;  %v3797_v0 = vadd.f32 %v7388_v59, %v8990_v35 }
 0x19e   : > { %v7420_v44 = vpop.f32.mrf.mxu1  ;;  %v3788_v60 = vpop.f32.mrf.mxu0 }
 0x19f   : > { %v9059_v52 = vadd.f32 %v7420_v44, %v3797_v0  ;;  %v3789_v17 = vadd.f32 %v3788_v60, %v8998_v62 }
 0x1a0   : > { %v4014_v13 = vpop.f32.mrf.mxu1  ;;  %v7389_v63 = vpop.f32.mrf.mxu0 }
 0x1a1   : > { %v9062_v25 = vadd.f32 %v4014_v13, %v3789_v17  ;;  %v3800_v51 = vadd.f32 %v7389_v63, %v9004_v1 }
 0x1a2   : > { %v7421_v5 = vpop.f32.mrf.mxu1  ;;  %v3791_v33 = vpop.f32.mrf.mxu0 }
 0x1a3   : > { %v9065_v4 = vadd.f32 %v7421_v5, %v3800_v51  ;;  %v3792_v3 = vadd.f32 %v3791_v33, %v9010_v26 }
 0x1a4   : > { %v4017_v48 = vpop.f32.mrf.mxu1  ;;  %v7392_v55 = vpop.f32.mrf.mxu0 }
 0x1a5   : > { %v9068_v18 = vadd.f32 %v4017_v48, %v3792_v3  ;;  %v3813_v56 = vadd.f32 %v7392_v55, %v9015_v54 }
 0x1a6   : > { %v7424_v35 = vpop.f32.mrf.mxu1  ;;  %v3804_v49 = vpop.f32.mrf.mxu0 }
 0x1a7   : > { %v9071_v31 = vadd.f32 %v7424_v35, %v3813_v56  ;;  %v3805_v37 = vadd.f32 %v3804_v49, %v9019_v38 }
 0x1a8   : > { %v4030_v62 = vpop.f32.mrf.mxu1  ;;  %v7393_v22 = vpop.f32.mrf.mxu0 }
 0x1a9   : > { %v9074_v43 = vadd.f32 %v4030_v62, %v3805_v37  ;;  %v3816_v19 = vadd.f32 %v7393_v22, %v9023_v14 }
 0x1aa   : > { %v7425_v1 = vpop.f32.mrf.mxu1  ;;  %v3807_v20 = vpop.f32.mrf.mxu0 }
 0x1ab   : > { %9320 = vst [vmem:[#allocation3_spill] sm:$0xff] %v9074_v43  ;;  %v9077_v6 = vadd.f32 %v7425_v1, %v3816_v19  ;;  %v3808_v24 = vadd.f32 %v3807_v20, %v9026_v2 }
 0x1ac   : > { %v4033_v26 = vpop.f32.mrf.mxu1  ;;  %v7444_v41 = vpop.f32.mrf.mxu0 }
 0x1ad   : > { %9321 = vst [vmem:[#allocation6_spill] sm:$0xff] %v9077_v6  ;;  %v9080_v15 = vadd.f32 %v4033_v26, %v3808_v24 }
 0x1ae   : > { %v7476_v54 = vpop.f32.mrf.mxu1  ;;  %v4224_v36 = vpop.f32.mrf.mxu0 }
 0x1af   : > { %9322 = vst [vmem:[#allocation15_spill] sm:$0xff] %v9080_v15 }
 0x1b0   : > { %v4466_v32 = vpop.f32.mrf.mxu1  ;;  %v7445_v16 = vpop.f32.mrf.mxu0 }
 0x1b2   : > { %v9082_v38 = vpop.f32.mrf.mxu1  ;;  %v4227_v40 = vpop.f32.mrf.mxu0 }
 0x1b4   : > { %v9084_v50 = vpop.f32.mrf.mxu1  ;;  %v9086_v21 = vpop.f32.mrf.mxu0 }
 0x1b6   : > { %v9088_v14 = vpop.f32.mrf.mxu1  ;;  %v9090_v30 = vpop.f32.mrf.mxu0 }
 0x1b8   : > { %v9092_v39 = vpop.f32.mrf.mxu1  ;;  %v9094_v2 = vpop.f32.mrf.mxu0 }
 0x1ba   : > { %v9096_v12 = vpop.f32.mrf.mxu1  ;;  %v9098_v34 = vpop.f32.mrf.mxu0 }
 0x1bc   : > { %v9100_v23 = vpop.f32.mrf.mxu1  ;;  %v9102_v42 = vpop.f32.mrf.mxu0 }
 0x1be   : > { %v9104_v45 = vpop.f32.mrf.mxu1  ;;  %v9106_v53 = vpop.f32.mrf.mxu0 }
 0x1c0   : > { %v9108_v61 = vpop.f32.mrf.mxu1  ;;  %v9112_v29 = vpop.f32.mrf.mxu0 }
 0x1c2   : > { %v9110_v10 = vpop.f32.mrf.mxu1  ;;  %v9116_v44 = vpop.f32.mrf.mxu0 }
 0x1c4   : > { %v9114_v59 = vpop.f32.mrf.mxu1  ;;  %v9122_v13 = vpop.f32.mrf.mxu0 }
 0x1c6   : > { %v9118_v0 = vpop.f32.mrf.mxu1  ;;  %v9126_v63 = vpop.f32.mrf.mxu0 }
 0x1c7   : > { %9325 = vst [vmem:[#allocation7_spill] sm:$0xff] %v9126_v63 }
 0x1c8   : > { %v9120_v60 = vpop.f32.mrf.mxu1  ;;  %v9130_v51 = vpop.f32.mrf.mxu0 }
 0x1c9   : > { %9323 = vst [vmem:[#allocation10_spill] sm:$0xff] %v9120_v60  ;;  %9327 = vst [vmem:[#allocation18_spill] sm:$0xff] %v9130_v51 }
 0x1ca   : > { %v9124_v17 = vpop.f32.mrf.mxu1  ;;  %v9132_v48 = vpop.f32.mrf.mxu0 }
 0x1cb   : > { %9324 = vst [vmem:[#allocation4_spill] sm:$0xff] %v9124_v17  ;;  %9328 = vst [vmem:[#allocation11_spill] sm:$0xff] %v9132_v48 }
 0x1cc   : > { %v9128_v5 = vpop.f32.mrf.mxu1  ;;  %v7508_v55 = vpop.f32.mrf.mxu0 }
 0x1cd   : > { %9326 = vst [vmem:[#allocation16_spill] sm:$0xff] %v9128_v5 }
 0x1ce   : > { %v7540_v33 = vpop.f32.mrf.mxu1  ;;  %v4708_v56 = vpop.f32.mrf.mxu0 }
 0x1d0   : > { %v4950_v3 = vpop.f32.mrf.mxu1  ;;  %v7509_v62 = vpop.f32.mrf.mxu0 }
 0x1d2   : > { %v7541_v35 = vpop.f32.mrf.mxu1  ;;  %v4711_v22 = vpop.f32.mrf.mxu0 }
 0x1d4   : > { %v4953_v49 = vpop.f32.mrf.mxu1 }
 0x1d5   : > { %v7512_v19 = vpop.f32.mrf.mxu0 }
 0x1d6   : > { %v9134_v37 = vpop.f32.mrf.mxu1 }
 0x1d7   : > { %v4724_v26 = vpop.f32.mrf.mxu0 }
 0x1d8   : > { %v9136_v1 = vpop.f32.mrf.mxu1 }
 0x1d9   : > { %v9142_v47 = vpop.f32.mrf.mxu0 }
 0x1da   : > { %v9138_v20 = vpop.f32.mrf.mxu1 }
 0x1db   : > { %9329 = vst [vmem:[#allocation5_spill] sm:$0xff] %v9138_v20  ;;  %v9146_v5 = vpop.f32.mrf.mxu0 }
 0x1dc   : > { %v9140_v24 = vpop.f32.mrf.mxu1 }
 0x1dd   : > { %9330 = vst [vmem:[#allocation8_spill] sm:$0xff] %v9140_v24  ;;  %v4289_v24 = vadd.f32 %v7444_v41, %v9031_v7  ;;  %v4288_v7 = vadd.f32 %v4227_v40, %v9044_v9 }
 0x1df   : > { %v9150_v15 = vpop.f32.mrf.mxu0 }
 0x1e0   : > { %9333 = vst [vmem:[#allocation19_spill] sm:$0xff] %v9150_v15  ;;  %v4531_v15 = vadd.f32 %v7476_v54, %v4289_v24 }
 0x1e1   : > { %v9154_v60 = vpop.f32.mrf.mxu0 }
 0x1e2   : > { %v9144_v28 = vpop.f32.mrf.mxu1  ;;  %9335 = vst [vmem:[#allocation20_spill] sm:$0xff] %v9154_v60  ;;  %v4773_v41 = vadd.f32 %v7508_v55, %v4531_v15 }
 0x1e3   : > { %9331 = vst [vmem:[#allocation17_spill] sm:$0xff] %v9144_v28  ;;  %v9158_v20 = vpop.f32.mrf.mxu0  ;;  %v4287_v28 = vadd.f32 %v4224_v36, %v9036_v46  ;;  %v4293_v36 = vadd.f32 %v9086_v21, %v9047_v11  ;;  %v4292_v21 = vadd.f32 %v9098_v34, %v9056_v8 }
 0x1e4   : > { %v9148_v48 = vpop.f32.mrf.mxu1  ;;  %9337 = vst [vmem:[#allocation22_spill] sm:$0xff] %v9158_v20  ;;  %v5015_v9 = vadd.f32 %v7540_v33, %v4773_v41 }
 0x1e5   : > { %9332 = vst [vmem:[#allocation12_spill] sm:$0xff] %v9148_v48  ;;  %v9163_v63 = vpop.f32.mrf.mxu0  ;;  %v4529_v20 = vadd.f32 %v4466_v32, %v4287_v28  ;;  %v4530_v28 = vadd.f32 %v9084_v50, %v4288_v7  ;;  %v4535_v55 = vadd.f32 %v9088_v14, %v4293_v36  ;;  %v4297_v14 = vadd.f32 %v9102_v42, %v9059_v52 }
 0x1e6   : > { %v9152_v17 = vpop.f32.mrf.mxu1  ;;  %9339 = vst [vmem:[#allocation24_spill] sm:$0xff] %v9163_v63  ;;  %v4296_v52 = vadd.f32 %v9116_v44, %v9068_v18 }
 0x1e7   : > { %9334 = vst [vmem:[#allocation13_spill] sm:$0xff] %v9152_v17  ;;  %v9168_v48 = vpop.f32.mrf.mxu0  ;;  %v4290_v17 = vadd.f32 %v7445_v16, %v9041_v27  ;;  %v4771_v54 = vadd.f32 %v4708_v56, %v4529_v20  ;;  %v4291_v27 = vadd.f32 %v9090_v30, %v9050_v57  ;;  %v4294_v57 = vadd.f32 %v9094_v2, %v9053_v58 }
 0x1e8   : > { %v9156_v51 = vpop.f32.mrf.mxu1  ;;  %v4777_v33 = vadd.f32 %v7512_v19, %v4535_v55  ;;  %v4534_v19 = vadd.f32 %v9100_v23, %v4292_v21  ;;  %v4538_v41 = vadd.f32 %v9114_v59, %v4296_v52  ;;  %v9347_v59 = vld [vmem:[#allocation5_spill] sm:$0xff] }
 0x1e9   : > { %9336 = vst [vmem:[#allocation21_spill] sm:$0xff] %v9156_v51  ;;  %v9173_v51 = vpop.f32.mrf.mxu0  ;;  %v4532_v46 = vadd.f32 %v9082_v38, %v4290_v17  ;;  %v4772_v38 = vadd.f32 %v4711_v22, %v4530_v28  ;;  %v4533_v11 = vadd.f32 %v9092_v39, %v4291_v27  ;;  %v4298_v39 = vadd.f32 %v9112_v29, %v9065_v4  ;;  %v9344_v28 = vld [vmem:[#allocation7_spill] sm:$0xff] }
 0x1ea   : > { %v9161_v6 = vpop.f32.mrf.mxu1  ;;  %v5019_v4 = vadd.f32 %v9134_v37, %v4777_v33  ;;  %v4776_v7 = vadd.f32 %v9146_v5, %v4534_v19  ;;  %v9349_v33 = vld [vmem:[#allocation17_spill] sm:$0xff] }
 0x1eb   : > { %9338 = vst [vmem:[#allocation23_spill] sm:$0xff] %v9161_v6  ;;  %v9178_v63 = vpop.f32.mrf.mxu0  ;;  %v4774_v15 = vadd.f32 %v7509_v62, %v4532_v46  ;;  %v5014_v2 = vadd.f32 %v4953_v49, %v4772_v38  ;;  %v4775_v22 = vadd.f32 %v4724_v26, %v4533_v11  ;;  %v4539_v26 = vadd.f32 %v9104_v45, %v4297_v14  ;;  %v9342_v46 = vld [vmem:[#allocation19_spill] sm:$0xff] }
 0x1ec   : > { %v9166_v43 = vpop.f32.mrf.mxu1  ;;  %v4540_v44 = vadd.f32 %v9110_v10, %v4298_v39 }
 0x1ed   : > { %v9185_v16 = vpop.f32.mrf.mxu0  ;;  %v5016_v30 = vadd.f32 %v7541_v35, %v4774_v15  ;;  %v4781_v36 = vadd.f32 %v9342_v46, %v4539_v26  ;;  %v9345_v15 = vld [vmem:[#allocation6_spill] sm:$0xff]  ;;  %v9353_v52 = vld [vmem:[#allocation24_spill] sm:$0xff] }
 0x1ee   : > { %v9171_v60 = vpop.f32.mrf.mxu1 }
 0x1ef   : > { %9340 = vst [vmem:[#allocation25_spill] sm:$0xff] %v9171_v60 }
 0x1f0   : > { %v9176_v6 = vpop.f32.mrf.mxu1 }
 0x1f1   : > { %9341 = vst [vmem:[#allocation26_spill] sm:$0xff] %v9176_v6  ;;  %v5013_v6 = vadd.f32 %v4950_v3, %v4771_v54  ;;  %v4295_v3 = vadd.f32 %v9106_v53, %v9062_v25  ;;  %v4301_v25 = vadd.f32 %v9122_v13, %v9071_v31  ;;  %v5017_v31 = vadd.f32 %v9136_v1, %v4775_v22  ;;  %v9343_v1 = vld [vmem:[#allocation3_spill] sm:$0xff] }
 0x1f2   : > { %v7604_v24 = vpop.f32.mrf.mxu1 }
 0x1f3   : > { %v7572_v40 = vpop.f32.mrf.mxu0  ;;  %v4543_v45 = vadd.f32 %v9118_v0, %v4301_v25  ;;  %v9348_v0 = vld [vmem:[#allocation8_spill] sm:$0xff]  ;;  %v4780_v25 = vadd.f32 %v9353_v52, %v4538_v41 }
 0x1f4   : > { %v5434_v32 = vpop.f32.mrf.mxu1  ;;  %v5257_v17 = vadd.f32 %v7572_v40, %v5015_v9  ;;  %v4299_v9 = vadd.f32 %v9344_v28, %v9343_v1  ;;  %v5018_v38 = vadd.f32 %v9348_v0, %v4776_v7 }
 0x1f5   : > { %v5192_v50 = vpop.f32.mrf.mxu0  ;;  %v4785_v28 = vadd.f32 %v9168_v48, %v4543_v45 }
 0x1f6   : > { %v7605_v60 = vpop.f32.mrf.mxu1  ;;  %v5499_v56 = vadd.f32 %v7604_v24, %v5257_v17  ;;  %v5255_v62 = vadd.f32 %v5192_v50, %v5013_v6  ;;  %v4536_v6 = vadd.f32 %v9096_v12, %v4294_v57  ;;  %v4537_v12 = vadd.f32 %v9108_v61, %v4295_v3  ;;  %v9351_v3 = vld [vmem:[#allocation22_spill] sm:$0xff] }
 0x1f7   : > { %v7573_v58 = vpop.f32.mrf.mxu0  ;;  %v4782_v39 = vadd.f32 %v9351_v3, %v4540_v44 }
 0x1f8   : > { %v5437_v20 = vpop.f32.mrf.mxu1  ;;  %6352 = vst [vmem:[%s8928_s23 + $0x90] sm:$0xff] %v5499_v56  ;;  %v5497_v8 = vadd.f32 %v5434_v32, %v5255_v62  ;;  %v5258_v34 = vadd.f32 %v7573_v58, %v5016_v30  ;;  %v4778_v23 = vadd.f32 %v9142_v47, %v4536_v6  ;;  %v9346_v32 = vld [vmem:[#allocation18_spill] sm:$0xff]  ;;  %v5554_v11 = vmul.f32 %v5499_v56, %v5499_v56 }
 0x1f9   : > { %v5195_v42 = vpop.f32.mrf.mxu0  ;;  %v4302_v40 = vadd.f32 %v9346_v32, %v9345_v15  ;;  %v5023_v62 = vadd.f32 %v9349_v33, %v4781_v36  ;;  %v9358_v36 = vld [vmem:[#allocation13_spill] sm:$0xff] }
 0x1fa   : > { %v7608_v35 = vpop.f32.mrf.mxu1  ;;  %6350 = vst [vmem:[%s8928_s23 + $0x80] sm:$0xff] %v5497_v8  ;;  %v5500_v53 = vadd.f32 %v7605_v60, %v5258_v34  ;;  %v5256_v29 = vadd.f32 %v5195_v42, %v5014_v2  ;;  %v5552_v61 = vmul.f32 %v5497_v8, %v5497_v8  ;;  %v5020_v55 = vadd.f32 %v9347_v59, %v4778_v23 }
 0x1fb   : > { %v7576_v18 = vpop.f32.mrf.mxu0 }
 0x1fc   : > { %v5450_v49 = vpop.f32.mrf.mxu1  ;;  %6353 = vst [vmem:[%s8928_s23 + $0x98] sm:$0xff] %v5500_v53  ;;  %v5498_v13 = vadd.f32 %v5437_v20, %v5256_v29  ;;  %v5261_v37 = vadd.f32 %v7576_v18, %v5019_v4  ;;  %v9350_v20 = vld [vmem:[#allocation20_spill] sm:$0xff]  ;;  %v5555_v22 = vmul.f32 %v5500_v53, %v5500_v53 }
 0x1fd   : > { %v5208_v47 = vpop.f32.mrf.mxu0  ;;  %v4779_v14 = vadd.f32 %v9350_v20, %v4537_v12  ;;  %v9354_v18 = vld [vmem:[#allocation4_spill] sm:$0xff] }
 0x1fe   : > { %v7609_v60 = vpop.f32.mrf.mxu1  ;;  %6351 = vst [vmem:[%s8928_s23 + $0x88] sm:$0xff] %v5498_v13  ;;  %v5530_v5 = vadd.f32 %v5498_v13, %v5497_v8  ;;  %v5553_v54 = vmul.f32 %v5498_v13, %v5498_v13  ;;  %v5503_v24 = vadd.f32 %v7608_v35, %v5261_v37  ;;  %v5259_v10 = vadd.f32 %v5208_v47, %v5017_v31  ;;  %v9355_v31 = vld [vmem:[#allocation15_spill] sm:$0xff]  ;;  %v9357_v37 = vld [vmem:[#allocation12_spill] sm:$0xff] }
 0x1ff   : > { %v7577_v17 = vpop.f32.mrf.mxu0  ;;  %v4544_v44 = vadd.f32 %v9354_v18, %v4302_v40  ;;  %v5021_v46 = vadd.f32 %v9357_v37, %v4779_v14  ;;  %v9364_v37 = vld [vmem:[#allocation14_spill] sm:$0xff] }
 0x200   : > { %v5453_v27 = vpop.f32.mrf.mxu1  ;;  %v5531_v57 = vadd.f32 %v5530_v5, %v5499_v56  ;;  %v5568_v21 = vadd.f32 %v5553_v54, %v5552_v61  ;;  %6356 = vst [vmem:[%s8928_s23 + $0xb0] sm:$0xff] %v5503_v24  ;;  %v5501_v50 = vadd.f32 %v5450_v49, %v5259_v10  ;;  %v5262_v58 = vadd.f32 %v7577_v17, %v5020_v55  ;;  %v9352_v56 = vld [vmem:[#allocation10_spill] sm:$0xff] }
 0x201   : > { %v5211_v2 = vpop.f32.mrf.mxu0  ;;  %v4541_v19 = vadd.f32 %v9352_v56, %v4299_v9  ;;  %v5024_v61 = vadd.f32 %v9358_v36, %v4782_v39  ;;  %v5558_v40 = vmul.f32 %v5503_v24, %v5503_v24  ;;  %v4786_v17 = vadd.f32 %v9178_v63, %v4544_v44 }
 0x202   : > { %v7612_v30 = vpop.f32.mrf.mxu1  ;;  %v5569_v8 = vadd.f32 %v5568_v21, %v5554_v11  ;;  %6354 = vst [vmem:[%s8928_s23 + $0xa0] sm:$0xff] %v5501_v50  ;;  %v5532_v34 = vadd.f32 %v5531_v57, %v5500_v53  ;;  %v5260_v35 = vadd.f32 %v5211_v2, %v5018_v38  ;;  %v5556_v42 = vmul.f32 %v5501_v50, %v5501_v50  ;;  %v9356_v53 = vld [vmem:[#allocation11_spill] sm:$0xff] }
 0x203   : > { %v5504_v4 = vadd.f32 %v7609_v60, %v5262_v58  ;;  %v7580_v29 = vpop.f32.mrf.mxu0  ;;  %v4300_v13 = vadd.f32 %v9356_v53, %v9355_v31  ;;  %v4783_v9 = vadd.f32 %v9173_v51, %v4541_v19  ;;  %v9360_v51 = vld [vmem:[#allocation16_spill] sm:$0xff] }
 0x204   : > { %v5466_v6 = vpop.f32.mrf.mxu1  ;;  %v5533_v49 = vadd.f32 %v5532_v34, %v5501_v50  ;;  %v5570_v26 = vadd.f32 %v5569_v8, %v5555_v22  ;;  %v5502_v12 = vadd.f32 %v5453_v27, %v5260_v35  ;;  %v5265_v23 = vadd.f32 %v7580_v29, %v5023_v62  ;;  %v9359_v27 = vld [vmem:[#allocation21_spill] sm:$0xff]  ;;  %v9361_v62 = vld [vmem:[#allocation23_spill] sm:$0xff] }
 0x205   : > { %6357 = vst [vmem:[%s8928_s23 + $0xb8] sm:$0xff] %v5504_v4  ;;  %v5224_v41 = vpop.f32.mrf.mxu0  ;;  %v5022_v1 = vadd.f32 %v9359_v27, %v4780_v25  ;;  %v5559_v11 = vmul.f32 %v5504_v4, %v5504_v4  ;;  %v4542_v33 = vadd.f32 %v9360_v51, %v4300_v13  ;;  %v5025_v20 = vadd.f32 %v9166_v43, %v4783_v9  ;;  %v9362_v22 = vld [vmem:[#allocation25_spill] sm:$0xff] }
 0x206   : > { %v7613_v7 = vpop.f32.mrf.mxu1  ;;  %v5571_v47 = vadd.f32 %v5570_v26, %v5556_v42  ;;  %6355 = vst [vmem:[%s8928_s23 + $0xa8] sm:$0xff] %v5502_v12  ;;  %v5534_v60 = vadd.f32 %v5533_v49, %v5502_v12  ;;  %v5557_v5 = vmul.f32 %v5502_v12, %v5502_v12  ;;  %v5507_v54 = vadd.f32 %v7612_v30, %v5265_v23 }
 0x207   : > { %v5263_v15 = vadd.f32 %v5224_v41, %v5021_v46  ;;  %v7581_v32 = vpop.f32.mrf.mxu0  ;;  %v5028_v8 = vadd.f32 %v9362_v22, %v4786_v17  ;;  %v4784_v34 = vadd.f32 %v9185_v16, %v4542_v33  ;;  %v3322_v46 = vrot.slane %v9364_v37, 4 }
 0x208   : > { %v5469_v10 = vpop.f32.mrf.mxu1  ;;  %v5535_v59 = vadd.f32 %v5534_v60, %v5503_v24  ;;  %v5572_v55 = vadd.f32 %v5571_v47, %v5557_v5  ;;  %6360 = vst [vmem:[%s8928_s23 + $0xd0] sm:$0xff] %v5507_v54  ;;  %v5266_v0 = vadd.f32 %v7581_v32, %v5024_v61  ;;  %v5027_v24 = vadd.f32 %v9361_v62, %v4785_v28  ;;  %v9365_v5 = vld [vmem:[#allocation9_spill] sm:$0xff] }
 0x209   : > { %v5505_v57 = vadd.f32 %v5466_v6, %v5263_v15  ;;  %v5227_v21 = vpop.f32.mrf.mxu0  ;;  %v5562_v25 = vmul.f32 %v5507_v54, %v5507_v54 }
 0x20a   : > { %v7616_v38 = vpop.f32.mrf.mxu1  ;;  %v5573_v50 = vadd.f32 %v5572_v55, %v5558_v40  ;;  %v5536_v30 = vadd.f32 %v5535_v59, %v5504_v4  ;;  %v5508_v48 = vadd.f32 %v7613_v7, %v5266_v0  ;;  %v5264_v45 = vadd.f32 %v5227_v21, %v5022_v1  ;;  %v9363_v7 = vld [vmem:[#allocation26_spill] sm:$0xff] }
 0x20b   : > { %6358 = vst [vmem:[%s8928_s23 + $0xc0] sm:$0xff] %v5505_v57  ;;  %v7584_v14 = vpop.f32.mrf.mxu0  ;;  %v5560_v39 = vmul.f32 %v5505_v57, %v5505_v57  ;;  %v5026_v16 = vadd.f32 %v9363_v7, %v4784_v34  ;;  %v3323_v1 = vadd.f32 %v3322_v46, %v9364_v37 }
 0x20c   : > { %v5537_v3 = vadd.f32 %v5536_v30, %v5505_v57  ;;  %v5574_v63 = vadd.f32 %v5573_v50, %v5559_v11  ;;  %6361 = vst [vmem:[%s8928_s23 + $0xd8] sm:$0xff] %v5508_v48  ;;  %v5506_v58 = vadd.f32 %v5469_v10, %v5264_v45  ;;  %v5482_v2 = vpop.f32.mrf.mxu1  ;;  %v5269_v35 = vadd.f32 %v7584_v14, %v5027_v24 }
 0x20d   : > { %v5240_v6 = vpop.f32.mrf.mxu0  ;;  %v5563_v44 = vmul.f32 %v5508_v48, %v5508_v48  ;;  %v3324_v55 = vrot.slane %v3323_v1, 2 }
 0x20e   : > { %v5575_v56 = vadd.f32 %v5574_v63, %v5560_v39  ;;  %6359 = vst [vmem:[%s8928_s23 + $0xc8] sm:$0xff] %v5506_v58  ;;  %v5538_v19 = vadd.f32 %v5537_v3, %v5506_v58  ;;  %v5561_v43 = vmul.f32 %v5506_v58, %v5506_v58  ;;  %v5267_v52 = vadd.f32 %v5240_v6, %v5025_v20  ;;  %v7617_v23 = vpop.f32.mrf.mxu1 }
 0x20f   : > { %v5511_v42 = vadd.f32 %v7616_v38, %v5269_v35  ;;  %v7585_v4 = vpop.f32.mrf.mxu0  ;;  %v3325_v50 = vadd.f32 %v3324_v55, %v3323_v1 }
 0x210   : > { %v5539_v29 = vadd.f32 %v5538_v19, %v5507_v54  ;;  %v5576_v49 = vadd.f32 %v5575_v56, %v5561_v43  ;;  %v5509_v26 = vadd.f32 %v5482_v2, %v5267_v52  ;;  %v5270_v12 = vadd.f32 %v7585_v4, %v5028_v8  ;;  %v5485_v60 = vpop.f32.mrf.mxu1 }
 0x211   : > { %6364 = vst [vmem:[%s8928_s23 + $0xf0] sm:$0xff] %v5511_v42  ;;  %v5243_v18 = vpop.f32.mrf.mxu0  ;;  %v3360_v54 = vrot.slane %v9365_v5, 4  ;;  %v5566_v32 = vmul.f32 %v5511_v42, %v5511_v42  ;;  %v3326_v62 = vrot.slane %v3325_v50, 1 }
 0x212   : > { %v5577_v31 = vadd.f32 %v5576_v49, %v5562_v25  ;;  %6362 = vst [vmem:[%s8928_s23 + $0xe0] sm:$0xff] %v5509_v26  ;;  %v5540_v53 = vadd.f32 %v5539_v29, %v5508_v48  ;;  %v5512_v13 = vadd.f32 %v7617_v23, %v5270_v12  ;;  %v5268_v36 = vadd.f32 %v5243_v18, %v5026_v16 }
 0x213   : > { %v5564_v41 = vmul.f32 %v5509_v26, %v5509_v26  ;;  %v3361_v15 = vadd.f32 %v3360_v54, %v9365_v5  ;;  %v3327_v63 = vadd.f32 %v3326_v62, %v3325_v50 }
 0x214   : > { %v5541_v61 = vadd.f32 %v5540_v53, %v5509_v26  ;;  %v5578_v47 = vadd.f32 %v5577_v31, %v5563_v44  ;;  %6365 = vst [vmem:[%s8928_s23 + $0xf8] sm:$0xff] %v5512_v13  ;;  %v5510_v10 = vadd.f32 %v5485_v60, %v5268_v36  ;;  %v5567_v0 = vmul.f32 %v5512_v13, %v5512_v13 }
 0x215   : > { %v3362_v11 = vrot.slane %v3361_v15, 2 }
 0x216   : > { %v5579_v27 = vadd.f32 %v5578_v47, %v5564_v41  ;;  %6363 = vst [vmem:[%s8928_s23 + $0xe8] sm:$0xff] %v5510_v10  ;;  %v5542_v28 = vadd.f32 %v5541_v61, %v5510_v10  ;;  %v5565_v9 = vmul.f32 %v5510_v10, %v5510_v10 }
 0x217   : > { %v3363_v45 = vadd.f32 %v3362_v11, %v3361_v15 }
 0x218   : > { %v5543_v40 = vadd.f32 %v5542_v28, %v5511_v42  ;;  %v5580_v59 = vadd.f32 %v5579_v27, %v5565_v9 }
 0x219   : > { %v3364_v14 = vrot.slane %v3363_v45, 1 }
 0x21a   : > { %v5544_v38 = vadd.f32 %v5543_v40, %v5512_v13  ;;  %v5581_v17 = vadd.f32 %v5580_v59, %v5566_v32 }
 0x21b   : > { %v3365_v22 = vadd.f32 %v3364_v14, %v3363_v45 }
 0x21c   : > { %v5545_v57 = vrot.slane %v5544_v38, 4  ;;  %v5582_v21 = vadd.f32 %v5581_v17, %v5567_v0 }
 0x21e   : > { %v5546_v30 = vadd.f32 %v5545_v57, %v5544_v38  ;;  %v5583_v48 = vrot.slane %v5582_v21, 4 }
 0x220   : > { %v5547_v51 = vrot.slane %v5546_v30, 2  ;;  %v5584_v33 = vadd.f32 %v5583_v48, %v5582_v21 }
 0x222   : > { %v5548_v24 = vadd.f32 %v5547_v51, %v5546_v30  ;;  %v5585_v20 = vrot.slane %v5584_v33, 2 }
 0x224   : > { %v5549_v3 = vrot.slane %v5548_v24, 1  ;;  %v5586_v39 = vadd.f32 %v5585_v20, %v5584_v33 }
 0x226   : > { %v5550_v58 = vadd.f32 %v5549_v3, %v5548_v24  ;;  %v5587_v2 = vrot.slane %v5586_v39, 1 }
 0x228   : > { %v5551_v8 = vadd.f32 %v5550_v58, %v3327_v63  ;;  %v5588_v34 = vadd.f32 %v5587_v2, %v5586_v39 }
 0x22a   : > { %v5589_v35 = vadd.f32 %v5588_v34, %v3365_v22  ;;  %5590 = vst [vmem:[%s265_s25] sm:$0x1] %v5551_v8 }
 0x22c   : > { %5591 = vst [vmem:[%s268_s29] sm:$0x1] %v5589_v35 }
 0x22d PF: > { %s17_s21 = sadd.s32 1, %s7925_s21  }
 0x22e   : > { %p14_p4 = scmp.ge.s32.totalorder %s17_s21, 4  }
 0x230   :  { %16 = sbr.rel (!%p14_p4) target bundleno = 1 (0x1), region = 116 }

</bundles_post_ra>
